<compile_context>
chip_gen: v5e
topology: v5e:2x2
jax: 0.10.0
libtpu: 0.0.40
codegen_flags: <defaults>
</compile_context>

<pallas_src>
import functools
import math

import jax
import jax.numpy as jnp
from jax.experimental import pallas as pl
from jax.experimental.pallas import tpu as pltpu


# ------------------------------ config helpers -------------------------------

@functools.lru_cache(maxsize=None)
def _vmem_limit_bytes():
    """Generation-aware scoped-VMEM limit for weight-resident kernels."""
    try:
        kind = jax.devices()[0].device_kind.lower()
    except Exception:
        return None
    if "v7" in kind or "7x" in kind:
        return 56 * 1024 * 1024          # v7x: 64 MiB physical, leave headroom
    if any(t in kind for t in ("v6", "v5", "v4")):
        return 100 * 1024 * 1024         # 128 MiB physical, raise scoped limit
    return None


def _cparams(num_parallel_axes=1):
    kwargs = dict(dimension_semantics=("parallel",) * num_parallel_axes)
    limit = _vmem_limit_bytes()
    if limit is not None:
        kwargs["vmem_limit_bytes"] = limit
    return pltpu.CompilerParams(**kwargs)


def _group_tile(num_groups, rows, *, target_rows=1024):
    """(b, col) groups per grid step.

    Must be a multiple of 8 (sublane tile) dividing num_groups, or num_groups
    itself, so the (gt, dim)/(gt, rows) blocks satisfy the (8, 128) rule.
    """
    cand = [g for g in range(8, num_groups + 1, 8) if num_groups % g == 0]
    if not cand:
        return num_groups
    ok = [c for c in cand if c * rows <= target_rows] or [min(cand)]
    gt = max(ok)
    if gt == num_groups and len(cand) > 1:
        gt = sorted(cand)[-2]            # keep >= 2 grid steps (megacore/pipeline)
    return gt


# ------------------------------- Pallas kernels -------------------------------

def _col_attn_kernel(x_ref, mrow_ref, mcol_ref, n1_ref, wqkv_ref, wo_ref,
                     m1_ref, sm_ref, ctx_ref, *, gt, rows, num_heads, scale, eps):
    """norm_1 + QKV + column attention + out-proj + residual + masked mean."""
    D = x_ref.shape[-1]
    hd = D // num_heads

    x = x_ref[...].astype(jnp.float32)                           # (gt*rows, D)
    nw = n1_ref[...].astype(jnp.float32)                         # (1, D)
    xn = x * jax.lax.rsqrt(jnp.mean(x * x, -1, keepdims=True) + eps) * nw
    # big QKV projection over all gt*rows rows: bf16 MXU operands, f32 acc
    qkv = jnp.dot(xn.astype(jnp.bfloat16), wqkv_ref[...],
                  preferred_element_type=jnp.float32)            # (gt*rows, 3D)

    for g in range(gt):                                          # static unroll
        bias = jnp.where(mrow_ref[g:g + 1, :].astype(jnp.float32) > 0,
                         0.0, -1e9)                              # (1, rows)
        qkv_g = qkv[g * rows:(g + 1) * rows, :]                  # aligned slice
        for h in range(num_heads):
            # TODO(synk): pad/permute heads to 128-lane spans when head_dim<128
            #             to avoid per-head lane relayouts.
            q = qkv_g[:, h * hd:(h + 1) * hd].astype(jnp.bfloat16)
            k = qkv_g[:, D + h * hd:D + (h + 1) * hd].astype(jnp.bfloat16)
            v = qkv_g[:, 2 * D + h * hd:2 * D + (h + 1) * hd].astype(jnp.bfloat16)
            s = jax.lax.dot_general(q, k, (((1,), (1,)), ((), ())),
                                    preferred_element_type=jnp.float32) * scale
            s = s + bias
            s = s - jnp.max(s, axis=-1, keepdims=True)
            p = jnp.exp(s)
            p = p * pl.reciprocal(jnp.sum(p, axis=-1, keepdims=True), approx=True)
            ctx_ref[g * rows:(g + 1) * rows, h * hd:(h + 1) * hd] = jnp.dot(
                p.astype(jnp.bfloat16), v, preferred_element_type=jnp.float32)

    o = ctx_ref[...]                                             # (gt*rows, D) f32
    proj = jnp.dot(o.astype(jnp.bfloat16), wo_ref[...],
                   preferred_element_type=jnp.float32)
    m1 = x + proj
    m1_ref[...] = m1.astype(m1_ref.dtype)

    # fused masked mean over the row axis of each group
    w = mcol_ref[...].astype(jnp.float32)                        # (gt*rows, 1)
    m1w = m1 * w
    for g in range(gt):
        num = jnp.sum(m1w[g * rows:(g + 1) * rows, :], axis=0, keepdims=True)
        den = jnp.maximum(
            jnp.sum(w[g * rows:(g + 1) * rows, :], axis=0, keepdims=True), 1e-10)
        sm_ref[g:g + 1, :] = (num * pl.reciprocal(den, approx=True)
                              ).astype(sm_ref.dtype)


def _row_attn_kernel(x_ref, bias_ref, n2_ref, wqkv_ref, wo_ref, o_ref, ctx_ref,
                     *, num_heads, scale, eps):
    """norm_2 + QKV + row attention (over columns) + out-proj for one batch."""
    D = x_ref.shape[-1]
    hd = D // num_heads
    x = x_ref[...].astype(jnp.float32)                           # (C, D)
    nw = n2_ref[...].astype(jnp.float32)
    xn = x * jax.lax.rsqrt(jnp.mean(x * x, -1, keepdims=True) + eps) * nw
    qkv = jnp.dot(xn.astype(jnp.bfloat16), wqkv_ref[...],
                  preferred_element_type=jnp.float32)            # (C, 3D)
    bias = bias_ref[...].astype(jnp.float32)                     # (1, C)
    for h in range(num_heads):
        q = qkv[:, h * hd:(h + 1) * hd].astype(jnp.bfloat16)
        k = qkv[:, D + h * hd:D + (h + 1) * hd].astype(jnp.bfloat16)
        v = qkv[:, 2 * D + h * hd:2 * D + (h + 1) * hd].astype(jnp.bfloat16)
        s = jax.lax.dot_general(q, k, (((1,), (1,)), ((), ())),
                                preferred_element_type=jnp.float32) * scale
        s = s + bias
        s = s - jnp.max(s, axis=-1, keepdims=True)
        p = jnp.exp(s)
        p = p * pl.reciprocal(jnp.sum(p, axis=-1, keepdims=True), approx=True)
        ctx_ref[:, h * hd:(h + 1) * hd] = jnp.dot(
            p.astype(jnp.bfloat16), v, preferred_element_type=jnp.float32)
    o_ref[...] = jnp.dot(ctx_ref[...].astype(jnp.bfloat16), wo_ref[...],
                         preferred_element_type=jnp.float32).astype(o_ref.dtype)


def _res_swiglu_kernel(m_ref, h2_ref, n3_ref, w13_ref, w2_ref, o_ref, mr_ref,
                       *, gt, rows, ffn_dim, eps):
    """(m1 + broadcast row-attn hidden) -> norm_3 -> SwiGLU -> + residual."""
    m = m_ref[...].astype(jnp.float32)                           # (gt*rows, D)
    for g in range(gt):                                          # broadcast residual
        mr_ref[g * rows:(g + 1) * rows, :] = (
            m[g * rows:(g + 1) * rows, :] + h2_ref[g:g + 1, :].astype(jnp.float32))
    mr = mr_ref[...]                                             # (gt*rows, D) f32
    nw = n3_ref[...].astype(jnp.float32)
    xn = (mr * jax.lax.rsqrt(jnp.mean(mr * mr, -1, keepdims=True) + eps) * nw
          ).astype(jnp.bfloat16)
    # TODO(synk): tile the FFN dimension with an extra "arbitrary" grid axis for
    #             very large ffn_dim so w13/w2 need not be fully VMEM-resident.
    x1 = jnp.dot(xn, w13_ref[:, :ffn_dim], preferred_element_type=jnp.float32)
    x3 = jnp.dot(xn, w13_ref[:, ffn_dim:], preferred_element_type=jnp.float32)
    gact = (x1 * jax.nn.sigmoid(x1) * x3).astype(jnp.bfloat16)   # silu(x1) * x3
    mlp = jnp.dot(gact, w2_ref[...], preferred_element_type=jnp.float32)
    o_ref[...] = (mr + mlp).astype(o_ref.dtype)


# ------------------------------ USMBlock forward ------------------------------

def usm_block_forward(params, m, mask=None, *, num_heads, eps=1e-6):
    """Mirrors USMBlock.forward. m: [bs, row, col, dim]; mask: [bs, row, col]."""
    bs, R, C, D = m.shape
    H = num_heads
    hd = D // H
    scale = 1.0 / math.sqrt(hd)
    G = bs * C
    Rp = ((R + 7) // 8) * 8                      # sublane-aligned row count

    # ---- T layout [bs, col, row, dim] -> flat [(bs*col)*row, dim] ----
    # TODO(synk): fold the entry/exit transposes into the kernel BlockSpecs.
    mT = jnp.transpose(m, (0, 2, 1, 3)).reshape(G, R, D)
    if mask is not None:
        maskT = jnp.transpose(mask, (0, 2, 1)).reshape(G, R).astype(jnp.float32)
    else:
        maskT = jnp.ones((G, R), jnp.float32)
    if Rp != R:
        mT = jnp.pad(mT, ((0, 0), (0, Rp - R), (0, 0)))
        maskT = jnp.pad(maskT, ((0, 0), (0, Rp - R)))
    x_flat = mT.reshape(G * Rp, D)
    mcol = maskT.reshape(G * Rp, 1)

    col_valid = jnp.sum(maskT, axis=1) > 0                       # [G]
    row_bias = jnp.where(col_valid, 0.0, -1e9).astype(jnp.float32).reshape(bs, 1, C)

    # bf16 weights: MXU operands stay bf16, accumulation is f32 in-kernel.
    col_wqkv = params["col_wqkv"].astype(jnp.bfloat16)
    col_wo = params["col_wo"].astype(jnp.bfloat16)
    row_wqkv = params["row_wqkv"].astype(jnp.bfloat16)
    row_wo = params["row_wo"].astype(jnp.bfloat16)
    w13 = params["w13"].astype(jnp.bfloat16)
    w2 = params["w2"].astype(jnp.bfloat16)
    F = params["w2"].shape[0]

    gt = _group_tile(G, Rp)

    # ---- K1: column attention + masked mean (fused) ----
    m1_flat, sm = pl.pallas_call(
        functools.partial(_col_attn_kernel, gt=gt, rows=Rp,
                          num_heads=H, scale=scale, eps=eps),
        out_shape=(jax.ShapeDtypeStruct((G * Rp, D), m.dtype),
                   jax.ShapeDtypeStruct((G, D), m.dtype)),
        grid=(G // gt,),
        in_specs=[pl.BlockSpec((gt * Rp, D), lambda i: (i, 0)),
                  pl.BlockSpec((gt, Rp), lambda i: (i, 0)),
                  pl.BlockSpec((gt * Rp, 1), lambda i: (i, 0)),
                  pl.BlockSpec((1, D), lambda i: (0, 0)),
                  pl.BlockSpec((D, 3 * D), lambda i: (0, 0)),     # weight resident
                  pl.BlockSpec((D, D), lambda i: (0, 0))],
        out_specs=(pl.BlockSpec((gt * Rp, D), lambda i: (i, 0)),
                   pl.BlockSpec((gt, D), lambda i: (i, 0))),
        scratch_shapes=[pltpu.VMEM((gt * Rp, D), jnp.float32)],
        compiler_params=_cparams(1),
    )(x_flat, maskT, mcol, params["norm1_w"], col_wqkv, col_wo)

    # ---- K2: row attention on norm_2(sm) ----
    # TODO(synk): when bs == 1, split the query (col) axis too so v7x's second
    #             TensorCore gets work.
    sm3 = sm.reshape(bs, C, D)
    hidden2 = pl.pallas_call(
        functools.partial(_row_attn_kernel, num_heads=H, scale=scale, eps=eps),
        out_shape=jax.ShapeDtypeStruct((bs, C, D), m.dtype),
        grid=(bs,),
        in_specs=[pl.BlockSpec((None, C, D), lambda b: (b, 0, 0)),
                  pl.BlockSpec((None, 1, C), lambda b: (b, 0, 0)),
                  pl.BlockSpec((1, D), lambda b: (0, 0)),
                  pl.BlockSpec((D, 3 * D), lambda b: (0, 0)),
                  pl.BlockSpec((D, D), lambda b: (0, 0))],
        out_specs=pl.BlockSpec((None, C, D), lambda b: (b, 0, 0)),
        scratch_shapes=[pltpu.VMEM((C, D), jnp.float32)],
        compiler_params=_cparams(1),
    )(sm3, row_bias, params["norm2_w"], row_wqkv, row_wo)
    h2 = hidden2.reshape(G, D)

    # ---- K3: broadcast residual + norm_3 + SwiGLU + residual (in place) ----
    gt2 = _group_tile(G, Rp)
    out_flat = pl.pallas_call(
        functools.partial(_res_swiglu_kernel, gt=gt2, rows=Rp, ffn_dim=F, eps=eps),
        out_shape=jax.ShapeDtypeStruct((G * Rp, D), m.dtype),
        grid=(G // gt2,),
        in_specs=[pl.BlockSpec((gt2 * Rp, D), lambda i: (i, 0)),
                  pl.BlockSpec((gt2, D), lambda i: (i, 0)),
                  pl.BlockSpec((1, D), lambda i: (0, 0)),
                  pl.BlockSpec((D, 2 * F), lambda i: (0, 0)),     # weight resident
                  pl.BlockSpec((F, D), lambda i: (0, 0))],
        out_specs=pl.BlockSpec((gt2 * Rp, D), lambda i: (i, 0)),
        scratch_shapes=[pltpu.VMEM((gt2 * Rp, D), jnp.float32)],
        input_output_aliases={0: 0},                              # m1 updated in place
        compiler_params=_cparams(1),
    )(m1_flat, h2, params["norm3_w"], w13, w2)

    out = out_flat.reshape(G, Rp, D)[:, :R, :].reshape(bs, C, R, D)
    out = jnp.transpose(out, (0, 2, 1, 3))                        # [bs, R, C, D]

    # TODO(synk): return_attn_weight=True path (row-attention probabilities) is
    #             not exported from the fused kernel; chunk_size is perf-only;
    #             DropPath(p=0) == identity.
    return out, None


# --------------------------- pure-JAX reference ------------------------------

def usm_block_reference(params, m, mask=None, *, num_heads, eps=1e-6):
    bs, R, C, D = m.shape
    H = num_heads
    hd = D // H
    scale = 1.0 / math.sqrt(hd)

    def rms(x, w):
        return x * jax.lax.rsqrt(jnp.mean(x * x, -1, keepdims=True) + eps) * w.reshape(-1)

    # column attention (over rows)
    x = rms(m, params["norm1_w"])
    q, k, v = jnp.split(x @ params["col_wqkv"], 3, axis=-1)
    q = q.reshape(bs, R, C, H, hd); k = k.reshape(bs, R, C, H, hd)
    v = v.reshape(bs, R, C, H, hd)
    s = jnp.einsum("brchd,bkchd->bchrk", q, k) * scale
    if mask is not None:
        bias = jnp.where(jnp.transpose(mask, (0, 2, 1)) > 0, 0.0, -1e9)
        s = s + bias[:, :, None, None, :]
    p = jax.nn.softmax(s, axis=-1)
    o = jnp.einsum("bchrk,bkchd->brchd", p, v).reshape(bs, R, C, D)
    m1 = m + o @ params["col_wo"]

    # masked mean over rows
    w = mask[..., None].astype(m.dtype) if mask is not None else jnp.ones((bs, R, C, 1), m.dtype)
    sm = jnp.sum(m1 * w, axis=1, keepdims=True) / jnp.maximum(
        jnp.sum(w, axis=1, keepdims=True), 1e-10)

    # row attention (over columns)
    x2 = rms(sm, params["norm2_w"])
    q2, k2, v2 = jnp.split(x2 @ params["row_wqkv"], 3, axis=-1)
    q2 = q2[:, 0].reshape(bs, C, H, hd); k2 = k2[:, 0].reshape(bs, C, H, hd)
    v2 = v2[:, 0].reshape(bs, C, H, hd)
    s2 = jnp.einsum("bqhd,bkhd->bhqk", q2, k2) * scale
    if mask is not None:
        cbias = jnp.where(jnp.sum(mask, axis=1) > 0, 0.0, -1e9)
        s2 = s2 + cbias[:, None, None, :]
    p2 = jax.nn.softmax(s2, axis=-1)
    o2 = jnp.einsum("bhqk,bkhd->bqhd", p2, v2).reshape(bs, C, D)
    m2 = m1 + (o2 @ params["row_wo"])[:, None]

    # SwiGLU MLP
    F = params["w2"].shape[0]
    x3 = rms(m2, params["norm3_w"])
    h = x3 @ params["w13"]
    g = jax.nn.silu(h[..., :F]) * h[..., F:]
    return m2 + g @ params["w2"], None


# -------------------------------- parameters ---------------------------------

def init_params(key, dim, ffn_dim):
    ks = jax.random.split(key, 6)
    s = 0.05
    return {
        "norm1_w": jnp.ones((1, dim), jnp.float32),
        "norm2_w": jnp.ones((1, dim), jnp.float32),
        "norm3_w": jnp.ones((1, dim), jnp.float32),
        "col_wqkv": s * jax.random.normal(ks[0], (dim, 3 * dim), jnp.float32),
        "col_wo":   s * jax.random.normal(ks[1], (dim, dim), jnp.float32),
        "row_wqkv": s * jax.random.normal(ks[2], (dim, 3 * dim), jnp.float32),
        "row_wo":   s * jax.random.normal(ks[3], (dim, dim), jnp.float32),
        "w13":      s * jax.random.normal(ks[4], (dim, 2 * ffn_dim), jnp.float32),
        "w2":       s * jax.random.normal(ks[5], (ffn_dim, dim), jnp.float32),
    }


# ----------------------------------- main -------------------------------------

if __name__ == "__main__":
    bs, R, C, dim, heads, ffn = 2, 8, 8, 32, 4, 64

    key = jax.random.PRNGKey(0)
    k_m, k_p = jax.random.split(key)
    m = jax.random.normal(k_m, (bs, R, C, dim), jnp.float32)

    # partial mask (keeps >=1 valid row per column) to exercise the masked paths
    mask = jnp.ones((bs, R, C), jnp.float32)
    mask = mask.at[0, R - 1, : C // 2].set(0.0)
    mask = mask.at[1, 0, 0].set(0.0)

    params = init_params(k_p, dim, ffn)

    fwd = jax.jit(functools.partial(usm_block_forward, num_heads=heads))
    out, attn_w = fwd(params, m, mask)
    out = jax.block_until_ready(out)

    with jax.default_matmul_precision("highest"):     # f32 reference only
        ref, _ = usm_block_reference(params, m, mask, num_heads=heads)

    assert out.shape == (bs, R, C, dim)
    err = float(jnp.max(jnp.abs(out - ref)))
    assert err < 2e-2, f"max abs err {err}"

    print("KERNEL_OK")
</pallas_src>

<mosaic_0001>
module attributes {stable_mosaic.version = 11 : i64} {
  func.func @_col_attn_kernel(%arg0: i32, %arg1: memref<64x32xf32, #tpu.memory_space<vmem>>, %arg2: memref<8x8xf32, #tpu.memory_space<vmem>>, %arg3: memref<64x1xf32, #tpu.memory_space<vmem>>, %arg4: memref<1x32xf32, #tpu.memory_space<vmem>>, %arg5: memref<32x96xbf16, #tpu.memory_space<vmem>>, %arg6: memref<32x32xbf16, #tpu.memory_space<vmem>>, %arg7: memref<64x32xf32, #tpu.memory_space<vmem>>, %arg8: memref<8x32xf32, #tpu.memory_space<vmem>>, %arg9: memref<64x32xf32, #tpu.memory_space<vmem>>) attributes {dimension_semantics = [#tpu.dimension_semantics<parallel>], iteration_bounds = array<i64: 2>, scalar_prefetch = 0 : i64, scratch_operands = 1 : i64, tpu.core_type = #tpu.core_type<tc>, window_params = [{transform_indices = @transform_0, window_bounds = array<i64: 64, 32>}, {transform_indices = @transform_1, window_bounds = array<i64: 8, 8>}, {transform_indices = @transform_2, window_bounds = array<i64: 64, 1>}, {pipeline_mode = #tpu.pipeline_mode<synchronous>, transform_indices = @transform_3, window_bounds = array<i64: 1, 32>}, {pipeline_mode = #tpu.pipeline_mode<synchronous>, transform_indices = @transform_4, window_bounds = array<i64: 32, 96>}, {pipeline_mode = #tpu.pipeline_mode<synchronous>, transform_indices = @transform_5, window_bounds = array<i64: 32, 32>}, {transform_indices = @transform_6, window_bounds = array<i64: 64, 32>}, {transform_indices = @transform_7, window_bounds = array<i64: 8, 32>}]} {
    %c0 = arith.constant 0 : index
    %c0_0 = arith.constant 0 : index
    %0 = vector.load %arg1[%c0, %c0_0] : memref<64x32xf32, #tpu.memory_space<vmem>>, vector<64x32xf32>
    %c0_1 = arith.constant 0 : index
    %c0_2 = arith.constant 0 : index
    %1 = vector.load %arg4[%c0_1, %c0_2] : memref<1x32xf32, #tpu.memory_space<vmem>>, vector<1x32xf32>
    %2 = arith.mulf %0, %0 : vector<64x32xf32>
    %cst = arith.constant dense<0.000000e+00> : vector<64xf32>
    %3 = vector.multi_reduction <add>, %2, %cst [1] : vector<64x32xf32> to vector<64xf32>
    %4 = vector.shape_cast %3 : vector<64xf32> to vector<64x1xf32>
    %cst_3 = arith.constant 3.200000e+01 : f32
    %5 = vector.broadcast %cst_3 : f32 to vector<64x1xf32>
    %6 = arith.divf %4, %5 : vector<64x1xf32>
    %cst_4 = arith.constant 9.99999997E-7 : f32
    %7 = vector.broadcast %cst_4 : f32 to vector<64x1xf32>
    %8 = arith.addf %6, %7 : vector<64x1xf32>
    %9 = math.rsqrt %8 : vector<64x1xf32>
    %10 = vector.broadcast %9 : vector<64x1xf32> to vector<64x32xf32>
    %11 = arith.mulf %0, %10 : vector<64x32xf32>
    %12 = vector.broadcast %1 : vector<1x32xf32> to vector<64x32xf32>
    %13 = arith.mulf %11, %12 : vector<64x32xf32>
    %14 = arith.truncf %13 : vector<64x32xf32> to vector<64x32xbf16>
    %c0_5 = arith.constant 0 : index
    %c0_6 = arith.constant 0 : index
    %15 = vector.load %arg5[%c0_5, %c0_6] : memref<32x96xbf16, #tpu.memory_space<vmem>>, vector<32x96xbf16>
    %cst_7 = arith.constant dense<0.000000e+00> : vector<64x96xf32>
    %16 = tpu.matmul %14, %15, %cst_7 {dimension_numbers = #tpu.dot_dimension_numbers<[1], [0], [0], [1], [0, 0, 1, 1], [], []>} : vector<64x32xbf16>, vector<32x96xbf16>, vector<64x96xf32> -> vector<64x96xf32>
    %c0_8 = arith.constant 0 : index
    %c0_9 = arith.constant 0 : index
    %17 = vector.load %arg2[%c0_8, %c0_9] : memref<8x8xf32, #tpu.memory_space<vmem>>, vector<1x8xf32>
    %cst_10 = arith.constant 0.000000e+00 : f32
    %18 = vector.broadcast %cst_10 : f32 to vector<1x8xf32>
    %19 = arith.cmpf ogt, %17, %18 : vector<1x8xf32>
    %cst_11 = arith.constant 0.000000e+00 : f32
    %cst_12 = arith.constant -1.000000e+09 : f32
    %20 = vector.broadcast %cst_11 : f32 to vector<1x8xf32>
    %21 = vector.broadcast %cst_12 : f32 to vector<1x8xf32>
    %22 = arith.select %19, %20, %21 : vector<1x8xi1>, vector<1x8xf32>
    %23 = vector.extract_strided_slice %16 {offsets = [0, 0], sizes = [8, 96], strides = [1, 1]} : vector<64x96xf32> to vector<8x96xf32>
    %24 = vector.extract_strided_slice %23 {offsets = [0, 0], sizes = [8, 8], strides = [1, 1]} : vector<8x96xf32> to vector<8x8xf32>
    %25 = arith.truncf %24 : vector<8x8xf32> to vector<8x8xbf16>
    %26 = vector.extract_strided_slice %23 {offsets = [0, 32], sizes = [8, 8], strides = [1, 1]} : vector<8x96xf32> to vector<8x8xf32>
    %27 = arith.truncf %26 : vector<8x8xf32> to vector<8x8xbf16>
    %28 = vector.extract_strided_slice %23 {offsets = [0, 64], sizes = [8, 8], strides = [1, 1]} : vector<8x96xf32> to vector<8x8xf32>
    %29 = arith.truncf %28 : vector<8x8xf32> to vector<8x8xbf16>
    %cst_13 = arith.constant dense<0.000000e+00> : vector<8x8xf32>
    %30 = tpu.matmul %25, %27, %cst_13 {dimension_numbers = #tpu.dot_dimension_numbers<[1], [1], [0], [0], [0, 0, 1, 0], [], []>} : vector<8x8xbf16>, vector<8x8xbf16>, vector<8x8xf32> -> vector<8x8xf32>
    %cst_14 = arith.constant 0.353553385 : f32
    %31 = vector.broadcast %cst_14 : f32 to vector<8x8xf32>
    %32 = arith.mulf %30, %31 : vector<8x8xf32>
    %33 = vector.broadcast %22 : vector<1x8xf32> to vector<8x8xf32>
    %34 = arith.addf %32, %33 : vector<8x8xf32>
    %cst_15 = arith.constant dense<0xFF800000> : vector<8xf32>
    %35 = vector.multi_reduction <maximumf>, %34, %cst_15 [1] : vector<8x8xf32> to vector<8xf32>
    %36 = vector.shape_cast %35 : vector<8xf32> to vector<8x1xf32>
    %37 = vector.broadcast %36 : vector<8x1xf32> to vector<8x8xf32>
    %38 = arith.subf %34, %37 : vector<8x8xf32>
    %39 = math.exp %38 : vector<8x8xf32>
    %cst_16 = arith.constant dense<0.000000e+00> : vector<8xf32>
    %40 = vector.multi_reduction <add>, %39, %cst_16 [1] : vector<8x8xf32> to vector<8xf32>
    %41 = vector.shape_cast %40 : vector<8xf32> to vector<8x1xf32>
    %42 = tpu.reciprocal %41 {approx = true} : vector<8x1xf32> -> vector<8x1xf32>
    %43 = vector.broadcast %42 : vector<8x1xf32> to vector<8x8xf32>
    %44 = arith.mulf %39, %43 : vector<8x8xf32>
    %45 = arith.truncf %44 : vector<8x8xf32> to vector<8x8xbf16>
    %cst_17 = arith.constant dense<0.000000e+00> : vector<8x8xf32>
    %46 = tpu.matmul %45, %29, %cst_17 {dimension_numbers = #tpu.dot_dimension_numbers<[1], [0], [0], [1], [0, 0, 1, 1], [], []>} : vector<8x8xbf16>, vector<8x8xbf16>, vector<8x8xf32> -> vector<8x8xf32>
    %c0_18 = arith.constant 0 : index
    %c0_19 = arith.constant 0 : index
    %47 = vector.load %arg9[%c0_18, %c0_19] : memref<64x32xf32, #tpu.memory_space<vmem>>, vector<8x8xf32>
    tpu.vector_store %arg9[%c0_18, %c0_19], %46 {strides = array<i32>} : memref<64x32xf32, #tpu.memory_space<vmem>>, vector<8x8xf32>,
    %48 = vector.extract_strided_slice %23 {offsets = [0, 8], sizes = [8, 8], strides = [1, 1]} : vector<8x96xf32> to vector<8x8xf32>
    %49 = arith.truncf %48 : vector<8x8xf32> to vector<8x8xbf16>
    %50 = vector.extract_strided_slice %23 {offsets = [0, 40], sizes = [8, 8], strides = [1, 1]} : vector<8x96xf32> to vector<8x8xf32>
    %51 = arith.truncf %50 : vector<8x8xf32> to vector<8x8xbf16>
    %52 = vector.extract_strided_slice %23 {offsets = [0, 72], sizes = [8, 8], strides = [1, 1]} : vector<8x96xf32> to vector<8x8xf32>
    %53 = arith.truncf %52 : vector<8x8xf32> to vector<8x8xbf16>
    %cst_20 = arith.constant dense<0.000000e+00> : vector<8x8xf32>
    %54 = tpu.matmul %49, %51, %cst_20 {dimension_numbers = #tpu.dot_dimension_numbers<[1], [1], [0], [0], [0, 0, 1, 0], [], []>} : vector<8x8xbf16>, vector<8x8xbf16>, vector<8x8xf32> -> vector<8x8xf32>
    %cst_21 = arith.constant 0.353553385 : f32
    %55 = vector.broadcast %cst_21 : f32 to vector<8x8xf32>
    %56 = arith.mulf %54, %55 : vector<8x8xf32>
    %57 = vector.broadcast %22 : vector<1x8xf32> to vector<8x8xf32>
    %58 = arith.addf %56, %57 : vector<8x8xf32>
    %cst_22 = arith.constant dense<0xFF800000> : vector<8xf32>
    %59 = vector.multi_reduction <maximumf>, %58, %cst_22 [1] : vector<8x8xf32> to vector<8xf32>
    %60 = vector.shape_cast %59 : vector<8xf32> to vector<8x1xf32>
    %61 = vector.broadcast %60 : vector<8x1xf32> to vector<8x8xf32>
    %62 = arith.subf %58, %61 : vector<8x8xf32>
    %63 = math.exp %62 : vector<8x8xf32>
    %cst_23 = arith.constant dense<0.000000e+00> : vector<8xf32>
    %64 = vector.multi_reduction <add>, %63, %cst_23 [1] : vector<8x8xf32> to vector<8xf32>
    %65 = vector.shape_cast %64 : vector<8xf32> to vector<8x1xf32>
    %66 = tpu.reciprocal %65 {approx = true} : vector<8x1xf32> -> vector<8x1xf32>
    %67 = vector.broadcast %66 : vector<8x1xf32> to vector<8x8xf32>
    %68 = arith.mulf %63, %67 : vector<8x8xf32>
    %69 = arith.truncf %68 : vector<8x8xf32> to vector<8x8xbf16>
    %cst_24 = arith.constant dense<0.000000e+00> : vector<8x8xf32>
    %70 = tpu.matmul %69, %53, %cst_24 {dimension_numbers = #tpu.dot_dimension_numbers<[1], [0], [0], [1], [0, 0, 1, 1], [], []>} : vector<8x8xbf16>, vector<8x8xbf16>, vector<8x8xf32> -> vector<8x8xf32>
    %c0_25 = arith.constant 0 : index
    %c8 = arith.constant 8 : index
    %71 = vector.load %arg9[%c0_25, %c8] : memref<64x32xf32, #tpu.memory_space<vmem>>, vector<8x8xf32>
    tpu.vector_store %arg9[%c0_25, %c8], %70 {strides = array<i32>} : memref<64x32xf32, #tpu.memory_space<vmem>>, vector<8x8xf32>,
    %72 = vector.extract_strided_slice %23 {offsets = [0, 16], sizes = [8, 8], strides = [1, 1]} : vector<8x96xf32> to vector<8x8xf32>
    %73 = arith.truncf %72 : vector<8x8xf32> to vector<8x8xbf16>
    %74 = vector.extract_strided_slice %23 {offsets = [0, 48], sizes = [8, 8], strides = [1, 1]} : vector<8x96xf32> to vector<8x8xf32>
    %75 = arith.truncf %74 : vector<8x8xf32> to vector<8x8xbf16>
    %76 = vector.extract_strided_slice %23 {offsets = [0, 80], sizes = [8, 8], strides = [1, 1]} : vector<8x96xf32> to vector<8x8xf32>
    %77 = arith.truncf %76 : vector<8x8xf32> to vector<8x8xbf16>
    %cst_26 = arith.constant dense<0.000000e+00> : vector<8x8xf32>
    %78 = tpu.matmul %73, %75, %cst_26 {dimension_numbers = #tpu.dot_dimension_numbers<[1], [1], [0], [0], [0, 0, 1, 0], [], []>} : vector<8x8xbf16>, vector<8x8xbf16>, vector<8x8xf32> -> vector<8x8xf32>
    %cst_27 = arith.constant 0.353553385 : f32
    %79 = vector.broadcast %cst_27 : f32 to vector<8x8xf32>
    %80 = arith.mulf %78, %79 : vector<8x8xf32>
    %81 = vector.broadcast %22 : vector<1x8xf32> to vector<8x8xf32>
    %82 = arith.addf %80, %81 : vector<8x8xf32>
    %cst_28 = arith.constant dense<0xFF800000> : vector<8xf32>
    %83 = vector.multi_reduction <maximumf>, %82, %cst_28 [1] : vector<8x8xf32> to vector<8xf32>
    %84 = vector.shape_cast %83 : vector<8xf32> to vector<8x1xf32>
    %85 = vector.broadcast %84 : vector<8x1xf32> to vector<8x8xf32>
    %86 = arith.subf %82, %85 : vector<8x8xf32>
    %87 = math.exp %86 : vector<8x8xf32>
    %cst_29 = arith.constant dense<0.000000e+00> : vector<8xf32>
    %88 = vector.multi_reduction <add>, %87, %cst_29 [1] : vector<8x8xf32> to vector<8xf32>
    %89 = vector.shape_cast %88 : vector<8xf32> to vector<8x1xf32>
    %90 = tpu.reciprocal %89 {approx = true} : vector<8x1xf32> -> vector<8x1xf32>
    %91 = vector.broadcast %90 : vector<8x1xf32> to vector<8x8xf32>
    %92 = arith.mulf %87, %91 : vector<8x8xf32>
    %93 = arith.truncf %92 : vector<8x8xf32> to vector<8x8xbf16>
    %cst_30 = arith.constant dense<0.000000e+00> : vector<8x8xf32>
    %94 = tpu.matmul %93, %77, %cst_30 {dimension_numbers = #tpu.dot_dimension_numbers<[1], [0], [0], [1], [0, 0, 1, 1], [], []>} : vector<8x8xbf16>, vector<8x8xbf16>, vector<8x8xf32> -> vector<8x8xf32>
    %c0_31 = arith.constant 0 : index
    %c16 = arith.constant 16 : index
    %95 = vector.load %arg9[%c0_31, %c16] : memref<64x32xf32, #tpu.memory_space<vmem>>, vector<8x8xf32>
    tpu.vector_store %arg9[%c0_31, %c16], %94 {strides = array<i32>} : memref<64x32xf32, #tpu.memory_space<vmem>>, vector<8x8xf32>,
    %96 = vector.extract_strided_slice %23 {offsets = [0, 24], sizes = [8, 8], strides = [1, 1]} : vector<8x96xf32> to vector<8x8xf32>
    %97 = arith.truncf %96 : vector<8x8xf32> to vector<8x8xbf16>
    %98 = vector.extract_strided_slice %23 {offsets = [0, 56], sizes = [8, 8], strides = [1, 1]} : vector<8x96xf32> to vector<8x8xf32>
    %99 = arith.truncf %98 : vector<8x8xf32> to vector<8x8xbf16>
    %100 = vector.extract_strided_slice %23 {offsets = [0, 88], sizes = [8, 8], strides = [1, 1]} : vector<8x96xf32> to vector<8x8xf32>
    %101 = arith.truncf %100 : vector<8x8xf32> to vector<8x8xbf16>
    %cst_32 = arith.constant dense<0.000000e+00> : vector<8x8xf32>
    %102 = tpu.matmul %97, %99, %cst_32 {dimension_numbers = #tpu.dot_dimension_numbers<[1], [1], [0], [0], [0, 0, 1, 0], [], []>} : vector<8x8xbf16>, vector<8x8xbf16>, vector<8x8xf32> -> vector<8x8xf32>
    %cst_33 = arith.constant 0.353553385 : f32
    %103 = vector.broadcast %cst_33 : f32 to vector<8x8xf32>
    %104 = arith.mulf %102, %103 : vector<8x8xf32>
    %105 = vector.broadcast %22 : vector<1x8xf32> to vector<8x8xf32>
    %106 = arith.addf %104, %105 : vector<8x8xf32>
    %cst_34 = arith.constant dense<0xFF800000> : vector<8xf32>
    %107 = vector.multi_reduction <maximumf>, %106, %cst_34 [1] : vector<8x8xf32> to vector<8xf32>
    %108 = vector.shape_cast %107 : vector<8xf32> to vector<8x1xf32>
    %109 = vector.broadcast %108 : vector<8x1xf32> to vector<8x8xf32>
    %110 = arith.subf %106, %109 : vector<8x8xf32>
    %111 = math.exp %110 : vector<8x8xf32>
    %cst_35 = arith.constant dense<0.000000e+00> : vector<8xf32>
    %112 = vector.multi_reduction <add>, %111, %cst_35 [1] : vector<8x8xf32> to vector<8xf32>
    %113 = vector.shape_cast %112 : vector<8xf32> to vector<8x1xf32>
    %114 = tpu.reciprocal %113 {approx = true} : vector<8x1xf32> -> vector<8x1xf32>
    %115 = vector.broadcast %114 : vector<8x1xf32> to vector<8x8xf32>
    %116 = arith.mulf %111, %115 : vector<8x8xf32>
    %117 = arith.truncf %116 : vector<8x8xf32> to vector<8x8xbf16>
    %cst_36 = arith.constant dense<0.000000e+00> : vector<8x8xf32>
    %118 = tpu.matmul %117, %101, %cst_36 {dimension_numbers = #tpu.dot_dimension_numbers<[1], [0], [0], [1], [0, 0, 1, 1], [], []>} : vector<8x8xbf16>, vector<8x8xbf16>, vector<8x8xf32> -> vector<8x8xf32>
    %c0_37 = arith.constant 0 : index
    %c24 = arith.constant 24 : index
    %119 = vector.load %arg9[%c0_37, %c24] : memref<64x32xf32, #tpu.memory_space<vmem>>, vector<8x8xf32>
    tpu.vector_store %arg9[%c0_37, %c24], %118 {strides = array<i32>} : memref<64x32xf32, #tpu.memory_space<vmem>>, vector<8x8xf32>,
    %c1 = arith.constant 1 : index
    %c0_38 = arith.constant 0 : index
    %120 = vector.load %arg2[%c1, %c0_38] : memref<8x8xf32, #tpu.memory_space<vmem>>, vector<1x8xf32>
    %cst_39 = arith.constant 0.000000e+00 : f32
    %121 = vector.broadcast %cst_39 : f32 to vector<1x8xf32>
    %122 = arith.cmpf ogt, %120, %121 : vector<1x8xf32>
    %cst_40 = arith.constant 0.000000e+00 : f32
    %cst_41 = arith.constant -1.000000e+09 : f32
    %123 = vector.broadcast %cst_40 : f32 to vector<1x8xf32>
    %124 = vector.broadcast %cst_41 : f32 to vector<1x8xf32>
    %125 = arith.select %122, %123, %124 : vector<1x8xi1>, vector<1x8xf32>
    %126 = vector.extract_strided_slice %16 {offsets = [8, 0], sizes = [8, 96], strides = [1, 1]} : vector<64x96xf32> to vector<8x96xf32>
    %127 = vector.extract_strided_slice %126 {offsets = [0, 0], sizes = [8, 8], strides = [1, 1]} : vector<8x96xf32> to vector<8x8xf32>
    %128 = arith.truncf %127 : vector<8x8xf32> to vector<8x8xbf16>
    %129 = vector.extract_strided_slice %126 {offsets = [0, 32], sizes = [8, 8], strides = [1, 1]} : vector<8x96xf32> to vector<8x8xf32>
    %130 = arith.truncf %129 : vector<8x8xf32> to vector<8x8xbf16>
    %131 = vector.extract_strided_slice %126 {offsets = [0, 64], sizes = [8, 8], strides = [1, 1]} : vector<8x96xf32> to vector<8x8xf32>
    %132 = arith.truncf %131 : vector<8x8xf32> to vector<8x8xbf16>
    %cst_42 = arith.constant dense<0.000000e+00> : vector<8x8xf32>
    %133 = tpu.matmul %128, %130, %cst_42 {dimension_numbers = #tpu.dot_dimension_numbers<[1], [1], [0], [0], [0, 0, 1, 0], [], []>} : vector<8x8xbf16>, vector<8x8xbf16>, vector<8x8xf32> -> vector<8x8xf32>
    %cst_43 = arith.constant 0.353553385 : f32
    %134 = vector.broadcast %cst_43 : f32 to vector<8x8xf32>
    %135 = arith.mulf %133, %134 : vector<8x8xf32>
    %136 = vector.broadcast %125 : vector<1x8xf32> to vector<8x8xf32>
    %137 = arith.addf %135, %136 : vector<8x8xf32>
    %cst_44 = arith.constant dense<0xFF800000> : vector<8xf32>
    %138 = vector.multi_reduction <maximumf>, %137, %cst_44 [1] : vector<8x8xf32> to vector<8xf32>
    %139 = vector.shape_cast %138 : vector<8xf32> to vector<8x1xf32>
    %140 = vector.broadcast %139 : vector<8x1xf32> to vector<8x8xf32>
    %141 = arith.subf %137, %140 : vector<8x8xf32>
    %142 = math.exp %141 : vector<8x8xf32>
    %cst_45 = arith.constant dense<0.000000e+00> : vector<8xf32>
    %143 = vector.multi_reduction <add>, %142, %cst_45 [1] : vector<8x8xf32> to vector<8xf32>
    %144 = vector.shape_cast %143 : vector<8xf32> to vector<8x1xf32>
    %145 = tpu.reciprocal %144 {approx = true} : vector<8x1xf32> -> vector<8x1xf32>
    %146 = vector.broadcast %145 : vector<8x1xf32> to vector<8x8xf32>
    %147 = arith.mulf %142, %146 : vector<8x8xf32>
    %148 = arith.truncf %147 : vector<8x8xf32> to vector<8x8xbf16>
    %cst_46 = arith.constant dense<0.000000e+00> : vector<8x8xf32>
    %149 = tpu.matmul %148, %132, %cst_46 {dimension_numbers = #tpu.dot_dimension_numbers<[1], [0], [0], [1], [0, 0, 1, 1], [], []>} : vector<8x8xbf16>, vector<8x8xbf16>, vector<8x8xf32> -> vector<8x8xf32>
    %c8_47 = arith.constant 8 : index
    %c0_48 = arith.constant 0 : index
    %150 = vector.load %arg9[%c8_47, %c0_48] : memref<64x32xf32, #tpu.memory_space<vmem>>, vector<8x8xf32>
    tpu.vector_store %arg9[%c8_47, %c0_48], %149 {strides = array<i32>} : memref<64x32xf32, #tpu.memory_space<vmem>>, vector<8x8xf32>,
    %151 = vector.extract_strided_slice %126 {offsets = [0, 8], sizes = [8, 8], strides = [1, 1]} : vector<8x96xf32> to vector<8x8xf32>
    %152 = arith.truncf %151 : vector<8x8xf32> to vector<8x8xbf16>
    %153 = vector.extract_strided_slice %126 {offsets = [0, 40], sizes = [8, 8], strides = [1, 1]} : vector<8x96xf32> to vector<8x8xf32>
    %154 = arith.truncf %153 : vector<8x8xf32> to vector<8x8xbf16>
    %155 = vector.extract_strided_slice %126 {offsets = [0, 72], sizes = [8, 8], strides = [1, 1]} : vector<8x96xf32> to vector<8x8xf32>
    %156 = arith.truncf %155 : vector<8x8xf32> to vector<8x8xbf16>
    %cst_49 = arith.constant dense<0.000000e+00> : vector<8x8xf32>
    %157 = tpu.matmul %152, %154, %cst_49 {dimension_numbers = #tpu.dot_dimension_numbers<[1], [1], [0], [0], [0, 0, 1, 0], [], []>} : vector<8x8xbf16>, vector<8x8xbf16>, vector<8x8xf32> -> vector<8x8xf32>
    %cst_50 = arith.constant 0.353553385 : f32
    %158 = vector.broadcast %cst_50 : f32 to vector<8x8xf32>
    %159 = arith.mulf %157, %158 : vector<8x8xf32>
    %160 = vector.broadcast %125 : vector<1x8xf32> to vector<8x8xf32>
    %161 = arith.addf %159, %160 : vector<8x8xf32>
    %cst_51 = arith.constant dense<0xFF800000> : vector<8xf32>
    %162 = vector.multi_reduction <maximumf>, %161, %cst_51 [1] : vector<8x8xf32> to vector<8xf32>
    %163 = vector.shape_cast %162 : vector<8xf32> to vector<8x1xf32>
    %164 = vector.broadcast %163 : vector<8x1xf32> to vector<8x8xf32>
    %165 = arith.subf %161, %164 : vector<8x8xf32>
    %166 = math.exp %165 : vector<8x8xf32>
    %cst_52 = arith.constant dense<0.000000e+00> : vector<8xf32>
    %167 = vector.multi_reduction <add>, %166, %cst_52 [1] : vector<8x8xf32> to vector<8xf32>
    %168 = vector.shape_cast %167 : vector<8xf32> to vector<8x1xf32>
    %169 = tpu.reciprocal %168 {approx = true} : vector<8x1xf32> -> vector<8x1xf32>
    %170 = vector.broadcast %169 : vector<8x1xf32> to vector<8x8xf32>
    %171 = arith.mulf %166, %170 : vector<8x8xf32>
    %172 = arith.truncf %171 : vector<8x8xf32> to vector<8x8xbf16>
    %cst_53 = arith.constant dense<0.000000e+00> : vector<8x8xf32>
    %173 = tpu.matmul %172, %156, %cst_53 {dimension_numbers = #tpu.dot_dimension_numbers<[1], [0], [0], [1], [0, 0, 1, 1], [], []>} : vector<8x8xbf16>, vector<8x8xbf16>, vector<8x8xf32> -> vector<8x8xf32>
    %c8_54 = arith.constant 8 : index
    %c8_55 = arith.constant 8 : index
    %174 = vector.load %arg9[%c8_54, %c8_55] : memref<64x32xf32, #tpu.memory_space<vmem>>, vector<8x8xf32>
    tpu.vector_store %arg9[%c8_54, %c8_55], %173 {strides = array<i32>} : memref<64x32xf32, #tpu.memory_space<vmem>>, vector<8x8xf32>,
    %175 = vector.extract_strided_slice %126 {offsets = [0, 16], sizes = [8, 8], strides = [1, 1]} : vector<8x96xf32> to vector<8x8xf32>
    %176 = arith.truncf %175 : vector<8x8xf32> to vector<8x8xbf16>
    %177 = vector.extract_strided_slice %126 {offsets = [0, 48], sizes = [8, 8], strides = [1, 1]} : vector<8x96xf32> to vector<8x8xf32>
    %178 = arith.truncf %177 : vector<8x8xf32> to vector<8x8xbf16>
    %179 = vector.extract_strided_slice %126 {offsets = [0, 80], sizes = [8, 8], strides = [1, 1]} : vector<8x96xf32> to vector<8x8xf32>
    %180 = arith.truncf %179 : vector<8x8xf32> to vector<8x8xbf16>
    %cst_56 = arith.constant dense<0.000000e+00> : vector<8x8xf32>
    %181 = tpu.matmul %176, %178, %cst_56 {dimension_numbers = #tpu.dot_dimension_numbers<[1], [1], [0], [0], [0, 0, 1, 0], [], []>} : vector<8x8xbf16>, vector<8x8xbf16>, vector<8x8xf32> -> vector<8x8xf32>
    %cst_57 = arith.constant 0.353553385 : f32
    %182 = vector.broadcast %cst_57 : f32 to vector<8x8xf32>
    %183 = arith.mulf %181, %182 : vector<8x8xf32>
    %184 = vector.broadcast %125 : vector<1x8xf32> to vector<8x8xf32>
    %185 = arith.addf %183, %184 : vector<8x8xf32>
    %cst_58 = arith.constant dense<0xFF800000> : vector<8xf32>
    %186 = vector.multi_reduction <maximumf>, %185, %cst_58 [1] : vector<8x8xf32> to vector<8xf32>
    %187 = vector.shape_cast %186 : vector<8xf32> to vector<8x1xf32>
    %188 = vector.broadcast %187 : vector<8x1xf32> to vector<8x8xf32>
    %189 = arith.subf %185, %188 : vector<8x8xf32>
    %190 = math.exp %189 : vector<8x8xf32>
    %cst_59 = arith.constant dense<0.000000e+00> : vector<8xf32>
    %191 = vector.multi_reduction <add>, %190, %cst_59 [1] : vector<8x8xf32> to vector<8xf32>
    %192 = vector.shape_cast %191 : vector<8xf32> to vector<8x1xf32>
    %193 = tpu.reciprocal %192 {approx = true} : vector<8x1xf32> -> vector<8x1xf32>
    %194 = vector.broadcast %193 : vector<8x1xf32> to vector<8x8xf32>
    %195 = arith.mulf %190, %194 : vector<8x8xf32>
    %196 = arith.truncf %195 : vector<8x8xf32> to vector<8x8xbf16>
    %cst_60 = arith.constant dense<0.000000e+00> : vector<8x8xf32>
    %197 = tpu.matmul %196, %180, %cst_60 {dimension_numbers = #tpu.dot_dimension_numbers<[1], [0], [0], [1], [0, 0, 1, 1], [], []>} : vector<8x8xbf16>, vector<8x8xbf16>, vector<8x8xf32> -> vector<8x8xf32>
    %c8_61 = arith.constant 8 : index
    %c16_62 = arith.constant 16 : index
    %198 = vector.load %arg9[%c8_61, %c16_62] : memref<64x32xf32, #tpu.memory_space<vmem>>, vector<8x8xf32>
    tpu.vector_store %arg9[%c8_61, %c16_62], %197 {strides = array<i32>} : memref<64x32xf32, #tpu.memory_space<vmem>>, vector<8x8xf32>,
    %199 = vector.extract_strided_slice %126 {offsets = [0, 24], sizes = [8, 8], strides = [1, 1]} : vector<8x96xf32> to vector<8x8xf32>
    %200 = arith.truncf %199 : vector<8x8xf32> to vector<8x8xbf16>
    %201 = vector.extract_strided_slice %126 {offsets = [0, 56], sizes = [8, 8], strides = [1, 1]} : vector<8x96xf32> to vector<8x8xf32>
    %202 = arith.truncf %201 : vector<8x8xf32> to vector<8x8xbf16>
    %203 = vector.extract_strided_slice %126 {offsets = [0, 88], sizes = [8, 8], strides = [1, 1]} : vector<8x96xf32> to vector<8x8xf32>
    %204 = arith.truncf %203 : vector<8x8xf32> to vector<8x8xbf16>
    %cst_63 = arith.constant dense<0.000000e+00> : vector<8x8xf32>
    %205 = tpu.matmul %200, %202, %cst_63 {dimension_numbers = #tpu.dot_dimension_numbers<[1], [1], [0], [0], [0, 0, 1, 0], [], []>} : vector<8x8xbf16>, vector<8x8xbf16>, vector<8x8xf32> -> vector<8x8xf32>
    %cst_64 = arith.constant 0.353553385 : f32
    %206 = vector.broadcast %cst_64 : f32 to vector<8x8xf32>
    %207 = arith.mulf %205, %206 : vector<8x8xf32>
    %208 = vector.broadcast %125 : vector<1x8xf32> to vector<8x8xf32>
    %209 = arith.addf %207, %208 : vector<8x8xf32>
    %cst_65 = arith.constant dense<0xFF800000> : vector<8xf32>
    %210 = vector.multi_reduction <maximumf>, %209, %cst_65 [1] : vector<8x8xf32> to vector<8xf32>
    %211 = vector.shape_cast %210 : vector<8xf32> to vector<8x1xf32>
    %212 = vector.broadcast %211 : vector<8x1xf32> to vector<8x8xf32>
    %213 = arith.subf %209, %212 : vector<8x8xf32>
    %214 = math.exp %213 : vector<8x8xf32>
    %cst_66 = arith.constant dense<0.000000e+00> : vector<8xf32>
    %215 = vector.multi_reduction <add>, %214, %cst_66 [1] : vector<8x8xf32> to vector<8xf32>
    %216 = vector.shape_cast %215 : vector<8xf32> to vector<8x1xf32>
    %217 = tpu.reciprocal %216 {approx = true} : vector<8x1xf32> -> vector<8x1xf32>
    %218 = vector.broadcast %217 : vector<8x1xf32> to vector<8x8xf32>
    %219 = arith.mulf %214, %218 : vector<8x8xf32>
    %220 = arith.truncf %219 : vector<8x8xf32> to vector<8x8xbf16>
    %cst_67 = arith.constant dense<0.000000e+00> : vector<8x8xf32>
    %221 = tpu.matmul %220, %204, %cst_67 {dimension_numbers = #tpu.dot_dimension_numbers<[1], [0], [0], [1], [0, 0, 1, 1], [], []>} : vector<8x8xbf16>, vector<8x8xbf16>, vector<8x8xf32> -> vector<8x8xf32>
    %c8_68 = arith.constant 8 : index
    %c24_69 = arith.constant 24 : index
    %222 = vector.load %arg9[%c8_68, %c24_69] : memref<64x32xf32, #tpu.memory_space<vmem>>, vector<8x8xf32>
    tpu.vector_store %arg9[%c8_68, %c24_69], %221 {strides = array<i32>} : memref<64x32xf32, #tpu.memory_space<vmem>>, vector<8x8xf32>,
    %c2 = arith.constant 2 : index
    %c0_70 = arith.constant 0 : index
    %223 = vector.load %arg2[%c2, %c0_70] : memref<8x8xf32, #tpu.memory_space<vmem>>, vector<1x8xf32>
    %cst_71 = arith.constant 0.000000e+00 : f32
    %224 = vector.broadcast %cst_71 : f32 to vector<1x8xf32>
    %225 = arith.cmpf ogt, %223, %224 : vector<1x8xf32>
    %cst_72 = arith.constant 0.000000e+00 : f32
    %cst_73 = arith.constant -1.000000e+09 : f32
    %226 = vector.broadcast %cst_72 : f32 to vector<1x8xf32>
    %227 = vector.broadcast %cst_73 : f32 to vector<1x8xf32>
    %228 = arith.select %225, %226, %227 : vector<1x8xi1>, vector<1x8xf32>
    %229 = vector.extract_strided_slice %16 {offsets = [16, 0], sizes = [8, 96], strides = [1, 1]} : vector<64x96xf32> to vector<8x96xf32>
    %230 = vector.extract_strided_slice %229 {offsets = [0, 0], sizes = [8, 8], strides = [1, 1]} : vector<8x96xf32> to vector<8x8xf32>
    %231 = arith.truncf %230 : vector<8x8xf32> to vector<8x8xbf16>
    %232 = vector.extract_strided_slice %229 {offsets = [0, 32], sizes = [8, 8], strides = [1, 1]} : vector<8x96xf32> to vector<8x8xf32>
    %233 = arith.truncf %232 : vector<8x8xf32> to vector<8x8xbf16>
    %234 = vector.extract_strided_slice %229 {offsets = [0, 64], sizes = [8, 8], strides = [1, 1]} : vector<8x96xf32> to vector<8x8xf32>
    %235 = arith.truncf %234 : vector<8x8xf32> to vector<8x8xbf16>
    %cst_74 = arith.constant dense<0.000000e+00> : vector<8x8xf32>
    %236 = tpu.matmul %231, %233, %cst_74 {dimension_numbers = #tpu.dot_dimension_numbers<[1], [1], [0], [0], [0, 0, 1, 0], [], []>} : vector<8x8xbf16>, vector<8x8xbf16>, vector<8x8xf32> -> vector<8x8xf32>
    %cst_75 = arith.constant 0.353553385 : f32
    %237 = vector.broadcast %cst_75 : f32 to vector<8x8xf32>
    %238 = arith.mulf %236, %237 : vector<8x8xf32>
    %239 = vector.broadcast %228 : vector<1x8xf32> to vector<8x8xf32>
    %240 = arith.addf %238, %239 : vector<8x8xf32>
    %cst_76 = arith.constant dense<0xFF800000> : vector<8xf32>
    %241 = vector.multi_reduction <maximumf>, %240, %cst_76 [1] : vector<8x8xf32> to vector<8xf32>
    %242 = vector.shape_cast %241 : vector<8xf32> to vector<8x1xf32>
    %243 = vector.broadcast %242 : vector<8x1xf32> to vector<8x8xf32>
    %244 = arith.subf %240, %243 : vector<8x8xf32>
    %245 = math.exp %244 : vector<8x8xf32>
    %cst_77 = arith.constant dense<0.000000e+00> : vector<8xf32>
    %246 = vector.multi_reduction <add>, %245, %cst_77 [1] : vector<8x8xf32> to vector<8xf32>
    %247 = vector.shape_cast %246 : vector<8xf32> to vector<8x1xf32>
    %248 = tpu.reciprocal %247 {approx = true} : vector<8x1xf32> -> vector<8x1xf32>
    %249 = vector.broadcast %248 : vector<8x1xf32> to vector<8x8xf32>
    %250 = arith.mulf %245, %249 : vector<8x8xf32>
    %251 = arith.truncf %250 : vector<8x8xf32> to vector<8x8xbf16>
    %cst_78 = arith.constant dense<0.000000e+00> : vector<8x8xf32>
    %252 = tpu.matmul %251, %235, %cst_78 {dimension_numbers = #tpu.dot_dimension_numbers<[1], [0], [0], [1], [0, 0, 1, 1], [], []>} : vector<8x8xbf16>, vector<8x8xbf16>, vector<8x8xf32> -> vector<8x8xf32>
    %c16_79 = arith.constant 16 : index
    %c0_80 = arith.constant 0 : index
    %253 = vector.load %arg9[%c16_79, %c0_80] : memref<64x32xf32, #tpu.memory_space<vmem>>, vector<8x8xf32>
    tpu.vector_store %arg9[%c16_79, %c0_80], %252 {strides = array<i32>} : memref<64x32xf32, #tpu.memory_space<vmem>>, vector<8x8xf32>,
    %254 = vector.extract_strided_slice %229 {offsets = [0, 8], sizes = [8, 8], strides = [1, 1]} : vector<8x96xf32> to vector<8x8xf32>
    %255 = arith.truncf %254 : vector<8x8xf32> to vector<8x8xbf16>
    %256 = vector.extract_strided_slice %229 {offsets = [0, 40], sizes = [8, 8], strides = [1, 1]} : vector<8x96xf32> to vector<8x8xf32>
    %257 = arith.truncf %256 : vector<8x8xf32> to vector<8x8xbf16>
    %258 = vector.extract_strided_slice %229 {offsets = [0, 72], sizes = [8, 8], strides = [1, 1]} : vector<8x96xf32> to vector<8x8xf32>
    %259 = arith.truncf %258 : vector<8x8xf32> to vector<8x8xbf16>
    %cst_81 = arith.constant dense<0.000000e+00> : vector<8x8xf32>
    %260 = tpu.matmul %255, %257, %cst_81 {dimension_numbers = #tpu.dot_dimension_numbers<[1], [1], [0], [0], [0, 0, 1, 0], [], []>} : vector<8x8xbf16>, vector<8x8xbf16>, vector<8x8xf32> -> vector<8x8xf32>
    %cst_82 = arith.constant 0.353553385 : f32
    %261 = vector.broadcast %cst_82 : f32 to vector<8x8xf32>
    %262 = arith.mulf %260, %261 : vector<8x8xf32>
    %263 = vector.broadcast %228 : vector<1x8xf32> to vector<8x8xf32>
    %264 = arith.addf %262, %263 : vector<8x8xf32>
    %cst_83 = arith.constant dense<0xFF800000> : vector<8xf32>
    %265 = vector.multi_reduction <maximumf>, %264, %cst_83 [1] : vector<8x8xf32> to vector<8xf32>
    %266 = vector.shape_cast %265 : vector<8xf32> to vector<8x1xf32>
    %267 = vector.broadcast %266 : vector<8x1xf32> to vector<8x8xf32>
    %268 = arith.subf %264, %267 : vector<8x8xf32>
    %269 = math.exp %268 : vector<8x8xf32>
    %cst_84 = arith.constant dense<0.000000e+00> : vector<8xf32>
    %270 = vector.multi_reduction <add>, %269, %cst_84 [1] : vector<8x8xf32> to vector<8xf32>
    %271 = vector.shape_cast %270 : vector<8xf32> to vector<8x1xf32>
    %272 = tpu.reciprocal %271 {approx = true} : vector<8x1xf32> -> vector<8x1xf32>
    %273 = vector.broadcast %272 : vector<8x1xf32> to vector<8x8xf32>
    %274 = arith.mulf %269, %273 : vector<8x8xf32>
    %275 = arith.truncf %274 : vector<8x8xf32> to vector<8x8xbf16>
    %cst_85 = arith.constant dense<0.000000e+00> : vector<8x8xf32>
    %276 = tpu.matmul %275, %259, %cst_85 {dimension_numbers = #tpu.dot_dimension_numbers<[1], [0], [0], [1], [0, 0, 1, 1], [], []>} : vector<8x8xbf16>, vector<8x8xbf16>, vector<8x8xf32> -> vector<8x8xf32>
    %c16_86 = arith.constant 16 : index
    %c8_87 = arith.constant 8 : index
    %277 = vector.load %arg9[%c16_86, %c8_87] : memref<64x32xf32, #tpu.memory_space<vmem>>, vector<8x8xf32>
    tpu.vector_store %arg9[%c16_86, %c8_87], %276 {strides = array<i32>} : memref<64x32xf32, #tpu.memory_space<vmem>>, vector<8x8xf32>,
    %278 = vector.extract_strided_slice %229 {offsets = [0, 16], sizes = [8, 8], strides = [1, 1]} : vector<8x96xf32> to vector<8x8xf32>
    %279 = arith.truncf %278 : vector<8x8xf32> to vector<8x8xbf16>
    %280 = vector.extract_strided_slice %229 {offsets = [0, 48], sizes = [8, 8], strides = [1, 1]} : vector<8x96xf32> to vector<8x8xf32>
    %281 = arith.truncf %280 : vector<8x8xf32> to vector<8x8xbf16>
    %282 = vector.extract_strided_slice %229 {offsets = [0, 80], sizes = [8, 8], strides = [1, 1]} : vector<8x96xf32> to vector<8x8xf32>
    %283 = arith.truncf %282 : vector<8x8xf32> to vector<8x8xbf16>
    %cst_88 = arith.constant dense<0.000000e+00> : vector<8x8xf32>
    %284 = tpu.matmul %279, %281, %cst_88 {dimension_numbers = #tpu.dot_dimension_numbers<[1], [1], [0], [0], [0, 0, 1, 0], [], []>} : vector<8x8xbf16>, vector<8x8xbf16>, vector<8x8xf32> -> vector<8x8xf32>
    %cst_89 = arith.constant 0.353553385 : f32
    %285 = vector.broadcast %cst_89 : f32 to vector<8x8xf32>
    %286 = arith.mulf %284, %285 : vector<8x8xf32>
    %287 = vector.broadcast %228 : vector<1x8xf32> to vector<8x8xf32>
    %288 = arith.addf %286, %287 : vector<8x8xf32>
    %cst_90 = arith.constant dense<0xFF800000> : vector<8xf32>
    %289 = vector.multi_reduction <maximumf>, %288, %cst_90 [1] : vector<8x8xf32> to vector<8xf32>
    %290 = vector.shape_cast %289 : vector<8xf32> to vector<8x1xf32>
    %291 = vector.broadcast %290 : vector<8x1xf32> to vector<8x8xf32>
    %292 = arith.subf %288, %291 : vector<8x8xf32>
    %293 = math.exp %292 : vector<8x8xf32>
    %cst_91 = arith.constant dense<0.000000e+00> : vector<8xf32>
    %294 = vector.multi_reduction <add>, %293, %cst_91 [1] : vector<8x8xf32> to vector<8xf32>
    %295 = vector.shape_cast %294 : vector<8xf32> to vector<8x1xf32>
    %296 = tpu.reciprocal %295 {approx = true} : vector<8x1xf32> -> vector<8x1xf32>
    %297 = vector.broadcast %296 : vector<8x1xf32> to vector<8x8xf32>
    %298 = arith.mulf %293, %297 : vector<8x8xf32>
    %299 = arith.truncf %298 : vector<8x8xf32> to vector<8x8xbf16>
    %cst_92 = arith.constant dense<0.000000e+00> : vector<8x8xf32>
    %300 = tpu.matmul %299, %283, %cst_92 {dimension_numbers = #tpu.dot_dimension_numbers<[1], [0], [0], [1], [0, 0, 1, 1], [], []>} : vector<8x8xbf16>, vector<8x8xbf16>, vector<8x8xf32> -> vector<8x8xf32>
    %c16_93 = arith.constant 16 : index
    %c16_94 = arith.constant 16 : index
    %301 = vector.load %arg9[%c16_93, %c16_94] : memref<64x32xf32, #tpu.memory_space<vmem>>, vector<8x8xf32>
    tpu.vector_store %arg9[%c16_93, %c16_94], %300 {strides = array<i32>} : memref<64x32xf32, #tpu.memory_space<vmem>>, vector<8x8xf32>,
    %302 = vector.extract_strided_slice %229 {offsets = [0, 24], sizes = [8, 8], strides = [1, 1]} : vector<8x96xf32> to vector<8x8xf32>
    %303 = arith.truncf %302 : vector<8x8xf32> to vector<8x8xbf16>
    %304 = vector.extract_strided_slice %229 {offsets = [0, 56], sizes = [8, 8], strides = [1, 1]} : vector<8x96xf32> to vector<8x8xf32>
    %305 = arith.truncf %304 : vector<8x8xf32> to vector<8x8xbf16>
    %306 = vector.extract_strided_slice %229 {offsets = [0, 88], sizes = [8, 8], strides = [1, 1]} : vector<8x96xf32> to vector<8x8xf32>
    %307 = arith.truncf %306 : vector<8x8xf32> to vector<8x8xbf16>
    %cst_95 = arith.constant dense<0.000000e+00> : vector<8x8xf32>
    %308 = tpu.matmul %303, %305, %cst_95 {dimension_numbers = #tpu.dot_dimension_numbers<[1], [1], [0], [0], [0, 0, 1, 0], [], []>} : vector<8x8xbf16>, vector<8x8xbf16>, vector<8x8xf32> -> vector<8x8xf32>
    %cst_96 = arith.constant 0.353553385 : f32
    %309 = vector.broadcast %cst_96 : f32 to vector<8x8xf32>
    %310 = arith.mulf %308, %309 : vector<8x8xf32>
    %311 = vector.broadcast %228 : vector<1x8xf32> to vector<8x8xf32>
    %312 = arith.addf %310, %311 : vector<8x8xf32>
    %cst_97 = arith.constant dense<0xFF800000> : vector<8xf32>
    %313 = vector.multi_reduction <maximumf>, %312, %cst_97 [1] : vector<8x8xf32> to vector<8xf32>
    %314 = vector.shape_cast %313 : vector<8xf32> to vector<8x1xf32>
    %315 = vector.broadcast %314 : vector<8x1xf32> to vector<8x8xf32>
    %316 = arith.subf %312, %315 : vector<8x8xf32>
    %317 = math.exp %316 : vector<8x8xf32>
    %cst_98 = arith.constant dense<0.000000e+00> : vector<8xf32>
    %318 = vector.multi_reduction <add>, %317, %cst_98 [1] : vector<8x8xf32> to vector<8xf32>
    %319 = vector.shape_cast %318 : vector<8xf32> to vector<8x1xf32>
    %320 = tpu.reciprocal %319 {approx = true} : vector<8x1xf32> -> vector<8x1xf32>
    %321 = vector.broadcast %320 : vector<8x1xf32> to vector<8x8xf32>
    %322 = arith.mulf %317, %321 : vector<8x8xf32>
    %323 = arith.truncf %322 : vector<8x8xf32> to vector<8x8xbf16>
    %cst_99 = arith.constant dense<0.000000e+00> : vector<8x8xf32>
    %324 = tpu.matmul %323, %307, %cst_99 {dimension_numbers = #tpu.dot_dimension_numbers<[1], [0], [0], [1], [0, 0, 1, 1], [], []>} : vector<8x8xbf16>, vector<8x8xbf16>, vector<8x8xf32> -> vector<8x8xf32>
    %c16_100 = arith.constant 16 : index
    %c24_101 = arith.constant 24 : index
    %325 = vector.load %arg9[%c16_100, %c24_101] : memref<64x32xf32, #tpu.memory_space<vmem>>, vector<8x8xf32>
    tpu.vector_store %arg9[%c16_100, %c24_101], %324 {strides = array<i32>} : memref<64x32xf32, #tpu.memory_space<vmem>>, vector<8x8xf32>,
    %c3 = arith.constant 3 : index
    %c0_102 = arith.constant 0 : index
    %326 = vector.load %arg2[%c3, %c0_102] : memref<8x8xf32, #tpu.memory_space<vmem>>, vector<1x8xf32>
    %cst_103 = arith.constant 0.000000e+00 : f32
    %327 = vector.broadcast %cst_103 : f32 to vector<1x8xf32>
    %328 = arith.cmpf ogt, %326, %327 : vector<1x8xf32>
    %cst_104 = arith.constant 0.000000e+00 : f32
    %cst_105 = arith.constant -1.000000e+09 : f32
    %329 = vector.broadcast %cst_104 : f32 to vector<1x8xf32>
    %330 = vector.broadcast %cst_105 : f32 to vector<1x8xf32>
    %331 = arith.select %328, %329, %330 : vector<1x8xi1>, vector<1x8xf32>
    %332 = vector.extract_strided_slice %16 {offsets = [24, 0], sizes = [8, 96], strides = [1, 1]} : vector<64x96xf32> to vector<8x96xf32>
    %333 = vector.extract_strided_slice %332 {offsets = [0, 0], sizes = [8, 8], strides = [1, 1]} : vector<8x96xf32> to vector<8x8xf32>
    %334 = arith.truncf %333 : vector<8x8xf32> to vector<8x8xbf16>
    %335 = vector.extract_strided_slice %332 {offsets = [0, 32], sizes = [8, 8], strides = [1, 1]} : vector<8x96xf32> to vector<8x8xf32>
    %336 = arith.truncf %335 : vector<8x8xf32> to vector<8x8xbf16>
    %337 = vector.extract_strided_slice %332 {offsets = [0, 64], sizes = [8, 8], strides = [1, 1]} : vector<8x96xf32> to vector<8x8xf32>
    %338 = arith.truncf %337 : vector<8x8xf32> to vector<8x8xbf16>
    %cst_106 = arith.constant dense<0.000000e+00> : vector<8x8xf32>
    %339 = tpu.matmul %334, %336, %cst_106 {dimension_numbers = #tpu.dot_dimension_numbers<[1], [1], [0], [0], [0, 0, 1, 0], [], []>} : vector<8x8xbf16>, vector<8x8xbf16>, vector<8x8xf32> -> vector<8x8xf32>
    %cst_107 = arith.constant 0.353553385 : f32
    %340 = vector.broadcast %cst_107 : f32 to vector<8x8xf32>
    %341 = arith.mulf %339, %340 : vector<8x8xf32>
    %342 = vector.broadcast %331 : vector<1x8xf32> to vector<8x8xf32>
    %343 = arith.addf %341, %342 : vector<8x8xf32>
    %cst_108 = arith.constant dense<0xFF800000> : vector<8xf32>
    %344 = vector.multi_reduction <maximumf>, %343, %cst_108 [1] : vector<8x8xf32> to vector<8xf32>
    %345 = vector.shape_cast %344 : vector<8xf32> to vector<8x1xf32>
    %346 = vector.broadcast %345 : vector<8x1xf32> to vector<8x8xf32>
    %347 = arith.subf %343, %346 : vector<8x8xf32>
    %348 = math.exp %347 : vector<8x8xf32>
    %cst_109 = arith.constant dense<0.000000e+00> : vector<8xf32>
    %349 = vector.multi_reduction <add>, %348, %cst_109 [1] : vector<8x8xf32> to vector<8xf32>
    %350 = vector.shape_cast %349 : vector<8xf32> to vector<8x1xf32>
    %351 = tpu.reciprocal %350 {approx = true} : vector<8x1xf32> -> vector<8x1xf32>
    %352 = vector.broadcast %351 : vector<8x1xf32> to vector<8x8xf32>
    %353 = arith.mulf %348, %352 : vector<8x8xf32>
    %354 = arith.truncf %353 : vector<8x8xf32> to vector<8x8xbf16>
    %cst_110 = arith.constant dense<0.000000e+00> : vector<8x8xf32>
    %355 = tpu.matmul %354, %338, %cst_110 {dimension_numbers = #tpu.dot_dimension_numbers<[1], [0], [0], [1], [0, 0, 1, 1], [], []>} : vector<8x8xbf16>, vector<8x8xbf16>, vector<8x8xf32> -> vector<8x8xf32>
    %c24_111 = arith.constant 24 : index
    %c0_112 = arith.constant 0 : index
    %356 = vector.load %arg9[%c24_111, %c0_112] : memref<64x32xf32, #tpu.memory_space<vmem>>, vector<8x8xf32>
    tpu.vector_store %arg9[%c24_111, %c0_112], %355 {strides = array<i32>} : memref<64x32xf32, #tpu.memory_space<vmem>>, vector<8x8xf32>,
    %357 = vector.extract_strided_slice %332 {offsets = [0, 8], sizes = [8, 8], strides = [1, 1]} : vector<8x96xf32> to vector<8x8xf32>
    %358 = arith.truncf %357 : vector<8x8xf32> to vector<8x8xbf16>
    %359 = vector.extract_strided_slice %332 {offsets = [0, 40], sizes = [8, 8], strides = [1, 1]} : vector<8x96xf32> to vector<8x8xf32>
    %360 = arith.truncf %359 : vector<8x8xf32> to vector<8x8xbf16>
    %361 = vector.extract_strided_slice %332 {offsets = [0, 72], sizes = [8, 8], strides = [1, 1]} : vector<8x96xf32> to vector<8x8xf32>
    %362 = arith.truncf %361 : vector<8x8xf32> to vector<8x8xbf16>
    %cst_113 = arith.constant dense<0.000000e+00> : vector<8x8xf32>
    %363 = tpu.matmul %358, %360, %cst_113 {dimension_numbers = #tpu.dot_dimension_numbers<[1], [1], [0], [0], [0, 0, 1, 0], [], []>} : vector<8x8xbf16>, vector<8x8xbf16>, vector<8x8xf32> -> vector<8x8xf32>
    %cst_114 = arith.constant 0.353553385 : f32
    %364 = vector.broadcast %cst_114 : f32 to vector<8x8xf32>
    %365 = arith.mulf %363, %364 : vector<8x8xf32>
    %366 = vector.broadcast %331 : vector<1x8xf32> to vector<8x8xf32>
    %367 = arith.addf %365, %366 : vector<8x8xf32>
    %cst_115 = arith.constant dense<0xFF800000> : vector<8xf32>
    %368 = vector.multi_reduction <maximumf>, %367, %cst_115 [1] : vector<8x8xf32> to vector<8xf32>
    %369 = vector.shape_cast %368 : vector<8xf32> to vector<8x1xf32>
    %370 = vector.broadcast %369 : vector<8x1xf32> to vector<8x8xf32>
    %371 = arith.subf %367, %370 : vector<8x8xf32>
    %372 = math.exp %371 : vector<8x8xf32>
    %cst_116 = arith.constant dense<0.000000e+00> : vector<8xf32>
    %373 = vector.multi_reduction <add>, %372, %cst_116 [1] : vector<8x8xf32> to vector<8xf32>
    %374 = vector.shape_cast %373 : vector<8xf32> to vector<8x1xf32>
    %375 = tpu.reciprocal %374 {approx = true} : vector<8x1xf32> -> vector<8x1xf32>
    %376 = vector.broadcast %375 : vector<8x1xf32> to vector<8x8xf32>
    %377 = arith.mulf %372, %376 : vector<8x8xf32>
    %378 = arith.truncf %377 : vector<8x8xf32> to vector<8x8xbf16>
    %cst_117 = arith.constant dense<0.000000e+00> : vector<8x8xf32>
    %379 = tpu.matmul %378, %362, %cst_117 {dimension_numbers = #tpu.dot_dimension_numbers<[1], [0], [0], [1], [0, 0, 1, 1], [], []>} : vector<8x8xbf16>, vector<8x8xbf16>, vector<8x8xf32> -> vector<8x8xf32>
    %c24_118 = arith.constant 24 : index
    %c8_119 = arith.constant 8 : index
    %380 = vector.load %arg9[%c24_118, %c8_119] : memref<64x32xf32, #tpu.memory_space<vmem>>, vector<8x8xf32>
    tpu.vector_store %arg9[%c24_118, %c8_119], %379 {strides = array<i32>} : memref<64x32xf32, #tpu.memory_space<vmem>>, vector<8x8xf32>,
    %381 = vector.extract_strided_slice %332 {offsets = [0, 16], sizes = [8, 8], strides = [1, 1]} : vector<8x96xf32> to vector<8x8xf32>
    %382 = arith.truncf %381 : vector<8x8xf32> to vector<8x8xbf16>
    %383 = vector.extract_strided_slice %332 {offsets = [0, 48], sizes = [8, 8], strides = [1, 1]} : vector<8x96xf32> to vector<8x8xf32>
    %384 = arith.truncf %383 : vector<8x8xf32> to vector<8x8xbf16>
    %385 = vector.extract_strided_slice %332 {offsets = [0, 80], sizes = [8, 8], strides = [1, 1]} : vector<8x96xf32> to vector<8x8xf32>
    %386 = arith.truncf %385 : vector<8x8xf32> to vector<8x8xbf16>
    %cst_120 = arith.constant dense<0.000000e+00> : vector<8x8xf32>
    %387 = tpu.matmul %382, %384, %cst_120 {dimension_numbers = #tpu.dot_dimension_numbers<[1], [1], [0], [0], [0, 0, 1, 0], [], []>} : vector<8x8xbf16>, vector<8x8xbf16>, vector<8x8xf32> -> vector<8x8xf32>
    %cst_121 = arith.constant 0.353553385 : f32
    %388 = vector.broadcast %cst_121 : f32 to vector<8x8xf32>
    %389 = arith.mulf %387, %388 : vector<8x8xf32>
    %390 = vector.broadcast %331 : vector<1x8xf32> to vector<8x8xf32>
    %391 = arith.addf %389, %390 : vector<8x8xf32>
    %cst_122 = arith.constant dense<0xFF800000> : vector<8xf32>
    %392 = vector.multi_reduction <maximumf>, %391, %cst_122 [1] : vector<8x8xf32> to vector<8xf32>
    %393 = vector.shape_cast %392 : vector<8xf32> to vector<8x1xf32>
    %394 = vector.broadcast %393 : vector<8x1xf32> to vector<8x8xf32>
    %395 = arith.subf %391, %394 : vector<8x8xf32>
    %396 = math.exp %395 : vector<8x8xf32>
    %cst_123 = arith.constant dense<0.000000e+00> : vector<8xf32>
    %397 = vector.multi_reduction <add>, %396, %cst_123 [1] : vector<8x8xf32> to vector<8xf32>
    %398 = vector.shape_cast %397 : vector<8xf32> to vector<8x1xf32>
    %399 = tpu.reciprocal %398 {approx = true} : vector<8x1xf32> -> vector<8x1xf32>
    %400 = vector.broadcast %399 : vector<8x1xf32> to vector<8x8xf32>
    %401 = arith.mulf %396, %400 : vector<8x8xf32>
    %402 = arith.truncf %401 : vector<8x8xf32> to vector<8x8xbf16>
    %cst_124 = arith.constant dense<0.000000e+00> : vector<8x8xf32>
    %403 = tpu.matmul %402, %386, %cst_124 {dimension_numbers = #tpu.dot_dimension_numbers<[1], [0], [0], [1], [0, 0, 1, 1], [], []>} : vector<8x8xbf16>, vector<8x8xbf16>, vector<8x8xf32> -> vector<8x8xf32>
    %c24_125 = arith.constant 24 : index
    %c16_126 = arith.constant 16 : index
    %404 = vector.load %arg9[%c24_125, %c16_126] : memref<64x32xf32, #tpu.memory_space<vmem>>, vector<8x8xf32>
    tpu.vector_store %arg9[%c24_125, %c16_126], %403 {strides = array<i32>} : memref<64x32xf32, #tpu.memory_space<vmem>>, vector<8x8xf32>,
    %405 = vector.extract_strided_slice %332 {offsets = [0, 24], sizes = [8, 8], strides = [1, 1]} : vector<8x96xf32> to vector<8x8xf32>
    %406 = arith.truncf %405 : vector<8x8xf32> to vector<8x8xbf16>
    %407 = vector.extract_strided_slice %332 {offsets = [0, 56], sizes = [8, 8], strides = [1, 1]} : vector<8x96xf32> to vector<8x8xf32>
    %408 = arith.truncf %407 : vector<8x8xf32> to vector<8x8xbf16>
    %409 = vector.extract_strided_slice %332 {offsets = [0, 88], sizes = [8, 8], strides = [1, 1]} : vector<8x96xf32> to vector<8x8xf32>
    %410 = arith.truncf %409 : vector<8x8xf32> to vector<8x8xbf16>
    %cst_127 = arith.constant dense<0.000000e+00> : vector<8x8xf32>
    %411 = tpu.matmul %406, %408, %cst_127 {dimension_numbers = #tpu.dot_dimension_numbers<[1], [1], [0], [0], [0, 0, 1, 0], [], []>} : vector<8x8xbf16>, vector<8x8xbf16>, vector<8x8xf32> -> vector<8x8xf32>
    %cst_128 = arith.constant 0.353553385 : f32
    %412 = vector.broadcast %cst_128 : f32 to vector<8x8xf32>
    %413 = arith.mulf %411, %412 : vector<8x8xf32>
    %414 = vector.broadcast %331 : vector<1x8xf32> to vector<8x8xf32>
    %415 = arith.addf %413, %414 : vector<8x8xf32>
    %cst_129 = arith.constant dense<0xFF800000> : vector<8xf32>
    %416 = vector.multi_reduction <maximumf>, %415, %cst_129 [1] : vector<8x8xf32> to vector<8xf32>
    %417 = vector.shape_cast %416 : vector<8xf32> to vector<8x1xf32>
    %418 = vector.broadcast %417 : vector<8x1xf32> to vector<8x8xf32>
    %419 = arith.subf %415, %418 : vector<8x8xf32>
    %420 = math.exp %419 : vector<8x8xf32>
    %cst_130 = arith.constant dense<0.000000e+00> : vector<8xf32>
    %421 = vector.multi_reduction <add>, %420, %cst_130 [1] : vector<8x8xf32> to vector<8xf32>
    %422 = vector.shape_cast %421 : vector<8xf32> to vector<8x1xf32>
    %423 = tpu.reciprocal %422 {approx = true} : vector<8x1xf32> -> vector<8x1xf32>
    %424 = vector.broadcast %423 : vector<8x1xf32> to vector<8x8xf32>
    %425 = arith.mulf %420, %424 : vector<8x8xf32>
    %426 = arith.truncf %425 : vector<8x8xf32> to vector<8x8xbf16>
    %cst_131 = arith.constant dense<0.000000e+00> : vector<8x8xf32>
    %427 = tpu.matmul %426, %410, %cst_131 {dimension_numbers = #tpu.dot_dimension_numbers<[1], [0], [0], [1], [0, 0, 1, 1], [], []>} : vector<8x8xbf16>, vector<8x8xbf16>, vector<8x8xf32> -> vector<8x8xf32>
    %c24_132 = arith.constant 24 : index
    %c24_133 = arith.constant 24 : index
    %428 = vector.load %arg9[%c24_132, %c24_133] : memref<64x32xf32, #tpu.memory_space<vmem>>, vector<8x8xf32>
    tpu.vector_store %arg9[%c24_132, %c24_133], %427 {strides = array<i32>} : memref<64x32xf32, #tpu.memory_space<vmem>>, vector<8x8xf32>,
    %c4 = arith.constant 4 : index
    %c0_134 = arith.constant 0 : index
    %429 = vector.load %arg2[%c4, %c0_134] : memref<8x8xf32, #tpu.memory_space<vmem>>, vector<1x8xf32>
    %cst_135 = arith.constant 0.000000e+00 : f32
    %430 = vector.broadcast %cst_135 : f32 to vector<1x8xf32>
    %431 = arith.cmpf ogt, %429, %430 : vector<1x8xf32>
    %cst_136 = arith.constant 0.000000e+00 : f32
    %cst_137 = arith.constant -1.000000e+09 : f32
    %432 = vector.broadcast %cst_136 : f32 to vector<1x8xf32>
    %433 = vector.broadcast %cst_137 : f32 to vector<1x8xf32>
    %434 = arith.select %431, %432, %433 : vector<1x8xi1>, vector<1x8xf32>
    %435 = vector.extract_strided_slice %16 {offsets = [32, 0], sizes = [8, 96], strides = [1, 1]} : vector<64x96xf32> to vector<8x96xf32>
    %436 = vector.extract_strided_slice %435 {offsets = [0, 0], sizes = [8, 8], strides = [1, 1]} : vector<8x96xf32> to vector<8x8xf32>
    %437 = arith.truncf %436 : vector<8x8xf32> to vector<8x8xbf16>
    %438 = vector.extract_strided_slice %435 {offsets = [0, 32], sizes = [8, 8], strides = [1, 1]} : vector<8x96xf32> to vector<8x8xf32>
    %439 = arith.truncf %438 : vector<8x8xf32> to vector<8x8xbf16>
    %440 = vector.extract_strided_slice %435 {offsets = [0, 64], sizes = [8, 8], strides = [1, 1]} : vector<8x96xf32> to vector<8x8xf32>
    %441 = arith.truncf %440 : vector<8x8xf32> to vector<8x8xbf16>
    %cst_138 = arith.constant dense<0.000000e+00> : vector<8x8xf32>
    %442 = tpu.matmul %437, %439, %cst_138 {dimension_numbers = #tpu.dot_dimension_numbers<[1], [1], [0], [0], [0, 0, 1, 0], [], []>} : vector<8x8xbf16>, vector<8x8xbf16>, vector<8x8xf32> -> vector<8x8xf32>
    %cst_139 = arith.constant 0.353553385 : f32
    %443 = vector.broadcast %cst_139 : f32 to vector<8x8xf32>
    %444 = arith.mulf %442, %443 : vector<8x8xf32>
    %445 = vector.broadcast %434 : vector<1x8xf32> to vector<8x8xf32>
    %446 = arith.addf %444, %445 : vector<8x8xf32>
    %cst_140 = arith.constant dense<0xFF800000> : vector<8xf32>
    %447 = vector.multi_reduction <maximumf>, %446, %cst_140 [1] : vector<8x8xf32> to vector<8xf32>
    %448 = vector.shape_cast %447 : vector<8xf32> to vector<8x1xf32>
    %449 = vector.broadcast %448 : vector<8x1xf32> to vector<8x8xf32>
    %450 = arith.subf %446, %449 : vector<8x8xf32>
    %451 = math.exp %450 : vector<8x8xf32>
    %cst_141 = arith.constant dense<0.000000e+00> : vector<8xf32>
    %452 = vector.multi_reduction <add>, %451, %cst_141 [1] : vector<8x8xf32> to vector<8xf32>
    %453 = vector.shape_cast %452 : vector<8xf32> to vector<8x1xf32>
    %454 = tpu.reciprocal %453 {approx = true} : vector<8x1xf32> -> vector<8x1xf32>
    %455 = vector.broadcast %454 : vector<8x1xf32> to vector<8x8xf32>
    %456 = arith.mulf %451, %455 : vector<8x8xf32>
    %457 = arith.truncf %456 : vector<8x8xf32> to vector<8x8xbf16>
    %cst_142 = arith.constant dense<0.000000e+00> : vector<8x8xf32>
    %458 = tpu.matmul %457, %441, %cst_142 {dimension_numbers = #tpu.dot_dimension_numbers<[1], [0], [0], [1], [0, 0, 1, 1], [], []>} : vector<8x8xbf16>, vector<8x8xbf16>, vector<8x8xf32> -> vector<8x8xf32>
    %c32 = arith.constant 32 : index
    %c0_143 = arith.constant 0 : index
    %459 = vector.load %arg9[%c32, %c0_143] : memref<64x32xf32, #tpu.memory_space<vmem>>, vector<8x8xf32>
    tpu.vector_store %arg9[%c32, %c0_143], %458 {strides = array<i32>} : memref<64x32xf32, #tpu.memory_space<vmem>>, vector<8x8xf32>,
    %460 = vector.extract_strided_slice %435 {offsets = [0, 8], sizes = [8, 8], strides = [1, 1]} : vector<8x96xf32> to vector<8x8xf32>
    %461 = arith.truncf %460 : vector<8x8xf32> to vector<8x8xbf16>
    %462 = vector.extract_strided_slice %435 {offsets = [0, 40], sizes = [8, 8], strides = [1, 1]} : vector<8x96xf32> to vector<8x8xf32>
    %463 = arith.truncf %462 : vector<8x8xf32> to vector<8x8xbf16>
    %464 = vector.extract_strided_slice %435 {offsets = [0, 72], sizes = [8, 8], strides = [1, 1]} : vector<8x96xf32> to vector<8x8xf32>
    %465 = arith.truncf %464 : vector<8x8xf32> to vector<8x8xbf16>
    %cst_144 = arith.constant dense<0.000000e+00> : vector<8x8xf32>
    %466 = tpu.matmul %461, %463, %cst_144 {dimension_numbers = #tpu.dot_dimension_numbers<[1], [1], [0], [0], [0, 0, 1, 0], [], []>} : vector<8x8xbf16>, vector<8x8xbf16>, vector<8x8xf32> -> vector<8x8xf32>
    %cst_145 = arith.constant 0.353553385 : f32
    %467 = vector.broadcast %cst_145 : f32 to vector<8x8xf32>
    %468 = arith.mulf %466, %467 : vector<8x8xf32>
    %469 = vector.broadcast %434 : vector<1x8xf32> to vector<8x8xf32>
    %470 = arith.addf %468, %469 : vector<8x8xf32>
    %cst_146 = arith.constant dense<0xFF800000> : vector<8xf32>
    %471 = vector.multi_reduction <maximumf>, %470, %cst_146 [1] : vector<8x8xf32> to vector<8xf32>
    %472 = vector.shape_cast %471 : vector<8xf32> to vector<8x1xf32>
    %473 = vector.broadcast %472 : vector<8x1xf32> to vector<8x8xf32>
    %474 = arith.subf %470, %473 : vector<8x8xf32>
    %475 = math.exp %474 : vector<8x8xf32>
    %cst_147 = arith.constant dense<0.000000e+00> : vector<8xf32>
    %476 = vector.multi_reduction <add>, %475, %cst_147 [1] : vector<8x8xf32> to vector<8xf32>
    %477 = vector.shape_cast %476 : vector<8xf32> to vector<8x1xf32>
    %478 = tpu.reciprocal %477 {approx = true} : vector<8x1xf32> -> vector<8x1xf32>
    %479 = vector.broadcast %478 : vector<8x1xf32> to vector<8x8xf32>
    %480 = arith.mulf %475, %479 : vector<8x8xf32>
    %481 = arith.truncf %480 : vector<8x8xf32> to vector<8x8xbf16>
    %cst_148 = arith.constant dense<0.000000e+00> : vector<8x8xf32>
    %482 = tpu.matmul %481, %465, %cst_148 {dimension_numbers = #tpu.dot_dimension_numbers<[1], [0], [0], [1], [0, 0, 1, 1], [], []>} : vector<8x8xbf16>, vector<8x8xbf16>, vector<8x8xf32> -> vector<8x8xf32>
    %c32_149 = arith.constant 32 : index
    %c8_150 = arith.constant 8 : index
    %483 = vector.load %arg9[%c32_149, %c8_150] : memref<64x32xf32, #tpu.memory_space<vmem>>, vector<8x8xf32>
    tpu.vector_store %arg9[%c32_149, %c8_150], %482 {strides = array<i32>} : memref<64x32xf32, #tpu.memory_space<vmem>>, vector<8x8xf32>,
    %484 = vector.extract_strided_slice %435 {offsets = [0, 16], sizes = [8, 8], strides = [1, 1]} : vector<8x96xf32> to vector<8x8xf32>
    %485 = arith.truncf %484 : vector<8x8xf32> to vector<8x8xbf16>
    %486 = vector.extract_strided_slice %435 {offsets = [0, 48], sizes = [8, 8], strides = [1, 1]} : vector<8x96xf32> to vector<8x8xf32>
    %487 = arith.truncf %486 : vector<8x8xf32> to vector<8x8xbf16>
    %488 = vector.extract_strided_slice %435 {offsets = [0, 80], sizes = [8, 8], strides = [1, 1]} : vector<8x96xf32> to vector<8x8xf32>
    %489 = arith.truncf %488 : vector<8x8xf32> to vector<8x8xbf16>
    %cst_151 = arith.constant dense<0.000000e+00> : vector<8x8xf32>
    %490 = tpu.matmul %485, %487, %cst_151 {dimension_numbers = #tpu.dot_dimension_numbers<[1], [1], [0], [0], [0, 0, 1, 0], [], []>} : vector<8x8xbf16>, vector<8x8xbf16>, vector<8x8xf32> -> vector<8x8xf32>
    %cst_152 = arith.constant 0.353553385 : f32
    %491 = vector.broadcast %cst_152 : f32 to vector<8x8xf32>
    %492 = arith.mulf %490, %491 : vector<8x8xf32>
    %493 = vector.broadcast %434 : vector<1x8xf32> to vector<8x8xf32>
    %494 = arith.addf %492, %493 : vector<8x8xf32>
    %cst_153 = arith.constant dense<0xFF800000> : vector<8xf32>
    %495 = vector.multi_reduction <maximumf>, %494, %cst_153 [1] : vector<8x8xf32> to vector<8xf32>
    %496 = vector.shape_cast %495 : vector<8xf32> to vector<8x1xf32>
    %497 = vector.broadcast %496 : vector<8x1xf32> to vector<8x8xf32>
    %498 = arith.subf %494, %497 : vector<8x8xf32>
    %499 = math.exp %498 : vector<8x8xf32>
    %cst_154 = arith.constant dense<0.000000e+00> : vector<8xf32>
    %500 = vector.multi_reduction <add>, %499, %cst_154 [1] : vector<8x8xf32> to vector<8xf32>
    %501 = vector.shape_cast %500 : vector<8xf32> to vector<8x1xf32>
    %502 = tpu.reciprocal %501 {approx = true} : vector<8x1xf32> -> vector<8x1xf32>
    %503 = vector.broadcast %502 : vector<8x1xf32> to vector<8x8xf32>
    %504 = arith.mulf %499, %503 : vector<8x8xf32>
    %505 = arith.truncf %504 : vector<8x8xf32> to vector<8x8xbf16>
    %cst_155 = arith.constant dense<0.000000e+00> : vector<8x8xf32>
    %506 = tpu.matmul %505, %489, %cst_155 {dimension_numbers = #tpu.dot_dimension_numbers<[1], [0], [0], [1], [0, 0, 1, 1], [], []>} : vector<8x8xbf16>, vector<8x8xbf16>, vector<8x8xf32> -> vector<8x8xf32>
    %c32_156 = arith.constant 32 : index
    %c16_157 = arith.constant 16 : index
    %507 = vector.load %arg9[%c32_156, %c16_157] : memref<64x32xf32, #tpu.memory_space<vmem>>, vector<8x8xf32>
    tpu.vector_store %arg9[%c32_156, %c16_157], %506 {strides = array<i32>} : memref<64x32xf32, #tpu.memory_space<vmem>>, vector<8x8xf32>,
    %508 = vector.extract_strided_slice %435 {offsets = [0, 24], sizes = [8, 8], strides = [1, 1]} : vector<8x96xf32> to vector<8x8xf32>
    %509 = arith.truncf %508 : vector<8x8xf32> to vector<8x8xbf16>
    %510 = vector.extract_strided_slice %435 {offsets = [0, 56], sizes = [8, 8], strides = [1, 1]} : vector<8x96xf32> to vector<8x8xf32>
    %511 = arith.truncf %510 : vector<8x8xf32> to vector<8x8xbf16>
    %512 = vector.extract_strided_slice %435 {offsets = [0, 88], sizes = [8, 8], strides = [1, 1]} : vector<8x96xf32> to vector<8x8xf32>
    %513 = arith.truncf %512 : vector<8x8xf32> to vector<8x8xbf16>
    %cst_158 = arith.constant dense<0.000000e+00> : vector<8x8xf32>
    %514 = tpu.matmul %509, %511, %cst_158 {dimension_numbers = #tpu.dot_dimension_numbers<[1], [1], [0], [0], [0, 0, 1, 0], [], []>} : vector<8x8xbf16>, vector<8x8xbf16>, vector<8x8xf32> -> vector<8x8xf32>
    %cst_159 = arith.constant 0.353553385 : f32
    %515 = vector.broadcast %cst_159 : f32 to vector<8x8xf32>
    %516 = arith.mulf %514, %515 : vector<8x8xf32>
    %517 = vector.broadcast %434 : vector<1x8xf32> to vector<8x8xf32>
    %518 = arith.addf %516, %517 : vector<8x8xf32>
    %cst_160 = arith.constant dense<0xFF800000> : vector<8xf32>
    %519 = vector.multi_reduction <maximumf>, %518, %cst_160 [1] : vector<8x8xf32> to vector<8xf32>
    %520 = vector.shape_cast %519 : vector<8xf32> to vector<8x1xf32>
    %521 = vector.broadcast %520 : vector<8x1xf32> to vector<8x8xf32>
    %522 = arith.subf %518, %521 : vector<8x8xf32>
    %523 = math.exp %522 : vector<8x8xf32>
    %cst_161 = arith.constant dense<0.000000e+00> : vector<8xf32>
    %524 = vector.multi_reduction <add>, %523, %cst_161 [1] : vector<8x8xf32> to vector<8xf32>
    %525 = vector.shape_cast %524 : vector<8xf32> to vector<8x1xf32>
    %526 = tpu.reciprocal %525 {approx = true} : vector<8x1xf32> -> vector<8x1xf32>
    %527 = vector.broadcast %526 : vector<8x1xf32> to vector<8x8xf32>
    %528 = arith.mulf %523, %527 : vector<8x8xf32>
    %529 = arith.truncf %528 : vector<8x8xf32> to vector<8x8xbf16>
    %cst_162 = arith.constant dense<0.000000e+00> : vector<8x8xf32>
    %530 = tpu.matmul %529, %513, %cst_162 {dimension_numbers = #tpu.dot_dimension_numbers<[1], [0], [0], [1], [0, 0, 1, 1], [], []>} : vector<8x8xbf16>, vector<8x8xbf16>, vector<8x8xf32> -> vector<8x8xf32>
    %c32_163 = arith.constant 32 : index
    %c24_164 = arith.constant 24 : index
    %531 = vector.load %arg9[%c32_163, %c24_164] : memref<64x32xf32, #tpu.memory_space<vmem>>, vector<8x8xf32>
    tpu.vector_store %arg9[%c32_163, %c24_164], %530 {strides = array<i32>} : memref<64x32xf32, #tpu.memory_space<vmem>>, vector<8x8xf32>,
    %c5 = arith.constant 5 : index
    %c0_165 = arith.constant 0 : index
    %532 = vector.load %arg2[%c5, %c0_165] : memref<8x8xf32, #tpu.memory_space<vmem>>, vector<1x8xf32>
    %cst_166 = arith.constant 0.000000e+00 : f32
    %533 = vector.broadcast %cst_166 : f32 to vector<1x8xf32>
    %534 = arith.cmpf ogt, %532, %533 : vector<1x8xf32>
    %cst_167 = arith.constant 0.000000e+00 : f32
    %cst_168 = arith.constant -1.000000e+09 : f32
    %535 = vector.broadcast %cst_167 : f32 to vector<1x8xf32>
    %536 = vector.broadcast %cst_168 : f32 to vector<1x8xf32>
    %537 = arith.select %534, %535, %536 : vector<1x8xi1>, vector<1x8xf32>
    %538 = vector.extract_strided_slice %16 {offsets = [40, 0], sizes = [8, 96], strides = [1, 1]} : vector<64x96xf32> to vector<8x96xf32>
    %539 = vector.extract_strided_slice %538 {offsets = [0, 0], sizes = [8, 8], strides = [1, 1]} : vector<8x96xf32> to vector<8x8xf32>
    %540 = arith.truncf %539 : vector<8x8xf32> to vector<8x8xbf16>
    %541 = vector.extract_strided_slice %538 {offsets = [0, 32], sizes = [8, 8], strides = [1, 1]} : vector<8x96xf32> to vector<8x8xf32>
    %542 = arith.truncf %541 : vector<8x8xf32> to vector<8x8xbf16>
    %543 = vector.extract_strided_slice %538 {offsets = [0, 64], sizes = [8, 8], strides = [1, 1]} : vector<8x96xf32> to vector<8x8xf32>
    %544 = arith.truncf %543 : vector<8x8xf32> to vector<8x8xbf16>
    %cst_169 = arith.constant dense<0.000000e+00> : vector<8x8xf32>
    %545 = tpu.matmul %540, %542, %cst_169 {dimension_numbers = #tpu.dot_dimension_numbers<[1], [1], [0], [0], [0, 0, 1, 0], [], []>} : vector<8x8xbf16>, vector<8x8xbf16>, vector<8x8xf32> -> vector<8x8xf32>
    %cst_170 = arith.constant 0.353553385 : f32
    %546 = vector.broadcast %cst_170 : f32 to vector<8x8xf32>
    %547 = arith.mulf %545, %546 : vector<8x8xf32>
    %548 = vector.broadcast %537 : vector<1x8xf32> to vector<8x8xf32>
    %549 = arith.addf %547, %548 : vector<8x8xf32>
    %cst_171 = arith.constant dense<0xFF800000> : vector<8xf32>
    %550 = vector.multi_reduction <maximumf>, %549, %cst_171 [1] : vector<8x8xf32> to vector<8xf32>
    %551 = vector.shape_cast %550 : vector<8xf32> to vector<8x1xf32>
    %552 = vector.broadcast %551 : vector<8x1xf32> to vector<8x8xf32>
    %553 = arith.subf %549, %552 : vector<8x8xf32>
    %554 = math.exp %553 : vector<8x8xf32>
    %cst_172 = arith.constant dense<0.000000e+00> : vector<8xf32>
    %555 = vector.multi_reduction <add>, %554, %cst_172 [1] : vector<8x8xf32> to vector<8xf32>
    %556 = vector.shape_cast %555 : vector<8xf32> to vector<8x1xf32>
    %557 = tpu.reciprocal %556 {approx = true} : vector<8x1xf32> -> vector<8x1xf32>
    %558 = vector.broadcast %557 : vector<8x1xf32> to vector<8x8xf32>
    %559 = arith.mulf %554, %558 : vector<8x8xf32>
    %560 = arith.truncf %559 : vector<8x8xf32> to vector<8x8xbf16>
    %cst_173 = arith.constant dense<0.000000e+00> : vector<8x8xf32>
    %561 = tpu.matmul %560, %544, %cst_173 {dimension_numbers = #tpu.dot_dimension_numbers<[1], [0], [0], [1], [0, 0, 1, 1], [], []>} : vector<8x8xbf16>, vector<8x8xbf16>, vector<8x8xf32> -> vector<8x8xf32>
    %c40 = arith.constant 40 : index
    %c0_174 = arith.constant 0 : index
    %562 = vector.load %arg9[%c40, %c0_174] : memref<64x32xf32, #tpu.memory_space<vmem>>, vector<8x8xf32>
    tpu.vector_store %arg9[%c40, %c0_174], %561 {strides = array<i32>} : memref<64x32xf32, #tpu.memory_space<vmem>>, vector<8x8xf32>,
    %563 = vector.extract_strided_slice %538 {offsets = [0, 8], sizes = [8, 8], strides = [1, 1]} : vector<8x96xf32> to vector<8x8xf32>
    %564 = arith.truncf %563 : vector<8x8xf32> to vector<8x8xbf16>
    %565 = vector.extract_strided_slice %538 {offsets = [0, 40], sizes = [8, 8], strides = [1, 1]} : vector<8x96xf32> to vector<8x8xf32>
    %566 = arith.truncf %565 : vector<8x8xf32> to vector<8x8xbf16>
    %567 = vector.extract_strided_slice %538 {offsets = [0, 72], sizes = [8, 8], strides = [1, 1]} : vector<8x96xf32> to vector<8x8xf32>
    %568 = arith.truncf %567 : vector<8x8xf32> to vector<8x8xbf16>
    %cst_175 = arith.constant dense<0.000000e+00> : vector<8x8xf32>
    %569 = tpu.matmul %564, %566, %cst_175 {dimension_numbers = #tpu.dot_dimension_numbers<[1], [1], [0], [0], [0, 0, 1, 0], [], []>} : vector<8x8xbf16>, vector<8x8xbf16>, vector<8x8xf32> -> vector<8x8xf32>
    %cst_176 = arith.constant 0.353553385 : f32
    %570 = vector.broadcast %cst_176 : f32 to vector<8x8xf32>
    %571 = arith.mulf %569, %570 : vector<8x8xf32>
    %572 = vector.broadcast %537 : vector<1x8xf32> to vector<8x8xf32>
    %573 = arith.addf %571, %572 : vector<8x8xf32>
    %cst_177 = arith.constant dense<0xFF800000> : vector<8xf32>
    %574 = vector.multi_reduction <maximumf>, %573, %cst_177 [1] : vector<8x8xf32> to vector<8xf32>
    %575 = vector.shape_cast %574 : vector<8xf32> to vector<8x1xf32>
    %576 = vector.broadcast %575 : vector<8x1xf32> to vector<8x8xf32>
    %577 = arith.subf %573, %576 : vector<8x8xf32>
    %578 = math.exp %577 : vector<8x8xf32>
    %cst_178 = arith.constant dense<0.000000e+00> : vector<8xf32>
    %579 = vector.multi_reduction <add>, %578, %cst_178 [1] : vector<8x8xf32> to vector<8xf32>
    %580 = vector.shape_cast %579 : vector<8xf32> to vector<8x1xf32>
    %581 = tpu.reciprocal %580 {approx = true} : vector<8x1xf32> -> vector<8x1xf32>
    %582 = vector.broadcast %581 : vector<8x1xf32> to vector<8x8xf32>
    %583 = arith.mulf %578, %582 : vector<8x8xf32>
    %584 = arith.truncf %583 : vector<8x8xf32> to vector<8x8xbf16>
    %cst_179 = arith.constant dense<0.000000e+00> : vector<8x8xf32>
    %585 = tpu.matmul %584, %568, %cst_179 {dimension_numbers = #tpu.dot_dimension_numbers<[1], [0], [0], [1], [0, 0, 1, 1], [], []>} : vector<8x8xbf16>, vector<8x8xbf16>, vector<8x8xf32> -> vector<8x8xf32>
    %c40_180 = arith.constant 40 : index
    %c8_181 = arith.constant 8 : index
    %586 = vector.load %arg9[%c40_180, %c8_181] : memref<64x32xf32, #tpu.memory_space<vmem>>, vector<8x8xf32>
    tpu.vector_store %arg9[%c40_180, %c8_181], %585 {strides = array<i32>} : memref<64x32xf32, #tpu.memory_space<vmem>>, vector<8x8xf32>,
    %587 = vector.extract_strided_slice %538 {offsets = [0, 16], sizes = [8, 8], strides = [1, 1]} : vector<8x96xf32> to vector<8x8xf32>
    %588 = arith.truncf %587 : vector<8x8xf32> to vector<8x8xbf16>
    %589 = vector.extract_strided_slice %538 {offsets = [0, 48], sizes = [8, 8], strides = [1, 1]} : vector<8x96xf32> to vector<8x8xf32>
    %590 = arith.truncf %589 : vector<8x8xf32> to vector<8x8xbf16>
    %591 = vector.extract_strided_slice %538 {offsets = [0, 80], sizes = [8, 8], strides = [1, 1]} : vector<8x96xf32> to vector<8x8xf32>
    %592 = arith.truncf %591 : vector<8x8xf32> to vector<8x8xbf16>
    %cst_182 = arith.constant dense<0.000000e+00> : vector<8x8xf32>
    %593 = tpu.matmul %588, %590, %cst_182 {dimension_numbers = #tpu.dot_dimension_numbers<[1], [1], [0], [0], [0, 0, 1, 0], [], []>} : vector<8x8xbf16>, vector<8x8xbf16>, vector<8x8xf32> -> vector<8x8xf32>
    %cst_183 = arith.constant 0.353553385 : f32
    %594 = vector.broadcast %cst_183 : f32 to vector<8x8xf32>
    %595 = arith.mulf %593, %594 : vector<8x8xf32>
    %596 = vector.broadcast %537 : vector<1x8xf32> to vector<8x8xf32>
    %597 = arith.addf %595, %596 : vector<8x8xf32>
    %cst_184 = arith.constant dense<0xFF800000> : vector<8xf32>
    %598 = vector.multi_reduction <maximumf>, %597, %cst_184 [1] : vector<8x8xf32> to vector<8xf32>
    %599 = vector.shape_cast %598 : vector<8xf32> to vector<8x1xf32>
    %600 = vector.broadcast %599 : vector<8x1xf32> to vector<8x8xf32>
    %601 = arith.subf %597, %600 : vector<8x8xf32>
    %602 = math.exp %601 : vector<8x8xf32>
    %cst_185 = arith.constant dense<0.000000e+00> : vector<8xf32>
    %603 = vector.multi_reduction <add>, %602, %cst_185 [1] : vector<8x8xf32> to vector<8xf32>
    %604 = vector.shape_cast %603 : vector<8xf32> to vector<8x1xf32>
    %605 = tpu.reciprocal %604 {approx = true} : vector<8x1xf32> -> vector<8x1xf32>
    %606 = vector.broadcast %605 : vector<8x1xf32> to vector<8x8xf32>
    %607 = arith.mulf %602, %606 : vector<8x8xf32>
    %608 = arith.truncf %607 : vector<8x8xf32> to vector<8x8xbf16>
    %cst_186 = arith.constant dense<0.000000e+00> : vector<8x8xf32>
    %609 = tpu.matmul %608, %592, %cst_186 {dimension_numbers = #tpu.dot_dimension_numbers<[1], [0], [0], [1], [0, 0, 1, 1], [], []>} : vector<8x8xbf16>, vector<8x8xbf16>, vector<8x8xf32> -> vector<8x8xf32>
    %c40_187 = arith.constant 40 : index
    %c16_188 = arith.constant 16 : index
    %610 = vector.load %arg9[%c40_187, %c16_188] : memref<64x32xf32, #tpu.memory_space<vmem>>, vector<8x8xf32>
    tpu.vector_store %arg9[%c40_187, %c16_188], %609 {strides = array<i32>} : memref<64x32xf32, #tpu.memory_space<vmem>>, vector<8x8xf32>,
    %611 = vector.extract_strided_slice %538 {offsets = [0, 24], sizes = [8, 8], strides = [1, 1]} : vector<8x96xf32> to vector<8x8xf32>
    %612 = arith.truncf %611 : vector<8x8xf32> to vector<8x8xbf16>
    %613 = vector.extract_strided_slice %538 {offsets = [0, 56], sizes = [8, 8], strides = [1, 1]} : vector<8x96xf32> to vector<8x8xf32>
    %614 = arith.truncf %613 : vector<8x8xf32> to vector<8x8xbf16>
    %615 = vector.extract_strided_slice %538 {offsets = [0, 88], sizes = [8, 8], strides = [1, 1]} : vector<8x96xf32> to vector<8x8xf32>
    %616 = arith.truncf %615 : vector<8x8xf32> to vector<8x8xbf16>
    %cst_189 = arith.constant dense<0.000000e+00> : vector<8x8xf32>
    %617 = tpu.matmul %612, %614, %cst_189 {dimension_numbers = #tpu.dot_dimension_numbers<[1], [1], [0], [0], [0, 0, 1, 0], [], []>} : vector<8x8xbf16>, vector<8x8xbf16>, vector<8x8xf32> -> vector<8x8xf32>
    %cst_190 = arith.constant 0.353553385 : f32
    %618 = vector.broadcast %cst_190 : f32 to vector<8x8xf32>
    %619 = arith.mulf %617, %618 : vector<8x8xf32>
    %620 = vector.broadcast %537 : vector<1x8xf32> to vector<8x8xf32>
    %621 = arith.addf %619, %620 : vector<8x8xf32>
    %cst_191 = arith.constant dense<0xFF800000> : vector<8xf32>
    %622 = vector.multi_reduction <maximumf>, %621, %cst_191 [1] : vector<8x8xf32> to vector<8xf32>
    %623 = vector.shape_cast %622 : vector<8xf32> to vector<8x1xf32>
    %624 = vector.broadcast %623 : vector<8x1xf32> to vector<8x8xf32>
    %625 = arith.subf %621, %624 : vector<8x8xf32>
    %626 = math.exp %625 : vector<8x8xf32>
    %cst_192 = arith.constant dense<0.000000e+00> : vector<8xf32>
    %627 = vector.multi_reduction <add>, %626, %cst_192 [1] : vector<8x8xf32> to vector<8xf32>
    %628 = vector.shape_cast %627 : vector<8xf32> to vector<8x1xf32>
    %629 = tpu.reciprocal %628 {approx = true} : vector<8x1xf32> -> vector<8x1xf32>
    %630 = vector.broadcast %629 : vector<8x1xf32> to vector<8x8xf32>
    %631 = arith.mulf %626, %630 : vector<8x8xf32>
    %632 = arith.truncf %631 : vector<8x8xf32> to vector<8x8xbf16>
    %cst_193 = arith.constant dense<0.000000e+00> : vector<8x8xf32>
    %633 = tpu.matmul %632, %616, %cst_193 {dimension_numbers = #tpu.dot_dimension_numbers<[1], [0], [0], [1], [0, 0, 1, 1], [], []>} : vector<8x8xbf16>, vector<8x8xbf16>, vector<8x8xf32> -> vector<8x8xf32>
    %c40_194 = arith.constant 40 : index
    %c24_195 = arith.constant 24 : index
    %634 = vector.load %arg9[%c40_194, %c24_195] : memref<64x32xf32, #tpu.memory_space<vmem>>, vector<8x8xf32>
    tpu.vector_store %arg9[%c40_194, %c24_195], %633 {strides = array<i32>} : memref<64x32xf32, #tpu.memory_space<vmem>>, vector<8x8xf32>,
    %c6 = arith.constant 6 : index
    %c0_196 = arith.constant 0 : index
    %635 = vector.load %arg2[%c6, %c0_196] : memref<8x8xf32, #tpu.memory_space<vmem>>, vector<1x8xf32>
    %cst_197 = arith.constant 0.000000e+00 : f32
    %636 = vector.broadcast %cst_197 : f32 to vector<1x8xf32>
    %637 = arith.cmpf ogt, %635, %636 : vector<1x8xf32>
    %cst_198 = arith.constant 0.000000e+00 : f32
    %cst_199 = arith.constant -1.000000e+09 : f32
    %638 = vector.broadcast %cst_198 : f32 to vector<1x8xf32>
    %639 = vector.broadcast %cst_199 : f32 to vector<1x8xf32>
    %640 = arith.select %637, %638, %639 : vector<1x8xi1>, vector<1x8xf32>
    %641 = vector.extract_strided_slice %16 {offsets = [48, 0], sizes = [8, 96], strides = [1, 1]} : vector<64x96xf32> to vector<8x96xf32>
    %642 = vector.extract_strided_slice %641 {offsets = [0, 0], sizes = [8, 8], strides = [1, 1]} : vector<8x96xf32> to vector<8x8xf32>
    %643 = arith.truncf %642 : vector<8x8xf32> to vector<8x8xbf16>
    %644 = vector.extract_strided_slice %641 {offsets = [0, 32], sizes = [8, 8], strides = [1, 1]} : vector<8x96xf32> to vector<8x8xf32>
    %645 = arith.truncf %644 : vector<8x8xf32> to vector<8x8xbf16>
    %646 = vector.extract_strided_slice %641 {offsets = [0, 64], sizes = [8, 8], strides = [1, 1]} : vector<8x96xf32> to vector<8x8xf32>
    %647 = arith.truncf %646 : vector<8x8xf32> to vector<8x8xbf16>
    %cst_200 = arith.constant dense<0.000000e+00> : vector<8x8xf32>
    %648 = tpu.matmul %643, %645, %cst_200 {dimension_numbers = #tpu.dot_dimension_numbers<[1], [1], [0], [0], [0, 0, 1, 0], [], []>} : vector<8x8xbf16>, vector<8x8xbf16>, vector<8x8xf32> -> vector<8x8xf32>
    %cst_201 = arith.constant 0.353553385 : f32
    %649 = vector.broadcast %cst_201 : f32 to vector<8x8xf32>
    %650 = arith.mulf %648, %649 : vector<8x8xf32>
    %651 = vector.broadcast %640 : vector<1x8xf32> to vector<8x8xf32>
    %652 = arith.addf %650, %651 : vector<8x8xf32>
    %cst_202 = arith.constant dense<0xFF800000> : vector<8xf32>
    %653 = vector.multi_reduction <maximumf>, %652, %cst_202 [1] : vector<8x8xf32> to vector<8xf32>
    %654 = vector.shape_cast %653 : vector<8xf32> to vector<8x1xf32>
    %655 = vector.broadcast %654 : vector<8x1xf32> to vector<8x8xf32>
    %656 = arith.subf %652, %655 : vector<8x8xf32>
    %657 = math.exp %656 : vector<8x8xf32>
    %cst_203 = arith.constant dense<0.000000e+00> : vector<8xf32>
    %658 = vector.multi_reduction <add>, %657, %cst_203 [1] : vector<8x8xf32> to vector<8xf32>
    %659 = vector.shape_cast %658 : vector<8xf32> to vector<8x1xf32>
    %660 = tpu.reciprocal %659 {approx = true} : vector<8x1xf32> -> vector<8x1xf32>
    %661 = vector.broadcast %660 : vector<8x1xf32> to vector<8x8xf32>
    %662 = arith.mulf %657, %661 : vector<8x8xf32>
    %663 = arith.truncf %662 : vector<8x8xf32> to vector<8x8xbf16>
    %cst_204 = arith.constant dense<0.000000e+00> : vector<8x8xf32>
    %664 = tpu.matmul %663, %647, %cst_204 {dimension_numbers = #tpu.dot_dimension_numbers<[1], [0], [0], [1], [0, 0, 1, 1], [], []>} : vector<8x8xbf16>, vector<8x8xbf16>, vector<8x8xf32> -> vector<8x8xf32>
    %c48 = arith.constant 48 : index
    %c0_205 = arith.constant 0 : index
    %665 = vector.load %arg9[%c48, %c0_205] : memref<64x32xf32, #tpu.memory_space<vmem>>, vector<8x8xf32>
    tpu.vector_store %arg9[%c48, %c0_205], %664 {strides = array<i32>} : memref<64x32xf32, #tpu.memory_space<vmem>>, vector<8x8xf32>,
    %666 = vector.extract_strided_slice %641 {offsets = [0, 8], sizes = [8, 8], strides = [1, 1]} : vector<8x96xf32> to vector<8x8xf32>
    %667 = arith.truncf %666 : vector<8x8xf32> to vector<8x8xbf16>
    %668 = vector.extract_strided_slice %641 {offsets = [0, 40], sizes = [8, 8], strides = [1, 1]} : vector<8x96xf32> to vector<8x8xf32>
    %669 = arith.truncf %668 : vector<8x8xf32> to vector<8x8xbf16>
    %670 = vector.extract_strided_slice %641 {offsets = [0, 72], sizes = [8, 8], strides = [1, 1]} : vector<8x96xf32> to vector<8x8xf32>
    %671 = arith.truncf %670 : vector<8x8xf32> to vector<8x8xbf16>
    %cst_206 = arith.constant dense<0.000000e+00> : vector<8x8xf32>
    %672 = tpu.matmul %667, %669, %cst_206 {dimension_numbers = #tpu.dot_dimension_numbers<[1], [1], [0], [0], [0, 0, 1, 0], [], []>} : vector<8x8xbf16>, vector<8x8xbf16>, vector<8x8xf32> -> vector<8x8xf32>
    %cst_207 = arith.constant 0.353553385 : f32
    %673 = vector.broadcast %cst_207 : f32 to vector<8x8xf32>
    %674 = arith.mulf %672, %673 : vector<8x8xf32>
    %675 = vector.broadcast %640 : vector<1x8xf32> to vector<8x8xf32>
    %676 = arith.addf %674, %675 : vector<8x8xf32>
    %cst_208 = arith.constant dense<0xFF800000> : vector<8xf32>
    %677 = vector.multi_reduction <maximumf>, %676, %cst_208 [1] : vector<8x8xf32> to vector<8xf32>
    %678 = vector.shape_cast %677 : vector<8xf32> to vector<8x1xf32>
    %679 = vector.broadcast %678 : vector<8x1xf32> to vector<8x8xf32>
    %680 = arith.subf %676, %679 : vector<8x8xf32>
    %681 = math.exp %680 : vector<8x8xf32>
    %cst_209 = arith.constant dense<0.000000e+00> : vector<8xf32>
    %682 = vector.multi_reduction <add>, %681, %cst_209 [1] : vector<8x8xf32> to vector<8xf32>
    %683 = vector.shape_cast %682 : vector<8xf32> to vector<8x1xf32>
    %684 = tpu.reciprocal %683 {approx = true} : vector<8x1xf32> -> vector<8x1xf32>
    %685 = vector.broadcast %684 : vector<8x1xf32> to vector<8x8xf32>
    %686 = arith.mulf %681, %685 : vector<8x8xf32>
    %687 = arith.truncf %686 : vector<8x8xf32> to vector<8x8xbf16>
    %cst_210 = arith.constant dense<0.000000e+00> : vector<8x8xf32>
    %688 = tpu.matmul %687, %671, %cst_210 {dimension_numbers = #tpu.dot_dimension_numbers<[1], [0], [0], [1], [0, 0, 1, 1], [], []>} : vector<8x8xbf16>, vector<8x8xbf16>, vector<8x8xf32> -> vector<8x8xf32>
    %c48_211 = arith.constant 48 : index
    %c8_212 = arith.constant 8 : index
    %689 = vector.load %arg9[%c48_211, %c8_212] : memref<64x32xf32, #tpu.memory_space<vmem>>, vector<8x8xf32>
    tpu.vector_store %arg9[%c48_211, %c8_212], %688 {strides = array<i32>} : memref<64x32xf32, #tpu.memory_space<vmem>>, vector<8x8xf32>,
    %690 = vector.extract_strided_slice %641 {offsets = [0, 16], sizes = [8, 8], strides = [1, 1]} : vector<8x96xf32> to vector<8x8xf32>
    %691 = arith.truncf %690 : vector<8x8xf32> to vector<8x8xbf16>
    %692 = vector.extract_strided_slice %641 {offsets = [0, 48], sizes = [8, 8], strides = [1, 1]} : vector<8x96xf32> to vector<8x8xf32>
    %693 = arith.truncf %692 : vector<8x8xf32> to vector<8x8xbf16>
    %694 = vector.extract_strided_slice %641 {offsets = [0, 80], sizes = [8, 8], strides = [1, 1]} : vector<8x96xf32> to vector<8x8xf32>
    %695 = arith.truncf %694 : vector<8x8xf32> to vector<8x8xbf16>
    %cst_213 = arith.constant dense<0.000000e+00> : vector<8x8xf32>
    %696 = tpu.matmul %691, %693, %cst_213 {dimension_numbers = #tpu.dot_dimension_numbers<[1], [1], [0], [0], [0, 0, 1, 0], [], []>} : vector<8x8xbf16>, vector<8x8xbf16>, vector<8x8xf32> -> vector<8x8xf32>
    %cst_214 = arith.constant 0.353553385 : f32
    %697 = vector.broadcast %cst_214 : f32 to vector<8x8xf32>
    %698 = arith.mulf %696, %697 : vector<8x8xf32>
    %699 = vector.broadcast %640 : vector<1x8xf32> to vector<8x8xf32>
    %700 = arith.addf %698, %699 : vector<8x8xf32>
    %cst_215 = arith.constant dense<0xFF800000> : vector<8xf32>
    %701 = vector.multi_reduction <maximumf>, %700, %cst_215 [1] : vector<8x8xf32> to vector<8xf32>
    %702 = vector.shape_cast %701 : vector<8xf32> to vector<8x1xf32>
    %703 = vector.broadcast %702 : vector<8x1xf32> to vector<8x8xf32>
    %704 = arith.subf %700, %703 : vector<8x8xf32>
    %705 = math.exp %704 : vector<8x8xf32>
    %cst_216 = arith.constant dense<0.000000e+00> : vector<8xf32>
    %706 = vector.multi_reduction <add>, %705, %cst_216 [1] : vector<8x8xf32> to vector<8xf32>
    %707 = vector.shape_cast %706 : vector<8xf32> to vector<8x1xf32>
    %708 = tpu.reciprocal %707 {approx = true} : vector<8x1xf32> -> vector<8x1xf32>
    %709 = vector.broadcast %708 : vector<8x1xf32> to vector<8x8xf32>
    %710 = arith.mulf %705, %709 : vector<8x8xf32>
    %711 = arith.truncf %710 : vector<8x8xf32> to vector<8x8xbf16>
    %cst_217 = arith.constant dense<0.000000e+00> : vector<8x8xf32>
    %712 = tpu.matmul %711, %695, %cst_217 {dimension_numbers = #tpu.dot_dimension_numbers<[1], [0], [0], [1], [0, 0, 1, 1], [], []>} : vector<8x8xbf16>, vector<8x8xbf16>, vector<8x8xf32> -> vector<8x8xf32>
    %c48_218 = arith.constant 48 : index
    %c16_219 = arith.constant 16 : index
    %713 = vector.load %arg9[%c48_218, %c16_219] : memref<64x32xf32, #tpu.memory_space<vmem>>, vector<8x8xf32>
    tpu.vector_store %arg9[%c48_218, %c16_219], %712 {strides = array<i32>} : memref<64x32xf32, #tpu.memory_space<vmem>>, vector<8x8xf32>,
    %714 = vector.extract_strided_slice %641 {offsets = [0, 24], sizes = [8, 8], strides = [1, 1]} : vector<8x96xf32> to vector<8x8xf32>
    %715 = arith.truncf %714 : vector<8x8xf32> to vector<8x8xbf16>
    %716 = vector.extract_strided_slice %641 {offsets = [0, 56], sizes = [8, 8], strides = [1, 1]} : vector<8x96xf32> to vector<8x8xf32>
    %717 = arith.truncf %716 : vector<8x8xf32> to vector<8x8xbf16>
    %718 = vector.extract_strided_slice %641 {offsets = [0, 88], sizes = [8, 8], strides = [1, 1]} : vector<8x96xf32> to vector<8x8xf32>
    %719 = arith.truncf %718 : vector<8x8xf32> to vector<8x8xbf16>
    %cst_220 = arith.constant dense<0.000000e+00> : vector<8x8xf32>
    %720 = tpu.matmul %715, %717, %cst_220 {dimension_numbers = #tpu.dot_dimension_numbers<[1], [1], [0], [0], [0, 0, 1, 0], [], []>} : vector<8x8xbf16>, vector<8x8xbf16>, vector<8x8xf32> -> vector<8x8xf32>
    %cst_221 = arith.constant 0.353553385 : f32
    %721 = vector.broadcast %cst_221 : f32 to vector<8x8xf32>
    %722 = arith.mulf %720, %721 : vector<8x8xf32>
    %723 = vector.broadcast %640 : vector<1x8xf32> to vector<8x8xf32>
    %724 = arith.addf %722, %723 : vector<8x8xf32>
    %cst_222 = arith.constant dense<0xFF800000> : vector<8xf32>
    %725 = vector.multi_reduction <maximumf>, %724, %cst_222 [1] : vector<8x8xf32> to vector<8xf32>
    %726 = vector.shape_cast %725 : vector<8xf32> to vector<8x1xf32>
    %727 = vector.broadcast %726 : vector<8x1xf32> to vector<8x8xf32>
    %728 = arith.subf %724, %727 : vector<8x8xf32>
    %729 = math.exp %728 : vector<8x8xf32>
    %cst_223 = arith.constant dense<0.000000e+00> : vector<8xf32>
    %730 = vector.multi_reduction <add>, %729, %cst_223 [1] : vector<8x8xf32> to vector<8xf32>
    %731 = vector.shape_cast %730 : vector<8xf32> to vector<8x1xf32>
    %732 = tpu.reciprocal %731 {approx = true} : vector<8x1xf32> -> vector<8x1xf32>
    %733 = vector.broadcast %732 : vector<8x1xf32> to vector<8x8xf32>
    %734 = arith.mulf %729, %733 : vector<8x8xf32>
    %735 = arith.truncf %734 : vector<8x8xf32> to vector<8x8xbf16>
    %cst_224 = arith.constant dense<0.000000e+00> : vector<8x8xf32>
    %736 = tpu.matmul %735, %719, %cst_224 {dimension_numbers = #tpu.dot_dimension_numbers<[1], [0], [0], [1], [0, 0, 1, 1], [], []>} : vector<8x8xbf16>, vector<8x8xbf16>, vector<8x8xf32> -> vector<8x8xf32>
    %c48_225 = arith.constant 48 : index
    %c24_226 = arith.constant 24 : index
    %737 = vector.load %arg9[%c48_225, %c24_226] : memref<64x32xf32, #tpu.memory_space<vmem>>, vector<8x8xf32>
    tpu.vector_store %arg9[%c48_225, %c24_226], %736 {strides = array<i32>} : memref<64x32xf32, #tpu.memory_space<vmem>>, vector<8x8xf32>,
    %c7 = arith.constant 7 : index
    %c0_227 = arith.constant 0 : index
    %738 = vector.load %arg2[%c7, %c0_227] : memref<8x8xf32, #tpu.memory_space<vmem>>, vector<1x8xf32>
    %cst_228 = arith.constant 0.000000e+00 : f32
    %739 = vector.broadcast %cst_228 : f32 to vector<1x8xf32>
    %740 = arith.cmpf ogt, %738, %739 : vector<1x8xf32>
    %cst_229 = arith.constant 0.000000e+00 : f32
    %cst_230 = arith.constant -1.000000e+09 : f32
    %741 = vector.broadcast %cst_229 : f32 to vector<1x8xf32>
    %742 = vector.broadcast %cst_230 : f32 to vector<1x8xf32>
    %743 = arith.select %740, %741, %742 : vector<1x8xi1>, vector<1x8xf32>
    %744 = vector.extract_strided_slice %16 {offsets = [56, 0], sizes = [8, 96], strides = [1, 1]} : vector<64x96xf32> to vector<8x96xf32>
    %745 = vector.extract_strided_slice %744 {offsets = [0, 0], sizes = [8, 8], strides = [1, 1]} : vector<8x96xf32> to vector<8x8xf32>
    %746 = arith.truncf %745 : vector<8x8xf32> to vector<8x8xbf16>
    %747 = vector.extract_strided_slice %744 {offsets = [0, 32], sizes = [8, 8], strides = [1, 1]} : vector<8x96xf32> to vector<8x8xf32>
    %748 = arith.truncf %747 : vector<8x8xf32> to vector<8x8xbf16>
    %749 = vector.extract_strided_slice %744 {offsets = [0, 64], sizes = [8, 8], strides = [1, 1]} : vector<8x96xf32> to vector<8x8xf32>
    %750 = arith.truncf %749 : vector<8x8xf32> to vector<8x8xbf16>
    %cst_231 = arith.constant dense<0.000000e+00> : vector<8x8xf32>
    %751 = tpu.matmul %746, %748, %cst_231 {dimension_numbers = #tpu.dot_dimension_numbers<[1], [1], [0], [0], [0, 0, 1, 0], [], []>} : vector<8x8xbf16>, vector<8x8xbf16>, vector<8x8xf32> -> vector<8x8xf32>
    %cst_232 = arith.constant 0.353553385 : f32
    %752 = vector.broadcast %cst_232 : f32 to vector<8x8xf32>
    %753 = arith.mulf %751, %752 : vector<8x8xf32>
    %754 = vector.broadcast %743 : vector<1x8xf32> to vector<8x8xf32>
    %755 = arith.addf %753, %754 : vector<8x8xf32>
    %cst_233 = arith.constant dense<0xFF800000> : vector<8xf32>
    %756 = vector.multi_reduction <maximumf>, %755, %cst_233 [1] : vector<8x8xf32> to vector<8xf32>
    %757 = vector.shape_cast %756 : vector<8xf32> to vector<8x1xf32>
    %758 = vector.broadcast %757 : vector<8x1xf32> to vector<8x8xf32>
    %759 = arith.subf %755, %758 : vector<8x8xf32>
    %760 = math.exp %759 : vector<8x8xf32>
    %cst_234 = arith.constant dense<0.000000e+00> : vector<8xf32>
    %761 = vector.multi_reduction <add>, %760, %cst_234 [1] : vector<8x8xf32> to vector<8xf32>
    %762 = vector.shape_cast %761 : vector<8xf32> to vector<8x1xf32>
    %763 = tpu.reciprocal %762 {approx = true} : vector<8x1xf32> -> vector<8x1xf32>
    %764 = vector.broadcast %763 : vector<8x1xf32> to vector<8x8xf32>
    %765 = arith.mulf %760, %764 : vector<8x8xf32>
    %766 = arith.truncf %765 : vector<8x8xf32> to vector<8x8xbf16>
    %cst_235 = arith.constant dense<0.000000e+00> : vector<8x8xf32>
    %767 = tpu.matmul %766, %750, %cst_235 {dimension_numbers = #tpu.dot_dimension_numbers<[1], [0], [0], [1], [0, 0, 1, 1], [], []>} : vector<8x8xbf16>, vector<8x8xbf16>, vector<8x8xf32> -> vector<8x8xf32>
    %c56 = arith.constant 56 : index
    %c0_236 = arith.constant 0 : index
    %768 = vector.load %arg9[%c56, %c0_236] : memref<64x32xf32, #tpu.memory_space<vmem>>, vector<8x8xf32>
    tpu.vector_store %arg9[%c56, %c0_236], %767 {strides = array<i32>} : memref<64x32xf32, #tpu.memory_space<vmem>>, vector<8x8xf32>,
    %769 = vector.extract_strided_slice %744 {offsets = [0, 8], sizes = [8, 8], strides = [1, 1]} : vector<8x96xf32> to vector<8x8xf32>
    %770 = arith.truncf %769 : vector<8x8xf32> to vector<8x8xbf16>
    %771 = vector.extract_strided_slice %744 {offsets = [0, 40], sizes = [8, 8], strides = [1, 1]} : vector<8x96xf32> to vector<8x8xf32>
    %772 = arith.truncf %771 : vector<8x8xf32> to vector<8x8xbf16>
    %773 = vector.extract_strided_slice %744 {offsets = [0, 72], sizes = [8, 8], strides = [1, 1]} : vector<8x96xf32> to vector<8x8xf32>
    %774 = arith.truncf %773 : vector<8x8xf32> to vector<8x8xbf16>
    %cst_237 = arith.constant dense<0.000000e+00> : vector<8x8xf32>
    %775 = tpu.matmul %770, %772, %cst_237 {dimension_numbers = #tpu.dot_dimension_numbers<[1], [1], [0], [0], [0, 0, 1, 0], [], []>} : vector<8x8xbf16>, vector<8x8xbf16>, vector<8x8xf32> -> vector<8x8xf32>
    %cst_238 = arith.constant 0.353553385 : f32
    %776 = vector.broadcast %cst_238 : f32 to vector<8x8xf32>
    %777 = arith.mulf %775, %776 : vector<8x8xf32>
    %778 = vector.broadcast %743 : vector<1x8xf32> to vector<8x8xf32>
    %779 = arith.addf %777, %778 : vector<8x8xf32>
    %cst_239 = arith.constant dense<0xFF800000> : vector<8xf32>
    %780 = vector.multi_reduction <maximumf>, %779, %cst_239 [1] : vector<8x8xf32> to vector<8xf32>
    %781 = vector.shape_cast %780 : vector<8xf32> to vector<8x1xf32>
    %782 = vector.broadcast %781 : vector<8x1xf32> to vector<8x8xf32>
    %783 = arith.subf %779, %782 : vector<8x8xf32>
    %784 = math.exp %783 : vector<8x8xf32>
    %cst_240 = arith.constant dense<0.000000e+00> : vector<8xf32>
    %785 = vector.multi_reduction <add>, %784, %cst_240 [1] : vector<8x8xf32> to vector<8xf32>
    %786 = vector.shape_cast %785 : vector<8xf32> to vector<8x1xf32>
    %787 = tpu.reciprocal %786 {approx = true} : vector<8x1xf32> -> vector<8x1xf32>
    %788 = vector.broadcast %787 : vector<8x1xf32> to vector<8x8xf32>
    %789 = arith.mulf %784, %788 : vector<8x8xf32>
    %790 = arith.truncf %789 : vector<8x8xf32> to vector<8x8xbf16>
    %cst_241 = arith.constant dense<0.000000e+00> : vector<8x8xf32>
    %791 = tpu.matmul %790, %774, %cst_241 {dimension_numbers = #tpu.dot_dimension_numbers<[1], [0], [0], [1], [0, 0, 1, 1], [], []>} : vector<8x8xbf16>, vector<8x8xbf16>, vector<8x8xf32> -> vector<8x8xf32>
    %c56_242 = arith.constant 56 : index
    %c8_243 = arith.constant 8 : index
    %792 = vector.load %arg9[%c56_242, %c8_243] : memref<64x32xf32, #tpu.memory_space<vmem>>, vector<8x8xf32>
    tpu.vector_store %arg9[%c56_242, %c8_243], %791 {strides = array<i32>} : memref<64x32xf32, #tpu.memory_space<vmem>>, vector<8x8xf32>,
    %793 = vector.extract_strided_slice %744 {offsets = [0, 16], sizes = [8, 8], strides = [1, 1]} : vector<8x96xf32> to vector<8x8xf32>
    %794 = arith.truncf %793 : vector<8x8xf32> to vector<8x8xbf16>
    %795 = vector.extract_strided_slice %744 {offsets = [0, 48], sizes = [8, 8], strides = [1, 1]} : vector<8x96xf32> to vector<8x8xf32>
    %796 = arith.truncf %795 : vector<8x8xf32> to vector<8x8xbf16>
    %797 = vector.extract_strided_slice %744 {offsets = [0, 80], sizes = [8, 8], strides = [1, 1]} : vector<8x96xf32> to vector<8x8xf32>
    %798 = arith.truncf %797 : vector<8x8xf32> to vector<8x8xbf16>
    %cst_244 = arith.constant dense<0.000000e+00> : vector<8x8xf32>
    %799 = tpu.matmul %794, %796, %cst_244 {dimension_numbers = #tpu.dot_dimension_numbers<[1], [1], [0], [0], [0, 0, 1, 0], [], []>} : vector<8x8xbf16>, vector<8x8xbf16>, vector<8x8xf32> -> vector<8x8xf32>
    %cst_245 = arith.constant 0.353553385 : f32
    %800 = vector.broadcast %cst_245 : f32 to vector<8x8xf32>
    %801 = arith.mulf %799, %800 : vector<8x8xf32>
    %802 = vector.broadcast %743 : vector<1x8xf32> to vector<8x8xf32>
    %803 = arith.addf %801, %802 : vector<8x8xf32>
    %cst_246 = arith.constant dense<0xFF800000> : vector<8xf32>
    %804 = vector.multi_reduction <maximumf>, %803, %cst_246 [1] : vector<8x8xf32> to vector<8xf32>
    %805 = vector.shape_cast %804 : vector<8xf32> to vector<8x1xf32>
    %806 = vector.broadcast %805 : vector<8x1xf32> to vector<8x8xf32>
    %807 = arith.subf %803, %806 : vector<8x8xf32>
    %808 = math.exp %807 : vector<8x8xf32>
    %cst_247 = arith.constant dense<0.000000e+00> : vector<8xf32>
    %809 = vector.multi_reduction <add>, %808, %cst_247 [1] : vector<8x8xf32> to vector<8xf32>
    %810 = vector.shape_cast %809 : vector<8xf32> to vector<8x1xf32>
    %811 = tpu.reciprocal %810 {approx = true} : vector<8x1xf32> -> vector<8x1xf32>
    %812 = vector.broadcast %811 : vector<8x1xf32> to vector<8x8xf32>
    %813 = arith.mulf %808, %812 : vector<8x8xf32>
    %814 = arith.truncf %813 : vector<8x8xf32> to vector<8x8xbf16>
    %cst_248 = arith.constant dense<0.000000e+00> : vector<8x8xf32>
    %815 = tpu.matmul %814, %798, %cst_248 {dimension_numbers = #tpu.dot_dimension_numbers<[1], [0], [0], [1], [0, 0, 1, 1], [], []>} : vector<8x8xbf16>, vector<8x8xbf16>, vector<8x8xf32> -> vector<8x8xf32>
    %c56_249 = arith.constant 56 : index
    %c16_250 = arith.constant 16 : index
    %816 = vector.load %arg9[%c56_249, %c16_250] : memref<64x32xf32, #tpu.memory_space<vmem>>, vector<8x8xf32>
    tpu.vector_store %arg9[%c56_249, %c16_250], %815 {strides = array<i32>} : memref<64x32xf32, #tpu.memory_space<vmem>>, vector<8x8xf32>,
    %817 = vector.extract_strided_slice %744 {offsets = [0, 24], sizes = [8, 8], strides = [1, 1]} : vector<8x96xf32> to vector<8x8xf32>
    %818 = arith.truncf %817 : vector<8x8xf32> to vector<8x8xbf16>
    %819 = vector.extract_strided_slice %744 {offsets = [0, 56], sizes = [8, 8], strides = [1, 1]} : vector<8x96xf32> to vector<8x8xf32>
    %820 = arith.truncf %819 : vector<8x8xf32> to vector<8x8xbf16>
    %821 = vector.extract_strided_slice %744 {offsets = [0, 88], sizes = [8, 8], strides = [1, 1]} : vector<8x96xf32> to vector<8x8xf32>
    %822 = arith.truncf %821 : vector<8x8xf32> to vector<8x8xbf16>
    %cst_251 = arith.constant dense<0.000000e+00> : vector<8x8xf32>
    %823 = tpu.matmul %818, %820, %cst_251 {dimension_numbers = #tpu.dot_dimension_numbers<[1], [1], [0], [0], [0, 0, 1, 0], [], []>} : vector<8x8xbf16>, vector<8x8xbf16>, vector<8x8xf32> -> vector<8x8xf32>
    %cst_252 = arith.constant 0.353553385 : f32
    %824 = vector.broadcast %cst_252 : f32 to vector<8x8xf32>
    %825 = arith.mulf %823, %824 : vector<8x8xf32>
    %826 = vector.broadcast %743 : vector<1x8xf32> to vector<8x8xf32>
    %827 = arith.addf %825, %826 : vector<8x8xf32>
    %cst_253 = arith.constant dense<0xFF800000> : vector<8xf32>
    %828 = vector.multi_reduction <maximumf>, %827, %cst_253 [1] : vector<8x8xf32> to vector<8xf32>
    %829 = vector.shape_cast %828 : vector<8xf32> to vector<8x1xf32>
    %830 = vector.broadcast %829 : vector<8x1xf32> to vector<8x8xf32>
    %831 = arith.subf %827, %830 : vector<8x8xf32>
    %832 = math.exp %831 : vector<8x8xf32>
    %cst_254 = arith.constant dense<0.000000e+00> : vector<8xf32>
    %833 = vector.multi_reduction <add>, %832, %cst_254 [1] : vector<8x8xf32> to vector<8xf32>
    %834 = vector.shape_cast %833 : vector<8xf32> to vector<8x1xf32>
    %835 = tpu.reciprocal %834 {approx = true} : vector<8x1xf32> -> vector<8x1xf32>
    %836 = vector.broadcast %835 : vector<8x1xf32> to vector<8x8xf32>
    %837 = arith.mulf %832, %836 : vector<8x8xf32>
    %838 = arith.truncf %837 : vector<8x8xf32> to vector<8x8xbf16>
    %cst_255 = arith.constant dense<0.000000e+00> : vector<8x8xf32>
    %839 = tpu.matmul %838, %822, %cst_255 {dimension_numbers = #tpu.dot_dimension_numbers<[1], [0], [0], [1], [0, 0, 1, 1], [], []>} : vector<8x8xbf16>, vector<8x8xbf16>, vector<8x8xf32> -> vector<8x8xf32>
    %c56_256 = arith.constant 56 : index
    %c24_257 = arith.constant 24 : index
    %840 = vector.load %arg9[%c56_256, %c24_257] : memref<64x32xf32, #tpu.memory_space<vmem>>, vector<8x8xf32>
    tpu.vector_store %arg9[%c56_256, %c24_257], %839 {strides = array<i32>} : memref<64x32xf32, #tpu.memory_space<vmem>>, vector<8x8xf32>,
    %c0_258 = arith.constant 0 : index
    %c0_259 = arith.constant 0 : index
    %841 = vector.load %arg9[%c0_258, %c0_259] : memref<64x32xf32, #tpu.memory_space<vmem>>, vector<64x32xf32>
    %842 = arith.truncf %841 : vector<64x32xf32> to vector<64x32xbf16>
    %c0_260 = arith.constant 0 : index
    %c0_261 = arith.constant 0 : index
    %843 = vector.load %arg6[%c0_260, %c0_261] : memref<32x32xbf16, #tpu.memory_space<vmem>>, vector<32x32xbf16>
    %cst_262 = arith.constant dense<0.000000e+00> : vector<64x32xf32>
    %844 = tpu.matmul %842, %843, %cst_262 {dimension_numbers = #tpu.dot_dimension_numbers<[1], [0], [0], [1], [0, 0, 1, 1], [], []>} : vector<64x32xbf16>, vector<32x32xbf16>, vector<64x32xf32> -> vector<64x32xf32>
    %845 = arith.addf %0, %844 : vector<64x32xf32>
    %c0_263 = arith.constant 0 : index
    %c0_264 = arith.constant 0 : index
    %846 = vector.load %arg7[%c0_263, %c0_264] : memref<64x32xf32, #tpu.memory_space<vmem>>, vector<64x32xf32>
    tpu.vector_store %arg7[%c0_263, %c0_264], %845 {strides = array<i32>} : memref<64x32xf32, #tpu.memory_space<vmem>>, vector<64x32xf32>,
    %c0_265 = arith.constant 0 : index
    %c0_266 = arith.constant 0 : index
    %847 = vector.load %arg3[%c0_265, %c0_266] : memref<64x1xf32, #tpu.memory_space<vmem>>, vector<64x1xf32>
    %848 = vector.broadcast %847 : vector<64x1xf32> to vector<64x32xf32>
    %849 = arith.mulf %845, %848 : vector<64x32xf32>
    %850 = vector.extract_strided_slice %849 {offsets = [0, 0], sizes = [8, 32], strides = [1, 1]} : vector<64x32xf32> to vector<8x32xf32>
    %cst_267 = arith.constant dense<0.000000e+00> : vector<32xf32>
    %851 = vector.multi_reduction <add>, %850, %cst_267 [0] : vector<8x32xf32> to vector<32xf32>
    %852 = vector.shape_cast %851 : vector<32xf32> to vector<1x32xf32>
    %853 = vector.extract_strided_slice %847 {offsets = [0, 0], sizes = [8, 1], strides = [1, 1]} : vector<64x1xf32> to vector<8x1xf32>
    %cst_268 = arith.constant dense<0.000000e+00> : vector<1xf32>
    %854 = vector.multi_reduction <add>, %853, %cst_268 [0] : vector<8x1xf32> to vector<1xf32>
    %855 = vector.shape_cast %854 : vector<1xf32> to vector<1x1xf32>
    %cst_269 = arith.constant 1.000000e-10 : f32
    %856 = vector.broadcast %cst_269 : f32 to vector<1x1xf32>
    %857 = arith.maximumf %855, %856 : vector<1x1xf32>
    %858 = tpu.reciprocal %857 {approx = true} : vector<1x1xf32> -> vector<1x1xf32>
    %859 = vector.broadcast %858 : vector<1x1xf32> to vector<1x32xf32>
    %860 = arith.mulf %852, %859 : vector<1x32xf32>
    %c0_270 = arith.constant 0 : index
    %c0_271 = arith.constant 0 : index
    %861 = vector.load %arg8[%c0_270, %c0_271] : memref<8x32xf32, #tpu.memory_space<vmem>>, vector<1x32xf32>
    tpu.vector_store %arg8[%c0_270, %c0_271], %860 {strides = array<i32>} : memref<8x32xf32, #tpu.memory_space<vmem>>, vector<1x32xf32>,
    %862 = vector.extract_strided_slice %849 {offsets = [8, 0], sizes = [8, 32], strides = [1, 1]} : vector<64x32xf32> to vector<8x32xf32>
    %cst_272 = arith.constant dense<0.000000e+00> : vector<32xf32>
    %863 = vector.multi_reduction <add>, %862, %cst_272 [0] : vector<8x32xf32> to vector<32xf32>
    %864 = vector.shape_cast %863 : vector<32xf32> to vector<1x32xf32>
    %865 = vector.extract_strided_slice %847 {offsets = [8, 0], sizes = [8, 1], strides = [1, 1]} : vector<64x1xf32> to vector<8x1xf32>
    %cst_273 = arith.constant dense<0.000000e+00> : vector<1xf32>
    %866 = vector.multi_reduction <add>, %865, %cst_273 [0] : vector<8x1xf32> to vector<1xf32>
    %867 = vector.shape_cast %866 : vector<1xf32> to vector<1x1xf32>
    %cst_274 = arith.constant 1.000000e-10 : f32
    %868 = vector.broadcast %cst_274 : f32 to vector<1x1xf32>
    %869 = arith.maximumf %867, %868 : vector<1x1xf32>
    %870 = tpu.reciprocal %869 {approx = true} : vector<1x1xf32> -> vector<1x1xf32>
    %871 = vector.broadcast %870 : vector<1x1xf32> to vector<1x32xf32>
    %872 = arith.mulf %864, %871 : vector<1x32xf32>
    %c1_275 = arith.constant 1 : index
    %c0_276 = arith.constant 0 : index
    %873 = vector.load %arg8[%c1_275, %c0_276] : memref<8x32xf32, #tpu.memory_space<vmem>>, vector<1x32xf32>
    tpu.vector_store %arg8[%c1_275, %c0_276], %872 {strides = array<i32>} : memref<8x32xf32, #tpu.memory_space<vmem>>, vector<1x32xf32>,
    %874 = vector.extract_strided_slice %849 {offsets = [16, 0], sizes = [8, 32], strides = [1, 1]} : vector<64x32xf32> to vector<8x32xf32>
    %cst_277 = arith.constant dense<0.000000e+00> : vector<32xf32>
    %875 = vector.multi_reduction <add>, %874, %cst_277 [0] : vector<8x32xf32> to vector<32xf32>
    %876 = vector.shape_cast %875 : vector<32xf32> to vector<1x32xf32>
    %877 = vector.extract_strided_slice %847 {offsets = [16, 0], sizes = [8, 1], strides = [1, 1]} : vector<64x1xf32> to vector<8x1xf32>
    %cst_278 = arith.constant dense<0.000000e+00> : vector<1xf32>
    %878 = vector.multi_reduction <add>, %877, %cst_278 [0] : vector<8x1xf32> to vector<1xf32>
    %879 = vector.shape_cast %878 : vector<1xf32> to vector<1x1xf32>
    %cst_279 = arith.constant 1.000000e-10 : f32
    %880 = vector.broadcast %cst_279 : f32 to vector<1x1xf32>
    %881 = arith.maximumf %879, %880 : vector<1x1xf32>
    %882 = tpu.reciprocal %881 {approx = true} : vector<1x1xf32> -> vector<1x1xf32>
    %883 = vector.broadcast %882 : vector<1x1xf32> to vector<1x32xf32>
    %884 = arith.mulf %876, %883 : vector<1x32xf32>
    %c2_280 = arith.constant 2 : index
    %c0_281 = arith.constant 0 : index
    %885 = vector.load %arg8[%c2_280, %c0_281] : memref<8x32xf32, #tpu.memory_space<vmem>>, vector<1x32xf32>
    tpu.vector_store %arg8[%c2_280, %c0_281], %884 {strides = array<i32>} : memref<8x32xf32, #tpu.memory_space<vmem>>, vector<1x32xf32>,
    %886 = vector.extract_strided_slice %849 {offsets = [24, 0], sizes = [8, 32], strides = [1, 1]} : vector<64x32xf32> to vector<8x32xf32>
    %cst_282 = arith.constant dense<0.000000e+00> : vector<32xf32>
    %887 = vector.multi_reduction <add>, %886, %cst_282 [0] : vector<8x32xf32> to vector<32xf32>
    %888 = vector.shape_cast %887 : vector<32xf32> to vector<1x32xf32>
    %889 = vector.extract_strided_slice %847 {offsets = [24, 0], sizes = [8, 1], strides = [1, 1]} : vector<64x1xf32> to vector<8x1xf32>
    %cst_283 = arith.constant dense<0.000000e+00> : vector<1xf32>
    %890 = vector.multi_reduction <add>, %889, %cst_283 [0] : vector<8x1xf32> to vector<1xf32>
    %891 = vector.shape_cast %890 : vector<1xf32> to vector<1x1xf32>
    %cst_284 = arith.constant 1.000000e-10 : f32
    %892 = vector.broadcast %cst_284 : f32 to vector<1x1xf32>
    %893 = arith.maximumf %891, %892 : vector<1x1xf32>
    %894 = tpu.reciprocal %893 {approx = true} : vector<1x1xf32> -> vector<1x1xf32>
    %895 = vector.broadcast %894 : vector<1x1xf32> to vector<1x32xf32>
    %896 = arith.mulf %888, %895 : vector<1x32xf32>
    %c3_285 = arith.constant 3 : index
    %c0_286 = arith.constant 0 : index
    %897 = vector.load %arg8[%c3_285, %c0_286] : memref<8x32xf32, #tpu.memory_space<vmem>>, vector<1x32xf32>
    tpu.vector_store %arg8[%c3_285, %c0_286], %896 {strides = array<i32>} : memref<8x32xf32, #tpu.memory_space<vmem>>, vector<1x32xf32>,
    %898 = vector.extract_strided_slice %849 {offsets = [32, 0], sizes = [8, 32], strides = [1, 1]} : vector<64x32xf32> to vector<8x32xf32>
    %cst_287 = arith.constant dense<0.000000e+00> : vector<32xf32>
    %899 = vector.multi_reduction <add>, %898, %cst_287 [0] : vector<8x32xf32> to vector<32xf32>
    %900 = vector.shape_cast %899 : vector<32xf32> to vector<1x32xf32>
    %901 = vector.extract_strided_slice %847 {offsets = [32, 0], sizes = [8, 1], strides = [1, 1]} : vector<64x1xf32> to vector<8x1xf32>
    %cst_288 = arith.constant dense<0.000000e+00> : vector<1xf32>
    %902 = vector.multi_reduction <add>, %901, %cst_288 [0] : vector<8x1xf32> to vector<1xf32>
    %903 = vector.shape_cast %902 : vector<1xf32> to vector<1x1xf32>
    %cst_289 = arith.constant 1.000000e-10 : f32
    %904 = vector.broadcast %cst_289 : f32 to vector<1x1xf32>
    %905 = arith.maximumf %903, %904 : vector<1x1xf32>
    %906 = tpu.reciprocal %905 {approx = true} : vector<1x1xf32> -> vector<1x1xf32>
    %907 = vector.broadcast %906 : vector<1x1xf32> to vector<1x32xf32>
    %908 = arith.mulf %900, %907 : vector<1x32xf32>
    %c4_290 = arith.constant 4 : index
    %c0_291 = arith.constant 0 : index
    %909 = vector.load %arg8[%c4_290, %c0_291] : memref<8x32xf32, #tpu.memory_space<vmem>>, vector<1x32xf32>
    tpu.vector_store %arg8[%c4_290, %c0_291], %908 {strides = array<i32>} : memref<8x32xf32, #tpu.memory_space<vmem>>, vector<1x32xf32>,
    %910 = vector.extract_strided_slice %849 {offsets = [40, 0], sizes = [8, 32], strides = [1, 1]} : vector<64x32xf32> to vector<8x32xf32>
    %cst_292 = arith.constant dense<0.000000e+00> : vector<32xf32>
    %911 = vector.multi_reduction <add>, %910, %cst_292 [0] : vector<8x32xf32> to vector<32xf32>
    %912 = vector.shape_cast %911 : vector<32xf32> to vector<1x32xf32>
    %913 = vector.extract_strided_slice %847 {offsets = [40, 0], sizes = [8, 1], strides = [1, 1]} : vector<64x1xf32> to vector<8x1xf32>
    %cst_293 = arith.constant dense<0.000000e+00> : vector<1xf32>
    %914 = vector.multi_reduction <add>, %913, %cst_293 [0] : vector<8x1xf32> to vector<1xf32>
    %915 = vector.shape_cast %914 : vector<1xf32> to vector<1x1xf32>
    %cst_294 = arith.constant 1.000000e-10 : f32
    %916 = vector.broadcast %cst_294 : f32 to vector<1x1xf32>
    %917 = arith.maximumf %915, %916 : vector<1x1xf32>
    %918 = tpu.reciprocal %917 {approx = true} : vector<1x1xf32> -> vector<1x1xf32>
    %919 = vector.broadcast %918 : vector<1x1xf32> to vector<1x32xf32>
    %920 = arith.mulf %912, %919 : vector<1x32xf32>
    %c5_295 = arith.constant 5 : index
    %c0_296 = arith.constant 0 : index
    %921 = vector.load %arg8[%c5_295, %c0_296] : memref<8x32xf32, #tpu.memory_space<vmem>>, vector<1x32xf32>
    tpu.vector_store %arg8[%c5_295, %c0_296], %920 {strides = array<i32>} : memref<8x32xf32, #tpu.memory_space<vmem>>, vector<1x32xf32>,
    %922 = vector.extract_strided_slice %849 {offsets = [48, 0], sizes = [8, 32], strides = [1, 1]} : vector<64x32xf32> to vector<8x32xf32>
    %cst_297 = arith.constant dense<0.000000e+00> : vector<32xf32>
    %923 = vector.multi_reduction <add>, %922, %cst_297 [0] : vector<8x32xf32> to vector<32xf32>
    %924 = vector.shape_cast %923 : vector<32xf32> to vector<1x32xf32>
    %925 = vector.extract_strided_slice %847 {offsets = [48, 0], sizes = [8, 1], strides = [1, 1]} : vector<64x1xf32> to vector<8x1xf32>
    %cst_298 = arith.constant dense<0.000000e+00> : vector<1xf32>
    %926 = vector.multi_reduction <add>, %925, %cst_298 [0] : vector<8x1xf32> to vector<1xf32>
    %927 = vector.shape_cast %926 : vector<1xf32> to vector<1x1xf32>
    %cst_299 = arith.constant 1.000000e-10 : f32
    %928 = vector.broadcast %cst_299 : f32 to vector<1x1xf32>
    %929 = arith.maximumf %927, %928 : vector<1x1xf32>
    %930 = tpu.reciprocal %929 {approx = true} : vector<1x1xf32> -> vector<1x1xf32>
    %931 = vector.broadcast %930 : vector<1x1xf32> to vector<1x32xf32>
    %932 = arith.mulf %924, %931 : vector<1x32xf32>
    %c6_300 = arith.constant 6 : index
    %c0_301 = arith.constant 0 : index
    %933 = vector.load %arg8[%c6_300, %c0_301] : memref<8x32xf32, #tpu.memory_space<vmem>>, vector<1x32xf32>
    tpu.vector_store %arg8[%c6_300, %c0_301], %932 {strides = array<i32>} : memref<8x32xf32, #tpu.memory_space<vmem>>, vector<1x32xf32>,
    %934 = vector.extract_strided_slice %849 {offsets = [56, 0], sizes = [8, 32], strides = [1, 1]} : vector<64x32xf32> to vector<8x32xf32>
    %cst_302 = arith.constant dense<0.000000e+00> : vector<32xf32>
    %935 = vector.multi_reduction <add>, %934, %cst_302 [0] : vector<8x32xf32> to vector<32xf32>
    %936 = vector.shape_cast %935 : vector<32xf32> to vector<1x32xf32>
    %937 = vector.extract_strided_slice %847 {offsets = [56, 0], sizes = [8, 1], strides = [1, 1]} : vector<64x1xf32> to vector<8x1xf32>
    %cst_303 = arith.constant dense<0.000000e+00> : vector<1xf32>
    %938 = vector.multi_reduction <add>, %937, %cst_303 [0] : vector<8x1xf32> to vector<1xf32>
    %939 = vector.shape_cast %938 : vector<1xf32> to vector<1x1xf32>
    %cst_304 = arith.constant 1.000000e-10 : f32
    %940 = vector.broadcast %cst_304 : f32 to vector<1x1xf32>
    %941 = arith.maximumf %939, %940 : vector<1x1xf32>
    %942 = tpu.reciprocal %941 {approx = true} : vector<1x1xf32> -> vector<1x1xf32>
    %943 = vector.broadcast %942 : vector<1x1xf32> to vector<1x32xf32>
    %944 = arith.mulf %936, %943 : vector<1x32xf32>
    %c7_305 = arith.constant 7 : index
    %c0_306 = arith.constant 0 : index
    %945 = vector.load %arg8[%c7_305, %c0_306] : memref<8x32xf32, #tpu.memory_space<vmem>>, vector<1x32xf32>
    tpu.vector_store %arg8[%c7_305, %c0_306], %944 {strides = array<i32>} : memref<8x32xf32, #tpu.memory_space<vmem>>, vector<1x32xf32>,
    return
  }
  func.func @transform_0(%arg0: i32) -> (i32, i32) {
    %c0_i32 = arith.constant 0 : i32
    %c0_i32_0 = arith.constant 0 : i32
    return %arg0, %c0_i32 : i32, i32
  }
  func.func @transform_1(%arg0: i32) -> (i32, i32) {
    %c0_i32 = arith.constant 0 : i32
    %c0_i32_0 = arith.constant 0 : i32
    return %arg0, %c0_i32 : i32, i32
  }
  func.func @transform_2(%arg0: i32) -> (i32, i32) {
    %c0_i32 = arith.constant 0 : i32
    %c0_i32_0 = arith.constant 0 : i32
    return %arg0, %c0_i32 : i32, i32
  }
  func.func @transform_3(%arg0: i32) -> (i32, i32) {
    %c0_i32 = arith.constant 0 : i32
    %c0_i32_0 = arith.constant 0 : i32
    %c0_i32_1 = arith.constant 0 : i32
    return %c0_i32, %c0_i32_0 : i32, i32
  }
  func.func @transform_4(%arg0: i32) -> (i32, i32) {
    %c0_i32 = arith.constant 0 : i32
    %c0_i32_0 = arith.constant 0 : i32
    %c0_i32_1 = arith.constant 0 : i32
    return %c0_i32, %c0_i32_0 : i32, i32
  }
  func.func @transform_5(%arg0: i32) -> (i32, i32) {
    %c0_i32 = arith.constant 0 : i32
    %c0_i32_0 = arith.constant 0 : i32
    %c0_i32_1 = arith.constant 0 : i32
    return %c0_i32, %c0_i32_0 : i32, i32
  }
  func.func @transform_6(%arg0: i32) -> (i32, i32) {
    %c0_i32 = arith.constant 0 : i32
    %c0_i32_0 = arith.constant 0 : i32
    return %arg0, %c0_i32 : i32, i32
  }
  func.func @transform_7(%arg0: i32) -> (i32, i32) {
    %c0_i32 = arith.constant 0 : i32
    %c0_i32_0 = arith.constant 0 : i32
    return %arg0, %c0_i32 : i32, i32
  }
}

module attributes {stable_mosaic.version = 11 : i64} {
  func.func @_res_swiglu_kernel(%arg0: i32, %arg1: memref<64x32xf32, #tpu.memory_space<vmem>>, %arg2: memref<8x32xf32, #tpu.memory_space<vmem>>, %arg3: memref<1x32xf32, #tpu.memory_space<vmem>>, %arg4: memref<32x128xbf16, #tpu.memory_space<vmem>>, %arg5: memref<64x32xbf16, #tpu.memory_space<vmem>>, %arg6: memref<64x32xf32, #tpu.memory_space<vmem>>, %arg7: memref<64x32xf32, #tpu.memory_space<vmem>>) attributes {dimension_semantics = [#tpu.dimension_semantics<parallel>], iteration_bounds = array<i64: 2>, scalar_prefetch = 0 : i64, scratch_operands = 1 : i64, tpu.core_type = #tpu.core_type<tc>, window_params = [{transform_indices = @transform_0, window_bounds = array<i64: 64, 32>}, {transform_indices = @transform_1, window_bounds = array<i64: 8, 32>}, {pipeline_mode = #tpu.pipeline_mode<synchronous>, transform_indices = @transform_2, window_bounds = array<i64: 1, 32>}, {pipeline_mode = #tpu.pipeline_mode<synchronous>, transform_indices = @transform_3, window_bounds = array<i64: 32, 128>}, {pipeline_mode = #tpu.pipeline_mode<synchronous>, transform_indices = @transform_4, window_bounds = array<i64: 64, 32>}, {transform_indices = @transform_5, window_bounds = array<i64: 64, 32>}]} {
    %c0 = arith.constant 0 : index
    %c0_0 = arith.constant 0 : index
    %0 = vector.load %arg1[%c0, %c0_0] : memref<64x32xf32, #tpu.memory_space<vmem>>, vector<64x32xf32>
    %1 = vector.extract_strided_slice %0 {offsets = [0, 0], sizes = [8, 32], strides = [1, 1]} : vector<64x32xf32> to vector<8x32xf32>
    %c0_1 = arith.constant 0 : index
    %c0_2 = arith.constant 0 : index
    %2 = vector.load %arg2[%c0_1, %c0_2] : memref<8x32xf32, #tpu.memory_space<vmem>>, vector<1x32xf32>
    %3 = vector.broadcast %2 : vector<1x32xf32> to vector<8x32xf32>
    %4 = arith.addf %1, %3 : vector<8x32xf32>
    %c0_3 = arith.constant 0 : index
    %c0_4 = arith.constant 0 : index
    %5 = vector.load %arg7[%c0_3, %c0_4] : memref<64x32xf32, #tpu.memory_space<vmem>>, vector<8x32xf32>
    tpu.vector_store %arg7[%c0_3, %c0_4], %4 {strides = array<i32>} : memref<64x32xf32, #tpu.memory_space<vmem>>, vector<8x32xf32>,
    %6 = vector.extract_strided_slice %0 {offsets = [8, 0], sizes = [8, 32], strides = [1, 1]} : vector<64x32xf32> to vector<8x32xf32>
    %c1 = arith.constant 1 : index
    %c0_5 = arith.constant 0 : index
    %7 = vector.load %arg2[%c1, %c0_5] : memref<8x32xf32, #tpu.memory_space<vmem>>, vector<1x32xf32>
    %8 = vector.broadcast %7 : vector<1x32xf32> to vector<8x32xf32>
    %9 = arith.addf %6, %8 : vector<8x32xf32>
    %c8 = arith.constant 8 : index
    %c0_6 = arith.constant 0 : index
    %10 = vector.load %arg7[%c8, %c0_6] : memref<64x32xf32, #tpu.memory_space<vmem>>, vector<8x32xf32>
    tpu.vector_store %arg7[%c8, %c0_6], %9 {strides = array<i32>} : memref<64x32xf32, #tpu.memory_space<vmem>>, vector<8x32xf32>,
    %11 = vector.extract_strided_slice %0 {offsets = [16, 0], sizes = [8, 32], strides = [1, 1]} : vector<64x32xf32> to vector<8x32xf32>
    %c2 = arith.constant 2 : index
    %c0_7 = arith.constant 0 : index
    %12 = vector.load %arg2[%c2, %c0_7] : memref<8x32xf32, #tpu.memory_space<vmem>>, vector<1x32xf32>
    %13 = vector.broadcast %12 : vector<1x32xf32> to vector<8x32xf32>
    %14 = arith.addf %11, %13 : vector<8x32xf32>
    %c16 = arith.constant 16 : index
    %c0_8 = arith.constant 0 : index
    %15 = vector.load %arg7[%c16, %c0_8] : memref<64x32xf32, #tpu.memory_space<vmem>>, vector<8x32xf32>
    tpu.vector_store %arg7[%c16, %c0_8], %14 {strides = array<i32>} : memref<64x32xf32, #tpu.memory_space<vmem>>, vector<8x32xf32>,
    %16 = vector.extract_strided_slice %0 {offsets = [24, 0], sizes = [8, 32], strides = [1, 1]} : vector<64x32xf32> to vector<8x32xf32>
    %c3 = arith.constant 3 : index
    %c0_9 = arith.constant 0 : index
    %17 = vector.load %arg2[%c3, %c0_9] : memref<8x32xf32, #tpu.memory_space<vmem>>, vector<1x32xf32>
    %18 = vector.broadcast %17 : vector<1x32xf32> to vector<8x32xf32>
    %19 = arith.addf %16, %18 : vector<8x32xf32>
    %c24 = arith.constant 24 : index
    %c0_10 = arith.constant 0 : index
    %20 = vector.load %arg7[%c24, %c0_10] : memref<64x32xf32, #tpu.memory_space<vmem>>, vector<8x32xf32>
    tpu.vector_store %arg7[%c24, %c0_10], %19 {strides = array<i32>} : memref<64x32xf32, #tpu.memory_space<vmem>>, vector<8x32xf32>,
    %21 = vector.extract_strided_slice %0 {offsets = [32, 0], sizes = [8, 32], strides = [1, 1]} : vector<64x32xf32> to vector<8x32xf32>
    %c4 = arith.constant 4 : index
    %c0_11 = arith.constant 0 : index
    %22 = vector.load %arg2[%c4, %c0_11] : memref<8x32xf32, #tpu.memory_space<vmem>>, vector<1x32xf32>
    %23 = vector.broadcast %22 : vector<1x32xf32> to vector<8x32xf32>
    %24 = arith.addf %21, %23 : vector<8x32xf32>
    %c32 = arith.constant 32 : index
    %c0_12 = arith.constant 0 : index
    %25 = vector.load %arg7[%c32, %c0_12] : memref<64x32xf32, #tpu.memory_space<vmem>>, vector<8x32xf32>
    tpu.vector_store %arg7[%c32, %c0_12], %24 {strides = array<i32>} : memref<64x32xf32, #tpu.memory_space<vmem>>, vector<8x32xf32>,
    %26 = vector.extract_strided_slice %0 {offsets = [40, 0], sizes = [8, 32], strides = [1, 1]} : vector<64x32xf32> to vector<8x32xf32>
    %c5 = arith.constant 5 : index
    %c0_13 = arith.constant 0 : index
    %27 = vector.load %arg2[%c5, %c0_13] : memref<8x32xf32, #tpu.memory_space<vmem>>, vector<1x32xf32>
    %28 = vector.broadcast %27 : vector<1x32xf32> to vector<8x32xf32>
    %29 = arith.addf %26, %28 : vector<8x32xf32>
    %c40 = arith.constant 40 : index
    %c0_14 = arith.constant 0 : index
    %30 = vector.load %arg7[%c40, %c0_14] : memref<64x32xf32, #tpu.memory_space<vmem>>, vector<8x32xf32>
    tpu.vector_store %arg7[%c40, %c0_14], %29 {strides = array<i32>} : memref<64x32xf32, #tpu.memory_space<vmem>>, vector<8x32xf32>,
    %31 = vector.extract_strided_slice %0 {offsets = [48, 0], sizes = [8, 32], strides = [1, 1]} : vector<64x32xf32> to vector<8x32xf32>
    %c6 = arith.constant 6 : index
    %c0_15 = arith.constant 0 : index
    %32 = vector.load %arg2[%c6, %c0_15] : memref<8x32xf32, #tpu.memory_space<vmem>>, vector<1x32xf32>
    %33 = vector.broadcast %32 : vector<1x32xf32> to vector<8x32xf32>
    %34 = arith.addf %31, %33 : vector<8x32xf32>
    %c48 = arith.constant 48 : index
    %c0_16 = arith.constant 0 : index
    %35 = vector.load %arg7[%c48, %c0_16] : memref<64x32xf32, #tpu.memory_space<vmem>>, vector<8x32xf32>
    tpu.vector_store %arg7[%c48, %c0_16], %34 {strides = array<i32>} : memref<64x32xf32, #tpu.memory_space<vmem>>, vector<8x32xf32>,
    %36 = vector.extract_strided_slice %0 {offsets = [56, 0], sizes = [8, 32], strides = [1, 1]} : vector<64x32xf32> to vector<8x32xf32>
    %c7 = arith.constant 7 : index
    %c0_17 = arith.constant 0 : index
    %37 = vector.load %arg2[%c7, %c0_17] : memref<8x32xf32, #tpu.memory_space<vmem>>, vector<1x32xf32>
    %38 = vector.broadcast %37 : vector<1x32xf32> to vector<8x32xf32>
    %39 = arith.addf %36, %38 : vector<8x32xf32>
    %c56 = arith.constant 56 : index
    %c0_18 = arith.constant 0 : index
    %40 = vector.load %arg7[%c56, %c0_18] : memref<64x32xf32, #tpu.memory_space<vmem>>, vector<8x32xf32>
    tpu.vector_store %arg7[%c56, %c0_18], %39 {strides = array<i32>} : memref<64x32xf32, #tpu.memory_space<vmem>>, vector<8x32xf32>,
    %c0_19 = arith.constant 0 : index
    %c0_20 = arith.constant 0 : index
    %41 = vector.load %arg7[%c0_19, %c0_20] : memref<64x32xf32, #tpu.memory_space<vmem>>, vector<64x32xf32>
    %c0_21 = arith.constant 0 : index
    %c0_22 = arith.constant 0 : index
    %42 = vector.load %arg3[%c0_21, %c0_22] : memref<1x32xf32, #tpu.memory_space<vmem>>, vector<1x32xf32>
    %43 = arith.mulf %41, %41 : vector<64x32xf32>
    %cst = arith.constant dense<0.000000e+00> : vector<64xf32>
    %44 = vector.multi_reduction <add>, %43, %cst [1] : vector<64x32xf32> to vector<64xf32>
    %45 = vector.shape_cast %44 : vector<64xf32> to vector<64x1xf32>
    %cst_23 = arith.constant 3.200000e+01 : f32
    %46 = vector.broadcast %cst_23 : f32 to vector<64x1xf32>
    %47 = arith.divf %45, %46 : vector<64x1xf32>
    %cst_24 = arith.constant 9.99999997E-7 : f32
    %48 = vector.broadcast %cst_24 : f32 to vector<64x1xf32>
    %49 = arith.addf %47, %48 : vector<64x1xf32>
    %50 = math.rsqrt %49 : vector<64x1xf32>
    %51 = vector.broadcast %50 : vector<64x1xf32> to vector<64x32xf32>
    %52 = arith.mulf %41, %51 : vector<64x32xf32>
    %53 = vector.broadcast %42 : vector<1x32xf32> to vector<64x32xf32>
    %54 = arith.mulf %52, %53 : vector<64x32xf32>
    %55 = arith.truncf %54 : vector<64x32xf32> to vector<64x32xbf16>
    %c0_25 = arith.constant 0 : index
    %c0_26 = arith.constant 0 : index
    %56 = vector.load %arg4[%c0_25, %c0_26] : memref<32x128xbf16, #tpu.memory_space<vmem>>, vector<32x64xbf16>
    %cst_27 = arith.constant dense<0.000000e+00> : vector<64x64xf32>
    %57 = tpu.matmul %55, %56, %cst_27 {dimension_numbers = #tpu.dot_dimension_numbers<[1], [0], [0], [1], [0, 0, 1, 1], [], []>} : vector<64x32xbf16>, vector<32x64xbf16>, vector<64x64xf32> -> vector<64x64xf32>
    %c0_28 = arith.constant 0 : index
    %c64 = arith.constant 64 : index
    %58 = vector.load %arg4[%c0_28, %c64] : memref<32x128xbf16, #tpu.memory_space<vmem>>, vector<32x64xbf16>
    %cst_29 = arith.constant dense<0.000000e+00> : vector<64x64xf32>
    %59 = tpu.matmul %55, %58, %cst_29 {dimension_numbers = #tpu.dot_dimension_numbers<[1], [0], [0], [1], [0, 0, 1, 1], [], []>} : vector<64x32xbf16>, vector<32x64xbf16>, vector<64x64xf32> -> vector<64x64xf32>
    %60 = arith.negf %57 : vector<64x64xf32>
    %61 = math.exp %60 : vector<64x64xf32>
    %cst_30 = arith.constant 1.000000e+00 : f32
    %62 = vector.broadcast %cst_30 : f32 to vector<64x64xf32>
    %63 = arith.addf %62, %61 : vector<64x64xf32>
    %64 = arith.divf %62, %63 : vector<64x64xf32>
    %65 = arith.mulf %57, %64 : vector<64x64xf32>
    %66 = arith.mulf %65, %59 : vector<64x64xf32>
    %67 = arith.truncf %66 : vector<64x64xf32> to vector<64x64xbf16>
    %c0_31 = arith.constant 0 : index
    %c0_32 = arith.constant 0 : index
    %68 = vector.load %arg5[%c0_31, %c0_32] : memref<64x32xbf16, #tpu.memory_space<vmem>>, vector<64x32xbf16>
    %cst_33 = arith.constant dense<0.000000e+00> : vector<64x32xf32>
    %69 = tpu.matmul %67, %68, %cst_33 {dimension_numbers = #tpu.dot_dimension_numbers<[1], [0], [0], [1], [0, 0, 1, 1], [], []>} : vector<64x64xbf16>, vector<64x32xbf16>, vector<64x32xf32> -> vector<64x32xf32>
    %70 = arith.addf %41, %69 : vector<64x32xf32>
    %c0_34 = arith.constant 0 : index
    %c0_35 = arith.constant 0 : index
    %71 = vector.load %arg6[%c0_34, %c0_35] : memref<64x32xf32, #tpu.memory_space<vmem>>, vector<64x32xf32>
    tpu.vector_store %arg6[%c0_34, %c0_35], %70 {strides = array<i32>} : memref<64x32xf32, #tpu.memory_space<vmem>>, vector<64x32xf32>,
    return
  }
  func.func @transform_0(%arg0: i32) -> (i32, i32) {
    %c0_i32 = arith.constant 0 : i32
    %c0_i32_0 = arith.constant 0 : i32
    return %arg0, %c0_i32 : i32, i32
  }
  func.func @transform_1(%arg0: i32) -> (i32, i32) {
    %c0_i32 = arith.constant 0 : i32
    %c0_i32_0 = arith.constant 0 : i32
    return %arg0, %c0_i32 : i32, i32
  }
  func.func @transform_2(%arg0: i32) -> (i32, i32) {
    %c0_i32 = arith.constant 0 : i32
    %c0_i32_0 = arith.constant 0 : i32
    %c0_i32_1 = arith.constant 0 : i32
    return %c0_i32, %c0_i32_0 : i32, i32
  }
  func.func @transform_3(%arg0: i32) -> (i32, i32) {
    %c0_i32 = arith.constant 0 : i32
    %c0_i32_0 = arith.constant 0 : i32
    %c0_i32_1 = arith.constant 0 : i32
    return %c0_i32, %c0_i32_0 : i32, i32
  }
  func.func @transform_4(%arg0: i32) -> (i32, i32) {
    %c0_i32 = arith.constant 0 : i32
    %c0_i32_0 = arith.constant 0 : i32
    %c0_i32_1 = arith.constant 0 : i32
    return %c0_i32, %c0_i32_0 : i32, i32
  }
  func.func @transform_5(%arg0: i32) -> (i32, i32) {
    %c0_i32 = arith.constant 0 : i32
    %c0_i32_0 = arith.constant 0 : i32
    return %arg0, %c0_i32 : i32, i32
  }
}

module attributes {stable_mosaic.version = 11 : i64} {
  func.func @_row_attn_kernel(%arg0: i32, %arg1: memref<1x8x32xf32, #tpu.memory_space<vmem>>, %arg2: memref<1x1x8xf32, #tpu.memory_space<vmem>>, %arg3: memref<1x32xf32, #tpu.memory_space<vmem>>, %arg4: memref<32x96xbf16, #tpu.memory_space<vmem>>, %arg5: memref<32x32xbf16, #tpu.memory_space<vmem>>, %arg6: memref<1x8x32xf32, #tpu.memory_space<vmem>>, %arg7: memref<8x32xf32, #tpu.memory_space<vmem>>) attributes {dimension_semantics = [#tpu.dimension_semantics<parallel>], iteration_bounds = array<i64: 2>, scalar_prefetch = 0 : i64, scratch_operands = 1 : i64, tpu.core_type = #tpu.core_type<tc>, window_params = [{transform_indices = @transform_0, window_bounds = array<i64: 1, 8, 32>}, {transform_indices = @transform_1, window_bounds = array<i64: 1, 1, 8>}, {pipeline_mode = #tpu.pipeline_mode<synchronous>, transform_indices = @transform_2, window_bounds = array<i64: 1, 32>}, {pipeline_mode = #tpu.pipeline_mode<synchronous>, transform_indices = @transform_3, window_bounds = array<i64: 32, 96>}, {pipeline_mode = #tpu.pipeline_mode<synchronous>, transform_indices = @transform_4, window_bounds = array<i64: 32, 32>}, {transform_indices = @transform_5, window_bounds = array<i64: 1, 8, 32>}]} {
    %c0 = arith.constant 0 : index
    %c0_0 = arith.constant 0 : index
    %c0_1 = arith.constant 0 : index
    %0 = vector.load %arg1[%c0, %c0_0, %c0_1] : memref<1x8x32xf32, #tpu.memory_space<vmem>>, vector<1x8x32xf32>
    %1 = vector.shape_cast %0 : vector<1x8x32xf32> to vector<8x32xf32>
    %c0_2 = arith.constant 0 : index
    %c0_3 = arith.constant 0 : index
    %2 = vector.load %arg3[%c0_2, %c0_3] : memref<1x32xf32, #tpu.memory_space<vmem>>, vector<1x32xf32>
    %3 = arith.mulf %1, %1 : vector<8x32xf32>
    %cst = arith.constant dense<0.000000e+00> : vector<8xf32>
    %4 = vector.multi_reduction <add>, %3, %cst [1] : vector<8x32xf32> to vector<8xf32>
    %5 = vector.shape_cast %4 : vector<8xf32> to vector<8x1xf32>
    %cst_4 = arith.constant 3.200000e+01 : f32
    %6 = vector.broadcast %cst_4 : f32 to vector<8x1xf32>
    %7 = arith.divf %5, %6 : vector<8x1xf32>
    %cst_5 = arith.constant 9.99999997E-7 : f32
    %8 = vector.broadcast %cst_5 : f32 to vector<8x1xf32>
    %9 = arith.addf %7, %8 : vector<8x1xf32>
    %10 = math.rsqrt %9 : vector<8x1xf32>
    %11 = vector.broadcast %10 : vector<8x1xf32> to vector<8x32xf32>
    %12 = arith.mulf %1, %11 : vector<8x32xf32>
    %13 = vector.broadcast %2 : vector<1x32xf32> to vector<8x32xf32>
    %14 = arith.mulf %12, %13 : vector<8x32xf32>
    %15 = arith.truncf %14 : vector<8x32xf32> to vector<8x32xbf16>
    %c0_6 = arith.constant 0 : index
    %c0_7 = arith.constant 0 : index
    %16 = vector.load %arg4[%c0_6, %c0_7] : memref<32x96xbf16, #tpu.memory_space<vmem>>, vector<32x96xbf16>
    %cst_8 = arith.constant dense<0.000000e+00> : vector<8x96xf32>
    %17 = tpu.matmul %15, %16, %cst_8 {dimension_numbers = #tpu.dot_dimension_numbers<[1], [0], [0], [1], [0, 0, 1, 1], [], []>} : vector<8x32xbf16>, vector<32x96xbf16>, vector<8x96xf32> -> vector<8x96xf32>
    %c0_9 = arith.constant 0 : index
    %c0_10 = arith.constant 0 : index
    %c0_11 = arith.constant 0 : index
    %18 = vector.load %arg2[%c0_9, %c0_10, %c0_11] : memref<1x1x8xf32, #tpu.memory_space<vmem>>, vector<1x1x8xf32>
    %19 = vector.shape_cast %18 : vector<1x1x8xf32> to vector<1x8xf32>
    %20 = vector.extract_strided_slice %17 {offsets = [0, 0], sizes = [8, 8], strides = [1, 1]} : vector<8x96xf32> to vector<8x8xf32>
    %21 = arith.truncf %20 : vector<8x8xf32> to vector<8x8xbf16>
    %22 = vector.extract_strided_slice %17 {offsets = [0, 32], sizes = [8, 8], strides = [1, 1]} : vector<8x96xf32> to vector<8x8xf32>
    %23 = arith.truncf %22 : vector<8x8xf32> to vector<8x8xbf16>
    %24 = vector.extract_strided_slice %17 {offsets = [0, 64], sizes = [8, 8], strides = [1, 1]} : vector<8x96xf32> to vector<8x8xf32>
    %25 = arith.truncf %24 : vector<8x8xf32> to vector<8x8xbf16>
    %cst_12 = arith.constant dense<0.000000e+00> : vector<8x8xf32>
    %26 = tpu.matmul %21, %23, %cst_12 {dimension_numbers = #tpu.dot_dimension_numbers<[1], [1], [0], [0], [0, 0, 1, 0], [], []>} : vector<8x8xbf16>, vector<8x8xbf16>, vector<8x8xf32> -> vector<8x8xf32>
    %cst_13 = arith.constant 0.353553385 : f32
    %27 = vector.broadcast %cst_13 : f32 to vector<8x8xf32>
    %28 = arith.mulf %26, %27 : vector<8x8xf32>
    %29 = vector.broadcast %19 : vector<1x8xf32> to vector<8x8xf32>
    %30 = arith.addf %28, %29 : vector<8x8xf32>
    %cst_14 = arith.constant dense<0xFF800000> : vector<8xf32>
    %31 = vector.multi_reduction <maximumf>, %30, %cst_14 [1] : vector<8x8xf32> to vector<8xf32>
    %32 = vector.shape_cast %31 : vector<8xf32> to vector<8x1xf32>
    %33 = vector.broadcast %32 : vector<8x1xf32> to vector<8x8xf32>
    %34 = arith.subf %30, %33 : vector<8x8xf32>
    %35 = math.exp %34 : vector<8x8xf32>
    %cst_15 = arith.constant dense<0.000000e+00> : vector<8xf32>
    %36 = vector.multi_reduction <add>, %35, %cst_15 [1] : vector<8x8xf32> to vector<8xf32>
    %37 = vector.shape_cast %36 : vector<8xf32> to vector<8x1xf32>
    %38 = tpu.reciprocal %37 {approx = true} : vector<8x1xf32> -> vector<8x1xf32>
    %39 = vector.broadcast %38 : vector<8x1xf32> to vector<8x8xf32>
    %40 = arith.mulf %35, %39 : vector<8x8xf32>
    %41 = arith.truncf %40 : vector<8x8xf32> to vector<8x8xbf16>
    %cst_16 = arith.constant dense<0.000000e+00> : vector<8x8xf32>
    %42 = tpu.matmul %41, %25, %cst_16 {dimension_numbers = #tpu.dot_dimension_numbers<[1], [0], [0], [1], [0, 0, 1, 1], [], []>} : vector<8x8xbf16>, vector<8x8xbf16>, vector<8x8xf32> -> vector<8x8xf32>
    %c0_17 = arith.constant 0 : index
    %c0_18 = arith.constant 0 : index
    %43 = vector.load %arg7[%c0_17, %c0_18] : memref<8x32xf32, #tpu.memory_space<vmem>>, vector<8x8xf32>
    tpu.vector_store %arg7[%c0_17, %c0_18], %42 {strides = array<i32>} : memref<8x32xf32, #tpu.memory_space<vmem>>, vector<8x8xf32>,
    %44 = vector.extract_strided_slice %17 {offsets = [0, 8], sizes = [8, 8], strides = [1, 1]} : vector<8x96xf32> to vector<8x8xf32>
    %45 = arith.truncf %44 : vector<8x8xf32> to vector<8x8xbf16>
    %46 = vector.extract_strided_slice %17 {offsets = [0, 40], sizes = [8, 8], strides = [1, 1]} : vector<8x96xf32> to vector<8x8xf32>
    %47 = arith.truncf %46 : vector<8x8xf32> to vector<8x8xbf16>
    %48 = vector.extract_strided_slice %17 {offsets = [0, 72], sizes = [8, 8], strides = [1, 1]} : vector<8x96xf32> to vector<8x8xf32>
    %49 = arith.truncf %48 : vector<8x8xf32> to vector<8x8xbf16>
    %cst_19 = arith.constant dense<0.000000e+00> : vector<8x8xf32>
    %50 = tpu.matmul %45, %47, %cst_19 {dimension_numbers = #tpu.dot_dimension_numbers<[1], [1], [0], [0], [0, 0, 1, 0], [], []>} : vector<8x8xbf16>, vector<8x8xbf16>, vector<8x8xf32> -> vector<8x8xf32>
    %cst_20 = arith.constant 0.353553385 : f32
    %51 = vector.broadcast %cst_20 : f32 to vector<8x8xf32>
    %52 = arith.mulf %50, %51 : vector<8x8xf32>
    %53 = vector.broadcast %19 : vector<1x8xf32> to vector<8x8xf32>
    %54 = arith.addf %52, %53 : vector<8x8xf32>
    %cst_21 = arith.constant dense<0xFF800000> : vector<8xf32>
    %55 = vector.multi_reduction <maximumf>, %54, %cst_21 [1] : vector<8x8xf32> to vector<8xf32>
    %56 = vector.shape_cast %55 : vector<8xf32> to vector<8x1xf32>
    %57 = vector.broadcast %56 : vector<8x1xf32> to vector<8x8xf32>
    %58 = arith.subf %54, %57 : vector<8x8xf32>
    %59 = math.exp %58 : vector<8x8xf32>
    %cst_22 = arith.constant dense<0.000000e+00> : vector<8xf32>
    %60 = vector.multi_reduction <add>, %59, %cst_22 [1] : vector<8x8xf32> to vector<8xf32>
    %61 = vector.shape_cast %60 : vector<8xf32> to vector<8x1xf32>
    %62 = tpu.reciprocal %61 {approx = true} : vector<8x1xf32> -> vector<8x1xf32>
    %63 = vector.broadcast %62 : vector<8x1xf32> to vector<8x8xf32>
    %64 = arith.mulf %59, %63 : vector<8x8xf32>
    %65 = arith.truncf %64 : vector<8x8xf32> to vector<8x8xbf16>
    %cst_23 = arith.constant dense<0.000000e+00> : vector<8x8xf32>
    %66 = tpu.matmul %65, %49, %cst_23 {dimension_numbers = #tpu.dot_dimension_numbers<[1], [0], [0], [1], [0, 0, 1, 1], [], []>} : vector<8x8xbf16>, vector<8x8xbf16>, vector<8x8xf32> -> vector<8x8xf32>
    %c0_24 = arith.constant 0 : index
    %c8 = arith.constant 8 : index
    %67 = vector.load %arg7[%c0_24, %c8] : memref<8x32xf32, #tpu.memory_space<vmem>>, vector<8x8xf32>
    tpu.vector_store %arg7[%c0_24, %c8], %66 {strides = array<i32>} : memref<8x32xf32, #tpu.memory_space<vmem>>, vector<8x8xf32>,
    %68 = vector.extract_strided_slice %17 {offsets = [0, 16], sizes = [8, 8], strides = [1, 1]} : vector<8x96xf32> to vector<8x8xf32>
    %69 = arith.truncf %68 : vector<8x8xf32> to vector<8x8xbf16>
    %70 = vector.extract_strided_slice %17 {offsets = [0, 48], sizes = [8, 8], strides = [1, 1]} : vector<8x96xf32> to vector<8x8xf32>
    %71 = arith.truncf %70 : vector<8x8xf32> to vector<8x8xbf16>
    %72 = vector.extract_strided_slice %17 {offsets = [0, 80], sizes = [8, 8], strides = [1, 1]} : vector<8x96xf32> to vector<8x8xf32>
    %73 = arith.truncf %72 : vector<8x8xf32> to vector<8x8xbf16>
    %cst_25 = arith.constant dense<0.000000e+00> : vector<8x8xf32>
    %74 = tpu.matmul %69, %71, %cst_25 {dimension_numbers = #tpu.dot_dimension_numbers<[1], [1], [0], [0], [0, 0, 1, 0], [], []>} : vector<8x8xbf16>, vector<8x8xbf16>, vector<8x8xf32> -> vector<8x8xf32>
    %cst_26 = arith.constant 0.353553385 : f32
    %75 = vector.broadcast %cst_26 : f32 to vector<8x8xf32>
    %76 = arith.mulf %74, %75 : vector<8x8xf32>
    %77 = vector.broadcast %19 : vector<1x8xf32> to vector<8x8xf32>
    %78 = arith.addf %76, %77 : vector<8x8xf32>
    %cst_27 = arith.constant dense<0xFF800000> : vector<8xf32>
    %79 = vector.multi_reduction <maximumf>, %78, %cst_27 [1] : vector<8x8xf32> to vector<8xf32>
    %80 = vector.shape_cast %79 : vector<8xf32> to vector<8x1xf32>
    %81 = vector.broadcast %80 : vector<8x1xf32> to vector<8x8xf32>
    %82 = arith.subf %78, %81 : vector<8x8xf32>
    %83 = math.exp %82 : vector<8x8xf32>
    %cst_28 = arith.constant dense<0.000000e+00> : vector<8xf32>
    %84 = vector.multi_reduction <add>, %83, %cst_28 [1] : vector<8x8xf32> to vector<8xf32>
    %85 = vector.shape_cast %84 : vector<8xf32> to vector<8x1xf32>
    %86 = tpu.reciprocal %85 {approx = true} : vector<8x1xf32> -> vector<8x1xf32>
    %87 = vector.broadcast %86 : vector<8x1xf32> to vector<8x8xf32>
    %88 = arith.mulf %83, %87 : vector<8x8xf32>
    %89 = arith.truncf %88 : vector<8x8xf32> to vector<8x8xbf16>
    %cst_29 = arith.constant dense<0.000000e+00> : vector<8x8xf32>
    %90 = tpu.matmul %89, %73, %cst_29 {dimension_numbers = #tpu.dot_dimension_numbers<[1], [0], [0], [1], [0, 0, 1, 1], [], []>} : vector<8x8xbf16>, vector<8x8xbf16>, vector<8x8xf32> -> vector<8x8xf32>
    %c0_30 = arith.constant 0 : index
    %c16 = arith.constant 16 : index
    %91 = vector.load %arg7[%c0_30, %c16] : memref<8x32xf32, #tpu.memory_space<vmem>>, vector<8x8xf32>
    tpu.vector_store %arg7[%c0_30, %c16], %90 {strides = array<i32>} : memref<8x32xf32, #tpu.memory_space<vmem>>, vector<8x8xf32>,
    %92 = vector.extract_strided_slice %17 {offsets = [0, 24], sizes = [8, 8], strides = [1, 1]} : vector<8x96xf32> to vector<8x8xf32>
    %93 = arith.truncf %92 : vector<8x8xf32> to vector<8x8xbf16>
    %94 = vector.extract_strided_slice %17 {offsets = [0, 56], sizes = [8, 8], strides = [1, 1]} : vector<8x96xf32> to vector<8x8xf32>
    %95 = arith.truncf %94 : vector<8x8xf32> to vector<8x8xbf16>
    %96 = vector.extract_strided_slice %17 {offsets = [0, 88], sizes = [8, 8], strides = [1, 1]} : vector<8x96xf32> to vector<8x8xf32>
    %97 = arith.truncf %96 : vector<8x8xf32> to vector<8x8xbf16>
    %cst_31 = arith.constant dense<0.000000e+00> : vector<8x8xf32>
    %98 = tpu.matmul %93, %95, %cst_31 {dimension_numbers = #tpu.dot_dimension_numbers<[1], [1], [0], [0], [0, 0, 1, 0], [], []>} : vector<8x8xbf16>, vector<8x8xbf16>, vector<8x8xf32> -> vector<8x8xf32>
    %cst_32 = arith.constant 0.353553385 : f32
    %99 = vector.broadcast %cst_32 : f32 to vector<8x8xf32>
    %100 = arith.mulf %98, %99 : vector<8x8xf32>
    %101 = vector.broadcast %19 : vector<1x8xf32> to vector<8x8xf32>
    %102 = arith.addf %100, %101 : vector<8x8xf32>
    %cst_33 = arith.constant dense<0xFF800000> : vector<8xf32>
    %103 = vector.multi_reduction <maximumf>, %102, %cst_33 [1] : vector<8x8xf32> to vector<8xf32>
    %104 = vector.shape_cast %103 : vector<8xf32> to vector<8x1xf32>
    %105 = vector.broadcast %104 : vector<8x1xf32> to vector<8x8xf32>
    %106 = arith.subf %102, %105 : vector<8x8xf32>
    %107 = math.exp %106 : vector<8x8xf32>
    %cst_34 = arith.constant dense<0.000000e+00> : vector<8xf32>
    %108 = vector.multi_reduction <add>, %107, %cst_34 [1] : vector<8x8xf32> to vector<8xf32>
    %109 = vector.shape_cast %108 : vector<8xf32> to vector<8x1xf32>
    %110 = tpu.reciprocal %109 {approx = true} : vector<8x1xf32> -> vector<8x1xf32>
    %111 = vector.broadcast %110 : vector<8x1xf32> to vector<8x8xf32>
    %112 = arith.mulf %107, %111 : vector<8x8xf32>
    %113 = arith.truncf %112 : vector<8x8xf32> to vector<8x8xbf16>
    %cst_35 = arith.constant dense<0.000000e+00> : vector<8x8xf32>
    %114 = tpu.matmul %113, %97, %cst_35 {dimension_numbers = #tpu.dot_dimension_numbers<[1], [0], [0], [1], [0, 0, 1, 1], [], []>} : vector<8x8xbf16>, vector<8x8xbf16>, vector<8x8xf32> -> vector<8x8xf32>
    %c0_36 = arith.constant 0 : index
    %c24 = arith.constant 24 : index
    %115 = vector.load %arg7[%c0_36, %c24] : memref<8x32xf32, #tpu.memory_space<vmem>>, vector<8x8xf32>
    tpu.vector_store %arg7[%c0_36, %c24], %114 {strides = array<i32>} : memref<8x32xf32, #tpu.memory_space<vmem>>, vector<8x8xf32>,
    %c0_37 = arith.constant 0 : index
    %c0_38 = arith.constant 0 : index
    %116 = vector.load %arg7[%c0_37, %c0_38] : memref<8x32xf32, #tpu.memory_space<vmem>>, vector<8x32xf32>
    %117 = arith.truncf %116 : vector<8x32xf32> to vector<8x32xbf16>
    %c0_39 = arith.constant 0 : index
    %c0_40 = arith.constant 0 : index
    %118 = vector.load %arg5[%c0_39, %c0_40] : memref<32x32xbf16, #tpu.memory_space<vmem>>, vector<32x32xbf16>
    %cst_41 = arith.constant dense<0.000000e+00> : vector<8x32xf32>
    %119 = tpu.matmul %117, %118, %cst_41 {dimension_numbers = #tpu.dot_dimension_numbers<[1], [0], [0], [1], [0, 0, 1, 1], [], []>} : vector<8x32xbf16>, vector<32x32xbf16>, vector<8x32xf32> -> vector<8x32xf32>
    %c0_42 = arith.constant 0 : index
    %c0_43 = arith.constant 0 : index
    %c0_44 = arith.constant 0 : index
    %120 = vector.load %arg6[%c0_42, %c0_43, %c0_44] : memref<1x8x32xf32, #tpu.memory_space<vmem>>, vector<1x8x32xf32>
    %121 = vector.shape_cast %120 : vector<1x8x32xf32> to vector<8x32xf32>
    %122 = vector.shape_cast %119 : vector<8x32xf32> to vector<1x8x32xf32>
    tpu.vector_store %arg6[%c0_42, %c0_43, %c0_44], %122 {strides = array<i32>} : memref<1x8x32xf32, #tpu.memory_space<vmem>>, vector<1x8x32xf32>,
    return
  }
  func.func @transform_0(%arg0: i32) -> (i32, i32, i32) {
    %c0_i32 = arith.constant 0 : i32
    %c0_i32_0 = arith.constant 0 : i32
    %c0_i32_1 = arith.constant 0 : i32
    return %arg0, %c0_i32, %c0_i32_0 : i32, i32, i32
  }
  func.func @transform_1(%arg0: i32) -> (i32, i32, i32) {
    %c0_i32 = arith.constant 0 : i32
    %c0_i32_0 = arith.constant 0 : i32
    %c0_i32_1 = arith.constant 0 : i32
    return %arg0, %c0_i32, %c0_i32_0 : i32, i32, i32
  }
  func.func @transform_2(%arg0: i32) -> (i32, i32) {
    %c0_i32 = arith.constant 0 : i32
    %c0_i32_0 = arith.constant 0 : i32
    %c0_i32_1 = arith.constant 0 : i32
    return %c0_i32, %c0_i32_0 : i32, i32
  }
  func.func @transform_3(%arg0: i32) -> (i32, i32) {
    %c0_i32 = arith.constant 0 : i32
    %c0_i32_0 = arith.constant 0 : i32
    %c0_i32_1 = arith.constant 0 : i32
    return %c0_i32, %c0_i32_0 : i32, i32
  }
  func.func @transform_4(%arg0: i32) -> (i32, i32) {
    %c0_i32 = arith.constant 0 : i32
    %c0_i32_0 = arith.constant 0 : i32
    %c0_i32_1 = arith.constant 0 : i32
    return %c0_i32, %c0_i32_0 : i32, i32
  }
  func.func @transform_5(%arg0: i32) -> (i32, i32, i32) {
    %c0_i32 = arith.constant 0 : i32
    %c0_i32_0 = arith.constant 0 : i32
    %c0_i32_1 = arith.constant 0 : i32
    return %arg0, %c0_i32, %c0_i32_0 : i32, i32, i32
  }
}

</mosaic_0001>

<bundles_post_ra>
// kernel: usm_block_forward.5
= control target key start
LH: loop header
LB: loop body
LE: loop exit
PB: predicated region body
PF: predicated region fallthrough
CT: control target
= control target key end

     0   :  { %s1051_s18 = smov 0   ;;  %s1261_s0 = inlined_call_operand.vmem [shape: f32[128,32], index: 0, kind: input, shape index: {}, may-alias: {0,5}]   ;;  %s1262_s1 = inlined_call_operand.vmem [shape: f32[16,32], index: 1, kind: input, shape index: {}]   ;;  %s1263_s2 = inlined_call_operand.vmem [shape: f32[1,32], index: 2, kind: input, shape index: {}]   ;;  %s1264_s3 = inlined_call_operand.vmem [shape: bf16[32,128], index: 3, kind: input, shape index: {}]   ;;  %s1265_s4 = inlined_call_operand.vmem [shape: bf16[64,32], index: 4, kind: input, shape index: {}]   ;;  %s1266_s5 = inlined_call_operand.vmem [shape: f32[128,32], index: 5, kind: output, shape index: {}, may-alias: {0,5}]  }
   0x1 LB: > { %s876_s19 = sadd.s32 4294967295, %s1017_s18   ;;  %p880_p0 = scmp.ge.s32.totalorder %s1017_s18, 1  ;;  %s1017_s18 = sphi %s1051_s18, %s15_s18  }
   0x2   : > { %p197_p1 = scmp.lt.s32.totalorder %s1017_s18, 3 }
   0x4   : > { %p198_p2 = pnand %p880_p0, %p197_p1 }
   0x5   : > { %s881_s20 = sshll.u32 (!%p198_p2), %s876_s19, 3  ;;  %p235_p3 = scmp.lt.s32.totalorder (!%p198_p2), %s876_s19, 1 }
   0x6   : > { %201 = sbr.rel (%p198_p2) target bundleno = 540 (0x21c), region = 40  ;;  %p230_p4 = scmp.lt.s32.totalorder (!%p198_p2), %s881_s20, 15 }
   0x7   : > { %s1019_s8 = smov (!%p198_p2), 64  }
   0xb   : > { %s1268_s19 = smov (!%p235_p3, %s876_s19), 1  ;;  %s1270_s20 = smov (!%p230_p4, %s881_s20), 15  ;;  %vm257_vm0 = vcmask 261120   ;;  %v933_v40 = vld [vmem:[%s1264_s3 + $0x8] sm:$0xff]  ;;  %v932_v46 = vld [vmem:[%s1264_s3] sm:$0xff]  ;;  %v1020_v50 = vmov 32.0  }
   0xc   : > { %s883_s21 = sshll.u32 %s1268_s19, 3  ;;  %s882_s22 = sshll.u32 %s1270_s20, 3  ;;  %488 = vmatpush.bf16.msra.mxu0 %v933_v40  ;;  %961 = vrcp.f32 %v1020_v50 }
   0xd   : > { %s238_s25 = scalar_lea.vmem %s1262_s1, %s883_s21  ;;  %s233_s28 = scalar_lea.vmem %s1261_s0, %s882_s22 }
   0xe   : > { %v952_v0 = vld [vmem:[%s238_s25 + $0x2] ss:$0 sm:$0xff]  ;;  %v248_v1 = vld [vmem:[%s233_s28 + $0x10] sm:$0xff]  ;;  %v953_v3 = vld [vmem:[%s238_s25] ss:$0 sm:$0xff]  ;;  %s243_s24 = scalar_lea.vmem %s1266_s5, %s882_s22 }
   0xf   : > { %v246_v2 = vld [vmem:[%s233_s28] sm:$0xff]  ;;  %v265_v4 = vadd.f32 %v952_v0, %v248_v1  ;;  %v249_v5 = vld [vmem:[%s233_s28 + $0x18] sm:$0xff]  ;;  %v247_v8 = vld [vmem:[%s233_s28 + $0x8] sm:$0xff] }
  0x10   : > { %v954_v6 = vld [vmem:[%s238_s25 + $0x3] ss:$0 sm:$0xff]  ;;  %v256_v7 = vadd.f32 %v953_v3, %v246_v2  ;;  %v955_v9 = vld [vmem:[%s238_s25 + $0x1] ss:$0 sm:$0xff]  ;;  %v956_v12 = vld [vmem:[%s238_s25 + $0x4] ss:$0 sm:$0xff]  ;;  %489 = vmatpush.bf16.msra.mxu0 %v932_v46 }
  0x11   : > { %266 = vst.msk [vmem:[#allocation2 + $0x10] sm:$0xff] %vm257_vm0, %v265_v4  ;;  %v269_v10 = vadd.f32 %v954_v6, %v249_v5  ;;  %v250_v11 = vld [vmem:[%s233_s28 + $0x20] sm:$0xff]  ;;  %v261_v13 = vadd.f32 %v955_v9, %v247_v8  ;;  %v252_v14 = vld [vmem:[%s233_s28 + $0x30] sm:$0xff]  ;;  %v251_v17 = vld [vmem:[%s233_s28 + $0x28] sm:$0xff] }
  0x12   : > { %258 = vst.msk [vmem:[#allocation2] sm:$0xff] %vm257_vm0, %v256_v7  ;;  %v957_v15 = vld [vmem:[%s238_s25 + $0x6] ss:$0 sm:$0xff]  ;;  %v273_v16 = vadd.f32 %v956_v12, %v250_v11  ;;  %v958_v18 = vld [vmem:[%s238_s25 + $0x5] ss:$0 sm:$0xff]  ;;  %v253_v20 = vld [vmem:[%s233_s28 + $0x38] sm:$0xff]  ;;  %v962_v51 = vpop.eup %961 }
  0x13   : > { %270 = vst.msk [vmem:[#allocation2 + $0x18] sm:$0xff] %vm257_vm0, %v269_v10  ;;  %v281_v19 = vadd.f32 %v957_v15, %v252_v14  ;;  %v959_v21 = vld [vmem:[%s238_s25 + $0x7] ss:$0 sm:$0xff]  ;;  %v277_v22 = vadd.f32 %v958_v18, %v251_v17  ;;  %v329_v52 = vmul.f32 32.0, %v962_v51  ;;  %vm333_vm1 = vweird.f32 %v962_v51 }
  0x14   : > { %262 = vst.msk [vmem:[#allocation2 + $0x8] sm:$0xff] %vm257_vm0, %v261_v13  ;;  %v285_v23 = vadd.f32 %v959_v21, %v253_v20 }
  0x15   : > { %274 = vst.msk [vmem:[#allocation2 + $0x20] sm:$0xff] %vm257_vm0, %v273_v16  ;;  %v330_v53 = vsub.f32 1.0, %v329_v52 }
  0x16   : > { %282 = vst.msk [vmem:[#allocation2 + $0x30] sm:$0xff] %vm257_vm0, %v281_v19 }
  0x17   : > { %278 = vst.msk [vmem:[#allocation2 + $0x28] sm:$0xff] %vm257_vm0, %v277_v22  ;;  %v331_v54 = vmul.f32 %v962_v51, %v330_v53 }
  0x18   : > { %v1077_v24 = vld [vmem:[#allocation2 + $0x10] sm:$0xff]  ;;  %286 = vst.msk [vmem:[#allocation2 + $0x38] sm:$0xff] %vm257_vm0, %v285_v23 }
  0x19   : > { %v298_v25 = vmul.f32 %v1077_v24, %v1077_v24  ;;  %v1082_v26 = vld [vmem:[#allocation2] sm:$0xff]  ;;  %v332_v55 = vadd.f32 %v962_v51, %v331_v54 }
  0x1a   : > { %v296_v27 = vmul.f32 %v1082_v26, %v1082_v26  ;;  %v1086_v28 = vld [vmem:[#allocation2 + $0x18] sm:$0xff] }
  0x1b   : > { %v310_v29 = vsel %vm257_vm0, %v298_v25, 0.0  ;;  %v1089_v30 = vld [vmem:[#allocation2 + $0x8] sm:$0xff]  ;;  %v299_v33 = vmul.f32 %v1086_v28, %v1086_v28  ;;  %v1124_v56 = vsel %vm333_vm1, %v962_v51, %v332_v55 }
  0x1c   : > { %311 = vadd.xlane.f32.xlu1 %v310_v29  ;;  %v304_v31 = vsel %vm257_vm0, %v296_v27, 0.0  ;;  %v1092_v32 = vld [vmem:[#allocation2 + $0x20] sm:$0xff]  ;;  %v297_v35 = vmul.f32 %v1089_v30, %v1089_v30 }
  0x1d   : > { %305 = vadd.xlane.f32.xlu0 %v304_v31  ;;  %v300_v34 = vmul.f32 %v1092_v32, %v1092_v32  ;;  %v313_v38 = vsel %vm257_vm0, %v299_v33, 0.0  ;;  %v1112_v43 = vld [vmem:[#allocation2 + $0x30] sm:$0xff] }
  0x1e   : > { %v1100_v36 = vld [vmem:[#allocation2 + $0x28] sm:$0xff]  ;;  %v307_v41 = vsel %vm257_vm0, %v297_v35, 0.0  ;;  %v302_v47 = vmul.f32 %v1112_v43, %v1112_v43 }
  0x1f   : > { %v316_v37 = vsel %vm257_vm0, %v300_v34, 0.0  ;;  %v301_v39 = vmul.f32 %v1100_v36, %v1100_v36  ;;  %v1110_v42 = vld [vmem:[#allocation2 + $0x38] sm:$0xff] }
  0x20   : > { %317 = vadd.xlane.f32.xlu2 %v316_v37  ;;  %v303_v45 = vmul.f32 %v1110_v42, %v1110_v42  ;;  %v322_v49 = vsel %vm257_vm0, %v302_v47, 0.0 }
  0x21   : > { %v319_v44 = vsel %vm257_vm0, %v301_v39, 0.0 }
  0x22   : > { %v325_v48 = vsel %vm257_vm0, %v303_v45, 0.0 }
  0x24   : > { %314 = vadd.xlane.f32.xlu1 %v313_v38 }
  0x25   : > { %308 = vadd.xlane.f32.xlu0 %v307_v41 }
  0x28   : > { %320 = vadd.xlane.f32.xlu2 %v319_v44 }
  0x2c   : > { %326 = vadd.xlane.f32.xlu1 %v325_v48 }
  0x2d   : > { %323 = vadd.xlane.f32.xlu0 %v322_v49 }
  0x40   : > { %513 = vrot.lane.b32.xlu2 %v933_v40, %s1019_s8  ;;  %v1158_v40 = vld [vmem:[%s1263_s2] ss:$0 sm:$0xff] }
  0x41   : > { %511 = vrot.lane.b32.xlu0 %v932_v46, %s1019_s8 }
  0x8f   : > { %v312_v57 = vpop.xlane.xlu1 %311 }
  0x90   : > { %v306_v58 = vpop.xlane.xlu0 %305  ;;  %v337_v60 = vmul.f32 %v1124_v56, %v312_v57 }
  0x91   : > { %v335_v59 = vmul.f32 %v1124_v56, %v306_v58 }
  0x92   : > { %v1128_v63 = vadd.f32 1e-06, %v337_v60 }
  0x93   : > { %v343_v61 = vadd.f32 1e-06, %v335_v59  ;;  %v318_v62 = vpop.xlane.xlu2 %317 }
  0x94   : > { %v339_v12 = vmul.f32 %v1124_v56, %v318_v62  ;;  %vm377_vm10 = vweird.f32 %v1128_v63 }
  0x95   : > { %963 = vrsqrt.f32 %v343_v61  ;;  %vm357_vm3 = vweird.f32 %v343_v61 }
  0x96   : > { %965 = vrsqrt.f32 %v1128_v63  ;;  %v1144_v20 = vadd.f32 1e-06, %v339_v12 }
  0x97   : > { %v315_v0 = vpop.xlane.xlu1 %314 }
  0x98   : > { %v338_v1 = vmul.f32 %v1124_v56, %v315_v0  ;;  %v309_v2 = vpop.xlane.xlu0 %308  ;;  %vm397_vm14 = vweird.f32 %v1144_v20 }
  0x99   : > { %v336_v3 = vmul.f32 %v1124_v56, %v309_v2 }
  0x9a   : > { %v1132_v4 = vadd.f32 1e-06, %v338_v1 }
  0x9b   : > { %v964_v5 = vpop.eup %963  ;;  %v344_v6 = vadd.f32 1e-06, %v336_v3  ;;  %v321_v7 = vpop.xlane.xlu2 %320 }
  0x9c   : > { %v352_v8 = vmul.f32 %v964_v5, %v343_v61  ;;  %967 = vrsqrt.f32 %v1132_v4  ;;  %v1136_v11 = vpop.eup %965  ;;  %v340_v16 = vmul.f32 %v1124_v56, %v321_v7  ;;  %vm358_vm2 = vweird.f32 %v964_v5 }
  0x9d   : > { %969 = vrsqrt.f32 %v344_v6  ;;  %v372_v21 = vmul.f32 %v1136_v11, %v1128_v63  ;;  %vm359_vm4 = vmor %vm357_vm3, %vm358_vm2  ;;  %vm367_vm6 = vweird.f32 %v344_v6  ;;  %vm387_vm8 = vweird.f32 %v1132_v4 }
  0x9e   : > { %v353_v9 = vmul.f32 %v964_v5, %v352_v8  ;;  %v1148_v25 = vadd.f32 1e-06, %v340_v16  ;;  %971 = vrsqrt.f32 %v1144_v20  ;;  %vm378_vm11 = vweird.f32 %v1136_v11 }
  0x9f   : > { %v373_v33 = vmul.f32 %v1136_v11, %v372_v21  ;;  %v327_v46 = vpop.xlane.xlu1 %326  ;;  %vm379_vm13 = vmor %vm377_vm10, %vm378_vm11 }
  0xa0   : > { %v354_v10 = vmul.f32 0.5, %v353_v9  ;;  %v324_v31 = vpop.xlane.xlu0 %323  ;;  %973 = vrsqrt.f32 %v1148_v25  ;;  %v342_v53 = vmul.f32 %v1124_v56, %v327_v46  ;;  %vm407_vm1 = vweird.f32 %v1148_v25 }
  0xa1   : > { %v374_v41 = vmul.f32 0.5, %v373_v33  ;;  %v341_v54 = vmul.f32 %v1124_v56, %v324_v31 }
  0xa2   : > { %v1139_v13 = vpop.eup %967  ;;  %v355_v14 = vsub.f32 1.5, %v354_v10  ;;  %v350_v62 = vadd.f32 1e-06, %v342_v53  ;;  %v934_v53 = vld [vmem:[%s1265_s4] sm:$0xff] }
  0xa3   : > { %v970_v15 = vpop.eup %969  ;;  %v514_v17 = vpop.permute.xlu2 %513  ;;  %v382_v18 = vmul.f32 %v1139_v13, %v1132_v4  ;;  %v375_v52 = vsub.f32 1.5, %v374_v41  ;;  %vm388_vm9 = vweird.f32 %v1139_v13  ;;  %v349_v63 = vadd.f32 1e-06, %v341_v54 }
  0xa4   : > { %v362_v19 = vmul.f32 %v970_v15, %v344_v6  ;;  %523 = vmatpush.bf16.msra.mxu1 %v514_v17  ;;  %v356_v22 = vmul.f32 %v964_v5, %v355_v14  ;;  %vm368_vm5 = vweird.f32 %v970_v15  ;;  %v972_v45 = vpop.eup %971  ;;  %vm389_vm12 = vmor %vm387_vm8, %vm388_vm9  ;;  %975 = vrsqrt.f32 %v350_v62 }
  0xa5   : > { %v383_v27 = vmul.f32 %v1139_v13, %v382_v18  ;;  %vm369_vm7 = vmor %vm367_vm6, %vm368_vm5  ;;  %v392_v59 = vmul.f32 %v972_v45, %v1144_v20  ;;  %v376_v61 = vmul.f32 %v1136_v11, %v375_v52  ;;  %977 = vrsqrt.f32 %v349_v63 }
  0xa6   : > { %v363_v23 = vmul.f32 %v970_v15, %v362_v19  ;;  %v360_v34 = vsel %vm359_vm4, %v964_v5, %v356_v22  ;;  %v974_v49 = vpop.eup %973  ;;  %vm398_vm15 = vweird.f32 %v972_v45  ;;  %vm427_vm5 = vweird.f32 %v350_v62 }
  0xa7   : > { %v384_v37 = vmul.f32 0.5, %v383_v27  ;;  %v431_v39 = vmul.f32 %v360_v34, %v1082_v26  ;;  %v402_v60 = vmul.f32 %v974_v49, %v1148_v25  ;;  %v393_v0 = vmul.f32 %v972_v45, %v392_v59  ;;  %vm399_vm3 = vmor %vm397_vm14, %vm398_vm15 }
  0xa8   : > { %v364_v29 = vmul.f32 0.5, %v363_v23  ;;  %v380_v2 = vsel %vm379_vm13, %v1136_v11, %v376_v61  ;;  %vm408_vm2 = vweird.f32 %v974_v49 }
  0xa9   : > { %v385_v48 = vsub.f32 1.5, %v384_v37  ;;  %v442_v50 = vmul.f32 %v1158_v40, %v431_v39  ;;  %v403_v1 = vmul.f32 %v974_v49, %v402_v60  ;;  %v394_v4 = vmul.f32 0.5, %v393_v0  ;;  %vm409_vm4 = vmor %vm407_vm1, %vm408_vm2 }
  0xaa   : > { %v365_v35 = vsub.f32 1.5, %v364_v29  ;;  %v433_v6 = vmul.f32 %v380_v2, %v1077_v24  ;;  %v976_v8 = vpop.eup %975 }
  0xab   : > { %v386_v58 = vmul.f32 %v1139_v13, %v385_v48  ;;  %v404_v5 = vmul.f32 0.5, %v403_v1  ;;  %v395_v9 = vsub.f32 1.5, %v394_v4  ;;  %v978_v12 = vpop.eup %977  ;;  %v422_v17 = vmul.f32 %v976_v8, %v350_v62 }
  0xac   : > { %v366_v38 = vmul.f32 %v970_v15, %v365_v35  ;;  %v412_v16 = vmul.f32 %v978_v12, %v349_v63  ;;  %vm428_vm6 = vweird.f32 %v976_v8  ;;  %vm418_vm8 = vweird.f32 %v978_v12 }
  0xad   : > { %v390_v56 = vsel %vm389_vm12, %v1139_v13, %v386_v58  ;;  %v405_v10 = vsub.f32 1.5, %v404_v5  ;;  %v444_v13 = vmul.f32 %v1158_v40, %v433_v6  ;;  %v396_v14 = vmul.f32 %v972_v45, %v395_v9  ;;  %vm429_vm9 = vmor %vm427_vm5, %vm428_vm6 }
  0xae   : > { %v370_v44 = vsel %vm369_vm7, %v970_v15, %v366_v38  ;;  %v434_v3 = vmul.f32 %v390_v56, %v1086_v28  ;;  %v413_v20 = vmul.f32 %v978_v12, %v412_v16  ;;  %v423_v21 = vmul.f32 %v976_v8, %v422_v17 }
  0xaf   : > { %v432_v47 = vmul.f32 %v370_v44, %v1089_v30  ;;  %v406_v15 = vmul.f32 %v974_v49, %v405_v10  ;;  %v400_v18 = vsel %vm399_vm3, %v972_v45, %v396_v14  ;;  %vm417_vm7 = vweird.f32 %v349_v63 }
  0xb0   : > { %v445_v7 = vmul.f32 %v1158_v40, %v434_v3  ;;  %v435_v22 = vmul.f32 %v400_v18, %v1092_v32  ;;  %v414_v25 = vmul.f32 0.5, %v413_v20  ;;  %v424_v27 = vmul.f32 0.5, %v423_v21  ;;  %vm419_vm10 = vmor %vm417_vm7, %vm418_vm8 }
  0xb1   : > { %v443_v51 = vmul.f32 %v1158_v40, %v432_v47  ;;  %v410_v19 = vsel %vm409_vm4, %v974_v49, %v406_v15  ;;  %v937_v49 = vld [vmem:[%s1265_s4 + $0x18] sm:$0xff]  ;;  %vm750_vm4 = vcmask 523264  }
  0xb2   : > { %v451_v11 = vpack.c.bf16 %v445_v7, %v444_v13  ;;  %v436_v23 = vmul.f32 %v410_v19, %v1100_v36  ;;  %v446_v29 = vmul.f32 %v1158_v40, %v435_v22  ;;  %v415_v33 = vsub.f32 1.5, %v414_v25  ;;  %767 = vmatpush.bf16.msra.mxu2 %v937_v49  ;;  %938 = vmatpush.bf16.msra.mxu3 %v937_v49 }
  0xb3   : > { %v512_v55 = vpop.permute.xlu0 %511  ;;  %v450_v57 = vpack.c.bf16 %v443_v51, %v442_v50  ;;  %v425_v34 = vsub.f32 1.5, %v424_v27  ;;  %v936_v50 = vld [vmem:[%s1265_s4 + $0x10] sm:$0xff] }
  0xb4   : > { %524 = vmatpush.bf16.msra.mxu1 %v512_v55  ;;  %v447_v31 = vmul.f32 %v1158_v40, %v436_v23  ;;  %v416_v37 = vmul.f32 %v978_v12, %v415_v33 }
  0xb5   : > { %894 = vmatmul.msk.bf16.vlgmr.msra.gmra.mxu0 %vm257_vm0, %v450_v57  ;;  %v426_v38 = vmul.f32 %v976_v8, %v425_v34 }
  0xb6   : > { %v452_v35 = vpack.c.bf16 %v447_v31, %v446_v29  ;;  %v420_v39 = vsel %vm419_vm10, %v978_v12, %v416_v37  ;;  %768 = vmatpush.bf16.msra.mxu2 %v936_v50  ;;  %939 = vmatpush.bf16.msra.mxu3 %v936_v50 }
  0xb7   : > { %898 = vmatmul.msk.bf16.vlgmr.msra.gmra.mxu1 %vm257_vm0, %v450_v57  ;;  %v430_v41 = vsel %vm429_vm9, %v976_v8, %v426_v38  ;;  %v437_v44 = vmul.f32 %v420_v39, %v1112_v43 }
  0xb8   : > { %v438_v45 = vmul.f32 %v430_v41, %v1110_v42 }
  0xb9   : > { %v448_v46 = vmul.f32 %v1158_v40, %v437_v44 }
  0xba   : > { %v449_v47 = vmul.f32 %v1158_v40, %v438_v45  ;;  %v935_v40 = vld [vmem:[%s1265_s4 + $0x8] sm:$0xff] }
  0xbb   : > { %769 = vmatpush.bf16.msra.mxu2 %v935_v40  ;;  %940 = vmatpush.bf16.msra.mxu3 %v935_v40 }
  0xbc   : > { %v453_v48 = vpack.c.bf16 %v449_v47, %v448_v46 }
  0xbf   : > { %770 = vmatpush.bf16.msra.mxu2 %v934_v53  ;;  %941 = vmatpush.bf16.msra.mxu3 %v934_v53 }
  0xc5   : > { %895 = vmatmul.msk.bf16.gmra.mxu0 %vm257_vm0, %v451_v11 }
  0xc7   : > { %899 = vmatmul.msk.bf16.gmra.mxu1 %vm257_vm0, %v451_v11 }
  0xd5   : > { %896 = vmatmul.msk.bf16.gmra.mxu0 %vm257_vm0, %v452_v35 }
  0xd7   : > { %900 = vmatmul.msk.bf16.gmra.mxu1 %vm257_vm0, %v452_v35 }
  0xe5   : > { %897 = vmatmul.msk.bf16.gmra.mxu0 %vm257_vm0, %v453_v48 }
  0xe7   : > { %901 = vmatmul.msk.bf16.gmra.mxu1 %vm257_vm0, %v453_v48 }
 0x132   : > { %v491_v51 = vpop.f32.mrf.mxu0 }
 0x133   : > { %v902_v52 = vmul.f32 -1.442695, %v491_v51 }
 0x134   : > { %v526_v59 = vpop.f32.mrf.mxu1 }
 0x135   : > { %979 = vpow2.f32 %v902_v52 }
 0x13a   : > { %v493_v54 = vpop.f32.mrf.mxu0 }
 0x13b   : > { %v980_v55 = vpop.eup %979  ;;  %v903_v57 = vmul.f32 -1.442695, %v493_v54 }
 0x13c   : > { %v570_v58 = vadd.f32 1.0, %v980_v55  ;;  %v528_v9 = vpop.f32.mrf.mxu1 }
 0x13d   : > { %981 = vpow2.f32 %v903_v57 }
 0x13e   : > { %983 = vrcp.f32 %v570_v58  ;;  %v589_v8 = vand.u32 2147483648, %v570_v58  ;;  %vm583_vm12 = vweird.f32 %v570_v58  ;;  %v587_v12 = vand.u32 2147483647, %v570_v58 }
 0x140   : > { %v590_v15 = vor.u32 1.1754944e-38, %v589_v8  ;;  %vm588_vm14 = vcmp.eq.f32.partialorder %v587_v12, 8.507059e+37 }
 0x142   : > { %v1209_v60 = vpop.f32.mrf.mxu0 }
 0x143   : > { %v982_v61 = vpop.eup %981  ;;  %v904_v62 = vmul.f32 -1.442695, %v1209_v60 }
 0x144   : > { %v984_v63 = vpop.eup %983  ;;  %v571_v56 = vadd.f32 1.0, %v982_v61  ;;  %v531_v37 = vpop.f32.mrf.mxu1 }
 0x145   : > { %v579_v0 = vmul.f32 %v984_v63, %v570_v58  ;;  %985 = vpow2.f32 %v904_v62  ;;  %vm584_vm11 = vweird.f32 %v984_v63 }
 0x146   : > { %987 = vrcp.f32 %v571_v56  ;;  %vm585_vm13 = vmor %vm583_vm12, %vm584_vm11  ;;  %v602_v16 = vand.u32 2147483647, %v571_v56  ;;  %v604_v17 = vand.u32 2147483648, %v571_v56  ;;  %vm598_vm1 = vweird.f32 %v571_v56 }
 0x147   : > { %v580_v1 = vsub.f32 1.0, %v579_v0 }
 0x148   : > { %vm603_vm3 = vcmp.eq.f32.partialorder %v602_v16, 8.507059e+37  ;;  %v605_v27 = vor.u32 1.1754944e-38, %v604_v17 }
 0x149   : > { %v581_v2 = vmul.f32 %v984_v63, %v580_v1 }
 0x14a   : > { %v1212_v3 = vpop.f32.mrf.mxu0 }
 0x14b   : > { %v986_v4 = vpop.eup %985  ;;  %v582_v5 = vadd.f32 %v984_v63, %v581_v2  ;;  %v905_v6 = vmul.f32 -1.442695, %v1212_v3 }
 0x14c   : > { %v988_v7 = vpop.eup %987  ;;  %v572_v10 = vadd.f32 1.0, %v986_v4  ;;  %v533_v62 = vpop.f32.mrf.mxu1 }
 0x14d   : > { %v594_v13 = vmul.f32 %v988_v7, %v571_v56  ;;  %989 = vpow2.f32 %v905_v6  ;;  %v586_v11 = vsel %vm585_vm13, %v984_v63, %v582_v5  ;;  %vm599_vm15 = vweird.f32 %v988_v7 }
 0x14e   : > { %991 = vrcp.f32 %v572_v10  ;;  %v591_v19 = vsel %vm588_vm14, %v590_v15, %v586_v11  ;;  %vm600_vm2 = vmor %vm598_vm1, %vm599_vm15  ;;  %v619_v52 = vand.u32 2147483648, %v572_v10  ;;  %vm613_vm6 = vweird.f32 %v572_v10 }
 0x14f   : > { %v595_v14 = vsub.f32 1.0, %v594_v13  ;;  %v698_v31 = vmul.f32 %v591_v19, %v491_v51  ;;  %v617_v53 = vand.u32 2147483647, %v572_v10 }
 0x150   : > { %v620_v58 = vor.u32 1.1754944e-38, %v619_v52 }
 0x151   : > { %v596_v18 = vmul.f32 %v988_v7, %v595_v14  ;;  %v706_v41 = vmul.f32 %v698_v31, %v526_v59  ;;  %vm618_vm8 = vcmp.eq.f32.partialorder %v617_v53, 8.507059e+37 }
 0x152   : > { %v1215_v20 = vpop.f32.mrf.mxu0 }
 0x153   : > { %v990_v21 = vpop.eup %989  ;;  %v597_v22 = vadd.f32 %v988_v7, %v596_v18  ;;  %v906_v23 = vmul.f32 -1.442695, %v1215_v20 }
 0x154   : > { %v992_v25 = vpop.eup %991  ;;  %v573_v29 = vadd.f32 1.0, %v990_v21  ;;  %v536_v17 = vpop.f32.mrf.mxu1 }
 0x155   : > { %v601_v33 = vsel %vm600_vm2, %v988_v7, %v597_v22  ;;  %v609_v34 = vmul.f32 %v992_v25, %v572_v10  ;;  %993 = vpow2.f32 %v906_v23  ;;  %vm614_vm5 = vweird.f32 %v992_v25 }
 0x156   : > { %v606_v35 = vsel %vm603_vm3, %v605_v27, %v601_v33  ;;  %995 = vrcp.f32 %v573_v29  ;;  %vm615_vm7 = vmor %vm613_vm6, %vm614_vm5  ;;  %v632_v59 = vand.u32 2147483647, %v573_v29  ;;  %v634_v61 = vand.u32 2147483648, %v573_v29 }
 0x157   : > { %v699_v38 = vmul.f32 %v606_v35, %v493_v54  ;;  %v610_v39 = vsub.f32 1.0, %v609_v34  ;;  %vm628_vm10 = vweird.f32 %v573_v29 }
 0x158   : > { %vm633_vm12 = vcmp.eq.f32.partialorder %v632_v59, 8.507059e+37  ;;  %v635_v6 = vor.u32 1.1754944e-38, %v634_v61 }
 0x159   : > { %v707_v44 = vmul.f32 %v699_v38, %v528_v9  ;;  %v611_v45 = vmul.f32 %v992_v25, %v610_v39 }
 0x15a   : > { %v1218_v46 = vpop.f32.mrf.mxu0 }
 0x15b   : > { %v994_v47 = vpop.eup %993  ;;  %v714_v48 = vpack.c.bf16 %v707_v44, %v706_v41  ;;  %v612_v49 = vadd.f32 %v992_v25, %v611_v45  ;;  %v907_v50 = vmul.f32 -1.442695, %v1218_v46 }
 0x15c   : > { %v996_v51 = vpop.eup %995  ;;  %v574_v40 = vadd.f32 1.0, %v994_v47 }
 0x15d   : > { %v624_v55 = vmul.f32 %v996_v51, %v573_v29  ;;  %997 = vpow2.f32 %v907_v50  ;;  %926 = vmatmul.msk.bf16.vlgmr.msra.gmra.mxu2 %vm750_vm4, %v714_v48  ;;  %v616_v54 = vsel %vm615_vm7, %v992_v25, %v612_v49  ;;  %vm629_vm9 = vweird.f32 %v996_v51  ;;  %v538_v48 = vpop.f32.mrf.mxu1 }
 0x15e   : > { %999 = vrcp.f32 %v574_v40  ;;  %v621_v56 = vsel %vm618_vm8, %v620_v58, %v616_v54  ;;  %vm630_vm11 = vmor %vm628_vm10, %vm629_vm9  ;;  %v649_v25 = vand.u32 2147483648, %v574_v40  ;;  %vm643_vm14 = vweird.f32 %v574_v40 }
 0x15f   : > { %v625_v57 = vsub.f32 1.0, %v624_v55  ;;  %v700_v8 = vmul.f32 %v621_v56, %v1209_v60  ;;  %v647_v29 = vand.u32 2147483647, %v574_v40 }
 0x160   : > { %v650_v34 = vor.u32 1.1754944e-38, %v649_v25 }
 0x161   : > { %v626_v63 = vmul.f32 %v996_v51, %v625_v57  ;;  %v708_v14 = vmul.f32 %v700_v8, %v531_v37  ;;  %vm648_vm1 = vcmp.eq.f32.partialorder %v647_v29, 8.507059e+37 }
 0x162   : > { %v1222_v0 = vpop.f32.mrf.mxu0 }
 0x163   : > { %v998_v1 = vpop.eup %997  ;;  %v627_v2 = vadd.f32 %v996_v51, %v626_v63  ;;  %v908_v4 = vmul.f32 -1.442695, %v1222_v0 }
 0x164   : > { %v1000_v5 = vpop.eup %999  ;;  %v575_v7 = vadd.f32 1.0, %v998_v1 }
 0x165   : > { %v631_v9 = vsel %vm630_vm11, %v996_v51, %v627_v2  ;;  %v639_v10 = vmul.f32 %v1000_v5, %v574_v40  ;;  %1001 = vpow2.f32 %v908_v4  ;;  %vm644_vm13 = vweird.f32 %v1000_v5 }
 0x166   : > { %v636_v12 = vsel %vm633_vm12, %v635_v6, %v631_v9  ;;  %1003 = vrcp.f32 %v575_v7  ;;  %vm645_vm15 = vmor %vm643_vm14, %vm644_vm13  ;;  %v664_v35 = vand.u32 2147483648, %v575_v7  ;;  %v662_v38 = vand.u32 2147483647, %v575_v7 }
 0x167   : > { %v701_v13 = vmul.f32 %v636_v12, %v1212_v3  ;;  %v640_v11 = vsub.f32 1.0, %v639_v10  ;;  %vm658_vm3 = vweird.f32 %v575_v7 }
 0x168   : > { %v665_v47 = vor.u32 1.1754944e-38, %v664_v35  ;;  %vm663_vm6 = vcmp.eq.f32.partialorder %v662_v38, 8.507059e+37 }
 0x169   : > { %v709_v15 = vmul.f32 %v701_v13, %v533_v62  ;;  %v641_v16 = vmul.f32 %v1000_v5, %v640_v11 }
 0x16a   : > { %v1227_v18 = vpop.f32.mrf.mxu0 }
 0x16b   : > { %v1002_v19 = vpop.eup %1001  ;;  %v715_v21 = vpack.c.bf16 %v709_v15, %v708_v14  ;;  %v642_v22 = vadd.f32 %v1000_v5, %v641_v16  ;;  %v909_v60 = vmul.f32 -1.442695, %v1227_v18 }
 0x16c   : > { %v1004_v23 = vpop.eup %1003  ;;  %v576_v27 = vadd.f32 1.0, %v1002_v19 }
 0x16d   : > { %v654_v31 = vmul.f32 %v1004_v23, %v575_v7  ;;  %1005 = vpow2.f32 %v909_v60  ;;  %927 = vmatmul.msk.bf16.vlgmr.msra.gmra.mxu3 %vm750_vm4, %v715_v21  ;;  %v646_v3 = vsel %vm645_vm15, %v1000_v5, %v642_v22  ;;  %vm659_vm2 = vweird.f32 %v1004_v23 }
 0x16e   : > { %1007 = vrcp.f32 %v576_v27  ;;  %v651_v39 = vsel %vm648_vm1, %v650_v34, %v646_v3  ;;  %vm660_vm5 = vmor %vm658_vm3, %vm659_vm2  ;;  %v679_v63 = vand.u32 2147483648, %v576_v27  ;;  %vm673_vm8 = vweird.f32 %v576_v27 }
 0x16f   : > { %v655_v33 = vsub.f32 1.0, %v654_v31  ;;  %v702_v50 = vmul.f32 %v651_v39, %v1215_v20  ;;  %v677_v56 = vand.u32 2147483647, %v576_v27  ;;  %v541_v20 = vpop.f32.mrf.mxu1 }
 0x170   : > { %v680_v5 = vor.u32 1.1754944e-38, %v679_v63 }
 0x171   : > { %v656_v37 = vmul.f32 %v1004_v23, %v655_v33  ;;  %v710_v54 = vmul.f32 %v702_v50, %v536_v17  ;;  %vm678_vm10 = vcmp.eq.f32.partialorder %v677_v56, 8.507059e+37 }
 0x173   : > { %v1006_v41 = vpop.eup %1005  ;;  %v657_v44 = vadd.f32 %v1004_v23, %v656_v37 }
 0x174   : > { %v1008_v45 = vpop.eup %1007  ;;  %v577_v49 = vadd.f32 1.0, %v1006_v41 }
 0x175   : > { %v661_v51 = vsel %vm660_vm5, %v1004_v23, %v657_v44  ;;  %v669_v52 = vmul.f32 %v1008_v45, %v576_v27  ;;  %vm674_vm7 = vweird.f32 %v1008_v45 }
 0x176   : > { %v666_v40 = vsel %vm663_vm6, %v665_v47, %v661_v51  ;;  %1009 = vrcp.f32 %v577_v49  ;;  %vm675_vm9 = vmor %vm673_vm8, %vm674_vm7  ;;  %v692_v7 = vand.u32 2147483647, %v577_v49  ;;  %vm688_vm12 = vweird.f32 %v577_v49 }
 0x177   : > { %v703_v53 = vmul.f32 %v666_v40, %v1218_v46  ;;  %v670_v55 = vsub.f32 1.0, %v669_v52  ;;  %v694_v46 = vand.u32 2147483648, %v577_v49  ;;  %v543_v15 = vpop.f32.mrf.mxu1 }
 0x178   : > { %vm693_vm14 = vcmp.eq.f32.partialorder %v692_v7, 8.507059e+37 }
 0x179   : > { %v711_v57 = vmul.f32 %v703_v53, %v538_v48  ;;  %v671_v58 = vmul.f32 %v1008_v45, %v670_v55  ;;  %v695_v10 = vor.u32 1.1754944e-38, %v694_v46 }
 0x17b   : > { %v716_v59 = vpack.c.bf16 %v711_v57, %v710_v54  ;;  %v672_v61 = vadd.f32 %v1008_v45, %v671_v58 }
 0x17c   : > { %v1010_v62 = vpop.eup %1009 }
 0x17d   : > { %v684_v1 = vmul.f32 %v1010_v62, %v577_v49  ;;  %928 = vmatmul.msk.bf16.gmra.mxu3 %vm750_vm4, %v716_v59  ;;  %v676_v2 = vsel %vm675_vm9, %v1008_v45, %v672_v61  ;;  %vm689_vm11 = vweird.f32 %v1010_v62 }
 0x17e   : > { %v681_v8 = vsel %vm678_vm10, %v680_v5, %v676_v2  ;;  %vm690_vm13 = vmor %vm688_vm12, %vm689_vm11 }
 0x17f   : > { %v685_v4 = vsub.f32 1.0, %v684_v1  ;;  %v704_v12 = vmul.f32 %v681_v8, %v1222_v0 }
 0x181   : > { %v686_v6 = vmul.f32 %v1010_v62, %v685_v4  ;;  %v712_v16 = vmul.f32 %v704_v12, %v541_v20 }
 0x183   : > { %v687_v9 = vadd.f32 %v1010_v62, %v686_v6 }
 0x185   : > { %v691_v13 = vsel %vm690_vm13, %v1010_v62, %v687_v9 }
 0x186   : > { %v696_v11 = vsel %vm693_vm14, %v695_v10, %v691_v13 }
 0x187   : > { %v705_v14 = vmul.f32 %v696_v11, %v1227_v18 }
 0x189   : > { %v713_v17 = vmul.f32 %v705_v14, %v543_v15 }
 0x18b   : > { %v717_v19 = vpack.c.bf16 %v713_v17, %v712_v16 }
 0x18d   : > { %929 = vmatmul.msk.bf16.gmra.mxu3 %vm750_vm4, %v717_v19 }
 0x1e0   : > { %v772_v21 = vpop.f32.mrf.mxu2 }
 0x1e1   : > { %v792_v22 = vadd.f32 %v772_v21, %v1082_v26 }
 0x1e3   : > { %800 = vst.msk [vmem:[%s243_s24] sm:$0xff] %vm257_vm0, %v792_v22 }
 0x1e8   : > { %v774_v0 = vpop.f32.mrf.mxu2 }
 0x1e9   : > { %v793_v60 = vadd.f32 %v774_v0, %v1089_v30 }
 0x1eb   : > { %801 = vst.msk [vmem:[%s243_s24 + $0x8] sm:$0xff] %vm257_vm0, %v793_v60 }
 0x1f0   : > { %v777_v18 = vpop.f32.mrf.mxu3 }
 0x1f1   : > { %v794_v23 = vadd.f32 %v777_v18, %v1077_v24 }
 0x1f3   : > { %802 = vst.msk [vmem:[%s243_s24 + $0x10] sm:$0xff] %vm257_vm0, %v794_v23 }
 0x1f8   : > { %v779_v25 = vpop.f32.mrf.mxu3 }
 0x1f9   : > { %v795_v27 = vadd.f32 %v779_v25, %v1086_v28 }
 0x1fb   : > { %803 = vst.msk [vmem:[%s243_s24 + $0x18] sm:$0xff] %vm257_vm0, %v795_v27 }
 0x200   : > { %v782_v29 = vpop.f32.mrf.mxu3 }
 0x201   : > { %v796_v26 = vadd.f32 %v782_v29, %v1092_v32 }
 0x203   : > { %804 = vst.msk [vmem:[%s243_s24 + $0x20] sm:$0xff] %vm257_vm0, %v796_v26 }
 0x208   : > { %v784_v31 = vpop.f32.mrf.mxu3 }
 0x209   : > { %v797_v30 = vadd.f32 %v784_v31, %v1100_v36 }
 0x20b   : > { %805 = vst.msk [vmem:[%s243_s24 + $0x28] sm:$0xff] %vm257_vm0, %v797_v30 }
 0x210   : > { %v787_v3 = vpop.f32.mrf.mxu3 }
 0x211   : > { %v798_v24 = vadd.f32 %v787_v3, %v1112_v43 }
 0x213   : > { %806 = vst.msk [vmem:[%s243_s24 + $0x30] sm:$0xff] %vm257_vm0, %v798_v24 }
 0x218   : > { %v789_v33 = vpop.f32.mrf.mxu3 }
 0x219   : > { %v799_v28 = vadd.f32 %v789_v33, %v1110_v42 }
 0x21b   : > { %807 = vst.msk [vmem:[%s243_s24 + $0x38] sm:$0xff] %vm257_vm0, %v799_v28 }
 0x21c PF: > { %s15_s18 = sadd.s32 1, %s1017_s18  }
 0x21d   : > { %p12_p5 = scmp.ge.s32.totalorder %s15_s18, 4  }
 0x21f   :  { %14 = sbr.rel (!%p12_p5) target bundleno = 1 (0x1), region = 73 }

// kernel: usm_block_forward.4
= control target key start
LH: loop header
LB: loop body
LE: loop exit
PB: predicated region body
PF: predicated region fallthrough
CT: control target
= control target key end

     0   :  { %s790_s18 = smov 0   ;;  %s881_s0 = inlined_call_operand.vmem [shape: f32[2,8,32], index: 0, kind: input, shape index: {}]   ;;  %s882_s1 = inlined_call_operand.vmem [shape: f32[2,1,8], index: 1, kind: input, shape index: {}]   ;;  %s883_s2 = inlined_call_operand.vmem [shape: f32[1,32], index: 2, kind: input, shape index: {}]   ;;  %s884_s3 = inlined_call_operand.vmem [shape: bf16[32,96], index: 3, kind: input, shape index: {}]   ;;  %s885_s4 = inlined_call_operand.vmem [shape: bf16[32,32], index: 4, kind: input, shape index: {}]   ;;  %s886_s5 = inlined_call_operand.vmem [shape: f32[2,8,32], index: 5, kind: output, shape index: {}]  }
   0x1 LB: > { %s653_s19 = sadd.s32 4294967295, %s743_s18   ;;  %p657_p0 = scmp.ge.s32.totalorder %s743_s18, 1  ;;  %s743_s18 = sphi %s790_s18, %s15_s18  }
   0x2   : > { %p194_p1 = scmp.lt.s32.totalorder %s743_s18, 3 }
   0x4   : > { %p195_p2 = pnand %p657_p0, %p194_p1 }
   0x5   : > { %p223_p3 = scmp.lt.s32.totalorder (!%p195_p2), %s653_s19, 1  ;;  %s746_s8 = smov (!%p195_p2), 72  }
   0x6   : > { %198 = sbr.rel (%p195_p2) target bundleno = 1230 (0x4ce), region = 40  ;;  %s747_s9 = smov (!%p195_p2), 88  }
   0x7   : > { %s748_s10 = smov (!%p195_p2), 96   ;;  %s749_s11 = smov (!%p195_p2), 104  }
   0x8   : > { %s750_s12 = smov (!%p195_p2), 120   ;;  %s751_s13 = smov (!%p195_p2), 112  }
   0x9   : > { %s752_s14 = smov (!%p195_p2), 80   ;;  %s753_s17 = smov (!%p195_p2), 64  }
   0xa   : > { %s754_s21 = smov (!%p195_p2), 40   ;;  %s755_s22 = smov (!%p195_p2), 56  }
   0xb   : > { %s888_s19 = smov (!%p223_p3, %s653_s19), 1  ;;  %vm238_vm0 = vcmask 261120   ;;  %v745_v3 = vmov 32.0   ;;  %v689_v7 = vld [vmem:[%s884_s3 + $0x8] sm:$0xff]  ;;  %v688_v9 = vld [vmem:[%s884_s3] sm:$0xff]  ;;  %vm304_vm5 = vcmask 64512  }
   0xc   : > { %s658_s20 = sshll.u32 %s888_s19, 3  ;;  %s229_s23 = scalar_lea.vmem %s882_s1, %s888_s19  ;;  %717 = vrcp.f32 %v745_v3  ;;  %292 = vmatpush.bf16.msra.mxu0 %v689_v7  ;;  %v716_v21 = vld [vmem:[%s883_s2] ss:$0 sm:$0xff]  ;;  %vm346_vm6 = vcmask 1043456   ;;  %vm426_vm7 = vcmask 130112   ;;  %vm490_vm8 = vcmask 195712  }
   0xd   : > { %s226_s26 = scalar_lea.vmem %s881_s0, %s658_s20  ;;  %v715_v40 = vld [vmem:[%s229_s23] ss:$0 sm:$0xff]  ;;  %s756_s23 = smov 48   ;;  %vm554_vm9 = vcmask 261312  }
   0xe   : > { %v235_v0 = vld [vmem:[%s226_s26] sm:$0xff]  ;;  %s757_s24 = smov 8   ;;  %s758_s25 = smov 16  }
   0xf   : > { %v237_v1 = vmul.f32 %v235_v0, %v235_v0  ;;  %s759_s26 = smov 24  }
  0x10   : > { %293 = vmatpush.bf16.msra.mxu0 %v688_v9 }
  0x11   : > { %v239_v2 = vsel %vm238_vm0, %v237_v1, 0.0 }
  0x12   : > { %240 = vadd.xlane.f32.xlu0 %v239_v2  ;;  %v718_v4 = vpop.eup %717 }
  0x13   : > { %v243_v5 = vmul.f32 32.0, %v718_v4  ;;  %vm247_vm1 = vweird.f32 %v718_v4 }
  0x15   : > { %v244_v6 = vsub.f32 1.0, %v243_v5 }
  0x17   : > { %v245_v8 = vmul.f32 %v718_v4, %v244_v6 }
  0x19   : > { %v246_v10 = vadd.f32 %v718_v4, %v245_v8 }
  0x1b   : > { %v248_v11 = vsel %vm247_vm1, %v718_v4, %v246_v10 }
  0x85   : > { %v241_v12 = vpop.xlane.xlu0 %240 }
  0x86   : > { %v249_v13 = vmul.f32 %v248_v11, %v241_v12 }
  0x88   : > { %v250_v14 = vadd.f32 1e-06, %v249_v13 }
  0x8a   : > { %719 = vrsqrt.f32 %v250_v14  ;;  %vm257_vm3 = vweird.f32 %v250_v14 }
  0x90   : > { %v720_v15 = vpop.eup %719 }
  0x91   : > { %v252_v16 = vmul.f32 %v720_v15, %v250_v14  ;;  %vm258_vm2 = vweird.f32 %v720_v15 }
  0x92   : > { %vm259_vm4 = vmor %vm257_vm3, %vm258_vm2 }
  0x93   : > { %v253_v17 = vmul.f32 %v720_v15, %v252_v16 }
  0x95   : > { %v254_v18 = vmul.f32 0.5, %v253_v17 }
  0x97   : > { %v255_v19 = vsub.f32 1.5, %v254_v18 }
  0x99   : > { %v256_v20 = vmul.f32 %v720_v15, %v255_v19 }
  0x9b   : > { %v260_v22 = vsel %vm259_vm4, %v720_v15, %v256_v20 }
  0x9c   : > { %v261_v23 = vmul.f32 %v260_v22, %v235_v0 }
  0x9e   : > { %v265_v24 = vmul.f32 %v716_v21, %v261_v23 }
  0xa0   : > { %v266_v25 = vpack.c.bf16 %v265_v24, %v265_v24 }
  0xa2   : > { %668 = vmatmul.msk.bf16.vlgmr.msra.gmra.mxu0 %vm238_vm0, %v266_v25 }
 0x11f   : > { %v295_v26 = vpop.f32.mrf.mxu0 }
 0x120   : > { %v821_v27 = vpack.c.bf16 %v295_v26, %v295_v26 }
 0x122   : > { %494 = vrot.lane.b32.xlu2 %v821_v27, %s746_s8  ;;  %366 = vrot.lane.b32.xlu1 %v821_v27, %s747_s9  ;;  %s233_s8 = scalar_lea.vmem %s886_s5, %s658_s20 }
 0x123   : > { %302 = vrot.lane.b32.xlu0 %v821_v27, %s748_s10 }
 0x127   : > { %v297_v28 = vpop.f32.mrf.mxu0 }
 0x12a   : > { %492 = vrot.lane.b32.xlu2 %v821_v27, %s749_s11  ;;  %364 = vrot.lane.b32.xlu1 %v821_v27, %s750_s12 }
 0x132   : > { %428 = vrot.lane.b32.xlu2 %v821_v27, %s751_s13  ;;  %430 = vrot.lane.b32.xlu1 %v821_v27, %s752_s14 }
 0x17c   : > { %v495_v29 = vpop.permute.xlu2 %494 }
 0x17d   : > { %v500_v34 = vsel %vm304_vm5, %v495_v29, 0 }
 0x184   : > { %v493_v36 = vpop.permute.xlu2 %492 }
 0x18c   : > { %v429_v39 = vpop.permute.xlu2 %428 }
 0x194   : > { %v367_v30 = vpop.permute.xlu1 %366 }
 0x195   : > { %v303_v31 = vpop.permute.xlu0 %302  ;;  %v372_v32 = vsel %vm304_vm5, %v367_v30, 0 }
 0x196   : > { %v309_v33 = vsel %vm304_vm5, %v303_v31, 0  ;;  %381 = vmatpush.bf16.xpose.msra.mxu3 %v372_v32 }
 0x197   : > { %318 = vmatpush.bf16.xpose.msra.mxu1 %v309_v33 }
 0x19c   : > { %v365_v35 = vpop.permute.xlu1 %364 }
 0x19d   : > { %671 = vmatmul.msk.bf16.vlgmr.msra.gmra.mxu3 %vm304_vm5, %v365_v35 }
 0x19e   : > { %509 = vmatpush.bf16.xpose.msrb.mxu3 %v500_v34  ;;  %669 = vmatmul.msk.bf16.vlgmr.msra.gmra.mxu1 %vm304_vm5, %v821_v27 }
 0x1a4   : > { %v431_v37 = vpop.permute.xlu1 %430 }
 0x1a5   : > { %v436_v38 = vsel %vm304_vm5, %v431_v37, 0 }
 0x1a6   : > { %445 = vmatpush.bf16.xpose.msrb.mxu0 %v436_v38 }
 0x1ad   : > { %673 = vmatmul.msk.bf16.vlgmr.msrb.gmra.mxu0 %vm304_vm5, %v429_v39  ;;  %675 = vmatmul.msk.bf16.vlgmr.msrb.gmra.mxu3 %vm304_vm5, %v493_v36 }
 0x21b   : > { %v320_v41 = vpop.f32.mrf.mxu1 }
 0x21c   : > { %v324_v42 = vmul.f32 0.35355338, %v320_v41 }
 0x21e   : > { %v328_v43 = vadd.f32 %v715_v40, %v324_v42 }
 0x220   : > { %v383_v44 = vpop.f32.mrf.mxu3  ;;  %v329_v45 = vsel %vm304_vm5, %v328_v43, -inf }
 0x221   : > { %v387_v46 = vmul.f32 0.35355338, %v383_v44  ;;  %330 = vmax.xlane.f32.xlu1 %v329_v45 }
 0x223   : > { %v322_v47 = vpop.f32.mrf.mxu1  ;;  %v388_v48 = vadd.f32 %v715_v40, %v387_v46 }
 0x225   : > { %v389_v49 = vsel %vm304_vm5, %v388_v48, -inf }
 0x226   : > { %390 = vmax.xlane.f32.xlu2 %v389_v49  ;;  %v691_v49 = vld [vmem:[%s885_s4 + $0x8] sm:$0xff] }
 0x227   : > { %583 = vmatpush.bf16.msra.mxu0 %v691_v49 }
 0x228   : > { %v385_v50 = vpop.f32.mrf.mxu3 }
 0x229   : > { %v690_v50 = vld [vmem:[%s885_s4] sm:$0xff] }
 0x22a   : > { %v447_v51 = vpop.f32.mrf.mxu0 }
 0x22b   : > { %v451_v52 = vmul.f32 0.35355338, %v447_v51  ;;  %584 = vmatpush.bf16.msra.mxu0 %v690_v50 }
 0x22d   : > { %v452_v53 = vadd.f32 %v715_v40, %v451_v52 }
 0x22f   : > { %v453_v54 = vsel %vm304_vm5, %v452_v53, -inf }
 0x230   : > { %v511_v55 = vpop.f32.mrf.mxu3  ;;  %454 = vmax.xlane.f32.xlu2 %v453_v54 }
 0x231   : > { %v515_v56 = vmul.f32 0.35355338, %v511_v55 }
 0x232   : > { %v449_v57 = vpop.f32.mrf.mxu0 }
 0x233   : > { %v516_v58 = vadd.f32 %v715_v40, %v515_v56 }
 0x235   : > { %v517_v59 = vsel %vm304_vm5, %v516_v58, -inf }
 0x236   : > { %518 = vmax.xlane.f32.xlu0 %v517_v59 }
 0x238   : > { %v513_v60 = vpop.f32.mrf.mxu3 }
 0x24a   : > { %341 = vrot.lane.b32.xlu0 %v821_v27, %s753_s17 }
 0x252   : > { %529 = vrot.lane.b32.xlu0 %v821_v27, %s754_s21 }
 0x294   : > { %v331_v61 = vpop.xlane.xlu1 %330 }
 0x295   : > { %v332_v62 = vsub.f32 %v328_v43, %v331_v61 }
 0x297   : > { %v333_v63 = vmul.f32 1.442695, %v332_v62 }
 0x299   : > { %721 = vpow2.f32 %v333_v63  ;;  %v391_v0 = vpop.xlane.xlu2 %390 }
 0x29a   : > { %v392_v5 = vsub.f32 %v388_v48, %v391_v0 }
 0x29c   : > { %v393_v7 = vmul.f32 1.442695, %v392_v5 }
 0x29f   : > { %v722_v1 = vpop.eup %721 }
 0x2a0   : > { %v335_v2 = vsel %vm304_vm5, %v722_v1, 0.0 }
 0x2a1   : > { %336 = vadd.xlane.f32.xlu1 %v335_v2 }
 0x2a3   : > { %v455_v3 = vpop.xlane.xlu2 %454 }
 0x2a4   : > { %v456_v4 = vsub.f32 %v452_v53, %v455_v3 }
 0x2a6   : > { %v457_v6 = vmul.f32 1.442695, %v456_v4 }
 0x2a8   : > { %723 = vpow2.f32 %v457_v6 }
 0x2a9   : > { %v519_v8 = vpop.xlane.xlu0 %518  ;;  %725 = vpow2.f32 %v393_v7 }
 0x2aa   : > { %v520_v10 = vsub.f32 %v516_v58, %v519_v8 }
 0x2ac   : > { %v521_v12 = vmul.f32 1.442695, %v520_v10 }
 0x2ae   : > { %v724_v9 = vpop.eup %723  ;;  %727 = vpow2.f32 %v521_v12 }
 0x2af   : > { %v459_v11 = vsel %vm304_vm5, %v724_v9, 0.0  ;;  %v726_v13 = vpop.eup %725 }
 0x2b0   : > { %460 = vadd.xlane.f32.xlu2 %v459_v11  ;;  %v395_v14 = vsel %vm304_vm5, %v726_v13, 0.0 }
 0x2b4   : > { %v728_v15 = vpop.eup %727 }
 0x2b5   : > { %v523_v18 = vsel %vm304_vm5, %v728_v15, 0.0 }
 0x2b8   : > { %396 = vadd.xlane.f32.xlu2 %v395_v14 }
 0x2ba   : > { %401 = vrot.lane.b32.xlu1 %v821_v27, %s755_s22 }
 0x2bc   : > { %v342_v16 = vpop.permute.xlu0 %341 }
 0x2bd   : > { %v348_v17 = vsel %vm346_vm6, %v342_v16, 0 }
 0x2be   : > { %357 = vmatpush.bf16.msra.mxu2 %v348_v17 }
 0x2c0   : > { %524 = vadd.xlane.f32.xlu2 %v523_v18 }
 0x2c4   : > { %v530_v24 = vpop.permute.xlu0 %529 }
 0x2c5   : > { %v535_v29 = vsel %vm346_vm6, %v530_v24, 0 }
 0x2d8   : > { %465 = vrot.lane.b32.xlu2 %v821_v27, %s756_s23 }
 0x314   : > { %v337_v19 = vpop.xlane.xlu1 %336 }
 0x315   : > { %729 = vrcp.f32 %v337_v19 }
 0x31b   : > { %v730_v20 = vpop.eup %729 }
 0x31c   : > { %v339_v21 = vmul.f32 %v730_v20, %v722_v1 }
 0x31e   : > { %v340_v22 = vpack.c.bf16 %v339_v21, %v339_v21 }
 0x320   : > { %670 = vmatmul.msk.bf16.vlgmr.msra.gmra.mxu2 %vm304_vm5, %v340_v22 }
 0x323   : > { %v461_v23 = vpop.xlane.xlu2 %460 }
 0x32b   : > { %v397_v25 = vpop.xlane.xlu2 %396 }
 0x32c   : > { %v402_v26 = vpop.permute.xlu1 %401  ;;  %731 = vrcp.f32 %v397_v25 }
 0x32d   : > { %v407_v28 = vsel %vm346_vm6, %v402_v26, 0  ;;  %733 = vrcp.f32 %v461_v23 }
 0x32e   : > { %416 = vmatpush.bf16.msrb.mxu2 %v407_v28 }
 0x332   : > { %544 = vmatpush.bf16.msra.mxu2 %v535_v29  ;;  %v732_v27 = vpop.eup %731 }
 0x333   : > { %v399_v30 = vmul.f32 %v732_v27, %v726_v13  ;;  %v525_v31 = vpop.xlane.xlu2 %524  ;;  %v734_v33 = vpop.eup %733 }
 0x334   : > { %735 = vrcp.f32 %v525_v31  ;;  %v463_v34 = vmul.f32 %v734_v33, %v724_v9 }
 0x335   : > { %v400_v32 = vpack.c.bf16 %v399_v30, %v399_v30 }
 0x336   : > { %v464_v38 = vpack.c.bf16 %v463_v34, %v463_v34 }
 0x337   : > { %672 = vmatmul.msk.bf16.vlgmr.msrb.gmra.mxu2 %vm304_vm5, %v400_v32 }
 0x33a   : > { %v736_v37 = vpop.eup %735 }
 0x33b   : > { %v466_v35 = vpop.permute.xlu2 %465  ;;  %v527_v39 = vmul.f32 %v736_v37, %v728_v15 }
 0x33c   : > { %v471_v36 = vsel %vm346_vm6, %v466_v35, 0 }
 0x33d   : > { %480 = vmatpush.bf16.msrb.mxu1 %v471_v36  ;;  %v528_v40 = vpack.c.bf16 %v527_v39, %v527_v39 }
 0x340   : > { %674 = vmatmul.msk.bf16.vlgmr.msrb.gmra.mxu1 %vm304_vm5, %v464_v38 }
 0x347   : > { %676 = vmatmul.msk.bf16.vlgmr.msra.gmra.mxu2 %vm304_vm5, %v528_v40 }
 0x3a3   : > { %v359_v41 = vpop.f32.mrf.mxu2 }
 0x3a4   : > { %363 = vst.msk [vmem:[#allocation2] sm:$0xff] %vm304_vm5, %v359_v41 }
 0x3ab   : > { %v361_v42 = vpop.f32.mrf.mxu2 }
 0x3ba   : > { %v418_v43 = vpop.f32.mrf.mxu2 }
 0x3bb   : > { %423 = vrot.lane.b32.xlu0 %v418_v43, %s757_s24 }
 0x3bd   : > { %v482_v44 = vpop.f32.mrf.mxu1 }
 0x3be   : > { %487 = vrot.lane.b32.xlu1 %v482_v44, %s758_s25 }
 0x3c2   : > { %v420_v45 = vpop.f32.mrf.mxu2 }
 0x3c5   : > { %v484_v46 = vpop.f32.mrf.mxu1 }
 0x3ca   : > { %v546_v47 = vpop.f32.mrf.mxu2 }
 0x3cb   : > { %551 = vrot.lane.b32.xlu0 %v546_v47, %s759_s26 }
 0x3d2   : > { %v548_v48 = vpop.f32.mrf.mxu2 }
 0x42d   : > { %v424_v51 = vpop.permute.xlu0 %423 }
 0x42e   : > { %427 = vst.msk [vmem:[#allocation2] sm:$0xff] %vm426_vm7, %v424_v51 }
 0x430   : > { %v488_v52 = vpop.permute.xlu1 %487 }
 0x431   : > { %491 = vst.msk [vmem:[#allocation2] sm:$0xff] %vm490_vm8, %v488_v52 }
 0x43d   : > { %v552_v53 = vpop.permute.xlu0 %551 }
 0x43e   : > { %555 = vst.msk [vmem:[#allocation2] sm:$0xff] %vm554_vm9, %v552_v53 }
 0x445   : > { %v556_v54 = vld [vmem:[#allocation2] sm:$0xff] }
 0x446   : > { %v557_v55 = vpack.c.bf16 %v556_v54, %v556_v54 }
 0x448   : > { %685 = vmatmul.msk.bf16.vlgmr.msra.gmra.mxu0 %vm238_vm0, %v557_v55 }
 0x4c5   : > { %v586_v56 = vpop.f32.mrf.mxu0 }
 0x4c6   : > { %590 = vst.msk [vmem:[%s233_s8] sm:$0xff] %vm238_vm0, %v586_v56 }
 0x4cd   : > { %v588_v57 = vpop.f32.mrf.mxu0 }
 0x4ce PF: > { %s15_s18 = sadd.s32 1, %s743_s18  }
 0x4cf   : > { %p12_p4 = scmp.ge.s32.totalorder %s15_s18, 4  }
 0x4d1   :  { %14 = sbr.rel (!%p12_p4) target bundleno = 1 (0x1), region = 73 }

// kernel: usm_block_forward.3
= control target key start
LH: loop header
LB: loop body
LE: loop exit
PB: predicated region body
PF: predicated region fallthrough
CT: control target
= control target key end

     0   :  { %s3392_s24 = smov 0   ;;  %s4591_s0 = inlined_call_operand.vmem [shape: f32[128,32], index: 0, kind: input, shape index: {}]   ;;  %s4592_s1 = inlined_call_operand.vmem [shape: f32[16,8], index: 1, kind: input, shape index: {}]   ;;  %s4593_s2 = inlined_call_operand.vmem [shape: f32[128,1], index: 2, kind: input, shape index: {}]   ;;  %s4594_s3 = inlined_call_operand.vmem [shape: f32[1,32], index: 3, kind: input, shape index: {}]   ;;  %s4595_s4 = inlined_call_operand.vmem [shape: bf16[32,96], index: 4, kind: input, shape index: {}]   ;;  %s4596_s5 = inlined_call_operand.vmem [shape: bf16[32,32], index: 5, kind: input, shape index: {}]   ;;  %s4597_s6 = inlined_call_operand.vmem [shape: f32[128,32], index: 6, kind: output, shape index: {0}]   ;;  %s4598_s7 = inlined_call_operand.vmem [shape: f32[16,32], index: 7, kind: output, shape index: {1}]  }
   0x1 LB: > { %s3398_s25 = sadd.s32 4294967295, %s3333_s24   ;;  %p3021_p0 = scmp.ge.s32.totalorder %s3333_s24, 1  ;;  %s3333_s24 = sphi %s3392_s24, %s18_s24  }
   0x2   : > { %p261_p1 = scmp.lt.s32.totalorder %s3333_s24, 3 }
   0x4   : > { %p262_p2 = pnand %p3021_p0, %p261_p1 }
   0x5   : > { %s3022_s26 = sshll.u32 (!%p262_p2), %s3398_s25, 3  ;;  %s3336_s14 = smov (!%p262_p2), 88  }
   0x6   : > { %265 = sbr.rel (%p262_p2) target bundleno = 3190 (0xc76), region = 44  ;;  %p307_p3 = scmp.lt.s32.totalorder (!%p262_p2), %s3022_s26, 15 }
   0x7   : > { %s3337_s15 = smov (!%p262_p2), 64   ;;  %s3338_s16 = smov (!%p262_p2), 96  }
   0x8   : > { %s3339_s17 = smov (!%p262_p2), 120   ;;  %s3340_s18 = smov (!%p262_p2), 112  }
   0x9   : > { %s3341_s19 = smov (!%p262_p2), 48   ;;  %s3342_s20 = smov (!%p262_p2), 56  }
   0xa   : > { %s3343_s21 = smov (!%p262_p2), 104   ;;  %p312_p4 = scmp.lt.s32.totalorder (!%p262_p2), %s3398_s25, 1 }
   0xb   : > { %s4604_s26 = smov (!%p307_p3, %s3022_s26), 15  ;;  %vm350_vm0 = vcmask 261120   ;;  %v3335_v6 = vmov 32.0   ;;  %v3121_v12 = vld [vmem:[%s4595_s4 + $0x8] sm:$0xff]  ;;  %v3120_v14 = vld [vmem:[%s4595_s4] sm:$0xff]  ;;  %vm565_vm14 = vcmask 64512  }
   0xc   : > { %s3403_s27 = sshll.u32 %s4604_s26, 3  ;;  %3157 = vrcp.f32 %v3335_v6  ;;  %535 = vmatpush.bf16.msra.mxu0 %v3121_v12  ;;  %3124 = vmatpush.bf16.msra.mxu1 %v3121_v12  ;;  %v3440_v41 = vld [vmem:[%s4594_s3] ss:$0 sm:$0xff]  ;;  %vm605_vm15 = vcmask 1043456   ;;  %s4606_s25 = smov (!%p312_p4, %s3398_s25), 1 }
   0xd   : > { %s3409_s30 = scalar_lea.vmem %s4591_s0, %s3403_s27  ;;  %s3024_s22 = sshll.u32 %s4606_s25, 3 }
   0xe   : > { %v333_v0 = vld [vmem:[%s3409_s30] sm:$0xff]  ;;  %v334_v2 = vld [vmem:[%s3409_s30 + $0x8] sm:$0xff]  ;;  %v3425_v18 = vld [vmem:[%s3409_s30 + $0x30] sm:$0xff]  ;;  %s3501_s28 = scalar_lea.vmem %s4592_s1, %s3024_s22  ;;  %s3345_s29 = smov 80  }
   0xf   : > { %v342_v1 = vmul.f32 %v333_v0, %v333_v0  ;;  %v343_v4 = vmul.f32 %v334_v2, %v334_v2  ;;  %v348_v19 = vmul.f32 %v3425_v18, %v3425_v18  ;;  %v3430_v20 = vld [vmem:[%s3409_s30 + $0x38] sm:$0xff]  ;;  %s3346_s8 = smov 72   ;;  %v3536_v62 = vld [vmem:[%s3409_s30 + $0x20] sm:$0xff]  ;;  %s3347_s9 = smov 40  }
  0x10   : > { %536 = vmatpush.bf16.msra.mxu0 %v3120_v14  ;;  %3125 = vmatpush.bf16.msra.mxu1 %v3120_v14  ;;  %v349_v24 = vmul.f32 %v3430_v20, %v3430_v20  ;;  %s3348_s10 = smov 16   ;;  %s3349_s11 = smov 8  }
  0x11   : > { %v351_v3 = vsel %vm350_vm0, %v342_v1, 0.0  ;;  %v354_v5 = vsel %vm350_vm0, %v343_v4, 0.0  ;;  %v369_v22 = vsel %vm350_vm0, %v348_v19, 0.0  ;;  %s3350_s12 = smov 24   ;;  %s4508_s23 = scalar_lea.vmem %s4597_s6, %s3403_s27 }
  0x12   : > { %352 = vadd.xlane.f32.xlu0 %v351_v3  ;;  %v3158_v7 = vpop.eup %3157  ;;  %370 = vadd.xlane.f32.xlu1 %v369_v22  ;;  %v372_v29 = vsel %vm350_vm0, %v349_v24, 0.0  ;;  %v558_v24 = vld [vmem:[%s3501_s28] sm:$0x1] }
  0x13   : > { %v376_v8 = vmul.f32 32.0, %v3158_v7  ;;  %vm380_vm1 = vweird.f32 %v3158_v7 }
  0x15   : > { %v377_v9 = vsub.f32 1.0, %v376_v8 }
  0x17   : > { %v378_v10 = vmul.f32 %v3158_v7, %v377_v9 }
  0x19   : > { %v379_v11 = vadd.f32 %v3158_v7, %v378_v10 }
  0x1a   : > { %355 = vadd.xlane.f32.xlu0 %v354_v5  ;;  %373 = vadd.xlane.f32.xlu1 %v372_v29 }
  0x1b   : > { %v3418_v13 = vsel %vm380_vm1, %v3158_v7, %v379_v11  ;;  %v3473_v11 = vld [vmem:[%s3409_s30 + $0x18] sm:$0xff]  ;;  %vm559_vm1 = vcmp.gt.f32.partialorder %v558_v24, 0.0 }
  0x1c   : > { %v345_v12 = vmul.f32 %v3473_v11, %v3473_v11 }
  0x1e   : > { %v360_v14 = vsel %vm350_vm0, %v345_v12, 0.0 }
  0x85   : > { %v353_v15 = vpop.xlane.xlu0 %352  ;;  %v371_v47 = vpop.xlane.xlu1 %370 }
  0x86   : > { %v382_v16 = vmul.f32 %v3418_v13, %v353_v15  ;;  %v388_v48 = vmul.f32 %v3418_v13, %v371_v47 }
  0x88   : > { %v390_v17 = vadd.f32 1e-06, %v382_v16  ;;  %v396_v49 = vadd.f32 1e-06, %v388_v48 }
  0x8a   : > { %3159 = vrsqrt.f32 %v390_v17  ;;  %vm404_vm3 = vweird.f32 %v390_v17  ;;  %vm464_vm8 = vweird.f32 %v396_v49 }
  0x8d   : > { %v356_v21 = vpop.xlane.xlu0 %355  ;;  %v374_v50 = vpop.xlane.xlu1 %373 }
  0x8e   : > { %v383_v23 = vmul.f32 %v3418_v13, %v356_v21  ;;  %v389_v51 = vmul.f32 %v3418_v13, %v374_v50 }
  0x90   : > { %v3160_v25 = vpop.eup %3159  ;;  %v391_v26 = vadd.f32 1e-06, %v383_v23  ;;  %v397_v53 = vadd.f32 1e-06, %v389_v51 }
  0x91   : > { %v399_v27 = vmul.f32 %v3160_v25, %v390_v17  ;;  %vm405_vm2 = vweird.f32 %v3160_v25 }
  0x92   : > { %3161 = vrsqrt.f32 %v391_v26  ;;  %vm406_vm4 = vmor %vm404_vm3, %vm405_vm2  ;;  %vm414_vm6 = vweird.f32 %v391_v26  ;;  %vm474_vm11 = vweird.f32 %v397_v53 }
  0x93   : > { %v400_v28 = vmul.f32 %v3160_v25, %v399_v27  ;;  %3163 = vrsqrt.f32 %v396_v49 }
  0x94   : > { %3165 = vrsqrt.f32 %v397_v53 }
  0x95   : > { %v401_v30 = vmul.f32 0.5, %v400_v28 }
  0x97   : > { %v402_v31 = vsub.f32 1.5, %v401_v30 }
  0x98   : > { %v3162_v32 = vpop.eup %3161 }
  0x99   : > { %v409_v33 = vmul.f32 %v3162_v32, %v391_v26  ;;  %v403_v34 = vmul.f32 %v3160_v25, %v402_v31  ;;  %vm415_vm5 = vweird.f32 %v3162_v32  ;;  %v3164_v52 = vpop.eup %3163  ;;  %v3344_v26 = vmov -1e+09  }
  0x9a   : > { %vm416_vm7 = vmor %vm414_vm6, %vm415_vm5  ;;  %v459_v54 = vmul.f32 %v3164_v52, %v396_v49  ;;  %vm465_vm9 = vweird.f32 %v3164_v52  ;;  %v3166_v58 = vpop.eup %3165  ;;  %v560_v27 = vsel %vm559_vm1, 0.0, %v3344_v26 }
  0x9b   : > { %v410_v35 = vmul.f32 %v3162_v32, %v409_v33  ;;  %v407_v38 = vsel %vm406_vm4, %v3160_v25, %v403_v34  ;;  %v469_v60 = vmul.f32 %v3166_v58, %v397_v53  ;;  %vm3447_vm10 = vmor %vm464_vm8, %vm465_vm9  ;;  %vm475_vm12 = vweird.f32 %v3166_v58 }
  0x9c   : > { %v478_v40 = vmul.f32 %v407_v38, %v333_v0  ;;  %v460_v55 = vmul.f32 %v3164_v52, %v459_v54  ;;  %vm476_vm13 = vmor %vm474_vm11, %vm475_vm12  ;;  %v3507_v28 = vperm.slane %v560_v27, 0 }
  0x9d   : > { %v411_v36 = vmul.f32 0.5, %v410_v35  ;;  %v470_v0 = vmul.f32 %v3166_v58, %v469_v60 }
  0x9e   : > { %v489_v44 = vmul.f32 %v3440_v41, %v478_v40  ;;  %v461_v56 = vmul.f32 0.5, %v460_v55 }
  0x9f   : > { %v412_v37 = vsub.f32 1.5, %v411_v36  ;;  %v471_v1 = vmul.f32 0.5, %v470_v0  ;;  %v346_v0 = vmul.f32 %v3536_v62, %v3536_v62 }
  0xa0   : > { %v462_v57 = vsub.f32 1.5, %v461_v56 }
  0xa1   : > { %v413_v39 = vmul.f32 %v3162_v32, %v412_v37  ;;  %v472_v3 = vsub.f32 1.5, %v471_v1  ;;  %v363_v1 = vsel %vm350_vm0, %v346_v0, 0.0 }
  0xa2   : > { %v463_v59 = vmul.f32 %v3164_v52, %v462_v57 }
  0xa3   : > { %v417_v42 = vsel %vm416_vm7, %v3162_v32, %v413_v39  ;;  %v473_v5 = vmul.f32 %v3166_v58, %v472_v3 }
  0xa4   : > { %v479_v43 = vmul.f32 %v417_v42, %v334_v2  ;;  %v467_v2 = vsel %vm3447_vm10, %v3164_v52, %v463_v59 }
  0xa5   : > { %v484_v4 = vmul.f32 %v467_v2, %v3425_v18  ;;  %v477_v6 = vsel %vm476_vm13, %v3166_v58, %v473_v5 }
  0xa6   : > { %v490_v45 = vmul.f32 %v3440_v41, %v479_v43  ;;  %v485_v7 = vmul.f32 %v477_v6, %v3430_v20 }
  0xa7   : > { %v495_v8 = vmul.f32 %v3440_v41, %v484_v4 }
  0xa8   : > { %v497_v46 = vpack.c.bf16 %v490_v45, %v489_v44  ;;  %v496_v9 = vmul.f32 %v3440_v41, %v485_v7  ;;  %v3552_v7 = vld [vmem:[%s3409_s30 + $0x10] sm:$0xff] }
  0xaa   : > { %3038 = vmatmul.msk.bf16.vlgmr.msra.gmra.mxu0 %vm350_vm0, %v497_v46  ;;  %v500_v10 = vpack.c.bf16 %v496_v9, %v495_v8  ;;  %v344_v9 = vmul.f32 %v3552_v7, %v3552_v7 }
  0xac   : > { %3041 = vmatmul.msk.bf16.vlgmr.msra.gmra.mxu1 %vm350_vm0, %v500_v10  ;;  %v357_v12 = vsel %vm350_vm0, %v344_v9, 0.0 }
 0x127   : > { %v538_v61 = vpop.f32.mrf.mxu0 }
 0x128   : > { %v3451_v63 = vpack.c.bf16 %v538_v61, %v538_v61 }
 0x129   : > { %v3493_v23 = vpop.f32.mrf.mxu1 }
 0x12a   : > { %625 = vrot.lane.b32.xlu0 %v3451_v63, %s3336_s14  ;;  %600 = vrot.lane.b32.xlu1 %v3451_v63, %s3337_s15 }
 0x12b   : > { %563 = vrot.lane.b32.xlu2 %v3451_v63, %s3338_s16 }
 0x12f   : > { %v540_v15 = vpop.f32.mrf.mxu0 }
 0x130   : > { %v3478_v16 = vpack.c.bf16 %v540_v15, %v540_v15  ;;  %v3562_v15 = vld [vmem:[%s3409_s30 + $0x28] sm:$0xff] }
 0x131   : > { %v3504_v25 = vpop.f32.mrf.mxu1 }
 0x132   : > { %623 = vrot.lane.b32.xlu1 %v3451_v63, %s3339_s17 }
 0x13a   : > { %687 = vrot.lane.b32.xlu1 %v3451_v63, %s3340_s18 }
 0x142   : > { %724 = vrot.lane.b32.xlu1 %v3451_v63, %s3341_s19 }
 0x16c   : > { %361 = vadd.xlane.f32.xlu1 %v360_v14 }
 0x185   : > { %v564_v17 = vpop.permute.xlu2 %563  ;;  %915 = vrot.lane.b32.xlu1 %v3478_v16, %s3342_s20 }
 0x186   : > { %v570_v18 = vsel %vm565_vm14, %v564_v17, 0 }
 0x187   : > { %579 = vmatpush.bf16.xpose.msrb.mxu1 %v570_v18  ;;  %v347_v18 = vmul.f32 %v3562_v15, %v3562_v15 }
 0x18d   : > { %1004 = vrot.lane.b32.xlu1 %v3478_v16, %s3343_s21 }
 0x18e   : > { %3042 = vmatmul.msk.bf16.vlgmr.msrb.gmra.mxu1 %vm565_vm14, %v3451_v63 }
 0x19c   : > { %v626_v19 = vpop.permute.xlu0 %625  ;;  %v601_v20 = vpop.permute.xlu1 %600 }
 0x19d   : > { %v607_v21 = vsel %vm605_vm15, %v601_v20, 0  ;;  %v631_v22 = vsel %vm565_vm14, %v626_v19, 0  ;;  %v366_v19 = vsel %vm350_vm0, %v347_v18, 0.0 }
 0x19e   : > { %616 = vmatpush.bf16.msra.mxu3 %v607_v21 }
 0x1a2   : > { %640 = vmatpush.bf16.xpose.msrb.mxu3 %v631_v22 }
 0x1a4   : > { %v624_v39 = vpop.permute.xlu1 %623 }
 0x1ac   : > { %v688_v40 = vpop.permute.xlu1 %687 }
 0x1b4   : > { %v725_v45 = vpop.permute.xlu1 %724 }
 0x1b5   : > { %v730_v47 = vsel %vm605_vm15, %v725_v45, 0 }
 0x20b   : > { %v581_v29 = vpop.f32.mrf.mxu1 }
 0x20c   : > { %v585_v30 = vmul.f32 0.35355338, %v581_v29 }
 0x20e   : > { %v587_v31 = vadd.f32 %v3507_v28, %v585_v30  ;;  %v362_v30 = vpop.xlane.xlu1 %361 }
 0x210   : > { %v588_v32 = vsel %vm565_vm14, %v587_v31, -inf }
 0x211   : > { %589 = vmax.xlane.f32.xlu2 %v588_v32 }
 0x213   : > { %v583_v33 = vpop.f32.mrf.mxu1 }
 0x284   : > { %v590_v34 = vpop.xlane.xlu2 %589 }
 0x285   : > { %v591_v35 = vsub.f32 %v587_v31, %v590_v34  ;;  %v385_v31 = vmul.f32 %v3418_v13, %v362_v30 }
 0x287   : > { %v592_v36 = vmul.f32 1.442695, %v591_v35  ;;  %v393_v32 = vadd.f32 1e-06, %v385_v31 }
 0x289   : > { %3167 = vpow2.f32 %v592_v36  ;;  %vm434_vm2 = vweird.f32 %v393_v32 }
 0x28f   : > { %v3168_v37 = vpop.eup %3167 }
 0x290   : > { %v594_v38 = vsel %vm565_vm14, %v3168_v37, 0.0 }
 0x291   : > { %595 = vadd.xlane.f32.xlu0 %v594_v38 }
 0x2a5   : > { %689 = vrot.lane.b32.xlu0 %v3451_v63, %s3345_s29 }
 0x304   : > { %v596_v42 = vpop.xlane.xlu0 %595 }
 0x305   : > { %3169 = vrcp.f32 %v596_v42 }
 0x30b   : > { %v3170_v43 = vpop.eup %3169 }
 0x30c   : > { %v598_v44 = vmul.f32 %v3170_v43, %v3168_v37 }
 0x30e   : > { %v599_v46 = vpack.c.bf16 %v598_v44, %v598_v44  ;;  %v916_v44 = vpop.permute.xlu1 %915 }
 0x310   : > { %3043 = vmatmul.msk.bf16.vlgmr.msra.gmra.mxu3 %vm565_vm14, %v599_v46 }
 0x311   : > { %739 = vmatpush.bf16.msra.mxu3 %v730_v47 }
 0x317   : > { %v690_v48 = vpop.permute.xlu0 %689 }
 0x318   : > { %v695_v49 = vsel %vm565_vm14, %v690_v48, 0 }
 0x319   : > { %704 = vmatpush.bf16.xpose.msra.mxu1 %v695_v49  ;;  %v921_v49 = vsel %vm605_vm15, %v916_v44, 0 }
 0x320   : > { %3044 = vmatmul.msk.bf16.vlgmr.msrb.gmra.mxu3 %vm565_vm14, %v624_v39  ;;  %3046 = vmatmul.msk.bf16.vlgmr.msra.gmra.mxu1 %vm565_vm14, %v688_v40 }
 0x393   : > { %v618_v50 = vpop.f32.mrf.mxu3 }
 0x394   : > { %622 = vst.msk [vmem:[#allocation2] sm:$0xff] %vm565_vm14, %v618_v50 }
 0x39b   : > { %v620_v51 = vpop.f32.mrf.mxu3 }
 0x39d   : > { %v706_v52 = vpop.f32.mrf.mxu1 }
 0x39e   : > { %v710_v53 = vmul.f32 0.35355338, %v706_v52 }
 0x3a0   : > { %v711_v54 = vadd.f32 %v710_v53, %v3507_v28 }
 0x3a2   : > { %v712_v55 = vsel %vm565_vm14, %v711_v54, -inf }
 0x3a3   : > { %v642_v56 = vpop.f32.mrf.mxu3  ;;  %713 = vmax.xlane.f32.xlu0 %v712_v55 }
 0x3a4   : > { %v646_v57 = vmul.f32 0.35355338, %v642_v56 }
 0x3a5   : > { %v708_v58 = vpop.f32.mrf.mxu1 }
 0x3a6   : > { %v3523_v59 = vadd.f32 %v646_v57, %v3507_v28 }
 0x3a8   : > { %v648_v60 = vsel %vm565_vm14, %v3523_v59, -inf }
 0x3a9   : > { %649 = vmax.xlane.f32.xlu2 %v648_v60 }
 0x3ab   : > { %v644_v61 = vpop.f32.mrf.mxu3 }
 0x3b7   : > { %753 = vrot.lane.b32.xlu0 %v3451_v63, %s3346_s8 }
 0x3bf   : > { %751 = vrot.lane.b32.xlu0 %v3451_v63, %s3343_s21 }
 0x3c1   : > { %660 = vrot.lane.b32.xlu2 %v3451_v63, %s3342_s20 }
 0x3c7   : > { %820 = vrot.lane.b32.xlu0 %v3478_v16, %s3338_s16 }
 0x3f1   : > { %364 = vadd.xlane.f32.xlu0 %v363_v1 }
 0x405   : > { %788 = vrot.lane.b32.xlu0 %v3451_v63, %s3347_s9 }
 0x40d   : > { %878 = vrot.lane.b32.xlu0 %v3478_v16, %s3339_s17 }
 0x415   : > { %941 = vrot.lane.b32.xlu0 %v3478_v16, %s3340_s18 }
 0x416   : > { %v714_v2 = vpop.xlane.xlu0 %713 }
 0x417   : > { %v715_v3 = vsub.f32 %v711_v54, %v714_v2 }
 0x419   : > { %v716_v4 = vmul.f32 1.442695, %v715_v3 }
 0x41b   : > { %3171 = vpow2.f32 %v716_v4 }
 0x41c   : > { %v3547_v5 = vpop.xlane.xlu2 %649  ;;  %3173 = vrsqrt.f32 %v393_v32 }
 0x41d   : > { %943 = vrot.lane.b32.xlu0 %v3478_v16, %s3345_s29 }
 0x421   : > { %v3172_v6 = vpop.eup %3171 }
 0x422   : > { %v718_v63 = vsel %vm565_vm14, %v3172_v6, 0.0  ;;  %v3174_v36 = vpop.eup %3173 }
 0x423   : > { %719 = vadd.xlane.f32.xlu2 %v718_v63  ;;  %v429_v39 = vmul.f32 %v3174_v36, %v393_v32  ;;  %vm435_vm3 = vweird.f32 %v3174_v36 }
 0x424   : > { %v661_v8 = vpop.permute.xlu2 %660  ;;  %vm3596_vm4 = vmor %vm434_vm2, %vm435_vm3  ;;  %vm685_vm2 = vcmask 130112   ;;  %vm749_vm3 = vcmask 195712  }
 0x425   : > { %1041 = vrot.lane.b32.xlu0 %v3478_v16, %s3347_s9  ;;  %v666_v10 = vsel %vm605_vm15, %v661_v8, 0  ;;  %v430_v46 = vmul.f32 %v3174_v36, %v429_v39 }
 0x426   : > { %675 = vmatpush.bf16.msra.mxu2 %v666_v10 }
 0x427   : > { %v431_v50 = vmul.f32 0.5, %v430_v46 }
 0x429   : > { %v754_v14 = vpop.permute.xlu0 %753  ;;  %v432_v55 = vsub.f32 1.5, %v431_v50  ;;  %v651_v50 = vsub.f32 %v3523_v59, %v3547_v5 }
 0x42a   : > { %v759_v17 = vsel %vm565_vm14, %v754_v14, 0 }
 0x42b   : > { %358 = vadd.xlane.f32.xlu2 %v357_v12  ;;  %768 = vmatpush.bf16.xpose.msrb.mxu2 %v759_v17  ;;  %v433_v61 = vmul.f32 %v3174_v36, %v432_v55 }
 0x42d   : > { %v437_v8 = vsel %vm3596_vm4, %v3174_v36, %v433_v61 }
 0x42e   : > { %v481_v17 = vmul.f32 %v437_v8, %v3473_v11  ;;  %v3727_v8 = vpack.c.bf16 %v3504_v25, %v3504_v25 }
 0x430   : > { %v492_v30 = vmul.f32 %v3440_v41, %v481_v17 }
 0x431   : > { %v3568_v20 = vpop.permute.xlu0 %751 }
 0x433   : > { %367 = vadd.xlane.f32.xlu2 %v366_v19 }
 0x439   : > { %v821_v21 = vpop.permute.xlu0 %820 }
 0x43a   : > { %v826_v22 = vsel %vm565_vm14, %v821_v21, 0 }
 0x43b   : > { %835 = vmatpush.bf16.xpose.msrb.mxu3 %v826_v22 }
 0x44b   : > { %856 = vrot.lane.b32.xlu2 %v3478_v16, %s3337_s15 }
 0x453   : > { %880 = vrot.lane.b32.xlu2 %v3478_v16, %s3336_s14 }
 0x45b   : > { %978 = vrot.lane.b32.xlu2 %v3478_v16, %s3341_s19 }
 0x463   : > { %1006 = vrot.lane.b32.xlu2 %v3478_v16, %s3346_s8 }
 0x464   : > { %v365_v24 = vpop.xlane.xlu0 %364 }
 0x465   : > { %v386_v35 = vmul.f32 %v3418_v13, %v365_v24 }
 0x467   : > { %v3584_v37 = vadd.f32 1e-06, %v386_v35 }
 0x469   : > { %vm444_vm8 = vweird.f32 %v3584_v37 }
 0x477   : > { %v789_v27 = vpop.permute.xlu0 %788 }
 0x478   : > { %v794_v29 = vsel %vm605_vm15, %v789_v27, 0 }
 0x479   : > { %803 = vmatpush.bf16.msrb.mxu1 %v794_v29 }
 0x47f   : > { %v3581_v33 = vpop.permute.xlu0 %878 }
 0x487   : > { %v3586_v38 = vpop.permute.xlu0 %941 }
 0x48f   : > { %v3592_v52 = vpop.permute.xlu0 %943 }
 0x496   : > { %v720_v34 = vpop.xlane.xlu2 %719 }
 0x497   : > { %3175 = vrcp.f32 %v720_v34 }
 0x498   : > { %3177 = vrsqrt.f32 %v3584_v37 }
 0x49d   : > { %v3176_v40 = vpop.eup %3175 }
 0x49e   : > { %v722_v42 = vmul.f32 %v3176_v40, %v3172_v6  ;;  %v359_v43 = vpop.xlane.xlu2 %358  ;;  %v3178_v51 = vpop.eup %3177 }
 0x49f   : > { %v384_v45 = vmul.f32 %v3418_v13, %v359_v43  ;;  %v439_v56 = vmul.f32 %v3178_v51, %v3584_v37  ;;  %vm445_vm9 = vweird.f32 %v3178_v51 }
 0x4a0   : > { %v723_v47 = vpack.c.bf16 %v722_v42, %v722_v42  ;;  %vm446_vm12 = vmor %vm444_vm8, %vm445_vm9  ;;  %vm813_vm9 = vcmask 261312  }
 0x4a1   : > { %v392_v48 = vadd.f32 1e-06, %v384_v45  ;;  %v440_v0 = vmul.f32 %v3178_v51, %v439_v56 }
 0x4a2   : > { %3047 = vmatmul.msk.bf16.vlgmr.msra.gmra.mxu3 %vm565_vm14, %v723_v47 }
 0x4a3   : > { %3179 = vrsqrt.f32 %v392_v48  ;;  %930 = vmatpush.bf16.msra.mxu3 %v921_v49  ;;  %v441_v6 = vmul.f32 0.5, %v440_v0  ;;  %vm424_vm6 = vweird.f32 %v392_v48 }
 0x4a5   : > { %v442_v18 = vsub.f32 1.5, %v441_v6  ;;  %v3691_v6 = vpack.c.bf16 %v3493_v23, %v3493_v23  ;;  %v3717_v23 = vpop.permute.xlu1 %1004 }
 0x4a6   : > { %v368_v53 = vpop.xlane.xlu2 %367 }
 0x4a7   : > { %v387_v54 = vmul.f32 %v3418_v13, %v368_v53  ;;  %v1042_v13 = vpop.permute.xlu0 %1041  ;;  %v443_v31 = vmul.f32 %v3178_v51, %v442_v18  ;;  %v652_v53 = vmul.f32 1.442695, %v651_v50 }
 0x4a8   : > { %v1047_v10 = vsel %vm605_vm15, %v1042_v13, 0 }
 0x4a9   : > { %v3180_v57 = vpop.eup %3179  ;;  %v395_v58 = vadd.f32 1e-06, %v387_v54 }
 0x4aa   : > { %v419_v60 = vmul.f32 %v3180_v57, %v392_v48  ;;  %vm425_vm5 = vweird.f32 %v3180_v57 }
 0x4ab   : > { %3181 = vrsqrt.f32 %v395_v58  ;;  %vm426_vm7 = vmor %vm424_vm6, %vm425_vm5  ;;  %vm454_vm10 = vweird.f32 %v395_v58 }
 0x4ac   : > { %v420_v1 = vmul.f32 %v3180_v57, %v419_v60  ;;  %3183 = vpow2.f32 %v652_v53 }
 0x4ae   : > { %v421_v3 = vmul.f32 0.5, %v420_v1  ;;  %v3600_v4 = vpop.permute.xlu2 %856 }
 0x4b0   : > { %v422_v63 = vsub.f32 1.5, %v421_v3 }
 0x4b1   : > { %v3182_v9 = vpop.eup %3181 }
 0x4b2   : > { %v423_v12 = vmul.f32 %v3180_v57, %v422_v63  ;;  %v449_v14 = vmul.f32 %v3182_v9, %v395_v58  ;;  %3050 = vmatmul.msk.bf16.vlgmr.msrb.gmra.mxu3 %vm565_vm14, %v3478_v16  ;;  %vm455_vm11 = vweird.f32 %v3182_v9  ;;  %v3184_v60 = vpop.eup %3183 }
 0x4b3   : > { %1056 = vmatpush.bf16.msrb.mxu3 %v1047_v10  ;;  %vm456_vm13 = vmor %vm454_vm10, %vm455_vm11  ;;  %v654_v5 = vsel %vm565_vm14, %v3184_v60, 0.0 }
 0x4b4   : > { %v450_v19 = vmul.f32 %v3182_v9, %v449_v14  ;;  %v427_v21 = vsel %vm426_vm7, %v3180_v57, %v423_v12 }
 0x4b5   : > { %v480_v22 = vmul.f32 %v427_v21, %v3552_v7  ;;  %v447_v7 = vsel %vm446_vm12, %v3178_v51, %v443_v31  ;;  %v815_v51 = vld [vmem:[%s3501_s28 + $0x1] sm:$0x1] }
 0x4b6   : > { %v451_v24 = vmul.f32 0.5, %v450_v19  ;;  %v881_v27 = vpop.permute.xlu2 %880  ;;  %v482_v39 = vmul.f32 %v447_v7, %v3536_v62  ;;  %vm816_vm1 = vcmp.gt.f32.partialorder %v815_v51, 0.0 }
 0x4b7   : > { %v886_v29 = vsel %vm565_vm14, %v881_v27, 0  ;;  %v491_v16 = vmul.f32 %v3440_v41, %v480_v22  ;;  %v817_v54 = vsel %vm816_vm1, 0.0, %v3344_v26  ;;  %v862_v22 = vsel %vm605_vm15, %v3600_v4, 0 }
 0x4b8   : > { %v452_v11 = vsub.f32 1.5, %v451_v24  ;;  %895 = vmatpush.bf16.xpose.msra.mxu1 %v886_v29  ;;  %v493_v42 = vmul.f32 %v3440_v41, %v482_v39  ;;  %v3647_v57 = vperm.slane %v817_v54, 0  ;;  %v949_v29 = vsel %vm565_vm14, %v3592_v52, 0 }
 0x4b9   : > { %v498_v32 = vpack.c.bf16 %v492_v30, %v491_v16 }
 0x4ba   : > { %v453_v34 = vmul.f32 %v3182_v9, %v452_v11 }
 0x4bb   : > { %3039 = vmatmul.msk.bf16.gmra.mxu0 %vm350_vm0, %v498_v32 }
 0x4bc   : > { %v457_v35 = vsel %vm456_vm13, %v3182_v9, %v453_v34 }
 0x4bd   : > { %v483_v40 = vmul.f32 %v457_v35, %v3562_v15 }
 0x4be   : > { %v979_v36 = vpop.permute.xlu2 %978 }
 0x4bf   : > { %v984_v37 = vsel %vm605_vm15, %v979_v36, 0  ;;  %v494_v43 = vmul.f32 %v3440_v41, %v483_v40 }
 0x4c0   : > { %993 = vmatpush.bf16.msrb.mxu0 %v984_v37 }
 0x4c1   : > { %v499_v44 = vpack.c.bf16 %v494_v43, %v493_v42 }
 0x4c6   : > { %v3672_v2 = vpop.permute.xlu2 %1006 }
 0x4cb   : > { %3040 = vmatmul.msk.bf16.gmra.mxu0 %vm350_vm0, %v499_v44 }
 0x525   : > { %v741_v45 = vpop.f32.mrf.mxu3 }
 0x52d   : > { %v743_v46 = vpop.f32.mrf.mxu3 }
 0x535   : > { %v837_v47 = vpop.f32.mrf.mxu3 }
 0x536   : > { %v841_v56 = vmul.f32 0.35355338, %v837_v47 }
 0x538   : > { %v543_v48 = vpop.f32.mrf.mxu0  ;;  %v843_v59 = vadd.f32 %v3647_v57, %v841_v56 }
 0x539   : > { %v3620_v49 = vpack.c.bf16 %v543_v48, %v543_v48 }
 0x53a   : > { %v844_v61 = vsel %vm565_vm14, %v843_v59, -inf }
 0x53b   : > { %1132 = vrot.lane.b32.xlu1 %v3620_v49, %s3336_s14  ;;  %1108 = vrot.lane.b32.xlu2 %v3620_v49, %s3337_s15 }
 0x53c   : > { %1072 = vrot.lane.b32.xlu0 %v3620_v49, %s3338_s16 }
 0x53d   : > { %v839_v41 = vpop.f32.mrf.mxu3 }
 0x540   : > { %v545_v62 = vpop.f32.mrf.mxu0 }
 0x541   : > { %v3635_v15 = vpack.c.bf16 %v545_v62, %v545_v62 }
 0x543   : > { %1195 = vrot.lane.b32.xlu1 %v3620_v49, %s3345_s29  ;;  %1130 = vrot.lane.b32.xlu2 %v3620_v49, %s3339_s17 }
 0x544   : > { %1167 = vrot.lane.b32.xlu0 %v3620_v49, %s3342_s20 }
 0x548   : > { %v548_v55 = vpop.f32.mrf.mxu0 }
 0x549   : > { %v3649_v58 = vpack.c.bf16 %v548_v55, %v548_v55 }
 0x54b   : > { %746 = vrot.lane.b32.xlu2 %v741_v45, %s3348_s10 }
 0x550   : > { %v550_v0 = vpop.f32.mrf.mxu0 }
 0x551   : > { %v3666_v1 = vpack.c.bf16 %v550_v0, %v550_v0 }
 0x553   : > { %1324 = vrot.lane.b32.xlu2 %v3635_v15, %s3338_s16 }
 0x55b   : > { %1510 = vrot.lane.b32.xlu2 %v3635_v15, %s3346_s8 }
 0x563   : > { %1508 = vrot.lane.b32.xlu2 %v3635_v15, %s3343_s21 }
 0x56b   : > { %1636 = vrot.lane.b32.xlu2 %v3649_v58, %s3336_s14 }
 0x56d   : > { %655 = vadd.xlane.f32.xlu1 %v654_v5 }
 0x56e   : > { %845 = vmax.xlane.f32.xlu0 %v844_v61 }
 0x573   : > { %1762 = vrot.lane.b32.xlu2 %v3649_v58, %s3346_s8 }
 0x57b   : > { %1697 = vrot.lane.b32.xlu2 %v3649_v58, %s3340_s18 }
 0x582   : > { %1193 = vrot.lane.b32.xlu0 %v3620_v49, %s3340_s18 }
 0x583   : > { %1760 = vrot.lane.b32.xlu2 %v3649_v58, %s3343_s21 }
 0x586   : > { %1258 = vrot.lane.b32.xlu1 %v3620_v49, %s3346_s8 }
 0x58a   : > { %1699 = vrot.lane.b32.xlu0 %v3649_v58, %s3345_s29 }
 0x58b   : > { %1888 = vrot.lane.b32.xlu2 %v3666_v1, %s3336_s14 }
 0x58e   : > { %1256 = vrot.lane.b32.xlu1 %v3620_v49, %s3343_s21 }
 0x592   : > { %1828 = vrot.lane.b32.xlu0 %v3666_v1, %s3338_s16 }
 0x593   : > { %1951 = vrot.lane.b32.xlu2 %v3666_v1, %s3345_s29 }
 0x595   : > { %v1109_v3 = vpop.permute.xlu2 %1108 }
 0x596   : > { %v1114_v13 = vsel %vm605_vm15, %v1109_v3, 0  ;;  %1384 = vrot.lane.b32.xlu1 %v3635_v15, %s3336_s14 }
 0x597   : > { %1123 = vmatpush.bf16.msra.mxu0 %v1114_v13 }
 0x59a   : > { %1886 = vrot.lane.b32.xlu0 %v3666_v1, %s3339_s17 }
 0x59b   : > { %1949 = vrot.lane.b32.xlu2 %v3666_v1, %s3340_s18 }
 0x59d   : > { %v3749_v32 = vpop.permute.xlu2 %1130 }
 0x59e   : > { %1382 = vrot.lane.b32.xlu1 %v3635_v15, %s3339_s17 }
 0x5a2   : > { %2014 = vrot.lane.b32.xlu0 %v3666_v1, %s3346_s8 }
 0x5a3   : > { %2140 = vrot.lane.b32.xlu2 %v3691_v6, %s3336_s14 }
 0x5a5   : > { %v747_v7 = vpop.permute.xlu2 %746 }
 0x5a6   : > { %1447 = vrot.lane.b32.xlu1 %v3635_v15, %s3345_s29 }
 0x5aa   : > { %2012 = vrot.lane.b32.xlu0 %v3666_v1, %s3343_s21 }
 0x5ab   : > { %1230 = vrot.lane.b32.xlu2 %v3620_v49, %s3341_s19 }
 0x5ad   : > { %v3721_v63 = vpop.permute.xlu1 %1132  ;;  %v1325_v35 = vpop.permute.xlu2 %1324 }
 0x5ae   : > { %1445 = vrot.lane.b32.xlu1 %v3635_v15, %s3340_s18  ;;  %v1073_v10 = vpop.permute.xlu0 %1072 }
 0x5af   : > { %v1078_v54 = vsel %vm565_vm14, %v1073_v10, 0  ;;  %v1330_v10 = vsel %vm565_vm14, %v1325_v35, 0 }
 0x5b2   : > { %2138 = vrot.lane.b32.xlu0 %v3691_v6, %s3339_s17 }
 0x5b3   : > { %2266 = vrot.lane.b32.xlu2 %v3691_v6, %s3346_s8 }
 0x5b5   : > { %v1196_v9 = vpop.permute.xlu1 %1195 }
 0x5b6   : > { %1576 = vrot.lane.b32.xlu1 %v3649_v58, %s3338_s16  ;;  %v3731_v14 = vpop.permute.xlu0 %1167  ;;  %v1201_v0 = vsel %vm565_vm14, %v1196_v9, 0 }
 0x5ba   : > { %2203 = vrot.lane.b32.xlu0 %v3691_v6, %s3345_s29 }
 0x5bb   : > { %2264 = vrot.lane.b32.xlu2 %v3691_v6, %s3343_s21 }
 0x5be   : > { %1634 = vrot.lane.b32.xlu1 %v3649_v58, %s3339_s17 }
 0x5c6   : > { %2080 = vrot.lane.b32.xlu1 %v3691_v6, %s3338_s16 }
 0x5ce   : > { %2201 = vrot.lane.b32.xlu1 %v3691_v6, %s3340_s18 }
 0x5d6   : > { %2332 = vrot.lane.b32.xlu1 %v3727_v8, %s3338_s16 }
 0x5e0   : > { %v656_v12 = vpop.xlane.xlu1 %655 }
 0x5e1   : > { %3185 = vrcp.f32 %v656_v12  ;;  %v846_v21 = vpop.xlane.xlu0 %845 }
 0x5e2   : > { %v847_v25 = vsub.f32 %v843_v59, %v846_v21 }
 0x5e4   : > { %v848_v24 = vmul.f32 1.442695, %v847_v25 }
 0x5e6   : > { %3187 = vpow2.f32 %v848_v24 }
 0x5e7   : > { %v3186_v17 = vpop.eup %3185 }
 0x5e8   : > { %v658_v18 = vmul.f32 %v3186_v17, %v3184_v60 }
 0x5ea   : > { %v659_v19 = vpack.c.bf16 %v658_v18, %v658_v18 }
 0x5ec   : > { %3045 = vmatmul.msk.bf16.vlgmr.msra.gmra.mxu2 %vm565_vm14, %v659_v19  ;;  %v3188_v27 = vpop.eup %3187 }
 0x5ed   : > { %871 = vmatpush.bf16.msra.mxu2 %v862_v22  ;;  %v850_v16 = vsel %vm565_vm14, %v3188_v27, 0.0 }
 0x5f4   : > { %v1194_v12 = vpop.permute.xlu0 %1193 }
 0x5f8   : > { %v3741_v30 = vpop.permute.xlu1 %1258 }
 0x5fc   : > { %3048 = vmatmul.msk.bf16.vlgmr.msrb.gmra.mxu2 %vm565_vm14, %v3568_v20  ;;  %v3751_v20 = vpop.permute.xlu2 %1510  ;;  %v1700_v22 = vpop.permute.xlu0 %1699 }
 0x5fd   : > { %958 = vmatpush.bf16.xpose.msrb.mxu2 %v949_v29  ;;  %v1705_v25 = vsel %vm565_vm14, %v1700_v22, 0 }
 0x600   : > { %851 = vadd.xlane.f32.xlu1 %v850_v16  ;;  %v3743_v4 = vpop.permute.xlu1 %1256 }
 0x604   : > { %v3755_v39 = vpop.permute.xlu2 %1508  ;;  %v1829_v24 = vpop.permute.xlu0 %1828 }
 0x608   : > { %v3745_v31 = vpop.permute.xlu1 %1384 }
 0x60c   : > { %v3759_v42 = vpop.permute.xlu2 %1636  ;;  %v3802_v29 = vpop.permute.xlu0 %1886 }
 0x610   : > { %v3747_v11 = vpop.permute.xlu1 %1382 }
 0x614   : > { %v3763_v44 = vpop.permute.xlu2 %1762  ;;  %v3804_v16 = vpop.permute.xlu0 %2014 }
 0x618   : > { %v1448_v34 = vpop.permute.xlu1 %1447 }
 0x619   : > { %v1453_v18 = vsel %vm565_vm14, %v1448_v34, 0 }
 0x61c   : > { %v1698_v47 = vpop.permute.xlu2 %1697 }
 0x620   : > { %v1446_v52 = vpop.permute.xlu1 %1445 }
 0x624   : > { %v3768_v51 = vpop.permute.xlu2 %1760 }
 0x628   : > { %v1577_v36 = vpop.permute.xlu1 %1576 }
 0x629   : > { %v1582_v9 = vsel %vm565_vm14, %v1577_v36, 0 }
 0x62c   : > { %v3774_v5 = vpop.permute.xlu2 %1888 }
 0x630   : > { %v3753_v37 = vpop.permute.xlu1 %1634 }
 0x634   : > { %v1952_v3 = vpop.permute.xlu2 %1951 }
 0x635   : > { %v1957_v34 = vsel %vm565_vm14, %v1952_v3, 0 }
 0x638   : > { %v3757_v40 = vpop.permute.xlu1 %2080 }
 0x63c   : > { %v1950_v13 = vpop.permute.xlu2 %1949 }
 0x640   : > { %v3761_v43 = vpop.permute.xlu1 %2201 }
 0x648   : > { %v3765_v45 = vpop.permute.xlu1 %2332 }
 0x649   : > { %v2338_v3 = vsel %vm565_vm14, %v3765_v45, 0 }
 0x66f   : > { %v677_v46 = vpop.f32.mrf.mxu2 }
 0x670   : > { %682 = vrot.lane.b32.xlu2 %v677_v46, %s3349_s11  ;;  %v2086_v46 = vsel %vm565_vm14, %v3757_v40, 0 }
 0x673   : > { %v852_v48 = vpop.xlane.xlu1 %851 }
 0x674   : > { %3189 = vrcp.f32 %v852_v48 }
 0x677   : > { %v679_v41 = vpop.f32.mrf.mxu2 }
 0x67a   : > { %v3190_v62 = vpop.eup %3189 }
 0x67b   : > { %v854_v50 = vmul.f32 %v3190_v62, %v3188_v27  ;;  %v1834_v27 = vsel %vm565_vm14, %v1829_v24, 0 }
 0x67d   : > { %v855_v53 = vpack.c.bf16 %v854_v50, %v854_v50 }
 0x67f   : > { %v770_v55 = vpop.f32.mrf.mxu2  ;;  %3051 = vmatmul.msk.bf16.vlgmr.msra.gmra.mxu2 %vm565_vm14, %v855_v53 }
 0x680   : > { %v774_v56 = vmul.f32 0.35355338, %v770_v55  ;;  %1087 = vmatpush.bf16.xpose.msra.mxu2 %v1078_v54 }
 0x682   : > { %v775_v60 = vadd.f32 %v774_v56, %v3507_v28  ;;  %v3782_v28 = vpop.permute.xlu2 %2140 }
 0x684   : > { %v776_v59 = vsel %vm565_vm14, %v775_v60, -inf }
 0x685   : > { %777 = vmax.xlane.f32.xlu1 %v776_v59  ;;  %v1067_v59 = vld [vmem:[%s3501_s28 + $0x2] sm:$0x1] }
 0x686   : > { %vm1068_vm4 = vcmp.gt.f32.partialorder %v1067_v59, 0.0 }
 0x687   : > { %v772_v61 = vpop.f32.mrf.mxu2 }
 0x68a   : > { %v3784_v17 = vpop.permute.xlu2 %1230 }
 0x68f   : > { %3054 = vmatmul.msk.bf16.vlgmr.msrb.gmra.mxu2 %vm565_vm14, %v3586_v38 }
 0x690   : > { %1210 = vmatpush.bf16.xpose.msrb.mxu2 %v1201_v0  ;;  %v1069_v0 = vsel %vm1068_vm4, 0.0, %v3344_v26 }
 0x692   : > { %v3788_v38 = vpop.permute.xlu2 %2266 }
 0x69a   : > { %v3793_v19 = vpop.permute.xlu2 %2264 }
 0x69f   : > { %3058 = vmatmul.msk.bf16.vlgmr.msra.gmra.mxu2 %vm565_vm14, %v3620_v49 }
 0x6a0   : > { %1339 = vmatpush.bf16.xpose.msra.mxu2 %v1330_v10 }
 0x6af   : > { %3062 = vmatmul.msk.bf16.vlgmr.msrb.gmra.mxu2 %vm565_vm14, %v1194_v12 }
 0x6b0   : > { %1462 = vmatpush.bf16.xpose.msrb.mxu2 %v1453_v18 }
 0x6bf   : > { %3066 = vmatmul.msk.bf16.vlgmr.msra.gmra.mxu2 %vm565_vm14, %v3635_v15 }
 0x6c0   : > { %1591 = vmatpush.bf16.xpose.msra.mxu2 %v1582_v9 }
 0x6ca   : > { %v683_v21 = vpop.permute.xlu2 %682 }
 0x6cb   : > { %686 = vst.msk [vmem:[#allocation2] sm:$0xff] %vm685_vm2, %v683_v21 }
 0x6cc   : > { %750 = vst.msk [vmem:[#allocation2] sm:$0xff] %vm749_vm3, %v747_v7  ;;  %v3808_v7 = vpop.permute.xlu0 %2012 }
 0x6cf   : > { %3070 = vmatmul.msk.bf16.vlgmr.msrb.gmra.mxu2 %vm565_vm14, %v1446_v52 }
 0x6d0   : > { %1714 = vmatpush.bf16.xpose.msrb.mxu2 %v1705_v25 }
 0x6d4   : > { %v3814_v48 = vpop.permute.xlu0 %2138 }
 0x6dc   : > { %v2204_v53 = vpop.permute.xlu0 %2203 }
 0x6dd   : > { %v2209_v40 = vsel %vm565_vm14, %v2204_v53, 0 }
 0x6df   : > { %3074 = vmatmul.msk.bf16.vlgmr.msra.gmra.mxu2 %vm565_vm14, %v3649_v58 }
 0x6e0   : > { %1843 = vmatpush.bf16.xpose.msra.mxu2 %v1834_v27 }
 0x6ef   : > { %3078 = vmatmul.msk.bf16.vlgmr.msrb.gmra.mxu2 %vm565_vm14, %v1698_v47 }
 0x6f0   : > { %1966 = vmatpush.bf16.xpose.msrb.mxu2 %v1957_v34 }
 0x6f8   : > { %v778_v52 = vpop.xlane.xlu1 %777 }
 0x6f9   : > { %v779_v35 = vsub.f32 %v775_v60, %v778_v52 }
 0x6fb   : > { %v780_v36 = vmul.f32 1.442695, %v779_v35 }
 0x6fd   : > { %3191 = vpow2.f32 %v780_v36 }
 0x6ff   : > { %3082 = vmatmul.msk.bf16.vlgmr.msra.gmra.mxu2 %vm565_vm14, %v3666_v1 }
 0x700   : > { %2095 = vmatpush.bf16.xpose.msra.mxu2 %v2086_v46  ;;  %v1319_v46 = vld [vmem:[%s3501_s28 + $0x3] sm:$0x1] }
 0x701   : > { %vm1320_vm5 = vcmp.gt.f32.partialorder %v1319_v46, 0.0 }
 0x702   : > { %v873_v41 = vpop.f32.mrf.mxu2 }
 0x703   : > { %v3816_v62 = vpop.eup %3191  ;;  %877 = vst.msk [vmem:[#allocation2 + $0x8] sm:$0xff] %vm565_vm14, %v873_v41 }
 0x704   : > { %v782_v47 = vsel %vm565_vm14, %v3816_v62, 0.0 }
 0x705   : > { %783 = vadd.xlane.f32.xlu2 %v782_v47  ;;  %v1321_v47 = vsel %vm1320_vm5, 0.0, %v3344_v26 }
 0x706   : > { %v3872_v53 = vperm.slane %v1321_v47, 0 }
 0x70a   : > { %v875_v50 = vpop.f32.mrf.mxu2 }
 0x70f   : > { %3086 = vmatmul.msk.bf16.vlgmr.msrb.gmra.mxu2 %vm565_vm14, %v1950_v13  ;;  %v3836_v13 = vperm.slane %v1069_v0, 0 }
 0x710   : > { %2218 = vmatpush.bf16.xpose.msrb.mxu2 %v2209_v40 }
 0x712   : > { %v960_v54 = vpop.f32.mrf.mxu2 }
 0x713   : > { %v964_v55 = vmul.f32 0.35355338, %v960_v54  ;;  %v1571_v54 = vld [vmem:[%s3501_s28 + $0x4] sm:$0x1] }
 0x714   : > { %vm1572_vm6 = vcmp.gt.f32.partialorder %v1571_v54, 0.0 }
 0x715   : > { %v3824_v56 = vadd.f32 %v964_v55, %v3647_v57 }
 0x717   : > { %v966_v60 = vsel %vm565_vm14, %v3824_v56, -inf }
 0x718   : > { %967 = vmax.xlane.f32.xlu1 %v966_v60 }
 0x71a   : > { %v962_v61 = vpop.f32.mrf.mxu2 }
 0x71b   : > { %v1573_v61 = vsel %vm1572_vm6, 0.0, %v3344_v26 }
 0x71d   : > { %2392 = vrot.lane.b32.xlu2 %v3727_v8, %s3336_s14 }
 0x71f   : > { %3090 = vmatmul.msk.bf16.vlgmr.msra.gmra.mxu2 %vm565_vm14, %v3691_v6 }
 0x720   : > { %2347 = vmatpush.bf16.xpose.msra.mxu2 %v2338_v3  ;;  %v1823_v3 = vld [vmem:[%s3501_s28 + $0x5] sm:$0x1] }
 0x721   : > { %vm1824_vm7 = vcmp.gt.f32.partialorder %v1823_v3, 0.0 }
 0x722   : > { %v1089_v10 = vpop.f32.mrf.mxu2 }
 0x723   : > { %v1093_v12 = vmul.f32 0.35355338, %v1089_v10 }
 0x725   : > { %2455 = vrot.lane.b32.xlu2 %v3727_v8, %s3345_s29  ;;  %v3841_v18 = vadd.f32 %v3836_v13, %v1093_v12 }
 0x727   : > { %v1096_v9 = vsel %vm565_vm14, %v3841_v18, -inf }
 0x728   : > { %1097 = vmax.xlane.f32.xlu1 %v1096_v9 }
 0x72a   : > { %v1091_v21 = vpop.f32.mrf.mxu2 }
 0x72b   : > { %v3889_v21 = vperm.slane %v1573_v61, 0 }
 0x72d   : > { %2453 = vrot.lane.b32.xlu2 %v3727_v8, %s3340_s18 }
 0x72f   : > { %3094 = vmatmul.msk.bf16.vlgmr.msrb.gmra.mxu2 %vm565_vm14, %v3761_v43 }
 0x732   : > { %v1212_v45 = vpop.f32.mrf.mxu2 }
 0x733   : > { %v1216_v22 = vmul.f32 0.35355338, %v1212_v45 }
 0x735   : > { %1545 = vrot.lane.b32.xlu2 %v3635_v15, %s3347_s9  ;;  %v3852_v25 = vadd.f32 %v1216_v22, %v3836_v13  ;;  %v1825_v22 = vsel %vm1824_vm7, 0.0, %v3344_v26 }
 0x737   : > { %v1218_v24 = vsel %vm565_vm14, %v3852_v25, -inf }
 0x738   : > { %1219 = vmax.xlane.f32.xlu0 %v1218_v24 }
 0x73a   : > { %v1214_v27 = vpop.f32.mrf.mxu2 }
 0x73d   : > { %1482 = vrot.lane.b32.xlu2 %v3635_v15, %s3341_s19 }
 0x73f   : > { %3098 = vmatmul.msk.bf16.vlgmr.msra.gmra.mxu2 %vm565_vm14, %v3727_v8 }
 0x741   : > { %2390 = vrot.lane.b32.xlu1 %v3727_v8, %s3339_s17 }
 0x742   : > { %v1341_v43 = vpop.f32.mrf.mxu2 }
 0x743   : > { %v1345_v50 = vmul.f32 0.35355338, %v1341_v43 }
 0x745   : > { %1797 = vrot.lane.b32.xlu2 %v3649_v58, %s3347_s9  ;;  %v3875_v40 = vadd.f32 %v3872_v53, %v1345_v50 }
 0x747   : > { %v1348_v60 = vsel %vm565_vm14, %v3875_v40, -inf }
 0x749   : > { %2518 = vrot.lane.b32.xlu1 %v3727_v8, %s3346_s8 }
 0x74a   : > { %v1343_v34 = vpop.f32.mrf.mxu2 }
 0x74b   : > { %v3898_v34 = vperm.slane %v1825_v22, 0 }
 0x74c   : > { %1293 = vrot.lane.b32.xlu0 %v3620_v49, %s3347_s9 }
 0x751   : > { %2516 = vrot.lane.b32.xlu1 %v3727_v8, %s3343_s21 }
 0x752   : > { %v1464_v52 = vpop.f32.mrf.mxu2 }
 0x753   : > { %v1468_v49 = vmul.f32 0.35355338, %v1464_v52 }
 0x755   : > { %v3883_v59 = vadd.f32 %v1468_v49, %v3872_v53 }
 0x757   : > { %v1470_v9 = vsel %vm565_vm14, %v3883_v59, -inf }
 0x75a   : > { %v1466_v35 = vpop.f32.mrf.mxu2 }
 0x762   : > { %v1593_v36 = vpop.f32.mrf.mxu2 }
 0x763   : > { %v1597_v10 = vmul.f32 0.35355338, %v1593_v36 }
 0x765   : > { %v3892_v45 = vadd.f32 %v3889_v21, %v1597_v10 }
 0x767   : > { %v1600_v36 = vsel %vm565_vm14, %v3892_v45, -inf }
 0x76a   : > { %v1595_v41 = vpop.f32.mrf.mxu2 }
 0x76b   : > { %v1012_v41 = vsel %vm565_vm14, %v3672_v2, 0 }
 0x772   : > { %v3878_v55 = vpop.f32.mrf.mxu2 }
 0x776   : > { %1349 = vmax.xlane.f32.xlu0 %v1348_v60 }
 0x778   : > { %v784_v0 = vpop.xlane.xlu2 %783 }
 0x779   : > { %3193 = vrcp.f32 %v784_v0  ;;  %v1138_v0 = vsel %vm565_vm14, %v3721_v63, 0 }
 0x77a   : > { %v1718_v12 = vpop.f32.mrf.mxu2 }
 0x77b   : > { %1471 = vmax.xlane.f32.xlu1 %v1470_v9  ;;  %v2075_v12 = vld [vmem:[%s3501_s28 + $0x6] sm:$0x1] }
 0x77c   : > { %vm2076_vm8 = vcmp.gt.f32.partialorder %v2075_v12, 0.0 }
 0x77d   : > { %v2077_v22 = vsel %vm2076_vm8, 0.0, %v3344_v26 }
 0x77e   : > { %v3929_v63 = vperm.slane %v2077_v22, 0 }
 0x77f   : > { %v3194_v24 = vpop.eup %3193 }
 0x780   : > { %v786_v27 = vmul.f32 %v3194_v24, %v3816_v62  ;;  %v3896_v43 = vpop.permute.xlu2 %2392 }
 0x782   : > { %v787_v52 = vpack.c.bf16 %v786_v27, %v786_v27  ;;  %v1845_v35 = vpop.f32.mrf.mxu2  ;;  %v1264_v27 = vsel %vm565_vm14, %v3741_v30, 0 }
 0x783   : > { %v1849_v46 = vmul.f32 0.35355338, %v1845_v35  ;;  %1601 = vmax.xlane.f32.xlu1 %v1600_v36 }
 0x784   : > { %3049 = vmatmul.msk.bf16.vlgmr.msrb.gmra.mxu1 %vm565_vm14, %v787_v52 }
 0x785   : > { %1021 = vmatpush.bf16.xpose.msrb.mxu1 %v1012_v41  ;;  %v3906_v47 = vadd.f32 %v3898_v34, %v1849_v46  ;;  %v1720_v41 = vmul.f32 0.35355338, %v3878_v55 }
 0x787   : > { %v1852_v62 = vsel %vm565_vm14, %v3906_v47, -inf }
 0x788   : > { %v2456_v50 = vpop.permute.xlu2 %2455  ;;  %1853 = vmax.xlane.f32.xlu2 %v1852_v62 }
 0x789   : > { %v2461_v54 = vsel %vm565_vm14, %v2456_v50, 0 }
 0x78a   : > { %1419 = vrot.lane.b32.xlu0 %v3635_v15, %s3342_s20  ;;  %v1847_v49 = vpop.f32.mrf.mxu2  ;;  %2470 = vmatpush.bf16.xpose.msrb.mxu2 %v2461_v54 }
 0x78b   : > { %v968_v36 = vpop.xlane.xlu1 %967 }
 0x78c   : > { %v969_v30 = vsub.f32 %v3824_v56, %v968_v36  ;;  %v1768_v36 = vsel %vm565_vm14, %v3763_v44, 0  ;;  %v1894_v44 = vsel %vm565_vm14, %v3774_v5, 0 }
 0x78e   : > { %v970_v62 = vmul.f32 1.442695, %v969_v30 }
 0x790   : > { %v2454_v2 = vpop.permute.xlu2 %2453  ;;  %3195 = vpow2.f32 %v970_v62 }
 0x791   : > { %3102 = vmatmul.msk.bf16.vlgmr.msrb.gmra.mxu2 %vm565_vm14, %v2454_v2 }
 0x792   : > { %1612 = vrot.lane.b32.xlu0 %v3649_v58, %s3337_s15  ;;  %v1968_v60 = vpop.f32.mrf.mxu2 }
 0x793   : > { %v1972_v61 = vmul.f32 0.35355338, %v1968_v60  ;;  %v1516_v60 = vsel %vm565_vm14, %v3751_v20, 0 }
 0x794   : > { %3052 = vmatmul.msk.bf16.vlgmr.msra.gmra.mxu1 %vm565_vm14, %v3581_v33 }
 0x795   : > { %1147 = vmatpush.bf16.xpose.msra.mxu1 %v1138_v0  ;;  %v3921_v3 = vadd.f32 %v1972_v61, %v3898_v34 }
 0x796   : > { %v3958_v49 = vpop.eup %3195 }
 0x797   : > { %v1974_v10 = vsel %vm565_vm14, %v3921_v3, -inf }
 0x798   : > { %1975 = vmax.xlane.f32.xlu2 %v1974_v10 }
 0x79a   : > { %v1970_v9 = vpop.f32.mrf.mxu2 }
 0x79b   : > { %v1098_v50 = vpop.xlane.xlu1 %1097 }
 0x79c   : > { %1360 = vrot.lane.b32.xlu1 %v3635_v15, %s3337_s15  ;;  %v1099_v56 = vsub.f32 %v3841_v18, %v1098_v50 }
 0x7a2   : > { %v2097_v24 = vpop.f32.mrf.mxu2 }
 0x7a3   : > { %v2101_v33 = vmul.f32 0.35355338, %v2097_v24 }
 0x7a4   : > { %1671 = vrot.lane.b32.xlu1 %v3649_v58, %s3342_s20  ;;  %3056 = vmatmul.msk.bf16.vlgmr.msrb.gmra.mxu1 %vm565_vm14, %v3717_v23  ;;  %v1390_v23 = vsel %vm565_vm14, %v3745_v31, 0  ;;  %v1100_v31 = vmul.f32 1.442695, %v1099_v56 }
 0x7a5   : > { %1273 = vmatpush.bf16.xpose.msrb.mxu1 %v1264_v27  ;;  %v3938_v52 = vadd.f32 %v3929_v63, %v2101_v33  ;;  %v1642_v33 = vsel %vm565_vm14, %v3759_v42, 0 }
 0x7a6   : > { %3197 = vpow2.f32 %v1100_v31 }
 0x7a7   : > { %v2104_v15 = vsel %vm565_vm14, %v3938_v52, -inf }
 0x7a8   : > { %2105 = vmax.xlane.f32.xlu2 %v2104_v15 }
 0x7aa   : > { %v2099_v35 = vpop.f32.mrf.mxu2 }
 0x7ab   : > { %v1220_v61 = vpop.xlane.xlu0 %1219 }
 0x7ac   : > { %1734 = vrot.lane.b32.xlu1 %v3649_v58, %s3341_s19  ;;  %v3953_v58 = vadd.f32 %v1720_v41, %v3889_v21  ;;  %v3968_v18 = vpop.eup %3197  ;;  %v1221_v9 = vsub.f32 %v3852_v25, %v1220_v61  ;;  %v2146_v61 = vsel %vm565_vm14, %v3782_v28, 0  ;;  %v2272_v28 = vsel %vm565_vm14, %v3788_v38, 0 }
 0x7ad   : > { %v1102_v12 = vsel %vm565_vm14, %v3968_v18, 0.0  ;;  %v2398_v38 = vsel %vm565_vm14, %v3896_v43, 0 }
 0x7ae   : > { %v1722_v55 = vsel %vm565_vm14, %v3953_v58, -inf  ;;  %v1222_v20 = vmul.f32 1.442695, %v1221_v9 }
 0x7b0   : > { %3199 = vpow2.f32 %v1222_v20 }
 0x7b2   : > { %v2220_v46 = vpop.f32.mrf.mxu2 }
 0x7b3   : > { %v2224_v10 = vmul.f32 0.35355338, %v2220_v46  ;;  %v3976_v24 = vpop.permute.xlu1 %2390 }
 0x7b4   : > { %1923 = vrot.lane.b32.xlu1 %v3666_v1, %s3342_s20  ;;  %3060 = vmatmul.msk.bf16.vlgmr.msra.gmra.mxu1 %vm565_vm14, %v3749_v32  ;;  %v972_v32 = vsel %vm565_vm14, %v3958_v49, 0.0 }
 0x7b5   : > { %1399 = vmatpush.bf16.xpose.msra.mxu1 %v1390_v23  ;;  %v3974_v22 = vadd.f32 %v2224_v10, %v3929_v63 }
 0x7b6   : > { %v3984_v25 = vpop.eup %3199 }
 0x7b7   : > { %v1224_v15 = vsel %vm565_vm14, %v3984_v25, 0.0 }
 0x7ba   : > { %v2222_v54 = vpop.f32.mrf.mxu2 }
 0x7bb   : > { %v3986_v27 = vpop.permute.xlu1 %2518 }
 0x7bc   : > { %1723 = vmax.xlane.f32.xlu0 %v1722_v55 }
 0x7be   : > { %v3990_v35 = vpop.permute.xlu0 %1293 }
 0x7c2   : > { %v3960_v2 = vpop.f32.mrf.mxu2 }
 0x7c4   : > { %3064 = vmatmul.msk.bf16.vlgmr.msrb.gmra.mxu1 %vm565_vm14, %v3743_v4  ;;  %973 = vadd.xlane.f32.xlu0 %v972_v32  ;;  %v2226_v4 = vsel %vm565_vm14, %v3974_v22, -inf  ;;  %v2020_v32 = vsel %vm565_vm14, %v3804_v16, 0 }
 0x7c5   : > { %1525 = vmatpush.bf16.xpose.msrb.mxu1 %v1516_v60 }
 0x7ca   : > { %v2351_v0 = vpop.f32.mrf.mxu2 }
 0x7cb   : > { %v4023_v0 = vpop.permute.xlu2 %1545 }
 0x7cc   : > { %1103 = vadd.xlane.f32.xlu0 %v1102_v12 }
 0x7d3   : > { %v4032_v9 = vpop.permute.xlu2 %1482 }
 0x7d4   : > { %3068 = vmatmul.msk.bf16.vlgmr.msra.gmra.mxu1 %vm565_vm14, %v3747_v11  ;;  %2227 = vmax.xlane.f32.xlu0 %v2226_v4  ;;  %v3996_v11 = vpop.permute.xlu1 %2516 }
 0x7d5   : > { %1651 = vmatpush.bf16.xpose.msra.mxu1 %v1642_v33 }
 0x7db   : > { %v4040_v4 = vpop.permute.xlu2 %1797 }
 0x7de   : > { %1225 = vadd.xlane.f32.xlu1 %v1224_v15 }
 0x7e4   : > { %3072 = vmatmul.msk.bf16.vlgmr.msrb.gmra.mxu1 %vm565_vm14, %v3755_v39 }
 0x7e5   : > { %1777 = vmatpush.bf16.xpose.msrb.mxu1 %v1768_v36 }
 0x7e9   : > { %v1350_v42 = vpop.xlane.xlu0 %1349 }
 0x7ea   : > { %v1351_v30 = vsub.f32 %v3875_v40, %v1350_v42 }
 0x7ec   : > { %v1352_v46 = vmul.f32 1.442695, %v1351_v30 }
 0x7ee   : > { %3201 = vpow2.f32 %v1352_v46  ;;  %v1472_v41 = vpop.xlane.xlu1 %1471 }
 0x7ef   : > { %v1473_v23 = vsub.f32 %v3883_v59, %v1472_v41 }
 0x7f1   : > { %v1474_v62 = vmul.f32 1.442695, %v1473_v23 }
 0x7f3   : > { %3203 = vpow2.f32 %v1474_v62 }
 0x7f4   : > { %v4000_v50 = vpop.eup %3201  ;;  %3076 = vmatmul.msk.bf16.vlgmr.msra.gmra.mxu1 %vm565_vm14, %v3753_v37 }
 0x7f5   : > { %1903 = vmatpush.bf16.xpose.msra.mxu1 %v1894_v44  ;;  %v1354_v39 = vsel %vm565_vm14, %v4000_v50, 0.0 }
 0x7f6   : > { %v1602_v40 = vpop.xlane.xlu1 %1601  ;;  %1355 = vadd.xlane.f32.xlu1 %v1354_v39 }
 0x7f7   : > { %v1603_v56 = vsub.f32 %v3892_v45, %v1602_v40 }
 0x7f9   : > { %v1604_v54 = vmul.f32 1.442695, %v1603_v56  ;;  %v4009_v59 = vpop.eup %3203 }
 0x7fa   : > { %v1476_v55 = vsel %vm565_vm14, %v4009_v59, 0.0 }
 0x7fb   : > { %3205 = vpow2.f32 %v1604_v54  ;;  %v1854_v42 = vpop.xlane.xlu2 %1853 }
 0x7fc   : > { %v1855_v23 = vsub.f32 %v3906_v47, %v1854_v42 }
 0x7fe   : > { %1477 = vadd.xlane.f32.xlu1 %v1476_v55  ;;  %v1856_v62 = vmul.f32 1.442695, %v1855_v23 }
 0x801   : > { %v4013_v5 = vpop.eup %3205  ;;  %v805_v31 = vpop.f32.mrf.mxu1 }
 0x802   : > { %v1606_v37 = vsel %vm565_vm14, %v4013_v5, 0.0 }
 0x803   : > { %1607 = vadd.xlane.f32.xlu0 %v1606_v37 }
 0x804   : > { %3080 = vmatmul.msk.bf16.vlgmr.msrb.gmra.mxu1 %vm565_vm14, %v3768_v51  ;;  %v4030_v51 = vpop.permute.xlu0 %1419 }
 0x805   : > { %2029 = vmatpush.bf16.xpose.msrb.mxu1 %v2020_v32 }
 0x809   : > { %v807_v45 = vpop.f32.mrf.mxu1 }
 0x80e   : > { %v1361_v15 = vpop.permute.xlu1 %1360 }
 0x811   : > { %v897_v60 = vpop.f32.mrf.mxu1 }
 0x812   : > { %v901_v39 = vmul.f32 0.35355338, %v897_v60  ;;  %v1236_v60 = vsel %vm605_vm15, %v3784_v17, 0 }
 0x814   : > { %3084 = vmatmul.msk.bf16.vlgmr.msra.gmra.mxu1 %vm565_vm14, %v3802_v29  ;;  %v4027_v10 = vpop.f32.mrf.mxu2  ;;  %v4038_v29 = vpop.permute.xlu0 %1612  ;;  %v4057_v43 = vadd.f32 %v901_v39, %v3647_v57 }
 0x815   : > { %2155 = vmatpush.bf16.xpose.msra.mxu1 %v2146_v61  ;;  %v2524_v61 = vsel %vm565_vm14, %v3986_v27, 0 }
 0x816   : > { %v903_v55 = vsel %vm565_vm14, %v4057_v43, -inf }
 0x817   : > { %810 = vrot.lane.b32.xlu1 %v805_v31, %s3350_s12 }
 0x819   : > { %v899_v16 = vpop.f32.mrf.mxu1 }
 0x81c   : > { %v2474_v12 = vpop.f32.mrf.mxu2 }
 0x821   : > { %v1023_v20 = vpop.f32.mrf.mxu1 }
 0x822   : > { %v1027_v16 = vmul.f32 0.35355338, %v1023_v20 }
 0x824   : > { %3088 = vmatmul.msk.bf16.vlgmr.msrb.gmra.mxu1 %vm565_vm14, %v3808_v7  ;;  %v4050_v7 = vpop.permute.xlu1 %1671  ;;  %v4078_v12 = vadd.f32 %v1027_v16, %v3647_v57 }
 0x825   : > { %2281 = vmatpush.bf16.xpose.msrb.mxu1 %v2272_v28 }
 0x826   : > { %v1029_v27 = vsel %vm565_vm14, %v4078_v12, -inf }
 0x829   : > { %v1025_v33 = vpop.f32.mrf.mxu1 }
 0x82f   : > { %v1724_v36 = vpop.xlane.xlu0 %1723 }
 0x830   : > { %v1725_v30 = vsub.f32 %v3953_v58, %v1724_v36 }
 0x831   : > { %v4043_v46 = vpop.f32.mrf.mxu1 }
 0x832   : > { %v1726_v41 = vmul.f32 1.442695, %v1725_v30  ;;  %v1366_v30 = vsel %vm605_vm15, %v1361_v15, 0  ;;  %v1488_v15 = vsel %vm605_vm15, %v4032_v9, 0  ;;  %v1618_v9 = vsel %vm605_vm15, %v4038_v29, 0 }
 0x834   : > { %3207 = vpow2.f32 %v1726_v41  ;;  %3092 = vmatmul.msk.bf16.vlgmr.msra.gmra.mxu1 %vm565_vm14, %v3814_v48  ;;  %v4059_v48 = vpop.permute.xlu1 %1734 }
 0x835   : > { %2407 = vmatpush.bf16.xpose.msra.mxu1 %v2398_v38 }
 0x837   : > { %v974_v44 = vpop.xlane.xlu0 %973 }
 0x838   : > { %3209 = vrcp.f32 %v974_v44  ;;  %v1976_v44 = vpop.xlane.xlu2 %1975 }
 0x839   : > { %v1151_v58 = vpop.f32.mrf.mxu1  ;;  %3211 = vpow2.f32 %v1856_v62 }
 0x83a   : > { %v4052_v40 = vpop.eup %3207 }
 0x83b   : > { %v1728_v47 = vsel %vm565_vm14, %v4052_v40, 0.0 }
 0x83c   : > { %1729 = vadd.xlane.f32.xlu0 %v1728_v47  ;;  %v4080_v17 = vpop.permute.xlu1 %1923  ;;  %v1977_v47 = vsub.f32 %v3921_v3, %v1976_v44 }
 0x83e   : > { %v3210_v56 = vpop.eup %3209 }
 0x83f   : > { %v976_v54 = vmul.f32 %v3210_v56, %v3958_v49  ;;  %v4064_v31 = vpop.eup %3211  ;;  %v1104_v37 = vpop.xlane.xlu0 %1103 }
 0x840   : > { %3213 = vrcp.f32 %v1104_v37  ;;  %v1858_v49 = vsel %vm565_vm14, %v4064_v31, 0.0 }
 0x841   : > { %v4066_v32 = vpop.f32.mrf.mxu1  ;;  %904 = vmax.xlane.f32.xlu1 %v903_v55  ;;  %v977_v45 = vpack.c.bf16 %v976_v54, %v976_v54  ;;  %v1978_v55 = vmul.f32 1.442695, %v1977_v47 }
 0x843   : > { %3055 = vmatmul.msk.bf16.vlgmr.msrb.gmra.mxu0 %vm565_vm14, %v977_v45 }
 0x844   : > { %1245 = vmatpush.bf16.msrb.mxu0 %v1236_v60  ;;  %3096 = vmatmul.msk.bf16.vlgmr.msrb.gmra.mxu1 %vm565_vm14, %v3793_v19 }
 0x845   : > { %2533 = vmatpush.bf16.xpose.msrb.mxu1 %v2524_v61  ;;  %1859 = vadd.xlane.f32.xlu0 %v1858_v49 }
 0x846   : > { %v3214_v33 = vpop.eup %3213 }
 0x847   : > { %v1106_v20 = vmul.f32 %v3214_v33, %v3968_v18  ;;  %v4104_v37 = vpop.xlane.xlu0 %2227 }
 0x849   : > { %v1277_v28 = vpop.f32.mrf.mxu1  ;;  %v1107_v36 = vpack.c.bf16 %v1106_v20, %v1106_v20 }
 0x84a   : > { %v1740_v28 = vsel %vm605_vm15, %v4059_v48, 0 }
 0x84d   : > { %1030 = vmax.xlane.f32.xlu0 %v1029_v27 }
 0x851   : > { %v1401_v19 = vpop.f32.mrf.mxu1  ;;  %v1226_v42 = vpop.xlane.xlu1 %1225 }
 0x852   : > { %3215 = vrcp.f32 %v1226_v42  ;;  %v1405_v61 = vmul.f32 0.35355338, %v1401_v19 }
 0x853   : > { %3059 = vmatmul.msk.bf16.vlgmr.msra.gmra.mxu0 %vm565_vm14, %v1107_v36 }
 0x854   : > { %1375 = vmatpush.bf16.msra.mxu0 %v1366_v30  ;;  %3100 = vmatmul.msk.bf16.vlgmr.msra.gmra.mxu1 %vm565_vm14, %v3976_v24 }
 0x858   : > { %v3216_v41 = vpop.eup %3215 }
 0x859   : > { %v1403_v57 = vpop.f32.mrf.mxu1  ;;  %v1228_v18 = vmul.f32 %v3216_v41, %v3984_v25 }
 0x85a   : > { %1864 = vrot.lane.b32.xlu1 %v3666_v1, %s3337_s15 }
 0x85b   : > { %v1229_v23 = vpack.c.bf16 %v1228_v18, %v1228_v18 }
 0x861   : > { %v4092_v38 = vpop.f32.mrf.mxu1 }
 0x863   : > { %3063 = vmatmul.msk.bf16.vlgmr.msrb.gmra.mxu0 %vm565_vm14, %v1229_v23  ;;  %v2106_v23 = vpop.xlane.xlu2 %2105 }
 0x864   : > { %1497 = vmatpush.bf16.msrb.mxu0 %v1488_v15  ;;  %3104 = vmatmul.msk.bf16.vlgmr.msrb.gmra.mxu1 %vm565_vm14, %v3996_v11 }
 0x869   : > { %v1529_v24 = vpop.f32.mrf.mxu1  ;;  %v1356_v62 = vpop.xlane.xlu1 %1355 }
 0x86a   : > { %3217 = vrcp.f32 %v1356_v62  ;;  %v2107_v62 = vsub.f32 %v3938_v52, %v2106_v23 }
 0x870   : > { %v3218_v39 = vpop.eup %3217 }
 0x871   : > { %v1358_v58 = vmul.f32 %v3218_v39, %v4000_v50  ;;  %v1653_v25 = vpop.f32.mrf.mxu1  ;;  %v1478_v54 = vpop.xlane.xlu1 %1477  ;;  %v2108_v39 = vmul.f32 1.442695, %v2107_v62 }
 0x872   : > { %3219 = vrcp.f32 %v1478_v54  ;;  %v1657_v20 = vmul.f32 0.35355338, %v1653_v25 }
 0x873   : > { %v1359_v56 = vpack.c.bf16 %v1358_v58, %v1358_v58  ;;  %3221 = vpow2.f32 %v1978_v55 }
 0x874   : > { %v4122_v42 = vadd.f32 %v1657_v20, %v3889_v21 }
 0x875   : > { %3067 = vmatmul.msk.bf16.vlgmr.msra.gmra.mxu0 %vm565_vm14, %v1359_v56 }
 0x876   : > { %1627 = vmatpush.bf16.msra.mxu0 %v1618_v9  ;;  %v1608_v49 = vpop.xlane.xlu0 %1607  ;;  %v1659_v18 = vsel %vm565_vm14, %v4122_v42, -inf }
 0x877   : > { %3223 = vrcp.f32 %v1608_v49 }
 0x878   : > { %v3220_v45 = vpop.eup %3219  ;;  %3225 = vpow2.f32 %v2108_v39 }
 0x879   : > { %v1655_v11 = vpop.f32.mrf.mxu1  ;;  %v1480_v50 = vmul.f32 %v3220_v45, %v4009_v59  ;;  %v4107_v60 = vpop.eup %3221  ;;  %v4115_v59 = vadd.f32 %v1405_v61, %v3872_v53 }
 0x87a   : > { %v1980_v29 = vsel %vm565_vm14, %v4107_v60, 0.0 }
 0x87b   : > { %v1481_v16 = vpack.c.bf16 %v1480_v50, %v1480_v50  ;;  %v1407_v36 = vsel %vm565_vm14, %v4115_v59, -inf }
 0x87d   : > { %v3224_v19 = vpop.eup %3223 }
 0x87e   : > { %v1610_v48 = vmul.f32 %v3224_v19, %v4013_v5 }
 0x880   : > { %v1611_v57 = vpack.c.bf16 %v1610_v48, %v1610_v48 }
 0x881   : > { %v1779_v3 = vpop.f32.mrf.mxu1 }
 0x882   : > { %v1783_v41 = vmul.f32 0.35355338, %v1779_v3 }
 0x884   : > { %1981 = vadd.xlane.f32.xlu1 %v1980_v29  ;;  %v4128_v15 = vadd.f32 %v1783_v41, %v3889_v21  ;;  %v4140_v21 = vpop.eup %3225 }
 0x885   : > { %3071 = vmatmul.msk.bf16.vlgmr.msrb.gmra.mxu0 %vm565_vm14, %v1481_v16  ;;  %v2110_v52 = vsel %vm565_vm14, %v4140_v21, 0.0 }
 0x886   : > { %1749 = vmatpush.bf16.msrb.mxu0 %v1740_v28  ;;  %v1785_v44 = vsel %vm565_vm14, %v4128_v15, -inf }
 0x889   : > { %v1781_v33 = vpop.f32.mrf.mxu1  ;;  %v811_v27 = vpop.permute.xlu1 %810 }
 0x88a   : > { %814 = vst.msk [vmem:[#allocation2] sm:$0xff] %vm813_vm9, %v811_v27 }
 0x88c   : > { %1408 = vmax.xlane.f32.xlu1 %v1407_v36 }
 0x891   : > { %v1905_v30 = vpop.f32.mrf.mxu1 }
 0x892   : > { %v1909_v5 = vmul.f32 0.35355338, %v1905_v30 }
 0x894   : > { %1660 = vmax.xlane.f32.xlu1 %v1659_v18  ;;  %v4134_v58 = vadd.f32 %v1909_v5, %v3898_v34  ;;  %v1153_v18 = vmul.f32 0.35355338, %v4043_v46  ;;  %v1531_v5 = vmul.f32 0.35355338, %v4092_v38 }
 0x895   : > { %3075 = vmatmul.msk.bf16.vlgmr.msra.gmra.mxu0 %vm565_vm14, %v1611_v57 }
 0x896   : > { %v1911_v47 = vsel %vm565_vm14, %v4134_v58, -inf  ;;  %v4171_v46 = vadd.f32 %v1531_v5, %v3872_v53  ;;  %v2327_v53 = vld [vmem:[%s3501_s28 + $0x7] sm:$0x1]  ;;  %s4528_s28 = scalar_lea.vmem %s4598_s7, %s3024_s22 }
 0x897   : > { %vm2328_vm10 = vcmp.gt.f32.partialorder %v2327_v53, 0.0 }
 0x899   : > { %v1907_v24 = vpop.f32.mrf.mxu1 }
 0x89c   : > { %1786 = vmax.xlane.f32.xlu1 %v1785_v44 }
 0x8a1   : > { %v4136_v25 = vpop.f32.mrf.mxu1 }
 0x8a4   : > { %1912 = vmax.xlane.f32.xlu1 %v1911_v47 }
 0x8a9   : > { %v2033_v56 = vpop.f32.mrf.mxu1 }
 0x8aa   : > { %v1533_v56 = vsel %vm565_vm14, %v4171_v46, -inf }
 0x8ac   : > { %2111 = vadd.xlane.f32.xlu1 %v2110_v52 }
 0x8af   : > { %v1730_v54 = vpop.xlane.xlu0 %1729 }
 0x8b0   : > { %3227 = vrcp.f32 %v1730_v54 }
 0x8b1   : > { %v4144_v9 = vpop.f32.mrf.mxu1 }
 0x8b4   : > { %v905_v49 = vpop.xlane.xlu1 %904 }
 0x8b5   : > { %v906_v24 = vsub.f32 %v4057_v43, %v905_v49 }
 0x8b6   : > { %v3228_v55 = vpop.eup %3227 }
 0x8b7   : > { %v1732_v11 = vmul.f32 %v3228_v55, %v4052_v40  ;;  %v907_v47 = vmul.f32 1.442695, %v906_v24 }
 0x8b8   : > { %v1860_v3 = vpop.xlane.xlu0 %1859 }
 0x8b9   : > { %v1733_v45 = vpack.c.bf16 %v1732_v11, %v1732_v11  ;;  %v2159_v50 = vpop.f32.mrf.mxu1  ;;  %3229 = vrcp.f32 %v1860_v3 }
 0x8ba   : > { %3231 = vpow2.f32 %v907_v47 }
 0x8bb   : > { %3079 = vmatmul.msk.bf16.vlgmr.msrb.gmra.mxu0 %vm565_vm14, %v1733_v45  ;;  %v1279_v45 = vmul.f32 0.35355338, %v4066_v32 }
 0x8bd   : > { %v4189_v3 = vadd.f32 %v1279_v45, %v3836_v13  ;;  %v2161_v45 = vmul.f32 0.35355338, %v4144_v9 }
 0x8bf   : > { %v3230_v29 = vpop.eup %3229 }
 0x8c0   : > { %v995_v61 = vpop.f32.mrf.mxu0  ;;  %v1862_v40 = vmul.f32 %v3230_v29, %v4064_v31  ;;  %v4164_v31 = vadd.f32 %v1153_v18, %v3836_v13  ;;  %v4176_v43 = vpop.eup %3231  ;;  %v2353_v29 = vmul.f32 0.35355338, %v3960_v2 }
 0x8c1   : > { %v4148_v16 = vpop.f32.mrf.mxu1  ;;  %1000 = vrot.lane.b32.xlu2 %v995_v61, %s3348_s10  ;;  %v909_v54 = vsel %vm565_vm14, %v4176_v43, 0.0  ;;  %v2329_v61 = vsel %vm2328_vm10, 0.0, %v3344_v26 }
 0x8c2   : > { %v1863_v36 = vpack.c.bf16 %v1862_v40, %v1862_v40  ;;  %v1155_v39 = vsel %vm565_vm14, %v4164_v31, -inf  ;;  %v1281_v40 = vsel %vm565_vm14, %v4189_v3, -inf }
 0x8c5   : > { %2175 = vrot.lane.b32.xlu1 %v3691_v6, %s3342_s20 }
 0x8c8   : > { %v997_v28 = vpop.f32.mrf.mxu0 }
 0x8c9   : > { %v2285_v33 = vpop.f32.mrf.mxu1  ;;  %v4195_v28 = vperm.slane %v2329_v61, 0 }
 0x8cb   : > { %v4200_v32 = vadd.f32 %v4195_v28, %v2353_v29 }
 0x8cc   : > { %v1865_v27 = vpop.permute.xlu1 %1864 }
 0x8cd   : > { %v1870_v20 = vsel %vm605_vm15, %v1865_v27, 0 }
 0x8ce   : > { %1879 = vmatpush.bf16.msra.mxu0 %v1870_v20  ;;  %v2035_v20 = vmul.f32 0.35355338, %v4136_v25 }
 0x8d0   : > { %v1125_v19 = vpop.f32.mrf.mxu0 }
 0x8d1   : > { %1129 = vst.msk [vmem:[#allocation2 + $0x10] sm:$0xff] %vm565_vm14, %v1125_v19  ;;  %3083 = vmatmul.msk.bf16.vlgmr.msra.gmra.mxu0 %vm565_vm14, %v1863_v36  ;;  %v4157_v48 = vpop.f32.mrf.mxu1  ;;  %v2356_v36 = vsel %vm565_vm14, %v4200_v32, -inf  ;;  %v4210_v19 = vadd.f32 %v2035_v20, %v3898_v34 }
 0x8d3   : > { %v2037_v25 = vsel %vm565_vm14, %v4210_v19, -inf }
 0x8d8   : > { %v1127_v30 = vpop.f32.mrf.mxu0 }
 0x8d9   : > { %v2411_v57 = vpop.f32.mrf.mxu1 }
 0x8e0   : > { %v1247_v41 = vpop.f32.mrf.mxu0 }
 0x8e1   : > { %v4160_v23 = vpop.f32.mrf.mxu1  ;;  %1252 = vrot.lane.b32.xlu0 %v1247_v41, %s3348_s10  ;;  %v1031_v41 = vpop.xlane.xlu0 %1030 }
 0x8e2   : > { %v1032_v18 = vsub.f32 %v4078_v12, %v1031_v41  ;;  %v2539_v41 = vmul.f32 0.35355338, %v4160_v23  ;;  %v2287_v23 = vmul.f32 0.35355338, %v4148_v16 }
 0x8e4   : > { %v1033_v24 = vmul.f32 1.442695, %v1032_v18 }
 0x8e8   : > { %v1249_v62 = vpop.f32.mrf.mxu0 }
 0x8e9   : > { %v2537_v44 = vpop.f32.mrf.mxu1 }
 0x8ea   : > { %1156 = vmax.xlane.f32.xlu2 %v1155_v39 }
 0x8f2   : > { %1534 = vmax.xlane.f32.xlu2 %v1533_v56  ;;  %v1377_v52 = vpop.f32.mrf.mxu0 }
 0x8f3   : > { %1381 = vst.msk [vmem:[#allocation2 + $0x18] sm:$0xff] %vm565_vm14, %v1377_v52 }
 0x8f7   : > { %v4178_v38 = vpop.xlane.xlu1 %1981 }
 0x8fa   : > { %910 = vadd.xlane.f32.xlu2 %v909_v54  ;;  %v1379_v55 = vpop.f32.mrf.mxu0 }
 0x8ff   : > { %v4182_v11 = vpop.xlane.xlu1 %1408 }
 0x902   : > { %v4186_v50 = vpop.f32.mrf.mxu0 }
 0x907   : > { %v4192_v49 = vpop.xlane.xlu1 %1660 }
 0x90a   : > { %v1501_v33 = vpop.f32.mrf.mxu0 }
 0x90b   : > { %1282 = vmax.xlane.f32.xlu0 %v1281_v40  ;;  %v4239_v33 = vadd.f32 %v2161_v45, %v3929_v63 }
 0x90f   : > { %v1787_v27 = vpop.xlane.xlu1 %1786 }
 0x910   : > { %v1788_v13 = vsub.f32 %v4128_v15, %v1787_v27  ;;  %v2163_v27 = vsel %vm565_vm14, %v4239_v33, -inf }
 0x912   : > { %v1789_v26 = vmul.f32 1.442695, %v1788_v13  ;;  %2049 = vrot.lane.b32.xlu2 %v3666_v1, %s3347_s9  ;;  %v1629_v2 = vpop.f32.mrf.mxu0 }
 0x913   : > { %1633 = vst.msk [vmem:[#allocation2 + $0x20] sm:$0xff] %vm565_vm14, %v1629_v2  ;;  %2357 = vmax.xlane.f32.xlu0 %v2356_v36 }
 0x914   : > { %3233 = vpow2.f32 %v1789_v26 }
 0x915   : > { %3235 = vpow2.f32 %v1033_v24 }
 0x91a   : > { %v4212_v30 = vpop.eup %3233  ;;  %v1631_v15 = vpop.f32.mrf.mxu0 }
 0x91b   : > { %2038 = vmax.xlane.f32.xlu0 %v2037_v25  ;;  %v1791_v57 = vsel %vm565_vm14, %v4212_v30, 0.0  ;;  %v4221_v34 = vpop.eup %3235  ;;  %v4230_v12 = vpop.permute.xlu2 %1000 }
 0x91c   : > { %1792 = vadd.xlane.f32.xlu1 %v1791_v57  ;;  %v1035_v5 = vsel %vm565_vm14, %v4221_v34, 0.0  ;;  %v1662_v57 = vsub.f32 %v4122_v42, %v4192_v49 }
 0x91e   : > { %v1663_v24 = vmul.f32 1.442695, %v1662_v57 }
 0x935   : > { %2427 = vrot.lane.b32.xlu1 %v3727_v8, %s3342_s20 }
 0x938   : > { %v4223_v62 = vpop.f32.mrf.mxu0 }
 0x93b   : > { %1036 = vadd.xlane.f32.xlu2 %v1035_v5  ;;  %v4265_v5 = vadd.f32 %v2539_v41, %v4195_v28 }
 0x93d   : > { %2368 = vrot.lane.b32.xlu1 %v3727_v8, %s3337_s15  ;;  %v2541_v42 = vsel %vm565_vm14, %v4265_v5, -inf }
 0x940   : > { %v1753_v44 = vpop.f32.mrf.mxu0 }
 0x94e   : > { %v1881_v39 = vpop.f32.mrf.mxu0 }
 0x94f   : > { %1885 = vst.msk [vmem:[#allocation2 + $0x28] sm:$0xff] %vm565_vm14, %v1881_v39 }
 0x953   : > { %v4249_v2 = vpop.permute.xlu0 %1252 }
 0x956   : > { %v1883_v47 = vpop.f32.mrf.mxu0 }
 0x95d   : > { %v1157_v56 = vpop.xlane.xlu2 %1156 }
 0x95e   : > { %v1158_v52 = vsub.f32 %v4164_v31, %v1157_v56  ;;  %v2413_v31 = vmul.f32 0.35355338, %v4157_v48  ;;  %v4279_v56 = vadd.f32 %v2287_v23, %v3929_v63 }
 0x960   : > { %v1159_v54 = vmul.f32 1.442695, %v1158_v52  ;;  %v4247_v26 = vadd.f32 %v2413_v31, %v4195_v28  ;;  %v1913_v31 = vpop.xlane.xlu1 %1912 }
 0x962   : > { %3237 = vpow2.f32 %v1159_v54  ;;  %v2415_v48 = vsel %vm565_vm14, %v4247_v26, -inf }
 0x965   : > { %v1535_v55 = vpop.xlane.xlu2 %1534 }
 0x966   : > { %v1536_v40 = vsub.f32 %v4171_v46, %v1535_v55  ;;  %v1173_v46 = vsel %vm605_vm15, %v3731_v14, 0 }
 0x968   : > { %v4233_v53 = vpop.eup %3237  ;;  %v1537_v20 = vmul.f32 1.442695, %v1536_v40 }
 0x969   : > { %v1161_v61 = vsel %vm565_vm14, %v4233_v53, 0.0 }
 0x96a   : > { %1162 = vadd.xlane.f32.xlu0 %v1161_v61 }
 0x96d   : > { %v911_v29 = vpop.xlane.xlu2 %910 }
 0x96e   : > { %3239 = vrcp.f32 %v911_v29  ;;  %v1299_v29 = vsel %vm605_vm15, %v3990_v35, 0  ;;  %v2229_v35 = vsub.f32 %v3974_v22, %v4104_v37 }
 0x96f   : > { %3241 = vpow2.f32 %v1537_v20 }
 0x972   : > { %2164 = vmax.xlane.f32.xlu0 %v2163_v27  ;;  %v2476_v27 = vmul.f32 0.35355338, %v4027_v10 }
 0x974   : > { %v3240_v13 = vpop.eup %3239 }
 0x975   : > { %v913_v9 = vmul.f32 %v3240_v13, %v4176_v43  ;;  %v4256_v15 = vpop.eup %3241  ;;  %v4289_v54 = vpop.permute.xlu2 %2049 }
 0x976   : > { %v1539_v14 = vsel %vm565_vm14, %v4256_v15, 0.0 }
 0x977   : > { %v914_v36 = vpack.c.bf16 %v913_v9, %v913_v9 }
 0x979   : > { %3053 = vmatmul.msk.bf16.vlgmr.msra.gmra.mxu3 %vm565_vm14, %v914_v36 }
 0x97a   : > { %1182 = vmatpush.bf16.msra.mxu3 %v1173_v46  ;;  %2416 = vmax.xlane.f32.xlu0 %v2415_v48  ;;  %v2230_v48 = vmul.f32 1.442695, %v2229_v35 }
 0x97e   : > { %v1283_v43 = vpop.xlane.xlu0 %1282 }
 0x97f   : > { %v1284_v25 = vsub.f32 %v4189_v3, %v1283_v43  ;;  %v1410_v3 = vsub.f32 %v4115_v59, %v4182_v11  ;;  %v2289_v11 = vsel %vm565_vm14, %v4279_v56, -inf }
 0x981   : > { %v1285_v18 = vmul.f32 1.442695, %v1284_v25  ;;  %v1411_v39 = vmul.f32 1.442695, %v1410_v3  ;;  %v1425_v3 = vsel %vm605_vm15, %v4030_v51, 0 }
 0x982   : > { %1540 = vadd.xlane.f32.xlu0 %v1539_v14 }
 0x983   : > { %3243 = vpow2.f32 %v1285_v18 }
 0x984   : > { %3245 = vpow2.f32 %v1663_v24 }
 0x985   : > { %3247 = vpow2.f32 %v1411_v39 }
 0x986   : > { %v4299_v40 = vpop.xlane.xlu0 %2357 }
 0x989   : > { %v4267_v44 = vpop.eup %3243 }
 0x98a   : > { %2542 = vmax.xlane.f32.xlu0 %v2541_v42  ;;  %v1287_v49 = vsel %vm565_vm14, %v4267_v44, 0.0  ;;  %v4276_v47 = vpop.eup %3245 }
 0x98b   : > { %1288 = vadd.xlane.f32.xlu2 %v1287_v49  ;;  %v1665_v59 = vsel %vm565_vm14, %v4276_v47, 0.0  ;;  %v4285_v16 = vpop.eup %3247 }
 0x98c   : > { %v1413_v52 = vsel %vm565_vm14, %v4285_v16, 0.0 }
 0x98e   : > { %v2039_v13 = vpop.xlane.xlu0 %2038 }
 0x98f   : > { %v2040_v9 = vsub.f32 %v4210_v19, %v2039_v13 }
 0x991   : > { %v2041_v36 = vmul.f32 1.442695, %v2040_v9 }
 0x992   : > { %1666 = vadd.xlane.f32.xlu0 %v1665_v59 }
 0x993   : > { %2290 = vmax.xlane.f32.xlu2 %v2289_v11 }
 0x99b   : > { %1414 = vadd.xlane.f32.xlu2 %v1413_v52 }
 0x9a6   : > { %1986 = vrot.lane.b32.xlu0 %v3666_v1, %s3341_s19  ;;  %v1914_v1 = vsub.f32 %v4134_v58, %v1913_v31  ;;  %v2359_v31 = vsub.f32 %v4200_v32, %v4299_v40 }
 0x9a8   : > { %v1915_v20 = vmul.f32 1.442695, %v1914_v1 }
 0x9ae   : > { %v1037_v63 = vpop.xlane.xlu2 %1036 }
 0x9af   : > { %3249 = vrcp.f32 %v1037_v63 }
 0x9b0   : > { %3251 = vpow2.f32 %v1915_v20 }
 0x9b1   : > { %3253 = vpow2.f32 %v2041_v36 }
 0x9b2   : > { %3255 = vpow2.f32 %v2230_v48 }
 0x9b3   : > { %2116 = vrot.lane.b32.xlu2 %v3691_v6, %s3337_s15 }
 0x9b5   : > { %v3250_v55 = vpop.eup %3249 }
 0x9b6   : > { %v1039_v45 = vmul.f32 %v3250_v55, %v4221_v34  ;;  %v4305_v34 = vadd.f32 %v2476_v27, %v4195_v28  ;;  %v4311_v58 = vpop.eup %3251 }
 0x9b7   : > { %v1917_v10 = vsel %vm565_vm14, %v4311_v58, 0.0  ;;  %v4315_v19 = vpop.eup %3253 }
 0x9b8   : > { %v1040_v61 = vpack.c.bf16 %v1039_v45, %v1039_v45  ;;  %v2478_v46 = vsel %vm565_vm14, %v4305_v34, -inf  ;;  %v2043_v22 = vsel %vm565_vm14, %v4315_v19, 0.0  ;;  %v4319_v37 = vpop.eup %3255 }
 0x9b9   : > { %v2232_v43 = vsel %vm565_vm14, %v4319_v37, 0.0 }
 0x9ba   : > { %3057 = vmatmul.msk.bf16.vlgmr.msrb.gmra.mxu3 %vm565_vm14, %v1040_v61 }
 0x9bb   : > { %1308 = vmatpush.bf16.msrb.mxu3 %v1299_v29  ;;  %v1551_v29 = vsel %vm605_vm15, %v4023_v0, 0 }
 0x9d0   : > { %2479 = vmax.xlane.f32.xlu0 %v2478_v46  ;;  %v1677_v46 = vsel %vm605_vm15, %v4050_v7, 0 }
 0x9d8   : > { %1918 = vadd.xlane.f32.xlu0 %v1917_v10 }
 0x9dc   : > { %2044 = vadd.xlane.f32.xlu2 %v2043_v22  ;;  %v2112_v22 = vpop.xlane.xlu1 %2111 }
 0x9dd   : > { %v1163_v28 = vpop.xlane.xlu0 %1162 }
 0x9de   : > { %3257 = vrcp.f32 %v1163_v28 }
 0x9e0   : > { %2233 = vadd.xlane.f32.xlu0 %v2232_v43 }
 0x9e4   : > { %v3258_v25 = vpop.eup %3257 }
 0x9e5   : > { %v1165_v57 = vmul.f32 %v3258_v25, %v4233_v53  ;;  %v2165_v41 = vpop.xlane.xlu0 %2164 }
 0x9e6   : > { %v2166_v18 = vsub.f32 %v4239_v33, %v2165_v41 }
 0x9e7   : > { %v1166_v14 = vpack.c.bf16 %v1165_v57, %v1165_v57 }
 0x9e8   : > { %v2167_v24 = vmul.f32 1.442695, %v2166_v18 }
 0x9e9   : > { %3061 = vmatmul.msk.bf16.vlgmr.msra.gmra.mxu3 %vm565_vm14, %v1166_v14  ;;  %v1803_v14 = vsel %vm605_vm15, %v4040_v4, 0 }
 0x9ea   : > { %3259 = vpow2.f32 %v2167_v24  ;;  %1434 = vmatpush.bf16.msra.mxu3 %v1425_v3 }
 0x9ed   : > { %v2417_v49 = vpop.xlane.xlu0 %2416 }
 0x9ee   : > { %v2418_v7 = vsub.f32 %v4247_v26, %v2417_v49 }
 0x9f0   : > { %v4328_v42 = vpop.eup %3259  ;;  %v2419_v25 = vmul.f32 1.442695, %v2418_v7 }
 0x9f1   : > { %v2169_v23 = vsel %vm565_vm14, %v4328_v42, 0.0 }
 0x9f2   : > { %2170 = vadd.xlane.f32.xlu2 %v2169_v23 }
 0x9f4   : > { %2301 = vrot.lane.b32.xlu0 %v3691_v6, %s3347_s9 }
 0x9f5   : > { %v1541_v53 = vpop.xlane.xlu0 %1540 }
 0x9fc   : > { %v4334_v33 = vpop.f32.mrf.mxu3 }
 0x9fd   : > { %v2543_v11 = vpop.xlane.xlu0 %2542 }
 0x9fe   : > { %v1289_v39 = vpop.xlane.xlu2 %1288  ;;  %v2544_v18 = vsub.f32 %v4265_v5, %v2543_v11 }
 0x9ff   : > { %3261 = vrcp.f32 %v1289_v39  ;;  %v1929_v39 = vsel %vm605_vm15, %v4080_v17, 0  ;;  %v2055_v17 = vsel %vm605_vm15, %v4289_v54, 0 }
 0xa00   : > { %v2545_v26 = vmul.f32 1.442695, %v2544_v18 }
 0xa04   : > { %v934_v51 = vpop.f32.mrf.mxu3 }
 0xa05   : > { %v3262_v59 = vpop.eup %3261  ;;  %v1667_v1 = vpop.xlane.xlu0 %1666 }
 0xa06   : > { %v1291_v52 = vmul.f32 %v3262_v59, %v4267_v44  ;;  %v2291_v63 = vpop.xlane.xlu2 %2290 }
 0xa07   : > { %v2292_v55 = vsub.f32 %v4279_v56, %v2291_v63  ;;  %v2360_v56 = vmul.f32 1.442695, %v2359_v31 }
 0xa08   : > { %v1292_v45 = vpack.c.bf16 %v1291_v52, %v1291_v52 }
 0xa09   : > { %v2293_v61 = vmul.f32 1.442695, %v2292_v55 }
 0xa0a   : > { %3065 = vmatmul.msk.bf16.vlgmr.msrb.gmra.mxu3 %vm565_vm14, %v1292_v45  ;;  %2238 = vrot.lane.b32.xlu2 %v3691_v6, %s3341_s19 }
 0xa0b   : > { %3263 = vpow2.f32 %v2293_v61  ;;  %1560 = vmatpush.bf16.msrb.mxu3 %v1551_v29 }
 0xa0c   : > { %3265 = vrcp.f32 %v4178_v38 }
 0xa0e   : > { %v1415_v44 = vpop.xlane.xlu2 %1414 }
 0xa0f   : > { %3267 = vrcp.f32 %v1415_v44 }
 0xa10   : > { %3269 = vpow2.f32 %v2360_v56 }
 0xa11   : > { %v4346_v27 = vpop.eup %3263  ;;  %3271 = vrcp.f32 %v1541_v53 }
 0xa12   : > { %v2295_v0 = vsel %vm565_vm14, %v4346_v27, 0.0  ;;  %v3266_v13 = vpop.eup %3265  ;;  %3273 = vrcp.f32 %v2112_v22 }
 0xa13   : > { %2296 = vadd.xlane.f32.xlu1 %v2295_v0  ;;  %v1984_v9 = vmul.f32 %v3266_v13, %v4107_v60  ;;  %3275 = vpow2.f32 %v2419_v25 }
 0xa14   : > { %3277 = vrcp.f32 %v1667_v1 }
 0xa15   : > { %v3268_v6 = vpop.eup %3267  ;;  %v1985_v10 = vpack.c.bf16 %v1984_v9, %v1984_v9  ;;  %3279 = vpow2.f32 %v2545_v26 }
 0xa16   : > { %v1417_v20 = vmul.f32 %v3268_v6, %v4285_v16  ;;  %v2117_v32 = vpop.permute.xlu2 %2116  ;;  %v4353_v36 = vpop.eup %3269 }
 0xa17   : > { %v2122_v48 = vsel %vm605_vm15, %v2117_v32, 0  ;;  %v2362_v60 = vsel %vm565_vm14, %v4353_v36, 0.0  ;;  %v3272_v16 = vpop.eup %3271 }
 0xa18   : > { %v1418_v40 = vpack.c.bf16 %v1417_v20, %v1417_v20  ;;  %v1987_v38 = vpop.permute.xlu0 %1986  ;;  %v3274_v28 = vpop.eup %3273  ;;  %v1543_v43 = vmul.f32 %v3272_v16, %v4256_v15 }
 0xa19   : > { %v1992_v35 = vsel %vm605_vm15, %v1987_v38, 0  ;;  %v2114_v57 = vmul.f32 %v3274_v28, %v4140_v21  ;;  %v4372_v15 = vpop.eup %3275  ;;  %v2176_v21 = vpop.permute.xlu1 %2175 }
 0xa1a   : > { %3069 = vmatmul.msk.bf16.vlgmr.msra.gmra.mxu3 %vm565_vm14, %v1418_v40  ;;  %2001 = vmatpush.bf16.msrb.mxu0 %v1992_v35  ;;  %v1544_v41 = vpack.c.bf16 %v1543_v43, %v1543_v43  ;;  %v3278_v3 = vpop.eup %3277  ;;  %v2421_v5 = vsel %vm565_vm14, %v4372_v15, 0.0  ;;  %v2181_v54 = vsel %vm605_vm15, %v2176_v21, 0 }
 0xa1b   : > { %1686 = vmatpush.bf16.msra.mxu3 %v1677_v46  ;;  %v2115_v24 = vpack.c.bf16 %v2114_v57, %v2114_v57  ;;  %v1669_v4 = vmul.f32 %v3278_v3, %v4276_v47  ;;  %v4379_v23 = vpop.eup %3279 }
 0xa1c   : > { %v2547_v51 = vsel %vm565_vm14, %v4379_v23, 0.0 }
 0xa1d   : > { %3087 = vmatmul.msk.bf16.vlgmr.msrb.gmra.mxu0 %vm565_vm14, %v1985_v10  ;;  %v1670_v53 = vpack.c.bf16 %v1669_v4, %v1669_v4 }
 0xa1e   : > { %2131 = vmatpush.bf16.msra.mxu0 %v2122_v48  ;;  %2363 = vadd.xlane.f32.xlu0 %v2362_v60 }
 0xa21   : > { %v1793_v49 = vpop.xlane.xlu1 %1792 }
 0xa22   : > { %3281 = vrcp.f32 %v1793_v49 }
 0xa28   : > { %v3282_v47 = vpop.eup %3281 }
 0xa29   : > { %v2428_v13 = vpop.permute.xlu1 %2427 }
 0xa2a   : > { %3073 = vmatmul.msk.bf16.vlgmr.msrb.gmra.mxu3 %vm565_vm14, %v1544_v41 }
 0xa2b   : > { %1812 = vmatpush.bf16.msrb.mxu3 %v1803_v14 }
 0xa2c   : > { %2553 = vrot.lane.b32.xlu1 %v3727_v8, %s3347_s9 }
 0xa2d   : > { %3091 = vmatmul.msk.bf16.vlgmr.msra.gmra.mxu0 %vm565_vm14, %v2115_v24 }
 0xa31   : > { %v2369_v40 = vpop.permute.xlu1 %2368 }
 0xa33   : > { %2422 = vadd.xlane.f32.xlu2 %v2421_v5 }
 0xa34   : > { %1756 = vrot.lane.b32.xlu1 %v4223_v62, %s3348_s10  ;;  %v1795_v62 = vmul.f32 %v3282_v47, %v4212_v30 }
 0xa36   : > { %v1796_v45 = vpack.c.bf16 %v1795_v62, %v1795_v62 }
 0xa3a   : > { %3077 = vmatmul.msk.bf16.vlgmr.msra.gmra.mxu3 %vm565_vm14, %v1670_v53 }
 0xa3b   : > { %1938 = vmatpush.bf16.msra.mxu3 %v1929_v39  ;;  %2548 = vadd.xlane.f32.xlu2 %v2547_v51 }
 0xa3d   : > { %v4386_v59 = vpop.f32.mrf.mxu3 }
 0xa43   : > { %v2480_v11 = vpop.xlane.xlu0 %2479 }
 0xa44   : > { %v2481_v52 = vsub.f32 %v4305_v34, %v2480_v11 }
 0xa45   : > { %v1060_v63 = vpop.f32.mrf.mxu3 }
 0xa46   : > { %v2482_v55 = vmul.f32 1.442695, %v2481_v52 }
 0xa48   : > { %3283 = vpow2.f32 %v2482_v55 }
 0xa4a   : > { %3081 = vmatmul.msk.bf16.vlgmr.msrb.gmra.mxu3 %vm565_vm14, %v1796_v45 }
 0xa4b   : > { %2064 = vmatpush.bf16.msrb.mxu3 %v2055_v17  ;;  %v1919_v61 = vpop.xlane.xlu0 %1918 }
 0xa4c   : > { %3285 = vrcp.f32 %v1919_v61 }
 0xa4e   : > { %v4393_v29 = vpop.eup %3283 }
 0xa4f   : > { %v2484_v31 = vsel %vm565_vm14, %v4393_v29, 0.0  ;;  %v2045_v56 = vpop.xlane.xlu2 %2044 }
 0xa50   : > { %2485 = vadd.xlane.f32.xlu0 %v2484_v31  ;;  %3287 = vrcp.f32 %v2045_v56 }
 0xa52   : > { %v3286_v30 = vpop.eup %3285 }
 0xa53   : > { %2490 = vrot.lane.b32.xlu2 %v3727_v8, %s3341_s19  ;;  %v1921_v34 = vmul.f32 %v3286_v30, %v4311_v58  ;;  %v2234_v1 = vpop.xlane.xlu0 %2233  ;;  %s4464_s19 = scalar_lea.vmem %s4593_s2, %s3403_s27 }
 0xa54   : > { %3289 = vrcp.f32 %v2234_v1 }
 0xa55   : > { %v1922_v44 = vpack.c.bf16 %v1921_v34, %v1921_v34 }
 0xa56   : > { %v3288_v0 = vpop.eup %3287 }
 0xa57   : > { %v2047_v6 = vmul.f32 %v3288_v0, %v4315_v19 }
 0xa59   : > { %v2048_v58 = vpack.c.bf16 %v2047_v6, %v2047_v6 }
 0xa5a   : > { %3085 = vmatmul.msk.bf16.vlgmr.msra.gmra.mxu3 %vm565_vm14, %v1922_v44  ;;  %v3290_v9 = vpop.eup %3289 }
 0xa5b   : > { %2190 = vmatpush.bf16.msra.mxu3 %v2181_v54  ;;  %v2236_v38 = vmul.f32 %v3290_v9, %v4319_v37  ;;  %v2433_v37 = vsel %vm605_vm15, %v2428_v13, 0 }
 0xa5d   : > { %v2237_v48 = vpack.c.bf16 %v2236_v38, %v2236_v38 }
 0xa64   : > { %937 = vrot.lane.b32.xlu0 %v4334_v33, %s3349_s11  ;;  %v2374_v33 = vsel %vm605_vm15, %v2369_v40, 0 }
 0xa65   : > { %v2171_v8 = vpop.xlane.xlu2 %2170 }
 0xa66   : > { %v2302_v20 = vpop.permute.xlu0 %2301  ;;  %3291 = vrcp.f32 %v2171_v8 }
 0xa67   : > { %v2307_v32 = vsel %vm605_vm15, %v2302_v20, 0 }
 0xa6a   : > { %3089 = vmatmul.msk.bf16.vlgmr.msrb.gmra.mxu3 %vm565_vm14, %v2048_v58 }
 0xa6b   : > { %2316 = vmatpush.bf16.msrb.mxu3 %v2307_v32 }
 0xa6c   : > { %v1184_v35 = vpop.f32.mrf.mxu3  ;;  %v3292_v10 = vpop.eup %3291 }
 0xa6d   : > { %v2239_v46 = vpop.permute.xlu2 %2238  ;;  %1189 = vrot.lane.b32.xlu0 %v1184_v35, %s3349_s11  ;;  %v2173_v22 = vmul.f32 %v3292_v10, %v4328_v42 }
 0xa6e   : > { %v2244_v19 = vsel %vm605_vm15, %v2239_v46, 0 }
 0xa6f   : > { %2253 = vmatpush.bf16.msrb.mxu0 %v2244_v19  ;;  %v2174_v16 = vpack.c.bf16 %v2173_v22, %v2173_v22 }
 0xa72   : > { %3095 = vmatmul.msk.bf16.vlgmr.msrb.gmra.mxu0 %vm565_vm14, %v2237_v48  ;;  %v2579_v48 = vld [vmem:[#allocation2] sm:$0xff] }
 0xa73   : > { %2383 = vmatpush.bf16.msra.mxu0 %v2374_v33 }
 0xa74   : > { %v1186_v60 = vpop.f32.mrf.mxu3 }
 0xa7a   : > { %3093 = vmatmul.msk.bf16.vlgmr.msra.gmra.mxu3 %vm565_vm14, %v2174_v16  ;;  %v3351_v16 = vmov 0  }
 0xa7b   : > { %2442 = vmatpush.bf16.msra.mxu3 %v2433_v37  ;;  %3154 = vset.pattern.permute.xlu0 %v3351_v16  ;;  %v2665_v37 = vld [vmem:[%s4464_s19 + $0x8] sm:$0xff] }
 0xa7c   : > { %3153 = vset.pattern.permute.xlu1 %v3351_v16  ;;  %3155 = vset.pattern.permute.xlu2 %v3351_v16 }
 0xa86   : > { %v2297_v7 = vpop.xlane.xlu1 %2296 }
 0xa87   : > { %3293 = vrcp.f32 %v2297_v7 }
 0xa8d   : > { %v3294_v28 = vpop.eup %3293  ;;  %v1310_v43 = vpop.f32.mrf.mxu3 }
 0xa8e   : > { %v2299_v25 = vmul.f32 %v3294_v28, %v4346_v27  ;;  %1315 = vrot.lane.b32.xlu2 %v1310_v43, %s3350_s12 }
 0xa90   : > { %v2300_v57 = vpack.c.bf16 %v2299_v25, %v2299_v25 }
 0xa91   : > { %v2364_v41 = vpop.xlane.xlu0 %2363 }
 0xa92   : > { %3295 = vrcp.f32 %v2364_v41  ;;  %3097 = vmatmul.msk.bf16.vlgmr.msrb.gmra.mxu3 %vm565_vm14, %v2300_v57 }
 0xa95   : > { %v1312_v42 = vpop.f32.mrf.mxu3 }
 0xa98   : > { %v3296_v18 = vpop.eup %3295 }
 0xa99   : > { %v2366_v14 = vmul.f32 %v3296_v18, %v4353_v36 }
 0xa9a   : > { %v2003_v24 = vpop.f32.mrf.mxu0 }
 0xa9b   : > { %v2367_v26 = vpack.c.bf16 %v2366_v14, %v2366_v14  ;;  %2008 = vrot.lane.b32.xlu1 %v2003_v24, %s3348_s10 }
 0xa9d   : > { %v4420_v21 = vpop.f32.mrf.mxu3  ;;  %3099 = vmatmul.msk.bf16.vlgmr.msra.gmra.mxu0 %vm565_vm14, %v2367_v26 }
 0xa9e   : > { %v2554_v27 = vpop.permute.xlu1 %2553 }
 0xa9f   : > { %v2559_v3 = vsel %vm605_vm15, %v2554_v27, 0 }
 0xaa0   : > { %2568 = vmatpush.bf16.msrb.mxu3 %v2559_v3 }
 0xaa2   : > { %v2005_v5 = vpop.f32.mrf.mxu0 }
 0xaa3   : > { %1063 = vrot.lane.b32.xlu1 %v4386_v59, %s3350_s12  ;;  %v2668_v5 = vld [vmem:[%s4464_s19 + $0x20] sm:$0xff] }
 0xaa5   : > { %v1438_v4 = vpop.f32.mrf.mxu3 }
 0xaa6   : > { %v2423_v49 = vpop.xlane.xlu2 %2422  ;;  %v1757_v32 = vpop.permute.xlu1 %1756  ;;  %v2670_v4 = vld [vmem:[%s4464_s19 + $0x30] sm:$0xff] }
 0xaa7   : > { %3297 = vrcp.f32 %v2423_v49 }
 0xaaa   : > { %v2133_v36 = vpop.f32.mrf.mxu0 }
 0xaab   : > { %2137 = vst.msk [vmem:[#allocation2 + $0x30] sm:$0xff] %vm565_vm14, %v2133_v36 }
 0xaad   : > { %v3298_v53 = vpop.eup %3297  ;;  %v4427_v39 = vpop.f32.mrf.mxu3 }
 0xaae   : > { %v2425_v51 = vmul.f32 %v3298_v53, %v4372_v15  ;;  %v2549_v47 = vpop.xlane.xlu2 %2548 }
 0xaaf   : > { %3299 = vrcp.f32 %v2549_v47 }
 0xab0   : > { %v2426_v11 = vpack.c.bf16 %v2425_v51, %v2425_v51 }
 0xab2   : > { %v2135_v62 = vpop.f32.mrf.mxu0  ;;  %3101 = vmatmul.msk.bf16.vlgmr.msra.gmra.mxu3 %vm565_vm14, %v2426_v11 }
 0xab5   : > { %v1564_v52 = vpop.f32.mrf.mxu3  ;;  %v3300_v55 = vpop.eup %3299 }
 0xab6   : > { %v2491_v63 = vpop.permute.xlu2 %2490  ;;  %v2551_v45 = vmul.f32 %v3300_v55, %v4379_v23  ;;  %v2664_v55 = vld [vmem:[%s4464_s19] sm:$0xff] }
 0xab7   : > { %v2496_v59 = vsel %vm605_vm15, %v2491_v63, 0  ;;  %vm2727_vm15 = vcmask 7168  }
 0xab8   : > { %2505 = vmatpush.bf16.msrb.mxu0 %v2496_v59  ;;  %v2552_v61 = vpack.c.bf16 %v2551_v45, %v2551_v45  ;;  %v2752_v7 = vsel %vm2727_vm15, %v2665_v37, 0.0  ;;  %v2821_v49 = vsel %vm2727_vm15, %v2668_v5, 0.0 }
 0xab9   : > { %v2753_v43 = vrot.slane %v2752_v7, 4  ;;  %v2822_v53 = vrot.slane %v2821_v49, 4 }
 0xabb   : > { %v2754_v57 = vadd.f32 %v2753_v43, %v2752_v7 }
 0xabd   : > { %v1688_v17 = vpop.f32.mrf.mxu3  ;;  %v2755_v41 = vrot.slane %v2754_v57, 2 }
 0xabe   : > { %1693 = vrot.lane.b32.xlu0 %v1688_v17, %s3349_s11  ;;  %v4489_v17 = vld [vmem:[%s4464_s19 + $0x28] sm:$0xff] }
 0xabf   : > { %v2756_v18 = vadd.f32 %v2755_v41, %v2754_v57 }
 0xac1   : > { %v2757_v24 = vrot.slane %v2756_v18, 1 }
 0xac2   : > { %3105 = vmatmul.msk.bf16.vlgmr.msrb.gmra.mxu3 %vm565_vm14, %v2552_v61  ;;  %v2844_v61 = vsel %vm2727_vm15, %v4489_v17, 0.0 }
 0xac3   : > { %v2486_v15 = vpop.xlane.xlu0 %2485  ;;  %v2758_v27 = vadd.f32 %v2757_v24, %v2756_v18 }
 0xac4   : > { %3301 = vrcp.f32 %v2486_v15 }
 0xac5   : > { %v1690_v31 = vpop.f32.mrf.mxu3  ;;  %v2759_v3 = vmax.f32 %v2758_v27, 1e-10 }
 0xac7   : > { %3303 = vrcp.f32 %v2759_v3 }
 0xaca   : > { %v3302_v30 = vpop.eup %3301 }
 0xacb   : > { %v2488_v34 = vmul.f32 %v3302_v30, %v4393_v29 }
 0xacd   : > { %v2489_v44 = vpack.c.bf16 %v2488_v34, %v2488_v34  ;;  %v1814_v56 = vpop.f32.mrf.mxu3  ;;  %v3304_v63 = vpop.eup %3303  ;;  %v2845_v34 = vrot.slane %v2844_v61, 4 }
 0xace   : > { %1819 = vrot.lane.b32.xlu0 %v1814_v56, %s3350_s12 }
 0xacf   : > { %3103 = vmatmul.msk.bf16.vlgmr.msrb.gmra.mxu0 %vm565_vm14, %v2489_v44 }
 0xad5   : > { %v1816_v54 = vpop.f32.mrf.mxu3 }
 0xad6   : > { %v938_v23 = vpop.permute.xlu0 %937 }
 0xad7   : > { %940 = vst.msk [vmem:[#allocation2 + $0x8] sm:$0xff] %vm685_vm2, %v938_v23 }
 0xad8   : > { %1003 = vst.msk [vmem:[#allocation2 + $0x8] sm:$0xff] %vm749_vm3, %v4230_v12  ;;  %v3123_v12 = vld [vmem:[%s4596_s5 + $0x8] sm:$0xff] }
 0xad9   : > { %2625 = vmatpush.bf16.msra.mxu0 %v3123_v12  ;;  %3126 = vmatpush.bf16.msra.mxu2 %v3123_v12 }
 0xadd   : > { %v1940_v1 = vpop.f32.mrf.mxu3 }
 0xade   : > { %1945 = vrot.lane.b32.xlu1 %v1940_v1, %s3349_s11  ;;  %v2667_v1 = vld [vmem:[%s4464_s19 + $0x18] sm:$0xff] }
 0xadf   : > { %v1190_v0 = vpop.permute.xlu0 %1189 }
 0xae0   : > { %1192 = vst.msk [vmem:[#allocation2 + $0x10] sm:$0xff] %vm685_vm2, %v1190_v0  ;;  %v2798_v0 = vsel %vm2727_vm15, %v2667_v1, 0.0 }
 0xae1   : > { %1255 = vst.msk [vmem:[#allocation2 + $0x10] sm:$0xff] %vm749_vm3, %v4249_v2  ;;  %v3122_v2 = vld [vmem:[%s4596_s5] sm:$0xff] }
 0xae2   : > { %2626 = vmatpush.bf16.msra.mxu0 %v3122_v2  ;;  %3127 = vmatpush.bf16.msra.mxu2 %v3122_v2 }
 0xae5   : > { %v1942_v29 = vpop.f32.mrf.mxu3 }
 0xae6   : > { %v2846_v29 = vadd.f32 %v2845_v34, %v2844_v61 }
 0xae8   : > { %v1316_v13 = vpop.permute.xlu2 %1315 }
 0xae9   : > { %1318 = vst.msk [vmem:[#allocation2 + $0x10] sm:$0xff] %vm813_vm9, %v1316_v13  ;;  %v2666_v13 = vld [vmem:[%s4464_s19 + $0x10] sm:$0xff] }
 0xaed   : > { %v2066_v6 = vpop.f32.mrf.mxu3 }
 0xaee   : > { %2071 = vrot.lane.b32.xlu2 %v2066_v6, %s3350_s12  ;;  %v2775_v6 = vsel %vm2727_vm15, %v2666_v13, 0.0 }
 0xaef   : > { %v2255_v8 = vpop.f32.mrf.mxu0 }
 0xaf5   : > { %v2068_v20 = vpop.f32.mrf.mxu3 }
 0xaf6   : > { %2260 = vrot.lane.b32.xlu2 %v2255_v8, %s3348_s10  ;;  %v2776_v8 = vrot.slane %v2775_v6, 4 }
 0xaf7   : > { %v2257_v58 = vpop.f32.mrf.mxu0 }
 0xaf8   : > { %v2799_v58 = vrot.slane %v2798_v0, 4  ;;  %v2777_v2 = vadd.f32 %v2776_v8, %v2775_v6 }
 0xafd   : > { %v4451_v9 = vpop.f32.mrf.mxu3 }
 0xb05   : > { %v2194_v40 = vpop.f32.mrf.mxu3 }
 0xb0d   : > { %v2009_v38 = vpop.permute.xlu1 %2008 }
 0xb15   : > { %v1064_v35 = vpop.permute.xlu1 %1063  ;;  %v2318_v46 = vpop.f32.mrf.mxu3 }
 0xb16   : > { %1066 = vst.msk [vmem:[#allocation2 + $0x8] sm:$0xff] %vm813_vm9, %v1064_v35  ;;  %2323 = vrot.lane.b32.xlu0 %v2318_v46, %s3350_s12 }
 0xb1a   : > { %v2385_v19 = vpop.f32.mrf.mxu0 }
 0xb1b   : > { %2389 = vst.msk [vmem:[#allocation2 + $0x38] sm:$0xff] %vm565_vm14, %v2385_v19  ;;  %vm2743_vm14 = vcmask 253952  }
 0xb1d   : > { %v2320_v33 = vpop.f32.mrf.mxu3  ;;  %v2580_v10 = vld [vmem:[#allocation2 + $0x8] sm:$0xff] }
 0xb1e   : > { %v2587_v22 = vpack.c.bf16 %v2580_v10, %v2579_v48 }
 0xb20   : > { %3114 = vmatmul.msk.bf16.vlgmr.msra.gmra.mxu0 %vm350_vm0, %v2587_v22  ;;  %v2671_v22 = vld [vmem:[%s4464_s19 + $0x38] sm:$0xff] }
 0xb22   : > { %v2387_v60 = vpop.f32.mrf.mxu0 }
 0xb30   : > { %v1694_v28 = vpop.permute.xlu0 %1693 }
 0xb31   : > { %1696 = vst.msk [vmem:[#allocation2 + $0x20] sm:$0xff] %vm685_vm2, %v1694_v28 }
 0xb32   : > { %1759 = vst.msk [vmem:[#allocation2 + $0x20] sm:$0xff] %vm749_vm3, %v1757_v32  ;;  %v2778_v32 = vrot.slane %v2777_v2, 2 }
 0xb34   : > { %v2779_v46 = vadd.f32 %v2778_v32, %v2777_v2 }
 0xb35   : > { %v2444_v25 = vpop.f32.mrf.mxu3 }
 0xb36   : > { %2449 = vrot.lane.b32.xlu0 %v2444_v25, %s3349_s11  ;;  %v2780_v19 = vrot.slane %v2779_v46, 1 }
 0xb38   : > { %v2781_v16 = vadd.f32 %v2780_v19, %v2779_v46 }
 0xb3a   : > { %v2782_v28 = vmax.f32 %v2781_v16, 1e-10 }
 0xb3d   : > { %v2446_v42 = vpop.f32.mrf.mxu3 }
 0xb3e   : > { %1504 = vrot.lane.b32.xlu0 %v4186_v50, %s3348_s10  ;;  %v2823_v50 = vadd.f32 %v2822_v53, %v2821_v49 }
 0xb40   : > { %v1820_v14 = vpop.permute.xlu0 %1819  ;;  %v2824_v11 = vrot.slane %v2823_v50, 2 }
 0xb41   : > { %1822 = vst.msk [vmem:[#allocation2 + $0x20] sm:$0xff] %vm813_vm9, %v1820_v14 }
 0xb42   : > { %v2825_v52 = vadd.f32 %v2824_v11, %v2823_v50 }
 0xb44   : > { %v2826_v45 = vrot.slane %v2825_v52, 1 }
 0xb45   : > { %v2570_v26 = vpop.f32.mrf.mxu3 }
 0xb46   : > { %2679 = vperm.xlu0 %3154, %v2665_v37   ;;  %2575 = vrot.lane.b32.xlu2 %v2570_v26, %s3350_s12  ;;  %v2827_v15 = vadd.f32 %v2826_v45, %v2825_v52  ;;  %v2890_v37 = vsel %vm2727_vm15, %v2671_v22, 0.0 }
 0xb47   : > { %v2891_v7 = vrot.slane %v2890_v37, 4 }
 0xb48   : > { %v2072_v62 = vpop.permute.xlu2 %2071  ;;  %v2828_v30 = vmax.f32 %v2827_v15, 1e-10  ;;  %v2583_v44 = vld [vmem:[#allocation2 + $0x20] sm:$0xff] }
 0xb49   : > { %v2892_v41 = vadd.f32 %v2891_v7, %v2890_v37 }
 0xb4a   : > { %3305 = vrcp.f32 %v2828_v30  ;;  %v3320_v30 = vld [vmem:[%s3409_s30 + $0x8] sm:$0xff] }
 0xb4b   : > { %3307 = vrcp.f32 %v2782_v28  ;;  %v2893_v18 = vrot.slane %v2892_v41, 2 }
 0xb4c   : > { %v2507_v36 = vpop.f32.mrf.mxu0 }
 0xb4d   : > { %v2572_v51 = vpop.f32.mrf.mxu3  ;;  %2512 = vrot.lane.b32.xlu1 %v2507_v36, %s3348_s10  ;;  %v2894_v27 = vadd.f32 %v2893_v18, %v2892_v41 }
 0xb4e   : > { %2704 = vperm.xlu0 %3154, %v2670_v4   ;;  %1567 = vrot.lane.b32.xlu2 %v4427_v39, %s3350_s12  ;;  %v2728_v39 = vsel %vm2727_vm15, %v2664_v55, 0.0 }
 0xb4f   : > { %v2729_v31 = vrot.slane %v2728_v39, 4 }
 0xb50   : > { %v1946_v47 = vpop.permute.xlu1 %1945  ;;  %v3306_v20 = vpop.eup %3305 }
 0xb51   : > { %1948 = vst.msk [vmem:[#allocation2 + $0x28] sm:$0xff] %vm685_vm2, %v1946_v47  ;;  %v2730_v23 = vadd.f32 %v2729_v31, %v2728_v39 }
 0xb52   : > { %2011 = vst.msk [vmem:[#allocation2 + $0x28] sm:$0xff] %vm749_vm3, %v2009_v38  ;;  %v2867_v38 = vsel %vm2727_vm15, %v2670_v4, 0.0  ;;  %v3308_v4 = vpop.eup %3307 }
 0xb53   : > { %2074 = vst.msk [vmem:[#allocation2 + $0x28] sm:$0xff] %vm813_vm9, %v2072_v62  ;;  %v2731_v12 = vrot.slane %v2730_v23, 2  ;;  %v2868_v33 = vrot.slane %v2867_v38, 4 }
 0xb54   : > { %v2509_v59 = vpop.f32.mrf.mxu0 }
 0xb55   : > { %2197 = vrot.lane.b32.xlu1 %v4451_v9, %s3349_s11  ;;  %v2847_v9 = vrot.slane %v2846_v29, 2  ;;  %v2732_v40 = vadd.f32 %v2731_v12, %v2730_v23  ;;  %v2869_v43 = vadd.f32 %v2868_v33, %v2867_v38 }
 0xb56   : > { %2763 = vperm.xlu0 %3154, %v3304_v63   ;;  %2684 = vperm.xlu2 %3155, %v2666_v13  }
 0xb57   : > { %v2848_v35 = vadd.f32 %v2847_v9, %v2846_v29  ;;  %v2733_v48 = vrot.slane %v2732_v40, 1  ;;  %v2870_v14 = vrot.slane %v2869_v43, 2 }
 0xb59   : > { %v2849_v60 = vrot.slane %v2848_v35, 1  ;;  %v2734_v25 = vadd.f32 %v2733_v48, %v2732_v40  ;;  %v2871_v49 = vadd.f32 %v2870_v14, %v2869_v43 }
 0xb5a   : > { %v2584_v56 = vld [vmem:[#allocation2 + $0x28] sm:$0xff] }
 0xb5b   : > { %v2589_v54 = vpack.c.bf16 %v2584_v56, %v2583_v44  ;;  %v2850_v42 = vadd.f32 %v2849_v60, %v2848_v35  ;;  %v2735_v24 = vmax.f32 %v2734_v25, 1e-10  ;;  %v2872_v50 = vrot.slane %v2871_v49, 1  ;;  %v2581_v60 = vld [vmem:[#allocation2 + $0x10] sm:$0xff] }
 0xb5d   : > { %1441 = vrot.lane.b32.xlu1 %v4420_v21, %s3349_s11  ;;  %3116 = vmatmul.msk.bf16.vlgmr.msra.gmra.mxu2 %vm350_vm0, %v2589_v54  ;;  %v2800_v21 = vadd.f32 %v2799_v58, %v2798_v0  ;;  %v2851_v3 = vmax.f32 %v2850_v42, 1e-10  ;;  %3309 = vrcp.f32 %v2735_v24  ;;  %v2873_v52 = vadd.f32 %v2872_v50, %v2871_v49  ;;  %v2261_v54 = vpop.permute.xlu2 %2260  ;;  %v3321_v42 = vld [vmem:[%s3409_s30 + $0x20] sm:$0xff] }
 0xb5e   : > { %2832 = vperm.xlu0 %3154, %v3306_v20   ;;  %2694 = vperm.xlu2 %3155, %v2668_v5   ;;  %v2895_v5 = vrot.slane %v2894_v27, 1 }
 0xb5f   : > { %v2801_v10 = vrot.slane %v2800_v21, 2  ;;  %3311 = vrcp.f32 %v2851_v3  ;;  %v2874_v59 = vmax.f32 %v2873_v52, 1e-10 }
 0xb60   : > { %v2896_v53 = vadd.f32 %v2895_v5, %v2894_v27 }
 0xb61   : > { %v2802_v57 = vadd.f32 %v2801_v10, %v2800_v21 }
 0xb62   : > { %v2897_v51 = vmax.f32 %v2896_v53, 1e-10  ;;  %v3322_v53 = vld [vmem:[%s3409_s30 + $0x28] sm:$0xff] }
 0xb63   : > { %v2803_v26 = vrot.slane %v2802_v57, 1  ;;  %v3310_v11 = vpop.eup %3309 }
 0xb64   : > { %3313 = vrcp.f32 %v2897_v51 }
 0xb65   : > { %2674 = vperm.xlu1 %3153, %v2664_v55   ;;  %v2804_v36 = vadd.f32 %v2803_v26, %v2802_v57  ;;  %v3312_v62 = vpop.eup %3311 }
 0xb66   : > { %2709 = vperm.xlu2 %3155, %v2671_v22  }
 0xb67   : > { %v2805_v47 = vmax.f32 %v2804_v36, 1e-10 }
 0xb69   : > { %3315 = vrcp.f32 %v2805_v47 }
 0xb6a   : > { %v3314_v63 = vpop.eup %3313  ;;  %3317 = vrcp.f32 %v2874_v59 }
 0xb6b   : > { %2901 = vperm.xlu0 %3154, %v3314_v63  }
 0xb6d   : > { %2689 = vperm.xlu1 %3153, %v2667_v1  }
 0xb6e   : > { %2786 = vperm.xlu2 %3155, %v3308_v4  }
 0xb6f   : > { %v3316_v55 = vpop.eup %3315 }
 0xb70   : > { %v3318_v45 = vpop.eup %3317 }
 0xb75   : > { %2699 = vperm.xlu1 %3153, %v4489_v17   ;;  %v3319_v17 = vld [vmem:[%s3409_s30] sm:$0xff] }
 0xb76   : > { %2855 = vperm.xlu2 %3155, %v3312_v62  }
 0xb7d   : > { %2739 = vperm.xlu1 %3153, %v3310_v11  }
 0xb85   : > { %2809 = vperm.xlu1 %3153, %v3316_v55  }
 0xb88   : > { %v2324_v15 = vpop.permute.xlu0 %2323 }
 0xb8d   : > { %2878 = vperm.xlu1 %3153, %v3318_v45  }
 0xb9d   : > { %v2628_v39 = vpop.f32.mrf.mxu0 }
 0xb9e   : > { %v2648_v61 = vadd.f32 %v3319_v17, %v2628_v39 }
 0xba0   : > { %2656 = vst.msk [vmem:[%s4508_s23] sm:$0xff] %vm350_vm0, %v2648_v61  ;;  %v2576_v13 = vpop.permute.xlu2 %2575 }
 0xba5   : > { %v2630_v31 = vpop.f32.mrf.mxu0 }
 0xba6   : > { %v2649_v34 = vadd.f32 %v3320_v30, %v2630_v31 }
 0xba8   : > { %2657 = vst.msk [vmem:[%s4508_s23 + $0x8] sm:$0xff] %vm350_vm0, %v2649_v34  ;;  %v2450_v44 = vpop.permute.xlu0 %2449  ;;  %v1568_v32 = vpop.permute.xlu2 %1567 }
 0xba9   : > { %2452 = vst.msk [vmem:[#allocation2 + $0x38] sm:$0xff] %vm685_vm2, %v2450_v44 }
 0xbb0   : > { %v1505_v56 = vpop.permute.xlu0 %1504  ;;  %v4534_v46 = vpop.permute.xlu2 %2684 }
 0xbb8   : > { %v2680_v23 = vpop.permute.xlu0 %2679  ;;  %v2695_v37 = vpop.permute.xlu2 %2694 }
 0xbb9   : > { %v2713_v1 = vmul.f32 %v2680_v23, %v2649_v34 }
 0xbbb   : > { %v2745_v0 = vsel %vm350_vm0, %v2713_v1, 0.0 }
 0xbbc   : > { %v2746_v29 = vrot.slane %v2745_v0, 4 }
 0xbbe   : > { %v2747_v6 = vadd.f32 %v2746_v29, %v2745_v0  ;;  %v3323_v29 = vld [vmem:[%s3409_s30 + $0x30] sm:$0xff] }
 0xbbf   : > { %v2513_v8 = vpop.permute.xlu1 %2512 }
 0xbc0   : > { %v2748_v20 = vrot.slane %v2747_v6, 2  ;;  %2515 = vst.msk [vmem:[#allocation2 + $0x38] sm:$0xff] %vm749_vm3, %v2513_v8  ;;  %v4519_v12 = vpop.permute.xlu0 %2704  ;;  %v2710_v26 = vpop.permute.xlu2 %2709 }
 0xbc1   : > { %2578 = vst.msk [vmem:[#allocation2 + $0x38] sm:$0xff] %vm813_vm9, %v2576_v13 }
 0xbc2   : > { %v2749_v58 = vadd.f32 %v2748_v20, %v2747_v6  ;;  %v3324_v20 = vld [vmem:[%s3409_s30 + $0x10] sm:$0xff] }
 0xbc4   : > { %v2750_v9 = vrot.slane %v2749_v58, 1 }
 0xbc6   : > { %v2751_v2 = vadd.f32 %v2750_v9, %v2749_v58 }
 0xbc7   : > { %v2198_v40 = vpop.permute.xlu1 %2197 }
 0xbc8   : > { %2200 = vst.msk [vmem:[#allocation2 + $0x30] sm:$0xff] %vm685_vm2, %v2198_v40  ;;  %v2764_v21 = vpop.permute.xlu0 %2763  ;;  %v2586_v33 = vld [vmem:[#allocation2 + $0x38] sm:$0xff]  ;;  %v4552_v63 = vpop.permute.xlu2 %2786 }
 0xbc9   : > { %2263 = vst.msk [vmem:[#allocation2 + $0x30] sm:$0xff] %vm749_vm3, %v2261_v54  ;;  %v2766_v38 = vmul.f32 %v2764_v21, %v2751_v2 }
 0xbca   : > { %2326 = vst.msk [vmem:[#allocation2 + $0x30] sm:$0xff] %vm813_vm9, %v2324_v15 }
 0xbcb   : > { %2767 = vst.msk [vmem:[%s4528_s28 + $0x1] sm:$0x1] %vm2743_vm14, %v2766_v38 }
 0xbcf   : > { %v1442_v35 = vpop.permute.xlu1 %1441 }
 0xbd0   : > { %1444 = vst.msk [vmem:[#allocation2 + $0x18] sm:$0xff] %vm685_vm2, %v1442_v35  ;;  %v2833_v17 = vpop.permute.xlu0 %2832  ;;  %v2856_v54 = vpop.permute.xlu2 %2855 }
 0xbd1   : > { %1507 = vst.msk [vmem:[#allocation2 + $0x18] sm:$0xff] %vm749_vm3, %v1505_v56  ;;  %v2585_v19 = vld [vmem:[#allocation2 + $0x30] sm:$0xff] }
 0xbd2   : > { %1570 = vst.msk [vmem:[#allocation2 + $0x18] sm:$0xff] %vm813_vm9, %v1568_v32  ;;  %v2590_v48 = vpack.c.bf16 %v2586_v33, %v2585_v19  ;;  %v3325_v33 = vld [vmem:[%s3409_s30 + $0x38] sm:$0xff] }
 0xbd4   : > { %3117 = vmatmul.msk.bf16.gmra.mxu2 %vm350_vm0, %v2590_v48 }
 0xbd7   : > { %v2675_v10 = vpop.permute.xlu1 %2674 }
 0xbd8   : > { %v2712_v22 = vmul.f32 %v2675_v10, %v2648_v61 }
 0xbd9   : > { %v2582_v16 = vld [vmem:[#allocation2 + $0x18] sm:$0xff] }
 0xbda   : > { %v2720_v7 = vsel %vm350_vm0, %v2712_v22, 0.0  ;;  %v2588_v28 = vpack.c.bf16 %v2582_v16, %v2581_v60  ;;  %v3326_v16 = vld [vmem:[%s3409_s30 + $0x18] sm:$0xff] }
 0xbdb   : > { %v2721_v43 = vrot.slane %v2720_v7, 4 }
 0xbdc   : > { %3115 = vmatmul.msk.bf16.gmra.mxu0 %vm350_vm0, %v2588_v28 }
 0xbdd   : > { %v2722_v25 = vadd.f32 %v2721_v43, %v2720_v7 }
 0xbdf   : > { %v4542_v57 = vpop.permute.xlu1 %2689  ;;  %v2723_v14 = vrot.slane %v2722_v25, 2 }
 0xbe0   : > { %v2638_v41 = vpop.f32.mrf.mxu2 }
 0xbe1   : > { %v2652_v18 = vadd.f32 %v3321_v42, %v2638_v41  ;;  %v2724_v5 = vadd.f32 %v2723_v14, %v2722_v25 }
 0xbe3   : > { %2660 = vst.msk [vmem:[%s4508_s23 + $0x20] sm:$0xff] %vm350_vm0, %v2652_v18  ;;  %v2716_v24 = vmul.f32 %v2695_v37, %v2652_v18  ;;  %v2725_v47 = vrot.slane %v2724_v5, 1 }
 0xbe5   : > { %v2814_v27 = vsel %vm350_vm0, %v2716_v24, 0.0  ;;  %v2726_v55 = vadd.f32 %v2725_v47, %v2724_v5 }
 0xbe6   : > { %v2815_v3 = vrot.slane %v2814_v27, 4 }
 0xbe7   : > { %v2700_v4 = vpop.permute.xlu1 %2699 }
 0xbe8   : > { %v2816_v49 = vadd.f32 %v2815_v3, %v2814_v27  ;;  %v2640_v36 = vpop.f32.mrf.mxu2 }
 0xbe9   : > { %v2653_v51 = vadd.f32 %v3322_v53, %v2640_v36 }
 0xbea   : > { %v2817_v50 = vrot.slane %v2816_v49, 2 }
 0xbeb   : > { %2661 = vst.msk [vmem:[%s4508_s23 + $0x28] sm:$0xff] %vm350_vm0, %v2653_v51  ;;  %v2717_v11 = vmul.f32 %v2700_v4, %v2653_v51 }
 0xbec   : > { %v2818_v62 = vadd.f32 %v2817_v50, %v2816_v49 }
 0xbed   : > { %v2837_v52 = vsel %vm350_vm0, %v2717_v11, 0.0 }
 0xbee   : > { %v2838_v59 = vrot.slane %v2837_v52, 4  ;;  %v2819_v45 = vrot.slane %v2818_v62, 1 }
 0xbef   : > { %v2740_v39 = vpop.permute.xlu1 %2739 }
 0xbf0   : > { %v2839_v61 = vadd.f32 %v2838_v59, %v2837_v52  ;;  %v2742_v15 = vmul.f32 %v2740_v39, %v2726_v55  ;;  %v2820_v31 = vadd.f32 %v2819_v45, %v2818_v62  ;;  %v2902_v52 = vpop.permute.xlu0 %2901 }
 0xbf2   : > { %2744 = vst.msk [vmem:[%s4528_s28] sm:$0x1] %vm2743_vm14, %v2742_v15  ;;  %v2835_v30 = vmul.f32 %v2833_v17, %v2820_v31  ;;  %v2840_v34 = vrot.slane %v2839_v61, 2 }
 0xbf4   : > { %2836 = vst.msk [vmem:[%s4528_s28 + $0x4] sm:$0x1] %vm2743_vm14, %v2835_v30  ;;  %v2841_v44 = vadd.f32 %v2840_v34, %v2839_v61 }
 0xbf6   : > { %v2842_v56 = vrot.slane %v2841_v44, 1 }
 0xbf7   : > { %v2810_v40 = vpop.permute.xlu1 %2809 }
 0xbf8   : > { %v2843_v23 = vadd.f32 %v2842_v56, %v2841_v44 }
 0xbfa   : > { %v2858_v1 = vmul.f32 %v2856_v54, %v2843_v23 }
 0xbfc   : > { %2859 = vst.msk [vmem:[%s4528_s28 + $0x5] sm:$0x1] %vm2743_vm14, %v2858_v1 }
 0xbff   : > { %v2879_v3 = vpop.permute.xlu1 %2878 }
 0xc57   : > { %v2643_v0 = vpop.f32.mrf.mxu2 }
 0xc58   : > { %v2654_v13 = vadd.f32 %v3323_v29, %v2643_v0 }
 0xc59   : > { %v2633_v6 = vpop.f32.mrf.mxu0 }
 0xc5a   : > { %2662 = vst.msk [vmem:[%s4508_s23 + $0x30] sm:$0xff] %vm350_vm0, %v2654_v13  ;;  %v2718_v8 = vmul.f32 %v4519_v12, %v2654_v13  ;;  %v2650_v58 = vadd.f32 %v3324_v20, %v2633_v6 }
 0xc5c   : > { %v2860_v9 = vsel %vm350_vm0, %v2718_v8, 0.0  ;;  %2658 = vst.msk [vmem:[%s4508_s23 + $0x10] sm:$0xff] %vm350_vm0, %v2650_v58  ;;  %v2714_v2 = vmul.f32 %v4534_v46, %v2650_v58 }
 0xc5d   : > { %v2861_v32 = vrot.slane %v2860_v9, 4 }
 0xc5e   : > { %v2768_v21 = vsel %vm350_vm0, %v2714_v2, 0.0 }
 0xc5f   : > { %v2862_v38 = vadd.f32 %v2861_v32, %v2860_v9  ;;  %v2769_v35 = vrot.slane %v2768_v21, 4  ;;  %v2645_v19 = vpop.f32.mrf.mxu2 }
 0xc60   : > { %v2655_v12 = vadd.f32 %v3325_v33, %v2645_v19 }
 0xc61   : > { %v2863_v48 = vrot.slane %v2862_v38, 2  ;;  %v2770_v10 = vadd.f32 %v2769_v35, %v2768_v21  ;;  %v2635_v22 = vpop.f32.mrf.mxu0 }
 0xc62   : > { %2663 = vst.msk [vmem:[%s4508_s23 + $0x38] sm:$0xff] %vm350_vm0, %v2655_v12  ;;  %v2719_v60 = vmul.f32 %v2710_v26, %v2655_v12  ;;  %v2651_v37 = vadd.f32 %v3326_v16, %v2635_v22 }
 0xc63   : > { %v2864_v7 = vadd.f32 %v2863_v48, %v2862_v38  ;;  %v2771_v46 = vrot.slane %v2770_v10, 2 }
 0xc64   : > { %v2883_v28 = vsel %vm350_vm0, %v2719_v60, 0.0  ;;  %2659 = vst.msk [vmem:[%s4508_s23 + $0x18] sm:$0xff] %vm350_vm0, %v2651_v37  ;;  %v2715_v43 = vmul.f32 %v4542_v57, %v2651_v37 }
 0xc65   : > { %v2865_v25 = vrot.slane %v2864_v7, 1  ;;  %v2772_v41 = vadd.f32 %v2771_v46, %v2770_v10  ;;  %v2884_v42 = vrot.slane %v2883_v28, 4 }
 0xc66   : > { %v2791_v18 = vsel %vm350_vm0, %v2715_v43, 0.0 }
 0xc67   : > { %v2866_v14 = vadd.f32 %v2865_v25, %v2864_v7  ;;  %v2773_v24 = vrot.slane %v2772_v41, 1  ;;  %v2885_v26 = vadd.f32 %v2884_v42, %v2883_v28  ;;  %v2792_v27 = vrot.slane %v2791_v18, 4 }
 0xc69   : > { %v2881_v5 = vmul.f32 %v2879_v3, %v2866_v14  ;;  %v2774_v4 = vadd.f32 %v2773_v24, %v2772_v41  ;;  %v2886_v49 = vrot.slane %v2885_v26, 2  ;;  %v2793_v36 = vadd.f32 %v2792_v27, %v2791_v18 }
 0xc6b   : > { %2882 = vst.msk [vmem:[%s4528_s28 + $0x6] sm:$0x1] %vm2743_vm14, %v2881_v5  ;;  %v2789_v57 = vmul.f32 %v4552_v63, %v2774_v4  ;;  %v2887_v53 = vadd.f32 %v2886_v49, %v2885_v26  ;;  %v2794_v51 = vrot.slane %v2793_v36, 2 }
 0xc6d   : > { %2790 = vst.msk [vmem:[%s4528_s28 + $0x2] sm:$0x1] %vm2743_vm14, %v2789_v57  ;;  %v2888_v50 = vrot.slane %v2887_v53, 1  ;;  %v2795_v47 = vadd.f32 %v2794_v51, %v2793_v36 }
 0xc6f   : > { %v2889_v11 = vadd.f32 %v2888_v50, %v2887_v53  ;;  %v2796_v62 = vrot.slane %v2795_v47, 1 }
 0xc71   : > { %v2904_v59 = vmul.f32 %v2902_v52, %v2889_v11  ;;  %v2797_v55 = vadd.f32 %v2796_v62, %v2795_v47 }
 0xc73   : > { %2905 = vst.msk [vmem:[%s4528_s28 + $0x7] sm:$0x1] %vm2743_vm14, %v2904_v59  ;;  %v2812_v45 = vmul.f32 %v2810_v40, %v2797_v55 }
 0xc75   : > { %2813 = vst.msk [vmem:[%s4528_s28 + $0x3] sm:$0x1] %vm2743_vm14, %v2812_v45 }
 0xc76 PF: > { %s18_s24 = sadd.s32 1, %s3333_s24  }
 0xc77   : > { %p15_p5 = scmp.ge.s32.totalorder %s18_s24, 4  }
 0xc79   :  { %17 = sbr.rel (!%p15_p5) target bundleno = 1 (0x1), region = 92 }

</bundles_post_ra>
